<compile_context>
chip_gen: v5e
topology: v5e:2x2
jax: 0.10.0
libtpu: 0.0.40
codegen_flags: <defaults>
</compile_context>

<pallas_src>
import numpy as np
import jax
import jax.numpy as jnp
from jax import lax
from jax.experimental import pallas as pl
from jax.experimental.pallas import tpu as pltpu


# ---------------- fused Pallas kernel ----------------

def _specific_kernel(x_ref,
                     b1_ref, a1_ref, c1_ref,
                     b2_ref, a2_ref, c2_ref,
                     b3_ref, a3_ref, c3_ref,
                     wl_ref, bl_ref, o_ref):
    # x_ref : (1, TILE_N*H, W*Cin) bf16   TILE_N samples stacked along sublanes
    # b*_ref: (3, Wi*Cin, Wi*Cout) bf16   banded conv weights per vertical tap,
    #                                     output columns ordered [even x | odd x]
    # a*_ref: (3*THi, THi)        bf16    fused 0/1 row-selection (dy-major stack;
    #                                     within each block: top half = even conv
    #                                     rows, bottom half = odd conv rows)
    # c*_ref: (1, (Wi/2)*Cout)    f32     bias tiled over pooled x positions
    # wl_ref: (Hf, Wf*Cf, S_pad)  bf16    linear weight, rows in (x, c) order per y
    # bl_ref: (1, S_pad)          f32
    # o_ref : (TILE_N, S_pad)     f32
    act = x_ref[0]                                              # (TILE_N*H, W*Cin) bf16

    for b_ref, a_ref, c_ref in ((b1_ref, a1_ref, c1_ref),
                                (b2_ref, a2_ref, c2_ref),
                                (b3_ref, a3_ref, c3_ref)):
        th = a_ref.shape[1]                                     # rows of act this layer
        # fused even/odd row selection for all three vertical taps (one matmul,
        # bf16 0/1 matrix -> exact), applied on the act side (K = W*Cin)
        sel = jnp.dot(a_ref[...], act,
                      preferred_element_type=jnp.float32).astype(jnp.bfloat16)
        # three banded conv taps, accumulated in f32 (MXU, bf16 inputs)
        z = jnp.dot(sel[0:th], b_ref[0], preferred_element_type=jnp.float32)
        z = z + jnp.dot(sel[th:2 * th], b_ref[1], preferred_element_type=jnp.float32)
        z = z + jnp.dot(sel[2 * th:3 * th], b_ref[2], preferred_element_type=jnp.float32)
        # 2x2 max-pool = elementwise max of four aligned pieces
        t2 = th // 2                                            # even/odd conv rows
        hl = z.shape[1] // 2                                    # even/odd x lanes
        m = jnp.maximum(jnp.maximum(z[:t2, :hl], z[:t2, hl:]),
                        jnp.maximum(z[t2:, :hl], z[t2:, hl:]))
        # bias after pool (commutes with max), ReLU in f32, bf16 for next matmul
        act = jnp.maximum(m + c_ref[...], 0.0).astype(jnp.bfloat16)

    # fused Linear + ReLU; the last conv layer's rows were emitted (y, sample)-
    # major, so each y-slice is a contiguous sublane-aligned block of TILE_N rows.
    tn = o_ref.shape[0]
    hf = wl_ref.shape[0]
    acc = jnp.dot(act[0:tn], wl_ref[0], preferred_element_type=jnp.float32)
    for y in range(1, hf):
        acc = acc + jnp.dot(act[y * tn:(y + 1) * tn], wl_ref[y],
                            preferred_element_type=jnp.float32)
    o_ref[...] = jnp.maximum(acc + bl_ref[...], 0.0)


# ---------------- trace-time constant builders ----------------

def _conv_layer_consts(w, b, H, W, tile_n, y_major_out=False):
    """Constants for one conv(3x3, SAME) + maxpool(2) + ReLU layer.

    w: (Cout, Cin, 3, 3) PyTorch layout, b: (Cout,).  Activations are
    (tile_n*H, W*Cin) with lane index = x*Cin + ci and samples stacked along rows.
      B    : (3, W*Cin, W*Cout) bf16 banded weights; output cols = [even x | odd x]
      Acat : (3*tile_n*H, tile_n*H) bf16 fused 0/1 row selection, dy-major blocks;
             within a block the top tile_n*H/2 rows pick input rows 2k+dy-1 (even
             conv rows) and the bottom half picks 2k+dy (odd conv rows), per sample
             (SAME y-padding = missing entries).  Output rows are sample-major
             (n, k) unless y_major_out, in which case they are (k, n)-major so the
             following Linear can slice contiguous per-y blocks.
      brow : (1, (W//2)*Cout) f32 bias tiled over pooled x positions
    """
    Cout, Cin = int(w.shape[0]), int(w.shape[1])
    wk = jnp.transpose(w, (2, 3, 1, 0))                                 # (dy, dx, Cin, Cout)
    M = jnp.stack([jnp.eye(W, W, k=1 - dx, dtype=jnp.float32) for dx in range(3)])
    # B5[dy, xin, ci, xout, co] = sum_dx [xin == xout+dx-1] * w[co, ci, dy, dx]
    B5 = jnp.einsum("dio,ydcf->yicof", M, wk)                           # (3, W, Cin, W, Cout)
    xperm = np.concatenate([np.arange(0, W, 2), np.arange(1, W, 2)])    # [even x | odd x]
    B5 = B5[:, :, :, xperm, :]
    B = B5.reshape(3, W * Cin, W * Cout).astype(jnp.bfloat16)

    TH = tile_n * H
    TH2 = TH // 2
    Hp = H // 2
    A = np.zeros((3, TH, TH), np.float32)
    for dy in range(3):
        for n in range(tile_n):
            for k in range(Hp):
                r = (k * tile_n + n) if y_major_out else (n * Hp + k)
                j = 2 * k + dy - 1                                       # even conv row
                if 0 <= j < H:
                    A[dy, r, n * H + j] = 1.0
                j = 2 * k + dy                                           # odd conv row
                if j < H:
                    A[dy, TH2 + r, n * H + j] = 1.0
    Acat = jnp.asarray(A.reshape(3 * TH, TH), dtype=jnp.bfloat16)        # 0/1: exact in bf16

    brow = jnp.tile(b, W // 2)[None, :].astype(jnp.float32)
    return B, Acat, brow


# ---------------- wrapper ----------------

def specific_forward(img_nchw, params, tile_n=8):
    x = jnp.transpose(img_nchw, (0, 2, 3, 1)).astype(jnp.float32)        # NCHW -> NHWC
    N, H, W, C = x.shape
    # TODO(synk): odd pooled sizes (the 28x28 MNIST config of the module) need
    # floor-pool handling; this kernel assumes H and W divisible by 8 (e.g. 32x32).
    assert H % 8 == 0 and W % 8 == 0

    # pad batch to a multiple of tile_n; stack tile_n samples along the sublanes
    n_pad = -(-N // tile_n) * tile_n
    if n_pad != N:
        x = jnp.pad(x, ((0, n_pad - N), (0, 0), (0, 0), (0, 0)))
    xg = x.astype(jnp.bfloat16).reshape(n_pad // tile_n, tile_n * H, W * C)

    consts = []
    Hi, Wi, Ci = H, W, C
    n_layers = len(params["convs"])
    for li, (w, b) in enumerate(params["convs"]):
        consts.append(_conv_layer_consts(w, b, Hi, Wi, tile_n,
                                         y_major_out=(li == n_layers - 1)))
        Hi, Wi, Ci = Hi // 2, Wi // 2, int(w.shape[0])

    wl, bl = params["linear"]
    S = int(wl.shape[0])
    s_pad = max(128, -(-S // 128) * 128)                                  # lane-dense output
    # permute Linear rows from PyTorch NCHW flatten order (c, y, x) to kernel (y, x, c)
    wl3 = (wl.reshape(S, Ci, Hi, Wi).transpose(2, 3, 1, 0)
             .reshape(Hi, Wi * Ci, S))
    wl3 = jnp.pad(wl3, ((0, 0), (0, 0), (0, s_pad - S))).astype(jnp.bfloat16)
    blr = jnp.pad(bl, (0, s_pad - S))[None, :].astype(jnp.float32)

    (B1, A1, c1), (B2, A2, c2), (B3, A3, c3) = consts

    def cspec(a):
        return pl.BlockSpec(a.shape, lambda g: (0,) * a.ndim)

    G = n_pad // tile_n
    out = pl.pallas_call(
        _specific_kernel,
        out_shape=jax.ShapeDtypeStruct((n_pad, s_pad), jnp.float32),
        grid=(G,),
        in_specs=[pl.BlockSpec((1, tile_n * H, W * C), lambda g: (g, 0, 0)),
                  cspec(B1), cspec(A1), cspec(c1),
                  cspec(B2), cspec(A2), cspec(c2),
                  cspec(B3), cspec(A3), cspec(c3),
                  cspec(wl3), cspec(blr)],
        out_specs=pl.BlockSpec((tile_n, s_pad), lambda g: (g, 0)),
        compiler_params=pltpu.CompilerParams(
            dimension_semantics=("parallel",),
            vmem_limit_bytes=32 * 1024 * 1024),
    )(xg, B1, A1, c1, B2, A2, c2, B3, A3, c3, wl3, blr)
    return out[:N, :S]


# ---------------- reference (pure JAX, sanity check) ----------------

def reference_forward(img_nchw, params):
    x = img_nchw.astype(jnp.float32)
    for (w, b) in params["convs"]:
        x = lax.conv_general_dilated(x, w, (1, 1), "SAME",
                                     dimension_numbers=("NCHW", "OIHW", "NCHW"),
                                     precision=lax.Precision.HIGHEST)
        x = x + b[None, :, None, None]
        x = lax.reduce_window(x, -jnp.inf, lax.max, (1, 1, 2, 2), (1, 1, 2, 2), "VALID")
        x = jnp.maximum(x, 0.0)
    x = x.reshape(x.shape[0], -1)
    wl, bl = params["linear"]
    return jnp.maximum(jnp.dot(x, wl.T, precision=lax.Precision.HIGHEST) + bl, 0.0)


# ---------------- deterministic parameter init ----------------

def init_params(key, specific_size):
    conv_shapes = [(16, 3), (32, 16), (64, 32)]     # (Cout, Cin), 3x3 kernels
    convs = []
    for (cout, cin) in conv_shapes:
        key, kw, kb = jax.random.split(key, 3)
        scale = 1.0 / (cin * 9) ** 0.5
        convs.append((scale * jax.random.normal(kw, (cout, cin, 3, 3), jnp.float32),
                      scale * jax.random.normal(kb, (cout,), jnp.float32)))
    key, kw, kb = jax.random.split(key, 3)
    fin = 64 * 4 * 4                                 # feat_map_dim for 32x32 input
    scale = 1.0 / fin ** 0.5
    wl = scale * jax.random.normal(kw, (specific_size, fin), jnp.float32)
    bl = scale * jax.random.normal(kb, (specific_size,), jnp.float32)
    return {"convs": convs, "linear": (wl, bl)}


if __name__ == "__main__":
    key = jax.random.PRNGKey(0)
    pkey, xkey = jax.random.split(key)

    specific_size = 32
    params = init_params(pkey, specific_size)
    # img_shape = (3, 32, 32) -> channels=3, height=32 -> feat_map_dim=(64,4,4)
    # batch 16 with TILE_N=8 -> grid of 2 steps (keeps both v7x TensorCores busy)
    img = jax.random.normal(xkey, (16, 3, 32, 32), jnp.float32)

    out = jax.jit(specific_forward)(img, params)
    out = jax.block_until_ready(out)

    ref = reference_forward(img, params)
    assert out.shape == (16, specific_size)
    # kernel uses bf16 MXU inputs (f32 accumulation); reference is f32 HIGHEST
    assert jnp.allclose(out, ref, rtol=5e-2, atol=5e-2), float(jnp.max(jnp.abs(out - ref)))
    print("KERNEL_OK")
</pallas_src>

<mosaic_0001>
module attributes {stable_mosaic.version = 11 : i64} {
  func.func @_specific_kernel(%arg0: i32, %arg1: memref<1x256x96xbf16, #tpu.memory_space<vmem>>, %arg2: memref<3x96x512xbf16, #tpu.memory_space<vmem>>, %arg3: memref<768x256xbf16, #tpu.memory_space<vmem>>, %arg4: memref<1x256xf32, #tpu.memory_space<vmem>>, %arg5: memref<3x256x512xbf16, #tpu.memory_space<vmem>>, %arg6: memref<384x128xbf16, #tpu.memory_space<vmem>>, %arg7: memref<1x256xf32, #tpu.memory_space<vmem>>, %arg8: memref<3x256x512xbf16, #tpu.memory_space<vmem>>, %arg9: memref<192x64xbf16, #tpu.memory_space<vmem>>, %arg10: memref<1x256xf32, #tpu.memory_space<vmem>>, %arg11: memref<4x256x128xbf16, #tpu.memory_space<vmem>>, %arg12: memref<1x128xf32, #tpu.memory_space<vmem>>, %arg13: memref<8x128xf32, #tpu.memory_space<vmem>>) attributes {dimension_semantics = [#tpu.dimension_semantics<parallel>], iteration_bounds = array<i64: 2>, scalar_prefetch = 0 : i64, scratch_operands = 0 : i64, tpu.core_type = #tpu.core_type<tc>, window_params = [{transform_indices = @transform_0, window_bounds = array<i64: 1, 256, 96>}, {pipeline_mode = #tpu.pipeline_mode<synchronous>, transform_indices = @transform_1, window_bounds = array<i64: 3, 96, 512>}, {pipeline_mode = #tpu.pipeline_mode<synchronous>, transform_indices = @transform_2, window_bounds = array<i64: 768, 256>}, {pipeline_mode = #tpu.pipeline_mode<synchronous>, transform_indices = @transform_3, window_bounds = array<i64: 1, 256>}, {pipeline_mode = #tpu.pipeline_mode<synchronous>, transform_indices = @transform_4, window_bounds = array<i64: 3, 256, 512>}, {pipeline_mode = #tpu.pipeline_mode<synchronous>, transform_indices = @transform_5, window_bounds = array<i64: 384, 128>}, {pipeline_mode = #tpu.pipeline_mode<synchronous>, transform_indices = @transform_6, window_bounds = array<i64: 1, 256>}, {pipeline_mode = #tpu.pipeline_mode<synchronous>, transform_indices = @transform_7, window_bounds = array<i64: 3, 256, 512>}, {pipeline_mode = #tpu.pipeline_mode<synchronous>, transform_indices = @transform_8, window_bounds = array<i64: 192, 64>}, {pipeline_mode = #tpu.pipeline_mode<synchronous>, transform_indices = @transform_9, window_bounds = array<i64: 1, 256>}, {pipeline_mode = #tpu.pipeline_mode<synchronous>, transform_indices = @transform_10, window_bounds = array<i64: 4, 256, 128>}, {pipeline_mode = #tpu.pipeline_mode<synchronous>, transform_indices = @transform_11, window_bounds = array<i64: 1, 128>}, {transform_indices = @transform_12, window_bounds = array<i64: 8, 128>}]} {
    %c0 = arith.constant 0 : index
    %c0_0 = arith.constant 0 : index
    %c0_1 = arith.constant 0 : index
    %0 = vector.load %arg1[%c0, %c0_0, %c0_1] : memref<1x256x96xbf16, #tpu.memory_space<vmem>>, vector<1x256x96xbf16>
    %1 = vector.shape_cast %0 : vector<1x256x96xbf16> to vector<256x96xbf16>
    %c0_2 = arith.constant 0 : index
    %c0_3 = arith.constant 0 : index
    %2 = vector.load %arg3[%c0_2, %c0_3] : memref<768x256xbf16, #tpu.memory_space<vmem>>, vector<768x256xbf16>
    %cst = arith.constant dense<0.000000e+00> : vector<768x96xf32>
    %3 = tpu.matmul %2, %1, %cst {dimension_numbers = #tpu.dot_dimension_numbers<[1], [0], [0], [1], [0, 0, 1, 1], [], []>} : vector<768x256xbf16>, vector<256x96xbf16>, vector<768x96xf32> -> vector<768x96xf32>
    %4 = arith.truncf %3 : vector<768x96xf32> to vector<768x96xbf16>
    %5 = vector.extract_strided_slice %4 {offsets = [0, 0], sizes = [256, 96], strides = [1, 1]} : vector<768x96xbf16> to vector<256x96xbf16>
    %c0_4 = arith.constant 0 : index
    %c0_5 = arith.constant 0 : index
    %c0_6 = arith.constant 0 : index
    %6 = vector.load %arg2[%c0_4, %c0_5, %c0_6] : memref<3x96x512xbf16, #tpu.memory_space<vmem>>, vector<1x96x512xbf16>
    %7 = vector.shape_cast %6 : vector<1x96x512xbf16> to vector<96x512xbf16>
    %cst_7 = arith.constant dense<0.000000e+00> : vector<256x512xf32>
    %8 = tpu.matmul %5, %7, %cst_7 {dimension_numbers = #tpu.dot_dimension_numbers<[1], [0], [0], [1], [0, 0, 1, 1], [], []>} : vector<256x96xbf16>, vector<96x512xbf16>, vector<256x512xf32> -> vector<256x512xf32>
    %9 = vector.extract_strided_slice %4 {offsets = [256, 0], sizes = [256, 96], strides = [1, 1]} : vector<768x96xbf16> to vector<256x96xbf16>
    %c1 = arith.constant 1 : index
    %c0_8 = arith.constant 0 : index
    %c0_9 = arith.constant 0 : index
    %10 = vector.load %arg2[%c1, %c0_8, %c0_9] : memref<3x96x512xbf16, #tpu.memory_space<vmem>>, vector<1x96x512xbf16>
    %11 = vector.shape_cast %10 : vector<1x96x512xbf16> to vector<96x512xbf16>
    %cst_10 = arith.constant dense<0.000000e+00> : vector<256x512xf32>
    %12 = tpu.matmul %9, %11, %cst_10 {dimension_numbers = #tpu.dot_dimension_numbers<[1], [0], [0], [1], [0, 0, 1, 1], [], []>} : vector<256x96xbf16>, vector<96x512xbf16>, vector<256x512xf32> -> vector<256x512xf32>
    %13 = arith.addf %8, %12 : vector<256x512xf32>
    %14 = vector.extract_strided_slice %4 {offsets = [512, 0], sizes = [256, 96], strides = [1, 1]} : vector<768x96xbf16> to vector<256x96xbf16>
    %c2 = arith.constant 2 : index
    %c0_11 = arith.constant 0 : index
    %c0_12 = arith.constant 0 : index
    %15 = vector.load %arg2[%c2, %c0_11, %c0_12] : memref<3x96x512xbf16, #tpu.memory_space<vmem>>, vector<1x96x512xbf16>
    %16 = vector.shape_cast %15 : vector<1x96x512xbf16> to vector<96x512xbf16>
    %cst_13 = arith.constant dense<0.000000e+00> : vector<256x512xf32>
    %17 = tpu.matmul %14, %16, %cst_13 {dimension_numbers = #tpu.dot_dimension_numbers<[1], [0], [0], [1], [0, 0, 1, 1], [], []>} : vector<256x96xbf16>, vector<96x512xbf16>, vector<256x512xf32> -> vector<256x512xf32>
    %18 = arith.addf %13, %17 : vector<256x512xf32>
    %19 = vector.extract_strided_slice %18 {offsets = [0, 0], sizes = [128, 256], strides = [1, 1]} : vector<256x512xf32> to vector<128x256xf32>
    %20 = vector.extract_strided_slice %18 {offsets = [0, 256], sizes = [128, 256], strides = [1, 1]} : vector<256x512xf32> to vector<128x256xf32>
    %21 = arith.maximumf %19, %20 : vector<128x256xf32>
    %22 = vector.extract_strided_slice %18 {offsets = [128, 0], sizes = [128, 256], strides = [1, 1]} : vector<256x512xf32> to vector<128x256xf32>
    %23 = vector.extract_strided_slice %18 {offsets = [128, 256], sizes = [128, 256], strides = [1, 1]} : vector<256x512xf32> to vector<128x256xf32>
    %24 = arith.maximumf %22, %23 : vector<128x256xf32>
    %25 = arith.maximumf %21, %24 : vector<128x256xf32>
    %c0_14 = arith.constant 0 : index
    %c0_15 = arith.constant 0 : index
    %26 = vector.load %arg4[%c0_14, %c0_15] : memref<1x256xf32, #tpu.memory_space<vmem>>, vector<1x256xf32>
    %27 = vector.broadcast %26 : vector<1x256xf32> to vector<128x256xf32>
    %28 = arith.addf %25, %27 : vector<128x256xf32>
    %cst_16 = arith.constant 0.000000e+00 : f32
    %29 = vector.broadcast %cst_16 : f32 to vector<128x256xf32>
    %30 = arith.maximumf %28, %29 : vector<128x256xf32>
    %31 = arith.truncf %30 : vector<128x256xf32> to vector<128x256xbf16>
    %c0_17 = arith.constant 0 : index
    %c0_18 = arith.constant 0 : index
    %32 = vector.load %arg6[%c0_17, %c0_18] : memref<384x128xbf16, #tpu.memory_space<vmem>>, vector<384x128xbf16>
    %cst_19 = arith.constant dense<0.000000e+00> : vector<384x256xf32>
    %33 = tpu.matmul %32, %31, %cst_19 {dimension_numbers = #tpu.dot_dimension_numbers<[1], [0], [0], [1], [0, 0, 1, 1], [], []>} : vector<384x128xbf16>, vector<128x256xbf16>, vector<384x256xf32> -> vector<384x256xf32>
    %34 = arith.truncf %33 : vector<384x256xf32> to vector<384x256xbf16>
    %35 = vector.extract_strided_slice %34 {offsets = [0, 0], sizes = [128, 256], strides = [1, 1]} : vector<384x256xbf16> to vector<128x256xbf16>
    %c0_20 = arith.constant 0 : index
    %c0_21 = arith.constant 0 : index
    %c0_22 = arith.constant 0 : index
    %36 = vector.load %arg5[%c0_20, %c0_21, %c0_22] : memref<3x256x512xbf16, #tpu.memory_space<vmem>>, vector<1x256x512xbf16>
    %37 = vector.shape_cast %36 : vector<1x256x512xbf16> to vector<256x512xbf16>
    %cst_23 = arith.constant dense<0.000000e+00> : vector<128x512xf32>
    %38 = tpu.matmul %35, %37, %cst_23 {dimension_numbers = #tpu.dot_dimension_numbers<[1], [0], [0], [1], [0, 0, 1, 1], [], []>} : vector<128x256xbf16>, vector<256x512xbf16>, vector<128x512xf32> -> vector<128x512xf32>
    %39 = vector.extract_strided_slice %34 {offsets = [128, 0], sizes = [128, 256], strides = [1, 1]} : vector<384x256xbf16> to vector<128x256xbf16>
    %c1_24 = arith.constant 1 : index
    %c0_25 = arith.constant 0 : index
    %c0_26 = arith.constant 0 : index
    %40 = vector.load %arg5[%c1_24, %c0_25, %c0_26] : memref<3x256x512xbf16, #tpu.memory_space<vmem>>, vector<1x256x512xbf16>
    %41 = vector.shape_cast %40 : vector<1x256x512xbf16> to vector<256x512xbf16>
    %cst_27 = arith.constant dense<0.000000e+00> : vector<128x512xf32>
    %42 = tpu.matmul %39, %41, %cst_27 {dimension_numbers = #tpu.dot_dimension_numbers<[1], [0], [0], [1], [0, 0, 1, 1], [], []>} : vector<128x256xbf16>, vector<256x512xbf16>, vector<128x512xf32> -> vector<128x512xf32>
    %43 = arith.addf %38, %42 : vector<128x512xf32>
    %44 = vector.extract_strided_slice %34 {offsets = [256, 0], sizes = [128, 256], strides = [1, 1]} : vector<384x256xbf16> to vector<128x256xbf16>
    %c2_28 = arith.constant 2 : index
    %c0_29 = arith.constant 0 : index
    %c0_30 = arith.constant 0 : index
    %45 = vector.load %arg5[%c2_28, %c0_29, %c0_30] : memref<3x256x512xbf16, #tpu.memory_space<vmem>>, vector<1x256x512xbf16>
    %46 = vector.shape_cast %45 : vector<1x256x512xbf16> to vector<256x512xbf16>
    %cst_31 = arith.constant dense<0.000000e+00> : vector<128x512xf32>
    %47 = tpu.matmul %44, %46, %cst_31 {dimension_numbers = #tpu.dot_dimension_numbers<[1], [0], [0], [1], [0, 0, 1, 1], [], []>} : vector<128x256xbf16>, vector<256x512xbf16>, vector<128x512xf32> -> vector<128x512xf32>
    %48 = arith.addf %43, %47 : vector<128x512xf32>
    %49 = vector.extract_strided_slice %48 {offsets = [0, 0], sizes = [64, 256], strides = [1, 1]} : vector<128x512xf32> to vector<64x256xf32>
    %50 = vector.extract_strided_slice %48 {offsets = [0, 256], sizes = [64, 256], strides = [1, 1]} : vector<128x512xf32> to vector<64x256xf32>
    %51 = arith.maximumf %49, %50 : vector<64x256xf32>
    %52 = vector.extract_strided_slice %48 {offsets = [64, 0], sizes = [64, 256], strides = [1, 1]} : vector<128x512xf32> to vector<64x256xf32>
    %53 = vector.extract_strided_slice %48 {offsets = [64, 256], sizes = [64, 256], strides = [1, 1]} : vector<128x512xf32> to vector<64x256xf32>
    %54 = arith.maximumf %52, %53 : vector<64x256xf32>
    %55 = arith.maximumf %51, %54 : vector<64x256xf32>
    %c0_32 = arith.constant 0 : index
    %c0_33 = arith.constant 0 : index
    %56 = vector.load %arg7[%c0_32, %c0_33] : memref<1x256xf32, #tpu.memory_space<vmem>>, vector<1x256xf32>
    %57 = vector.broadcast %56 : vector<1x256xf32> to vector<64x256xf32>
    %58 = arith.addf %55, %57 : vector<64x256xf32>
    %cst_34 = arith.constant 0.000000e+00 : f32
    %59 = vector.broadcast %cst_34 : f32 to vector<64x256xf32>
    %60 = arith.maximumf %58, %59 : vector<64x256xf32>
    %61 = arith.truncf %60 : vector<64x256xf32> to vector<64x256xbf16>
    %c0_35 = arith.constant 0 : index
    %c0_36 = arith.constant 0 : index
    %62 = vector.load %arg9[%c0_35, %c0_36] : memref<192x64xbf16, #tpu.memory_space<vmem>>, vector<192x64xbf16>
    %cst_37 = arith.constant dense<0.000000e+00> : vector<192x256xf32>
    %63 = tpu.matmul %62, %61, %cst_37 {dimension_numbers = #tpu.dot_dimension_numbers<[1], [0], [0], [1], [0, 0, 1, 1], [], []>} : vector<192x64xbf16>, vector<64x256xbf16>, vector<192x256xf32> -> vector<192x256xf32>
    %64 = arith.truncf %63 : vector<192x256xf32> to vector<192x256xbf16>
    %65 = vector.extract_strided_slice %64 {offsets = [0, 0], sizes = [64, 256], strides = [1, 1]} : vector<192x256xbf16> to vector<64x256xbf16>
    %c0_38 = arith.constant 0 : index
    %c0_39 = arith.constant 0 : index
    %c0_40 = arith.constant 0 : index
    %66 = vector.load %arg8[%c0_38, %c0_39, %c0_40] : memref<3x256x512xbf16, #tpu.memory_space<vmem>>, vector<1x256x512xbf16>
    %67 = vector.shape_cast %66 : vector<1x256x512xbf16> to vector<256x512xbf16>
    %cst_41 = arith.constant dense<0.000000e+00> : vector<64x512xf32>
    %68 = tpu.matmul %65, %67, %cst_41 {dimension_numbers = #tpu.dot_dimension_numbers<[1], [0], [0], [1], [0, 0, 1, 1], [], []>} : vector<64x256xbf16>, vector<256x512xbf16>, vector<64x512xf32> -> vector<64x512xf32>
    %69 = vector.extract_strided_slice %64 {offsets = [64, 0], sizes = [64, 256], strides = [1, 1]} : vector<192x256xbf16> to vector<64x256xbf16>
    %c1_42 = arith.constant 1 : index
    %c0_43 = arith.constant 0 : index
    %c0_44 = arith.constant 0 : index
    %70 = vector.load %arg8[%c1_42, %c0_43, %c0_44] : memref<3x256x512xbf16, #tpu.memory_space<vmem>>, vector<1x256x512xbf16>
    %71 = vector.shape_cast %70 : vector<1x256x512xbf16> to vector<256x512xbf16>
    %cst_45 = arith.constant dense<0.000000e+00> : vector<64x512xf32>
    %72 = tpu.matmul %69, %71, %cst_45 {dimension_numbers = #tpu.dot_dimension_numbers<[1], [0], [0], [1], [0, 0, 1, 1], [], []>} : vector<64x256xbf16>, vector<256x512xbf16>, vector<64x512xf32> -> vector<64x512xf32>
    %73 = arith.addf %68, %72 : vector<64x512xf32>
    %74 = vector.extract_strided_slice %64 {offsets = [128, 0], sizes = [64, 256], strides = [1, 1]} : vector<192x256xbf16> to vector<64x256xbf16>
    %c2_46 = arith.constant 2 : index
    %c0_47 = arith.constant 0 : index
    %c0_48 = arith.constant 0 : index
    %75 = vector.load %arg8[%c2_46, %c0_47, %c0_48] : memref<3x256x512xbf16, #tpu.memory_space<vmem>>, vector<1x256x512xbf16>
    %76 = vector.shape_cast %75 : vector<1x256x512xbf16> to vector<256x512xbf16>
    %cst_49 = arith.constant dense<0.000000e+00> : vector<64x512xf32>
    %77 = tpu.matmul %74, %76, %cst_49 {dimension_numbers = #tpu.dot_dimension_numbers<[1], [0], [0], [1], [0, 0, 1, 1], [], []>} : vector<64x256xbf16>, vector<256x512xbf16>, vector<64x512xf32> -> vector<64x512xf32>
    %78 = arith.addf %73, %77 : vector<64x512xf32>
    %79 = vector.extract_strided_slice %78 {offsets = [0, 0], sizes = [32, 256], strides = [1, 1]} : vector<64x512xf32> to vector<32x256xf32>
    %80 = vector.extract_strided_slice %78 {offsets = [0, 256], sizes = [32, 256], strides = [1, 1]} : vector<64x512xf32> to vector<32x256xf32>
    %81 = arith.maximumf %79, %80 : vector<32x256xf32>
    %82 = vector.extract_strided_slice %78 {offsets = [32, 0], sizes = [32, 256], strides = [1, 1]} : vector<64x512xf32> to vector<32x256xf32>
    %83 = vector.extract_strided_slice %78 {offsets = [32, 256], sizes = [32, 256], strides = [1, 1]} : vector<64x512xf32> to vector<32x256xf32>
    %84 = arith.maximumf %82, %83 : vector<32x256xf32>
    %85 = arith.maximumf %81, %84 : vector<32x256xf32>
    %c0_50 = arith.constant 0 : index
    %c0_51 = arith.constant 0 : index
    %86 = vector.load %arg10[%c0_50, %c0_51] : memref<1x256xf32, #tpu.memory_space<vmem>>, vector<1x256xf32>
    %87 = vector.broadcast %86 : vector<1x256xf32> to vector<32x256xf32>
    %88 = arith.addf %85, %87 : vector<32x256xf32>
    %cst_52 = arith.constant 0.000000e+00 : f32
    %89 = vector.broadcast %cst_52 : f32 to vector<32x256xf32>
    %90 = arith.maximumf %88, %89 : vector<32x256xf32>
    %91 = arith.truncf %90 : vector<32x256xf32> to vector<32x256xbf16>
    %92 = vector.extract_strided_slice %91 {offsets = [0, 0], sizes = [8, 256], strides = [1, 1]} : vector<32x256xbf16> to vector<8x256xbf16>
    %c0_53 = arith.constant 0 : index
    %c0_54 = arith.constant 0 : index
    %c0_55 = arith.constant 0 : index
    %93 = vector.load %arg11[%c0_53, %c0_54, %c0_55] : memref<4x256x128xbf16, #tpu.memory_space<vmem>>, vector<1x256x128xbf16>
    %94 = vector.shape_cast %93 : vector<1x256x128xbf16> to vector<256x128xbf16>
    %cst_56 = arith.constant dense<0.000000e+00> : vector<8x128xf32>
    %95 = tpu.matmul %92, %94, %cst_56 {dimension_numbers = #tpu.dot_dimension_numbers<[1], [0], [0], [1], [0, 0, 1, 1], [], []>} : vector<8x256xbf16>, vector<256x128xbf16>, vector<8x128xf32> -> vector<8x128xf32>
    %96 = vector.extract_strided_slice %91 {offsets = [8, 0], sizes = [8, 256], strides = [1, 1]} : vector<32x256xbf16> to vector<8x256xbf16>
    %c1_57 = arith.constant 1 : index
    %c0_58 = arith.constant 0 : index
    %c0_59 = arith.constant 0 : index
    %97 = vector.load %arg11[%c1_57, %c0_58, %c0_59] : memref<4x256x128xbf16, #tpu.memory_space<vmem>>, vector<1x256x128xbf16>
    %98 = vector.shape_cast %97 : vector<1x256x128xbf16> to vector<256x128xbf16>
    %cst_60 = arith.constant dense<0.000000e+00> : vector<8x128xf32>
    %99 = tpu.matmul %96, %98, %cst_60 {dimension_numbers = #tpu.dot_dimension_numbers<[1], [0], [0], [1], [0, 0, 1, 1], [], []>} : vector<8x256xbf16>, vector<256x128xbf16>, vector<8x128xf32> -> vector<8x128xf32>
    %100 = arith.addf %95, %99 : vector<8x128xf32>
    %101 = vector.extract_strided_slice %91 {offsets = [16, 0], sizes = [8, 256], strides = [1, 1]} : vector<32x256xbf16> to vector<8x256xbf16>
    %c2_61 = arith.constant 2 : index
    %c0_62 = arith.constant 0 : index
    %c0_63 = arith.constant 0 : index
    %102 = vector.load %arg11[%c2_61, %c0_62, %c0_63] : memref<4x256x128xbf16, #tpu.memory_space<vmem>>, vector<1x256x128xbf16>
    %103 = vector.shape_cast %102 : vector<1x256x128xbf16> to vector<256x128xbf16>
    %cst_64 = arith.constant dense<0.000000e+00> : vector<8x128xf32>
    %104 = tpu.matmul %101, %103, %cst_64 {dimension_numbers = #tpu.dot_dimension_numbers<[1], [0], [0], [1], [0, 0, 1, 1], [], []>} : vector<8x256xbf16>, vector<256x128xbf16>, vector<8x128xf32> -> vector<8x128xf32>
    %105 = arith.addf %100, %104 : vector<8x128xf32>
    %106 = vector.extract_strided_slice %91 {offsets = [24, 0], sizes = [8, 256], strides = [1, 1]} : vector<32x256xbf16> to vector<8x256xbf16>
    %c3 = arith.constant 3 : index
    %c0_65 = arith.constant 0 : index
    %c0_66 = arith.constant 0 : index
    %107 = vector.load %arg11[%c3, %c0_65, %c0_66] : memref<4x256x128xbf16, #tpu.memory_space<vmem>>, vector<1x256x128xbf16>
    %108 = vector.shape_cast %107 : vector<1x256x128xbf16> to vector<256x128xbf16>
    %cst_67 = arith.constant dense<0.000000e+00> : vector<8x128xf32>
    %109 = tpu.matmul %106, %108, %cst_67 {dimension_numbers = #tpu.dot_dimension_numbers<[1], [0], [0], [1], [0, 0, 1, 1], [], []>} : vector<8x256xbf16>, vector<256x128xbf16>, vector<8x128xf32> -> vector<8x128xf32>
    %110 = arith.addf %105, %109 : vector<8x128xf32>
    %c0_68 = arith.constant 0 : index
    %c0_69 = arith.constant 0 : index
    %111 = vector.load %arg12[%c0_68, %c0_69] : memref<1x128xf32, #tpu.memory_space<vmem>>, vector<1x128xf32>
    %112 = vector.broadcast %111 : vector<1x128xf32> to vector<8x128xf32>
    %113 = arith.addf %110, %112 : vector<8x128xf32>
    %cst_70 = arith.constant 0.000000e+00 : f32
    %114 = vector.broadcast %cst_70 : f32 to vector<8x128xf32>
    %115 = arith.maximumf %113, %114 : vector<8x128xf32>
    %c0_71 = arith.constant 0 : index
    %c0_72 = arith.constant 0 : index
    %116 = vector.load %arg13[%c0_71, %c0_72] : memref<8x128xf32, #tpu.memory_space<vmem>>, vector<8x128xf32>
    tpu.vector_store %arg13[%c0_71, %c0_72], %115 {strides = array<i32>} : memref<8x128xf32, #tpu.memory_space<vmem>>, vector<8x128xf32>,
    return
  }
  func.func @transform_0(%arg0: i32) -> (i32, i32, i32) {
    %c0_i32 = arith.constant 0 : i32
    %c0_i32_0 = arith.constant 0 : i32
    %c0_i32_1 = arith.constant 0 : i32
    return %arg0, %c0_i32, %c0_i32_0 : i32, i32, i32
  }
  func.func @transform_1(%arg0: i32) -> (i32, i32, i32) {
    %c0_i32 = arith.constant 0 : i32
    %c0_i32_0 = arith.constant 0 : i32
    %c0_i32_1 = arith.constant 0 : i32
    %c0_i32_2 = arith.constant 0 : i32
    return %c0_i32, %c0_i32_0, %c0_i32_1 : i32, i32, i32
  }
  func.func @transform_2(%arg0: i32) -> (i32, i32) {
    %c0_i32 = arith.constant 0 : i32
    %c0_i32_0 = arith.constant 0 : i32
    %c0_i32_1 = arith.constant 0 : i32
    return %c0_i32, %c0_i32_0 : i32, i32
  }
  func.func @transform_3(%arg0: i32) -> (i32, i32) {
    %c0_i32 = arith.constant 0 : i32
    %c0_i32_0 = arith.constant 0 : i32
    %c0_i32_1 = arith.constant 0 : i32
    return %c0_i32, %c0_i32_0 : i32, i32
  }
  func.func @transform_4(%arg0: i32) -> (i32, i32, i32) {
    %c0_i32 = arith.constant 0 : i32
    %c0_i32_0 = arith.constant 0 : i32
    %c0_i32_1 = arith.constant 0 : i32
    %c0_i32_2 = arith.constant 0 : i32
    return %c0_i32, %c0_i32_0, %c0_i32_1 : i32, i32, i32
  }
  func.func @transform_5(%arg0: i32) -> (i32, i32) {
    %c0_i32 = arith.constant 0 : i32
    %c0_i32_0 = arith.constant 0 : i32
    %c0_i32_1 = arith.constant 0 : i32
    return %c0_i32, %c0_i32_0 : i32, i32
  }
  func.func @transform_6(%arg0: i32) -> (i32, i32) {
    %c0_i32 = arith.constant 0 : i32
    %c0_i32_0 = arith.constant 0 : i32
    %c0_i32_1 = arith.constant 0 : i32
    return %c0_i32, %c0_i32_0 : i32, i32
  }
  func.func @transform_7(%arg0: i32) -> (i32, i32, i32) {
    %c0_i32 = arith.constant 0 : i32
    %c0_i32_0 = arith.constant 0 : i32
    %c0_i32_1 = arith.constant 0 : i32
    %c0_i32_2 = arith.constant 0 : i32
    return %c0_i32, %c0_i32_0, %c0_i32_1 : i32, i32, i32
  }
  func.func @transform_8(%arg0: i32) -> (i32, i32) {
    %c0_i32 = arith.constant 0 : i32
    %c0_i32_0 = arith.constant 0 : i32
    %c0_i32_1 = arith.constant 0 : i32
    return %c0_i32, %c0_i32_0 : i32, i32
  }
  func.func @transform_9(%arg0: i32) -> (i32, i32) {
    %c0_i32 = arith.constant 0 : i32
    %c0_i32_0 = arith.constant 0 : i32
    %c0_i32_1 = arith.constant 0 : i32
    return %c0_i32, %c0_i32_0 : i32, i32
  }
  func.func @transform_10(%arg0: i32) -> (i32, i32, i32) {
    %c0_i32 = arith.constant 0 : i32
    %c0_i32_0 = arith.constant 0 : i32
    %c0_i32_1 = arith.constant 0 : i32
    %c0_i32_2 = arith.constant 0 : i32
    return %c0_i32, %c0_i32_0, %c0_i32_1 : i32, i32, i32
  }
  func.func @transform_11(%arg0: i32) -> (i32, i32) {
    %c0_i32 = arith.constant 0 : i32
    %c0_i32_0 = arith.constant 0 : i32
    %c0_i32_1 = arith.constant 0 : i32
    return %c0_i32, %c0_i32_0 : i32, i32
  }
  func.func @transform_12(%arg0: i32) -> (i32, i32) {
    %c0_i32 = arith.constant 0 : i32
    %c0_i32_0 = arith.constant 0 : i32
    return %arg0, %c0_i32 : i32, i32
  }
}

</mosaic_0001>

<bundles_post_ra>
// kernel: tile.18
= control target key start
LH: loop header
LB: loop body
LE: loop exit
PB: predicated region body
PF: predicated region fallthrough
CT: control target
= control target key end

     0   :  { %s28_s0 = inlined_call_operand.vmem [shape: f32[16], index: 0, kind: input, shape index: {}]   ;;  %s29_s1 = inlined_call_operand.vmem [shape: f32[16,16], index: 1, kind: output, shape index: {}]  }
   0x1   :  { %v4_v0 = vld [vmem:[%s28_s0] ss:$0 sm:$0xff] }
   0x2   :  { %5 = vst [vmem:[%s29_s1] sm:$0xff] %v4_v0 }
   0x3   :  { %8 = vst [vmem:[%s29_s1 + $0x8] sm:$0xff] %v4_v0 }

// kernel: tile.19
= control target key start
LH: loop header
LB: loop body
LE: loop exit
PB: predicated region body
PF: predicated region fallthrough
CT: control target
= control target key end

     0   :  { %s7_s6 = smov 3  ;;  %s21_s9 = smov 3  ;;  %vm4_vm0 = vcmask 130048   ;;  %vm11_vm1 = vcmask 1048448   ;;  %vm18_vm2 = vcmask 917248   ;;  %vm25_vm3 = vcmask 786048   ;;  %s129_s0 = inlined_call_operand.vmem [shape: f32[16,16], index: 0, kind: input, shape index: {}]   ;;  %s130_s1 = inlined_call_operand.vmem [shape: f32[1,256], index: 1, kind: output, shape index: {}]  }
   0x1   :  { %v67_v0 = vld [vmem:[%s129_s0 + $0x7] ss:$8 sm:%s7_s6]   ;;  %s82_s10 = smov 112   ;;  %v69_v1 = vld [vmem:[%s129_s0 + $0x5] ss:$8 sm:%s21_s9]   ;;  %s83_s13 = smov 80  }
   0x2   :  { %9 = vrot.lane.b32.xlu0 %v67_v0, %s82_s10  ;;  %23 = vrot.lane.b32.xlu1 %v69_v1, %s83_s13  ;;  %s14_s14 = smov 3  ;;  %s28_s15 = smov 3  ;;  %vm32_vm4 = vcmask 654848   ;;  %vm39_vm5 = vcmask 523648   ;;  %vm46_vm6 = vcmask 392448   ;;  %vm53_vm7 = vcmask 261248  }
   0x3   :  { %s35_s16 = smov 3  ;;  %v68_v3 = vld [vmem:[%s129_s0 + $0x6] ss:$8 sm:%s14_s14]   ;;  %s84_s21 = smov 48   ;;  %v70_v4 = vld [vmem:[%s129_s0 + $0x4] ss:$8 sm:%s28_s15]  }
   0x4   :  { %v71_v2 = vld [vmem:[%s129_s0 + $0x3] ss:$8 sm:%s35_s16]   ;;  %s42_s24 = smov 3  ;;  %s85_s25 = smov 96  }
   0x5   :  { %37 = vrot.lane.b32.xlu2 %v71_v2, %s84_s21  ;;  %s86_s26 = smov 64   ;;  %s49_s27 = smov 3  ;;  %v72_v5 = vld [vmem:[%s129_s0 + $0x2] ss:$8 sm:%s42_s24]  }
   0x6   :  { %v73_v6 = vld [vmem:[%s129_s0 + $0x1] ss:$8 sm:%s49_s27]   ;;  %s87_s3 = smov 32   ;;  %s88_s4 = smov 16  }
   0x7   :  { %s2_s5 = smov 3 }
   0x8   :  { %v3_v7 = vld [vmem:[%s129_s0] ss:$8 sm:%s2_s5]  }
   0x9   :  { %5 = vst.msk [vmem:[#allocation0] ss:$8 sm:$0x3] %vm4_vm0, %v3_v7  }
   0xa   :  { %16 = vrot.lane.b32.xlu0 %v68_v3, %s85_s25  ;;  %30 = vrot.lane.b32.xlu1 %v70_v4, %s86_s26 }
   0xd   :  { %44 = vrot.lane.b32.xlu2 %v72_v5, %s87_s3 }
  0x12   :  { %51 = vrot.lane.b32.xlu0 %v73_v6, %s88_s4 }
  0x5f   :  { %v38_v8 = vpop.permute.xlu2 %37  }
  0x67   :  { %v45_v9 = vpop.permute.xlu2 %44  }
  0x74   :  { %v10_v10 = vpop.permute.xlu0 %9   ;;  %v24_v11 = vpop.permute.xlu1 %23  }
  0x75   :  { %12 = vst.msk [vmem:[#allocation0] ss:$8 sm:$0x3] %vm11_vm1, %v10_v10  }
  0x7c   :  { %v17_v12 = vpop.permute.xlu0 %16   ;;  %v31_v13 = vpop.permute.xlu1 %30  }
  0x7d   :  { %19 = vst.msk [vmem:[#allocation0] ss:$8 sm:$0x3] %vm18_vm2, %v17_v12  }
  0x7e   :  { %26 = vst.msk [vmem:[#allocation0] ss:$8 sm:$0x3] %vm25_vm3, %v24_v11  }
  0x7f   :  { %33 = vst.msk [vmem:[#allocation0] ss:$8 sm:$0x3] %vm32_vm4, %v31_v13  }
  0x80   :  { %40 = vst.msk [vmem:[#allocation0] ss:$8 sm:$0x3] %vm39_vm5, %v38_v8  }
  0x81   :  { %47 = vst.msk [vmem:[#allocation0] ss:$8 sm:$0x3] %vm46_vm6, %v45_v9  }
  0x84   :  { %v52_v14 = vpop.permute.xlu0 %51  }
  0x85   :  { %54 = vst.msk [vmem:[#allocation0] ss:$8 sm:$0x3] %vm53_vm7, %v52_v14  }
  0x8c   :  { %v57_v15 = vld [vmem:[#allocation0] sm:$0x1]  ;;  %v62_v16 = vld [vmem:[#allocation0 + $0x8] sm:$0x1] }
  0x8d   :  { %60 = vst [vmem:[%s130_s1] sm:$0x1] %v57_v15 }
  0x8e   :  { %74 = vst [vmem:[%s130_s1 + $0x1] sm:$0x1] %v62_v16 }

// kernel: tile.23
= control target key start
LH: loop header
LB: loop body
LE: loop exit
PB: predicated region body
PF: predicated region fallthrough
CT: control target
= control target key end

     0   :  { %s22_s0 = inlined_call_operand.vmem [shape: f32[32], index: 0, kind: input, shape index: {}]   ;;  %s23_s1 = inlined_call_operand.vmem [shape: f32[8,32], index: 1, kind: output, shape index: {}]  }
   0x1   :  { %v4_v0 = vld [vmem:[%s22_s0] ss:$0 sm:$0xff] }
   0x2   :  { %5 = vst [vmem:[%s23_s1] sm:$0xff] %v4_v0 }

// kernel: tile.24
= control target key start
LH: loop header
LB: loop body
LE: loop exit
PB: predicated region body
PF: predicated region fallthrough
CT: control target
= control target key end

     0   :  { %s7_s6 = smov 3  ;;  %s46_s9 = smov 96   ;;  %vm4_vm0 = vcmask 261120   ;;  %vm11_vm1 = vcmask 1048320   ;;  %vm18_vm2 = vcmask 785920   ;;  %vm25_vm3 = vcmask 523520   ;;  %s77_s0 = inlined_call_operand.vmem [shape: f32[8,32], index: 0, kind: input, shape index: {}]   ;;  %s78_s1 = inlined_call_operand.vmem [shape: f32[1,256], index: 1, kind: output, shape index: {}]  }
   0x1   :  { %v39_v0 = vld [vmem:[%s77_s0 + $0x3] ss:$4 sm:%s7_s6]   ;;  %s21_s10 = smov 3  ;;  %s14_s13 = smov 3 }
   0x2   :  { %9 = vrot.lane.b32.xlu0 %v39_v0, %s46_s9  ;;  %v41_v1 = vld [vmem:[%s77_s0 + $0x1] ss:$4 sm:%s21_s10]   ;;  %s47_s14 = smov 32   ;;  %s48_s17 = smov 64  }
   0x3   :  { %23 = vrot.lane.b32.xlu1 %v41_v1, %s47_s14  ;;  %v40_v2 = vld [vmem:[%s77_s0 + $0x2] ss:$4 sm:%s14_s13]   ;;  %s2_s18 = smov 3 }
   0x4   :  { %v3_v3 = vld [vmem:[%s77_s0] ss:$4 sm:%s2_s18]  }
   0x5   :  { %5 = vst.msk [vmem:[#allocation0] ss:$8 sm:$0x3] %vm4_vm0, %v3_v3  }
   0xa   :  { %16 = vrot.lane.b32.xlu0 %v40_v2, %s48_s17 }
  0x74   :  { %v10_v4 = vpop.permute.xlu0 %9  }
  0x75   :  { %12 = vst.msk [vmem:[#allocation0] ss:$8 sm:$0x3] %vm11_vm1, %v10_v4   ;;  %v24_v5 = vpop.permute.xlu1 %23  }
  0x7c   :  { %v17_v6 = vpop.permute.xlu0 %16  }
  0x7d   :  { %19 = vst.msk [vmem:[#allocation0] ss:$8 sm:$0x3] %vm18_vm2, %v17_v6  }
  0x7e   :  { %26 = vst.msk [vmem:[#allocation0] ss:$8 sm:$0x3] %vm25_vm3, %v24_v5  }
  0x85   :  { %v29_v7 = vld [vmem:[#allocation0] sm:$0x1]  ;;  %v34_v8 = vld [vmem:[#allocation0 + $0x8] sm:$0x1] }
  0x86   :  { %32 = vst [vmem:[%s78_s1] sm:$0x1] %v29_v7 }
  0x87   :  { %42 = vst [vmem:[%s78_s1 + $0x1] sm:$0x1] %v34_v8 }

// kernel: tile.28
= control target key start
LH: loop header
LB: loop body
LE: loop exit
PB: predicated region body
PF: predicated region fallthrough
CT: control target
= control target key end

     0   :  { %s22_s0 = inlined_call_operand.vmem [shape: f32[64], index: 0, kind: input, shape index: {}]   ;;  %s23_s1 = inlined_call_operand.vmem [shape: f32[4,64], index: 1, kind: output, shape index: {}]  }
   0x1   :  { %v4_v0 = vld [vmem:[%s22_s0] ss:$0 sm:$0xff] }
   0x2   :  { %5 = vst [vmem:[%s23_s1] sm:$0xf] %v4_v0 }

// kernel: tile.29
= control target key start
LH: loop header
LB: loop body
LE: loop exit
PB: predicated region body
PF: predicated region fallthrough
CT: control target
= control target key end

     0   :  { %s6_s8 = smov 3  ;;  %vm8_vm0 = vcmask 523264   ;;  %s31_s9 = smov 64   ;;  %vm15_vm1 = vcmask 1048064   ;;  %s51_s0 = inlined_call_operand.vmem [shape: f32[4,64], index: 0, kind: input, shape index: {}]   ;;  %s52_s1 = inlined_call_operand.vmem [shape: f32[1,256], index: 1, kind: output, shape index: {}]  }
   0x1   :  { %v4_v0 = vld [vmem:[%s51_s0] sm:$0xf]  ;;  %s11_s0 = smov 3 }
   0x2   :  { %5 = vst [vmem:[#allocation1] sm:$0xf] %v4_v0 }
   0x9   :  { %v12_v1 = vld [vmem:[#allocation1 + $0x1] ss:$2 sm:%s11_s0]   ;;  %v7_v2 = vld [vmem:[#allocation1] ss:$2 sm:%s6_s8]  }
   0xa   :  { %13 = vrot.lane.b32.xlu0 %v12_v1, %s31_s9  ;;  %9 = vst.msk [vmem:[#allocation0] ss:$8 sm:$0x3] %vm8_vm0, %v7_v2  }
  0x7c   :  { %v14_v3 = vpop.permute.xlu0 %13  }
  0x7d   :  { %16 = vst.msk [vmem:[#allocation0] ss:$8 sm:$0x3] %vm15_vm1, %v14_v3  }
  0x84   :  { %v19_v4 = vld [vmem:[#allocation0] sm:$0x1]  ;;  %v24_v5 = vld [vmem:[#allocation0 + $0x8] sm:$0x1] }
  0x85   :  { %22 = vst [vmem:[%s52_s1] sm:$0x1] %v19_v4 }
  0x86   :  { %29 = vst [vmem:[%s52_s1 + $0x1] sm:$0x1] %v24_v5 }

// kernel: specific_forward.1
= control target key start
LH: loop header
LB: loop body
LE: loop exit
PB: predicated region body
PF: predicated region fallthrough
CT: control target
= control target key end

     0   :  { %s21293_s0 = inlined_call_operand.vmem [shape: bf16[2,256,96], index: 0, kind: input, shape index: {}]   ;;  %s21294_s1 = inlined_call_operand.vmem [shape: bf16[3,96,512], index: 1, kind: input, shape index: {}]   ;;  %s21295_s2 = inlined_call_operand.vmem [shape: bf16[768,256], index: 2, kind: input, shape index: {}]   ;;  %s21296_s3 = inlined_call_operand.vmem [shape: f32[1,256], index: 3, kind: input, shape index: {}]   ;;  %s21297_s4 = inlined_call_operand.vmem [shape: bf16[3,256,512], index: 4, kind: input, shape index: {}]   ;;  %s21298_s5 = inlined_call_operand.vmem [shape: bf16[384,128], index: 5, kind: input, shape index: {}]   ;;  %s21299_s6 = inlined_call_operand.vmem [shape: f32[1,256], index: 6, kind: input, shape index: {}]   ;;  %s21300_s7 = inlined_call_operand.vmem [shape: bf16[3,256,512], index: 7, kind: input, shape index: {}]   ;;  %s21301_s8 = inlined_call_operand.vmem [shape: bf16[192,64], index: 8, kind: input, shape index: {}]   ;;  %s21302_s9 = inlined_call_operand.vmem [shape: f32[1,256], index: 9, kind: input, shape index: {}]   ;;  %s21303_s10 = inlined_call_operand.vmem [shape: bf16[4,256,128], index: 10, kind: input, shape index: {}]   ;;  %s21304_s11 = inlined_call_operand.vmem [shape: f32[1,128], index: 11, kind: input, shape index: {}]   ;;  %s21305_s12 = inlined_call_operand.hbm [shape: f32[16,128], index: 12, kind: output, shape index: {}]  }
   0x1   :  { %21373 = sst [smem:[#allocation202_spill]] %s21293_s0 }
   0x2   :  { %21374 = sst [smem:[#allocation203_spill]] %s21294_s1 }
   0x3   :  { %17 = vsyncpa [#allocation3], 0 }
   0x4   :  { %19 = vsyncpa [#allocation3 + $0x1], 0  ;;  %s14337_s21 = smov 0   ;;  %s14339_s22 = smov 0  }
   0x5   :  { %s14341_s23 = smov 0   ;;  %s14343_s24 = smov 0  }
   0x6 LB: > { %s14358_s25 = sadd.s32 4294967295, %s14270_s24   ;;  %s10200_s26 = sadd.s32 4294967294, %s14270_s24   ;;  %s14270_s24 = sphi %s14343_s24, %s22086_s24   ;;  %s14266_s23 = sphi %s14341_s23, %s22085_s23   ;;  %s14262_s22 = sphi %s14339_s22, %s22084_s22   ;;  %s14258_s21 = sphi %s14337_s21, %s22083_s21  }
   0x7   : > { %s14362_s27 = sadd.s32 1, %s14270_s24   ;;  %s289_s28 = sadd.s32 1, %s14266_s23 }
   0x8   : > { %s286_s29 = ssub.s32 %s14270_s24, %s14362_s27  ;;  %p299_p0 = scmp.ne.s32.totalorder %s14266_s23, %s14262_s22 }
   0x9   : > { %p287_p1 = scmp.eq.s32.totalorder %s286_s29, 0  ;;  %p300_p2 = scmp.eq.s32.totalorder %s14358_s25, 1 }
   0xa   : > { %p305_p3 = scmp.ne.s32.totalorder %s14262_s22, %s14258_s21  ;;  %p306_p4 = scmp.eq.s32.totalorder %s10200_s26, 1 }
   0xb   : > { %s14373_s30 = scalar_select %p287_p1, %s14266_s23, %s289_s28  }
   0xc   : > { %p14375_p5 = por %p300_p2, %p299_p0  ;;  %p14379_p6 = por %p306_p4, %p305_p3 }
   0xd   : > { %21375 = sst [smem:[#allocation5_spill]] %s14373_s30  ;;  %p10203_p7 = scmp.ge.s32.totalorder %s14270_s24, 1 }
   0xe   : > { %p365_p8 = scmp.lt.s32.totalorder %s14270_s24, 3 }
  0x10   : > { %p366_p9 = pnand %p10203_p7, %p365_p8 }
  0x12   : > { %369 = sbr.rel (%p366_p9) target bundleno = 4172 (0x104c), region = 68 }
  0x17   : > { %p407_p10 = scmp.lt.s32.totalorder %s14358_s25, 1  ;;  %s21378_s0 = sld [smem:[#allocation202_spill]]  ;;  %v10209_v14 = vld [vmem:[%s21295_s2] sm:$0xf]  ;;  %v13517_v15 = vld [vmem:[%s21295_s2 + $0x4] sm:$0xf0] }
  0x18   : > { %v13516_v16 = vld [vmem:[%s21295_s2 + $0x4] sm:$0xf]  ;;  %v10211_v19 = vld [vmem:[%s21295_s2 + $0x8] sm:$0xf0]  ;;  %v10210_v20 = vor.u32 %v13517_v15, %v10209_v14  ;;  %v10217_v22 = vld [vmem:[%s21295_s2 + $0x10] sm:$0xf] }
  0x19   : > { %s408_s15 = scalar_select %p407_p10, %s14358_s25, 1  ;;  %v10214_v21 = vor.u32 %v13516_v16, %v10211_v19  ;;  %v13519_v23 = vld [vmem:[%s21295_s2 + $0x14] sm:$0xf0]  ;;  %v13518_v24 = vld [vmem:[%s21295_s2 + $0x14] sm:$0xf]  ;;  %vm1960_vm0 = vcmask 785408  }
  0x1a   : > { %v10219_v25 = vld [vmem:[%s21295_s2 + $0x18] sm:$0xf0]  ;;  %v10218_v26 = vor.u32 %v13519_v23, %v10217_v22  ;;  %v10225_v28 = vld [vmem:[%s21295_s2 + $0x20] sm:$0xf]  ;;  %v13521_v29 = vld [vmem:[%s21295_s2 + $0x24] sm:$0xf0] }
  0x1b   : > { %s13499_s16 = sshll.u32 %s408_s15, 7  ;;  %v10222_v27 = vor.u32 %v13518_v24, %v10219_v25  ;;  %v13520_v30 = vld [vmem:[%s21295_s2 + $0x24] sm:$0xf]  ;;  %v10227_v31 = vld [vmem:[%s21295_s2 + $0x28] sm:$0xf0]  ;;  %v10226_v32 = vor.u32 %v13521_v29, %v10225_v28  ;;  %s21382_s1 = sld [smem:[#allocation203_spill]] }
  0x1c   : > { %v10230_v33 = vor.u32 %v13520_v30, %v10227_v31  ;;  %v10233_v34 = vld [vmem:[%s21295_s2 + $0x30] sm:$0xf]  ;;  %v13523_v35 = vld [vmem:[%s21295_s2 + $0x34] sm:$0xf0]  ;;  %v13522_v36 = vld [vmem:[%s21295_s2 + $0x34] sm:$0xf] }
  0x1d   : > { %s14390_s19 = scalar_lea.vmem %s21378_s0, %s13499_s16  ;;  %v10235_v37 = vld [vmem:[%s21295_s2 + $0x38] sm:$0xf0]  ;;  %v10234_v38 = vor.u32 %v13523_v35, %v10233_v34  ;;  %v10241_v40 = vld [vmem:[%s21295_s2 + $0x40] sm:$0xf]  ;;  %v13525_v41 = vld [vmem:[%s21295_s2 + $0x44] sm:$0xf0] }
  0x1e   : > { %v13507_v0 = vld [vmem:[%s14390_s19 + $0x38] sm:$0xff]  ;;  %v13506_v2 = vld [vmem:[%s14390_s19 + $0x30] sm:$0xff]  ;;  %v13505_v4 = vld [vmem:[%s14390_s19 + $0x28] sm:$0xff]  ;;  %v10238_v39 = vor.u32 %v13522_v36, %v10235_v37  ;;  %v10242_v44 = vor.u32 %v13525_v41, %v10241_v40  ;;  %vm7218_vm1 = vcmask 523264   ;;  %s404_s29 = sand.u32 1, %s14262_s22  }
  0x1f   : > { %v13515_v1 = vld [vmem:[%s14390_s19 + $0x78] sm:$0xff]  ;;  %1117 = vmatpush.bf16.msra.mxu0 %v13507_v0  ;;  %v13514_v3 = vld [vmem:[%s14390_s19 + $0x70] sm:$0xff]  ;;  %v13513_v5 = vld [vmem:[%s14390_s19 + $0x68] sm:$0xff]  ;;  %s10204_s15 = sshll.u32 %s404_s29, 3 }
  0x20   : > { %1366 = vmatpush.bf16.msra.mxu1 %v13515_v1  ;;  %v13504_v6 = vld [vmem:[%s14390_s19 + $0x20] sm:$0xff]  ;;  %v13503_v8 = vld [vmem:[%s14390_s19 + $0x18] sm:$0xff]  ;;  %v13502_v10 = vld [vmem:[%s14390_s19 + $0x10] sm:$0xff]  ;;  %s406_s18 = scalar_lea.vmem [#allocation2], %s10204_s15  ;;  %s14228_s15 = scalar_lea.hbm %s21305_s12, 16 }
  0x21   : > { %v13512_v7 = vld [vmem:[%s14390_s19 + $0x60] sm:$0xff]  ;;  %v13511_v9 = vld [vmem:[%s14390_s19 + $0x58] sm:$0xff]  ;;  %v13510_v11 = vld [vmem:[%s14390_s19 + $0x50] sm:$0xff]  ;;  %s10138_s20 = sshll.u32 %s406_s18, 4  ;;  %s10139_s20 = int_to_ptr.vmem [resolvable:$true] %s10138_s20 }
  0x22   : > { %v13501_v12 = vld [vmem:[%s14390_s19 + $0x8] sm:$0xff]  ;;  %v13500_v17 = vld [vmem:[%s14390_s19] sm:$0xff]  ;;  %v10249_v46 = vld [vmem:[%s21295_s2 + $0x50] sm:$0xf] }
  0x23   : > { %1118 = vmatpush.bf16.msra.mxu0 %v13506_v2  ;;  %v13509_v13 = vld [vmem:[%s14390_s19 + $0x48] sm:$0xff]  ;;  %v13508_v18 = vld [vmem:[%s14390_s19 + $0x40] sm:$0xff]  ;;  %v13527_v47 = vld [vmem:[%s21295_s2 + $0x54] sm:$0xf0] }
  0x24   : > { %1367 = vmatpush.bf16.msra.mxu1 %v13514_v3  ;;  %v13524_v42 = vld [vmem:[%s21295_s2 + $0x44] sm:$0xf]  ;;  %v10243_v43 = vld [vmem:[%s21295_s2 + $0x48] sm:$0xf0]  ;;  %v13526_v48 = vld [vmem:[%s21295_s2 + $0x54] sm:$0xf]  ;;  %v10250_v50 = vor.u32 %v13527_v47, %v10249_v46 }
  0x25   : > { %v10246_v45 = vor.u32 %v13524_v42, %v10243_v43  ;;  %v10251_v49 = vld [vmem:[%s21295_s2 + $0x58] sm:$0xf0]  ;;  %v10257_v52 = vld [vmem:[%s21295_s2 + $0x60] sm:$0xf]  ;;  %v13529_v53 = vld [vmem:[%s21295_s2 + $0x64] sm:$0xf0] }
  0x26   : > { %v10254_v51 = vor.u32 %v13526_v48, %v10251_v49  ;;  %v13528_v54 = vld [vmem:[%s21295_s2 + $0x64] sm:$0xf]  ;;  %v10259_v55 = vld [vmem:[%s21295_s2 + $0x68] sm:$0xf0]  ;;  %v10258_v56 = vor.u32 %v13529_v53, %v10257_v52  ;;  %v10265_v58 = vld [vmem:[%s21295_s2 + $0x70] sm:$0xf] }
  0x27   : > { %1119 = vmatpush.bf16.msra.mxu0 %v13505_v4  ;;  %v10262_v57 = vor.u32 %v13528_v54, %v10259_v55  ;;  %v13531_v59 = vld [vmem:[%s21295_s2 + $0x74] sm:$0xf0]  ;;  %v13530_v60 = vld [vmem:[%s21295_s2 + $0x74] sm:$0xf]  ;;  %v10267_v61 = vld [vmem:[%s21295_s2 + $0x78] sm:$0xf0] }
  0x28   : > { %1368 = vmatpush.bf16.msra.mxu1 %v13513_v5  ;;  %v10266_v62 = vor.u32 %v13531_v59, %v10265_v58  ;;  %v10270_v63 = vor.u32 %v13530_v60, %v10267_v61  ;;  %v10273_v0 = vld [vmem:[%s21295_s2 + $0x80] sm:$0xf]  ;;  %v13533_v1 = vld [vmem:[%s21295_s2 + $0x84] sm:$0xf0]  ;;  %v13532_v2 = vld [vmem:[%s21295_s2 + $0x84] sm:$0xf] }
  0x29   : > { %v10275_v3 = vld [vmem:[%s21295_s2 + $0x88] sm:$0xf0]  ;;  %v10274_v4 = vor.u32 %v13533_v1, %v10273_v0  ;;  %v10281_v14 = vld [vmem:[%s21295_s2 + $0x90] sm:$0xf]  ;;  %v13535_v15 = vld [vmem:[%s21295_s2 + $0x94] sm:$0xf0] }
  0x2a   : > { %v10278_v5 = vor.u32 %v13532_v2, %v10275_v3  ;;  %v13534_v16 = vld [vmem:[%s21295_s2 + $0x94] sm:$0xf]  ;;  %v10289_v31 = vld [vmem:[%s21295_s2 + $0xa0] sm:$0xf]  ;;  %v10291_v34 = vld [vmem:[%s21295_s2 + $0xa8] sm:$0xf0] }
  0x2b   : > { %1120 = vmatpush.bf16.msra.mxu0 %v13504_v6  ;;  %v10297_v48 = vld [vmem:[%s21295_s2 + $0xb0] sm:$0xf]  ;;  %v13539_v49 = vld [vmem:[%s21295_s2 + $0xb4] sm:$0xf0]  ;;  %v10305_v1 = vld [vmem:[%s21295_s2 + $0xc0] sm:$0xf] }
  0x2c   : > { %1369 = vmatpush.bf16.msra.mxu1 %v13512_v7  ;;  %v10298_v55 = vor.u32 %v13539_v49, %v10297_v48  ;;  %v13541_v2 = vld [vmem:[%s21295_s2 + $0xc4] sm:$0xf0]  ;;  %v13540_v3 = vld [vmem:[%s21295_s2 + $0xc4] sm:$0xf] }
  0x2f   : > { %1121 = vmatpush.bf16.msra.mxu0 %v13503_v8 }
  0x30   : > { %1370 = vmatpush.bf16.msra.mxu1 %v13511_v9 }
  0x33   : > { %1122 = vmatpush.bf16.msra.mxu0 %v13502_v10 }
  0x34   : > { %1371 = vmatpush.bf16.msra.mxu1 %v13510_v11 }
  0x37   : > { %1123 = vmatpush.bf16.msra.mxu0 %v13501_v12 }
  0x38   : > { %1372 = vmatpush.bf16.msra.mxu1 %v13509_v13 }
  0x3b   : > { %1124 = vmatpush.bf16.msra.mxu0 %v13500_v17  ;;  %v10283_v17 = vld [vmem:[%s21295_s2 + $0x98] sm:$0xf0] }
  0x3c   : > { %1373 = vmatpush.bf16.msra.mxu1 %v13508_v18  ;;  %v10286_v22 = vor.u32 %v13534_v16, %v10283_v17 }
  0x3e   : > { %1125 = vmatmul.bf16.vlgmr.msra.gmra.mxu0 %v10210_v20 }
  0x3f   : > { %1374 = vmatmul.bf16.vlgmr.msra.gmra.mxu1 %v10214_v21  ;;  %v10282_v21 = vor.u32 %v13535_v15, %v10281_v14 }
  0x4e   : > { %1130 = vmatmul.bf16.gmra.mxu0 %v10218_v26 }
  0x4f   : > { %1379 = vmatmul.bf16.gmra.mxu1 %v10222_v27 }
  0x5e   : > { %1135 = vmatmul.bf16.gmra.mxu0 %v10226_v32  ;;  %v13537_v32 = vld [vmem:[%s21295_s2 + $0xa4] sm:$0xf0] }
  0x5f   : > { %1384 = vmatmul.bf16.gmra.mxu1 %v10230_v33  ;;  %v13536_v33 = vld [vmem:[%s21295_s2 + $0xa4] sm:$0xf] }
  0x6e   : > { %1140 = vmatmul.bf16.gmra.mxu0 %v10234_v38  ;;  %v10290_v38 = vor.u32 %v13537_v32, %v10289_v31 }
  0x6f   : > { %1389 = vmatmul.bf16.gmra.mxu1 %v10238_v39  ;;  %v10294_v39 = vor.u32 %v13536_v33, %v10291_v34 }
  0x7e   : > { %1145 = vmatmul.bf16.gmra.mxu0 %v10242_v44 }
  0x7f   : > { %1394 = vmatmul.bf16.gmra.mxu1 %v10246_v45 }
  0x8e   : > { %1150 = vmatmul.bf16.gmra.mxu0 %v10250_v50  ;;  %v13538_v50 = vld [vmem:[%s21295_s2 + $0xb4] sm:$0xf] }
  0x8f   : > { %1399 = vmatmul.bf16.gmra.mxu1 %v10254_v51  ;;  %v10299_v51 = vld [vmem:[%s21295_s2 + $0xb8] sm:$0xf0] }
  0x9e   : > { %1155 = vmatmul.bf16.gmra.mxu0 %v10258_v56  ;;  %v10302_v56 = vor.u32 %v13538_v50, %v10299_v51 }
  0x9f   : > { %1404 = vmatmul.bf16.gmra.mxu1 %v10262_v57 }
  0xae   : > { %1160 = vmatmul.bf16.gmra.mxu0 %v10266_v62 }
  0xaf   : > { %1409 = vmatmul.bf16.gmra.mxu1 %v10270_v63 }
  0xbb   : > { %v1126_v6 = vpop.f32.mrf.mxu0 }
  0xbc   : > { %v1375_v7 = vpop.f32.mrf.mxu1 }
  0xbd   : > { %v1376_v8 = vadd.f32 %v1375_v7, %v1126_v6 }
  0xbe   : > { %1165 = vmatmul.bf16.gmra.mxu0 %v10274_v4  ;;  %v10307_v4 = vld [vmem:[%s21295_s2 + $0xc8] sm:$0xf0] }
  0xbf   : > { %1414 = vmatmul.bf16.gmra.mxu1 %v10278_v5  ;;  %v1615_v11 = vpack.c.bf16 %v1376_v8, %v1376_v8  ;;  %v10306_v8 = vor.u32 %v13541_v2, %v10305_v1 }
  0xc1   : > { %v2397_v18 = vunpack.c.l.b16 %v1615_v11 }
  0xc3   : > { %v1128_v9 = vpop.f32.mrf.mxu0 }
  0xc4   : > { %v1377_v10 = vpop.f32.mrf.mxu1 }
  0xc5   : > { %v1378_v12 = vadd.f32 %v1377_v10, %v1128_v9  ;;  %v10310_v9 = vor.u32 %v13540_v3, %v10307_v4 }
  0xc7   : > { %v1616_v13 = vpack.c.bf16 %v1378_v12, %v1378_v12 }
  0xc9   : > { %v2398_v19 = vunpack.c.l.b16 %v1616_v13 }
  0xcb   : > { %v14528_v20 = vpack.c.b16 %v2398_v19, %v2397_v18  ;;  %v1131_v23 = vpop.f32.mrf.mxu0  ;;  %v10313_v18 = vld [vmem:[%s21295_s2 + $0xd0] sm:$0xf]  ;;  %v13543_v19 = vld [vmem:[%s21295_s2 + $0xd4] sm:$0xf0] }
  0xcc   : > { %v1380_v24 = vpop.f32.mrf.mxu1 }
  0xcd   : > { %v1381_v25 = vadd.f32 %v1380_v24, %v1131_v23 }
  0xce   : > { %1170 = vmatmul.bf16.gmra.mxu0 %v10282_v21  ;;  %v13542_v21 = vld [vmem:[%s21295_s2 + $0xd4] sm:$0xf] }
  0xcf   : > { %1419 = vmatmul.bf16.gmra.mxu1 %v10286_v22  ;;  %v1617_v28 = vpack.c.bf16 %v1381_v25, %v1381_v25  ;;  %v10315_v22 = vld [vmem:[%s21295_s2 + $0xd8] sm:$0xf0] }
  0xd1   : > { %v2399_v35 = vunpack.c.l.b16 %v1617_v28 }
  0xd3   : > { %v1133_v26 = vpop.f32.mrf.mxu0 }
  0xd4   : > { %v1382_v27 = vpop.f32.mrf.mxu1 }
  0xd5   : > { %v1383_v29 = vadd.f32 %v1382_v27, %v1133_v26  ;;  %v10314_v26 = vor.u32 %v13543_v19, %v10313_v18  ;;  %v10318_v27 = vor.u32 %v13542_v21, %v10315_v22 }
  0xd7   : > { %v1618_v30 = vpack.c.bf16 %v1383_v29, %v1383_v29 }
  0xd9   : > { %v2400_v36 = vunpack.c.l.b16 %v1618_v30 }
  0xdb   : > { %v14542_v37 = vpack.c.b16 %v2400_v36, %v2399_v35  ;;  %v1136_v40 = vpop.f32.mrf.mxu0  ;;  %v10321_v36 = vld [vmem:[%s21295_s2 + $0xe0] sm:$0xf] }
  0xdc   : > { %v1385_v41 = vpop.f32.mrf.mxu1 }
  0xdd   : > { %v1386_v42 = vadd.f32 %v1385_v41, %v1136_v40  ;;  %v10323_v40 = vld [vmem:[%s21295_s2 + $0xe8] sm:$0xf0] }
  0xde   : > { %1175 = vmatmul.bf16.gmra.mxu0 %v10290_v38  ;;  %v13545_v38 = vld [vmem:[%s21295_s2 + $0xe4] sm:$0xf0] }
  0xdf   : > { %1424 = vmatmul.bf16.gmra.mxu1 %v10294_v39  ;;  %v1619_v45 = vpack.c.bf16 %v1386_v42, %v1386_v42  ;;  %v13544_v39 = vld [vmem:[%s21295_s2 + $0xe4] sm:$0xf] }
  0xe1   : > { %v2401_v52 = vunpack.c.l.b16 %v1619_v45  ;;  %v10326_v45 = vor.u32 %v13544_v39, %v10323_v40 }
  0xe3   : > { %v1138_v43 = vpop.f32.mrf.mxu0 }
  0xe4   : > { %v1387_v44 = vpop.f32.mrf.mxu1 }
  0xe5   : > { %v1388_v46 = vadd.f32 %v1387_v44, %v1138_v43  ;;  %v10322_v44 = vor.u32 %v13545_v38, %v10321_v36 }
  0xe7   : > { %v1620_v47 = vpack.c.bf16 %v1388_v46, %v1388_v46 }
  0xe9   : > { %v2402_v53 = vunpack.c.l.b16 %v1620_v47 }
  0xeb   : > { %v14556_v54 = vpack.c.b16 %v2402_v53, %v2401_v52  ;;  %v1141_v57 = vpop.f32.mrf.mxu0 }
  0xec   : > { %v1390_v58 = vpop.f32.mrf.mxu1 }
  0xed   : > { %v1391_v59 = vadd.f32 %v1390_v58, %v1141_v57  ;;  %v13546_v57 = vld [vmem:[%s21295_s2 + $0xf4] sm:$0xf]  ;;  %v10331_v58 = vld [vmem:[%s21295_s2 + $0xf8] sm:$0xf0] }
  0xee   : > { %1180 = vmatmul.bf16.gmra.mxu0 %v10298_v55  ;;  %v10329_v55 = vld [vmem:[%s21295_s2 + $0xf0] sm:$0xf] }
  0xef   : > { %1429 = vmatmul.bf16.gmra.mxu1 %v10302_v56  ;;  %v1621_v62 = vpack.c.bf16 %v1391_v59, %v1391_v59  ;;  %v13547_v56 = vld [vmem:[%s21295_s2 + $0xf4] sm:$0xf0] }
  0xf1   : > { %v2403_v5 = vunpack.c.l.b16 %v1621_v62  ;;  %v10330_v62 = vor.u32 %v13547_v56, %v10329_v55 }
  0xf3   : > { %v1143_v60 = vpop.f32.mrf.mxu0 }
  0xf4   : > { %v1392_v61 = vpop.f32.mrf.mxu1 }
  0xf5   : > { %v1393_v63 = vadd.f32 %v1392_v61, %v1143_v60 }
  0xf7   : > { %v1622_v0 = vpack.c.bf16 %v1393_v63, %v1393_v63  ;;  %v10334_v63 = vor.u32 %v13546_v57, %v10331_v58 }
  0xf9   : > { %v2404_v6 = vunpack.c.l.b16 %v1622_v0 }
  0xfb   : > { %v14570_v7 = vpack.c.b16 %v2404_v6, %v2403_v5  ;;  %v1146_v10 = vpop.f32.mrf.mxu0 }
  0xfc   : > { %v1395_v11 = vpop.f32.mrf.mxu1 }
  0xfd   : > { %v1396_v12 = vadd.f32 %v1395_v11, %v1146_v10  ;;  %v13549_v10 = vld [vmem:[%s21295_s2 + $0x104] sm:$0xf0]  ;;  %v13548_v11 = vld [vmem:[%s21295_s2 + $0x104] sm:$0xf] }
  0xfe   : > { %1185 = vmatmul.bf16.gmra.mxu0 %v10306_v8 }
  0xff   : > { %1434 = vmatmul.bf16.gmra.mxu1 %v10310_v9  ;;  %v1623_v15 = vpack.c.bf16 %v1396_v12, %v1396_v12  ;;  %v10337_v9 = vld [vmem:[%s21295_s2 + $0x100] sm:$0xf]  ;;  %v10339_v12 = vld [vmem:[%s21295_s2 + $0x108] sm:$0xf0] }
 0x101   : > { %v2405_v23 = vunpack.c.l.b16 %v1623_v15 }
 0x103   : > { %v1148_v13 = vpop.f32.mrf.mxu0 }
 0x104   : > { %v1397_v14 = vpop.f32.mrf.mxu1 }
 0x105   : > { %v1398_v16 = vadd.f32 %v1397_v14, %v1148_v13 }
 0x107   : > { %v1624_v17 = vpack.c.bf16 %v1398_v16, %v1398_v16  ;;  %v10338_v16 = vor.u32 %v13549_v10, %v10337_v9 }
 0x109   : > { %v2406_v24 = vunpack.c.l.b16 %v1624_v17  ;;  %v10342_v17 = vor.u32 %v13548_v11, %v10339_v12 }
 0x10b   : > { %v14584_v25 = vpack.c.b16 %v2406_v24, %v2405_v23  ;;  %v1151_v28 = vpop.f32.mrf.mxu0 }
 0x10c   : > { %v1400_v29 = vpop.f32.mrf.mxu1 }
 0x10d   : > { %v1401_v30 = vadd.f32 %v1400_v29, %v1151_v28  ;;  %v10345_v28 = vld [vmem:[%s21295_s2 + $0x110] sm:$0xf]  ;;  %v13551_v29 = vld [vmem:[%s21295_s2 + $0x114] sm:$0xf0] }
 0x10e   : > { %1190 = vmatmul.bf16.gmra.mxu0 %v10314_v26 }
 0x10f   : > { %1439 = vmatmul.bf16.gmra.mxu1 %v10318_v27  ;;  %v1625_v33 = vpack.c.bf16 %v1401_v30, %v1401_v30  ;;  %v13550_v30 = vld [vmem:[%s21295_s2 + $0x114] sm:$0xf] }
 0x111   : > { %v2407_v41 = vunpack.c.l.b16 %v1625_v33 }
 0x113   : > { %v1153_v31 = vpop.f32.mrf.mxu0 }
 0x114   : > { %v1402_v32 = vpop.f32.mrf.mxu1 }
 0x115   : > { %v1403_v34 = vadd.f32 %v1402_v32, %v1153_v31  ;;  %v10347_v31 = vld [vmem:[%s21295_s2 + $0x118] sm:$0xf0] }
 0x116   : > { %v10350_v36 = vor.u32 %v13550_v30, %v10347_v31 }
 0x117   : > { %v1626_v35 = vpack.c.bf16 %v1403_v34, %v1403_v34 }
 0x119   : > { %v2408_v42 = vunpack.c.l.b16 %v1626_v35  ;;  %v10346_v35 = vor.u32 %v13551_v29, %v10345_v28 }
 0x11b   : > { %v14598_v43 = vpack.c.b16 %v2408_v42, %v2407_v41  ;;  %v1156_v46 = vpop.f32.mrf.mxu0 }
 0x11c   : > { %v1405_v47 = vpop.f32.mrf.mxu1 }
 0x11d   : > { %v1406_v48 = vadd.f32 %v1405_v47, %v1156_v46  ;;  %v10353_v47 = vld [vmem:[%s21295_s2 + $0x120] sm:$0xf] }
 0x11e   : > { %1195 = vmatmul.bf16.gmra.mxu0 %v10322_v44 }
 0x11f   : > { %1444 = vmatmul.bf16.gmra.mxu1 %v10326_v45  ;;  %v1627_v51 = vpack.c.bf16 %v1406_v48, %v1406_v48  ;;  %v13553_v48 = vld [vmem:[%s21295_s2 + $0x124] sm:$0xf0] }
 0x120   : > { %v10354_v55 = vor.u32 %v13553_v48, %v10353_v47 }
 0x121   : > { %v2409_v59 = vunpack.c.l.b16 %v1627_v51 }
 0x123   : > { %v1158_v49 = vpop.f32.mrf.mxu0 }
 0x124   : > { %v1407_v50 = vpop.f32.mrf.mxu1 }
 0x125   : > { %v1408_v52 = vadd.f32 %v1407_v50, %v1158_v49  ;;  %v13552_v49 = vld [vmem:[%s21295_s2 + $0x124] sm:$0xf]  ;;  %v10355_v50 = vld [vmem:[%s21295_s2 + $0x128] sm:$0xf0] }
 0x126   : > { %v10358_v56 = vor.u32 %v13552_v49, %v10355_v50 }
 0x127   : > { %v1628_v53 = vpack.c.bf16 %v1408_v52, %v1408_v52 }
 0x129   : > { %v2410_v60 = vunpack.c.l.b16 %v1628_v53 }
 0x12b   : > { %v14612_v61 = vpack.c.b16 %v2410_v60, %v2409_v59  ;;  %v1161_v0 = vpop.f32.mrf.mxu0 }
 0x12c   : > { %v1410_v1 = vpop.f32.mrf.mxu1 }
 0x12d   : > { %v1411_v2 = vadd.f32 %v1410_v1, %v1161_v0 }
 0x12e   : > { %1200 = vmatmul.bf16.gmra.mxu0 %v10330_v62 }
 0x12f   : > { %1449 = vmatmul.bf16.gmra.mxu1 %v10334_v63  ;;  %v1629_v5 = vpack.c.bf16 %v1411_v2, %v1411_v2  ;;  %v10361_v2 = vld [vmem:[%s21295_s2 + $0x130] sm:$0xf] }
 0x131   : > { %v2411_v13 = vunpack.c.l.b16 %v1629_v5  ;;  %v10363_v5 = vld [vmem:[%s21295_s2 + $0x138] sm:$0xf0] }
 0x133   : > { %v1163_v3 = vpop.f32.mrf.mxu0 }
 0x134   : > { %v1412_v4 = vpop.f32.mrf.mxu1 }
 0x135   : > { %v1413_v6 = vadd.f32 %v1412_v4, %v1163_v3  ;;  %v13555_v3 = vld [vmem:[%s21295_s2 + $0x134] sm:$0xf0]  ;;  %v13554_v4 = vld [vmem:[%s21295_s2 + $0x134] sm:$0xf] }
 0x136   : > { %v10362_v10 = vor.u32 %v13555_v3, %v10361_v2  ;;  %v10366_v11 = vor.u32 %v13554_v4, %v10363_v5  ;;  %v10385_v4 = vld [vmem:[%s21295_s2 + $0x160] sm:$0xf]  ;;  %v13561_v5 = vld [vmem:[%s21295_s2 + $0x164] sm:$0xf0] }
 0x137   : > { %v1630_v8 = vpack.c.bf16 %v1413_v6, %v1413_v6 }
 0x139   : > { %v2412_v14 = vunpack.c.l.b16 %v1630_v8 }
 0x13b   : > { %v14626_v15 = vpack.c.b16 %v2412_v14, %v2411_v13  ;;  %v1166_v18 = vpop.f32.mrf.mxu0 }
 0x13c   : > { %v1415_v19 = vpop.f32.mrf.mxu1 }
 0x13d   : > { %21379 = vst [vmem:[#allocation6_spill] sm:$0xff] %v14626_v15  ;;  %v1416_v21 = vadd.f32 %v1415_v19, %v1166_v18 }
 0x13e   : > { %1205 = vmatmul.bf16.gmra.mxu0 %v10338_v16 }
 0x13f   : > { %1454 = vmatmul.bf16.gmra.mxu1 %v10342_v17  ;;  %v1631_v24 = vpack.c.bf16 %v1416_v21, %v1416_v21 }
 0x141   : > { %v2413_v32 = vunpack.c.l.b16 %v1631_v24  ;;  %v13556_v24 = vld [vmem:[%s21295_s2 + $0x144] sm:$0xf] }
 0x143   : > { %v1168_v22 = vpop.f32.mrf.mxu0 }
 0x144   : > { %v1417_v23 = vpop.f32.mrf.mxu1 }
 0x145   : > { %v1418_v26 = vadd.f32 %v1417_v23, %v1168_v22  ;;  %v10369_v22 = vld [vmem:[%s21295_s2 + $0x140] sm:$0xf]  ;;  %v13557_v23 = vld [vmem:[%s21295_s2 + $0x144] sm:$0xf0] }
 0x146   : > { %v10370_v30 = vor.u32 %v13557_v23, %v10369_v22  ;;  %v10386_v22 = vor.u32 %v13561_v5, %v10385_v4 }
 0x147   : > { %v1632_v27 = vpack.c.bf16 %v1418_v26, %v1418_v26  ;;  %v10371_v26 = vld [vmem:[%s21295_s2 + $0x148] sm:$0xf0] }
 0x148   : > { %v10374_v31 = vor.u32 %v13556_v24, %v10371_v26  ;;  %v10729_v24 = vld [vmem:[%s21382_s1 + $0x120] sm:$0xf]  ;;  %v13650_v26 = vld [vmem:[%s21382_s1 + $0x12c] sm:$0xf0] }
 0x149   : > { %v2414_v33 = vunpack.c.l.b16 %v1632_v27 }
 0x14b   : > { %v14640_v34 = vpack.c.b16 %v2414_v33, %v2413_v32  ;;  %v1171_v38 = vpop.f32.mrf.mxu0 }
 0x14c   : > { %v1420_v39 = vpop.f32.mrf.mxu1 }
 0x14d   : > { %v1421_v40 = vadd.f32 %v1420_v39, %v1171_v38 }
 0x14e   : > { %1210 = vmatmul.bf16.gmra.mxu0 %v10346_v35 }
 0x14f   : > { %1459 = vmatmul.bf16.gmra.mxu1 %v10350_v36  ;;  %v1633_v44 = vpack.c.bf16 %v1421_v40, %v1421_v40 }
 0x151   : > { %v2415_v51 = vunpack.c.l.b16 %v1633_v44  ;;  %v13559_v44 = vld [vmem:[%s21295_s2 + $0x154] sm:$0xf0] }
 0x153   : > { %v1173_v41 = vpop.f32.mrf.mxu0 }
 0x154   : > { %v1422_v42 = vpop.f32.mrf.mxu1 }
 0x155   : > { %v1423_v45 = vadd.f32 %v1422_v42, %v1173_v41  ;;  %v10377_v42 = vld [vmem:[%s21295_s2 + $0x150] sm:$0xf] }
 0x156   : > { %v10378_v50 = vor.u32 %v13559_v44, %v10377_v42  ;;  %v10697_v44 = vld [vmem:[%s21382_s1 + $0xe0] sm:$0xf] }
 0x157   : > { %v1634_v46 = vpack.c.bf16 %v1423_v45, %v1423_v45  ;;  %v13558_v45 = vld [vmem:[%s21295_s2 + $0x154] sm:$0xf] }
 0x159   : > { %v2416_v52 = vunpack.c.l.b16 %v1634_v46  ;;  %v10379_v46 = vld [vmem:[%s21295_s2 + $0x158] sm:$0xf0] }
 0x15b   : > { %v14654_v53 = vpack.c.b16 %v2416_v52, %v2415_v51  ;;  %v1176_v57 = vpop.f32.mrf.mxu0  ;;  %v10382_v51 = vor.u32 %v13558_v45, %v10379_v46  ;;  %v13642_v45 = vld [vmem:[%s21382_s1 + $0xec] sm:$0xf0]  ;;  %v13640_v46 = vld [vmem:[%s21382_s1 + $0xe4] sm:$0xf] }
 0x15c   : > { %v1425_v58 = vpop.f32.mrf.mxu1 }
 0x15d   : > { %v1426_v59 = vadd.f32 %v1425_v58, %v1176_v57  ;;  %v10761_v57 = vld [vmem:[%s21382_s1 + $0x160] sm:$0xf]  ;;  %v13658_v58 = vld [vmem:[%s21382_s1 + $0x16c] sm:$0xf0] }
 0x15e   : > { %1215 = vmatmul.bf16.gmra.mxu0 %v10354_v55 }
 0x15f   : > { %1464 = vmatmul.bf16.gmra.mxu1 %v10358_v56  ;;  %v1635_v63 = vpack.c.bf16 %v1426_v59, %v1426_v59  ;;  %v13656_v59 = vld [vmem:[%s21382_s1 + $0x164] sm:$0xf] }
 0x161   : > { %v2417_v6 = vunpack.c.l.b16 %v1635_v63  ;;  %v10762_v63 = vor.u32 %v13658_v58, %v10761_v57  ;;  %v10393_v57 = vld [vmem:[%s21295_s2 + $0x170] sm:$0xf]  ;;  %v13563_v58 = vld [vmem:[%s21295_s2 + $0x174] sm:$0xf0] }
 0x163   : > { %v1178_v60 = vpop.f32.mrf.mxu0  ;;  %2011 = vmatpush.bf16.msra.mxu2 %v10762_v63  ;;  %v13636_v63 = vld [vmem:[%s21382_s1 + $0xc4] sm:$0xf] }
 0x164   : > { %v1427_v62 = vpop.f32.mrf.mxu1 }
 0x165   : > { %v1428_v0 = vadd.f32 %v1427_v62, %v1178_v60 }
 0x167   : > { %v1636_v1 = vpack.c.bf16 %v1428_v0, %v1428_v0  ;;  %v10763_v0 = vld [vmem:[%s21382_s1 + $0x170] sm:$0xf0] }
 0x168   : > { %v10766_v3 = vor.u32 %v13656_v59, %v10763_v0  ;;  %v13562_v0 = vld [vmem:[%s21295_s2 + $0x174] sm:$0xf] }
 0x169   : > { %v2418_v8 = vunpack.c.l.b16 %v1636_v1 }
 0x16a   : > { %2100 = vmatpush.bf16.msra.mxu3 %v10766_v3  ;;  %v10683_v3 = vld [vmem:[%s21382_s1 + $0xd0] sm:$0xf0] }
 0x16b   : > { %v14668_v9 = vpack.c.b16 %v2418_v8, %v2417_v6  ;;  %v1181_v12 = vpop.f32.mrf.mxu0  ;;  %v10745_v8 = vld [vmem:[%s21382_s1 + $0x140] sm:$0xf] }
 0x16c   : > { %v1430_v13 = vpop.f32.mrf.mxu1 }
 0x16d   : > { %v1431_v14 = vadd.f32 %v1430_v13, %v1181_v12  ;;  %v13560_v12 = vld [vmem:[%s21295_s2 + $0x164] sm:$0xf]  ;;  %v10387_v13 = vld [vmem:[%s21295_s2 + $0x168] sm:$0xf0] }
 0x16e   : > { %1220 = vmatmul.bf16.gmra.mxu0 %v10362_v10  ;;  %v13654_v10 = vld [vmem:[%s21382_s1 + $0x14c] sm:$0xf0]  ;;  %v10390_v23 = vor.u32 %v13560_v12, %v10387_v13 }
 0x16f   : > { %1469 = vmatmul.bf16.gmra.mxu1 %v10366_v11  ;;  %v1637_v18 = vpack.c.bf16 %v1431_v14, %v1431_v14  ;;  %v13652_v11 = vld [vmem:[%s21382_s1 + $0x144] sm:$0xf]  ;;  %v10746_v14 = vor.u32 %v13654_v10, %v10745_v8  ;;  %v10394_v10 = vor.u32 %v13563_v58, %v10393_v57 }
 0x171   : > { %v2419_v27 = vunpack.c.l.b16 %v1637_v18  ;;  %2012 = vmatpush.bf16.msra.mxu2 %v10746_v14 }
 0x173   : > { %v1183_v16 = vpop.f32.mrf.mxu0 }
 0x174   : > { %v1432_v17 = vpop.f32.mrf.mxu1 }
 0x175   : > { %v1433_v19 = vadd.f32 %v1432_v17, %v1183_v16  ;;  %v10747_v16 = vld [vmem:[%s21382_s1 + $0x150] sm:$0xf0] }
 0x177   : > { %v1638_v21 = vpack.c.bf16 %v1433_v19, %v1433_v19  ;;  %v10750_v19 = vor.u32 %v13652_v11, %v10747_v16 }
 0x179   : > { %v2420_v28 = vunpack.c.l.b16 %v1638_v21  ;;  %2101 = vmatpush.bf16.msra.mxu3 %v10750_v19 }
 0x17b   : > { %v14682_v29 = vpack.c.b16 %v2420_v28, %v2419_v27  ;;  %v1186_v32 = vpop.f32.mrf.mxu0  ;;  %v13648_v27 = vld [vmem:[%s21382_s1 + $0x124] sm:$0xf] }
 0x17c   : > { %v1435_v33 = vpop.f32.mrf.mxu1 }
 0x17d   : > { %21380 = vst [vmem:[#allocation7_spill] sm:$0xff] %v14682_v29  ;;  %v1436_v35 = vadd.f32 %v1435_v33, %v1186_v32  ;;  %v10731_v32 = vld [vmem:[%s21382_s1 + $0x130] sm:$0xf0] }
 0x17e   : > { %1225 = vmatmul.bf16.gmra.mxu0 %v10370_v30 }
 0x17f   : > { %1474 = vmatmul.bf16.gmra.mxu1 %v10374_v31  ;;  %v1639_v39 = vpack.c.bf16 %v1436_v35, %v1436_v35  ;;  %v10730_v31 = vor.u32 %v13650_v26, %v10729_v24  ;;  %v10734_v35 = vor.u32 %v13648_v27, %v10731_v32  ;;  %v13565_v24 = vld [vmem:[%s21295_s2 + $0x184] sm:$0xf0]  ;;  %v13564_v26 = vld [vmem:[%s21295_s2 + $0x184] sm:$0xf]  ;;  %v10403_v27 = vld [vmem:[%s21295_s2 + $0x188] sm:$0xf0] }
 0x181   : > { %v2421_v47 = vunpack.c.l.b16 %v1639_v39  ;;  %2013 = vmatpush.bf16.msra.mxu2 %v10730_v31  ;;  %v13644_v39 = vld [vmem:[%s21382_s1 + $0x104] sm:$0xf]  ;;  %2102 = vmatpush.bf16.msra.mxu3 %v10734_v35 }
 0x183   : > { %v1188_v36 = vpop.f32.mrf.mxu0 }
 0x184   : > { %v1437_v38 = vpop.f32.mrf.mxu1 }
 0x185   : > { %v1438_v40 = vadd.f32 %v1437_v38, %v1188_v36  ;;  %v10713_v36 = vld [vmem:[%s21382_s1 + $0x100] sm:$0xf]  ;;  %v13646_v38 = vld [vmem:[%s21382_s1 + $0x10c] sm:$0xf0] }
 0x187   : > { %v1640_v41 = vpack.c.bf16 %v1438_v40, %v1438_v40  ;;  %v10714_v40 = vor.u32 %v13646_v38, %v10713_v36 }
 0x189   : > { %v2422_v48 = vunpack.c.l.b16 %v1640_v41  ;;  %v10715_v41 = vld [vmem:[%s21382_s1 + $0x110] sm:$0xf0]  ;;  %2014 = vmatpush.bf16.msra.mxu2 %v10714_v40 }
 0x18a   : > { %v10718_v42 = vor.u32 %v13644_v39, %v10715_v41 }
 0x18b   : > { %v14696_v49 = vpack.c.b16 %v2422_v48, %v2421_v47  ;;  %v1191_v52 = vpop.f32.mrf.mxu0 }
 0x18c   : > { %v1440_v55 = vpop.f32.mrf.mxu1  ;;  %2103 = vmatpush.bf16.msra.mxu3 %v10718_v42 }
 0x18d   : > { %21381 = vst [vmem:[#allocation8_spill] sm:$0xff] %v14696_v49  ;;  %v1441_v56 = vadd.f32 %v1440_v55, %v1191_v52  ;;  %v10905_v49 = vld [vmem:[%s21382_s1 + $0x80] sm:$0xf] }
 0x18e   : > { %1230 = vmatmul.bf16.gmra.mxu0 %v10378_v50  ;;  %v10698_v50 = vor.u32 %v13642_v45, %v10697_v44  ;;  %v10409_v45 = vld [vmem:[%s21295_s2 + $0x190] sm:$0xf] }
 0x18f   : > { %1479 = vmatmul.bf16.gmra.mxu1 %v10382_v51  ;;  %v1641_v1 = vpack.c.bf16 %v1441_v56, %v1441_v56  ;;  %v10699_v51 = vld [vmem:[%s21382_s1 + $0xf0] sm:$0xf0] }
 0x190   : > { %v10702_v56 = vor.u32 %v13640_v46, %v10699_v51  ;;  %2015 = vmatpush.bf16.msra.mxu2 %v10698_v50  ;;  %v13567_v46 = vld [vmem:[%s21295_s2 + $0x194] sm:$0xf0] }
 0x191   : > { %v2423_v17 = vunpack.c.l.b16 %v1641_v1  ;;  %v10395_v1 = vld [vmem:[%s21295_s2 + $0x178] sm:$0xf0] }
 0x192   : > { %2104 = vmatpush.bf16.msra.mxu3 %v10702_v56  ;;  %v10398_v11 = vor.u32 %v13562_v0, %v10395_v1 }
 0x193   : > { %v1193_v60 = vpop.f32.mrf.mxu0 }
 0x194   : > { %v1442_v62 = vpop.f32.mrf.mxu1 }
 0x195   : > { %v1443_v2 = vadd.f32 %v1442_v62, %v1193_v60  ;;  %v10681_v60 = vld [vmem:[%s21382_s1 + $0xc0] sm:$0xf]  ;;  %v13638_v62 = vld [vmem:[%s21382_s1 + $0xcc] sm:$0xf0] }
 0x197   : > { %v1642_v6 = vpack.c.bf16 %v1443_v2, %v1443_v2  ;;  %v10682_v2 = vor.u32 %v13638_v62, %v10681_v60 }
 0x199   : > { %v2424_v18 = vunpack.c.l.b16 %v1642_v6  ;;  %v10686_v6 = vor.u32 %v13636_v63, %v10683_v3  ;;  %2016 = vmatpush.bf16.msra.mxu2 %v10682_v2  ;;  %v10417_v2 = vld [vmem:[%s21295_s2 + $0x1a0] sm:$0xf]  ;;  %v13569_v3 = vld [vmem:[%s21295_s2 + $0x1a4] sm:$0xf0] }
 0x19b   : > { %v14734_v21 = vpack.c.b16 %v2424_v18, %v2423_v17  ;;  %v1196_v28 = vpop.f32.mrf.mxu0  ;;  %2105 = vmatpush.bf16.msra.mxu3 %v10686_v6 }
 0x19c   : > { %v1445_v30 = vpop.f32.mrf.mxu1 }
 0x19d   : > { %21383 = vst [vmem:[#allocation9_spill] sm:$0xff] %v14734_v21  ;;  %v1446_v33 = vadd.f32 %v1445_v30, %v1196_v28 }
 0x19e   : > { %1235 = vmatmul.bf16.gmra.mxu0 %v10386_v22 }
 0x19f   : > { %1484 = vmatmul.bf16.gmra.mxu1 %v10390_v23  ;;  %v1643_v52 = vpack.c.bf16 %v1446_v33, %v1446_v33  ;;  %v10401_v23 = vld [vmem:[%s21295_s2 + $0x180] sm:$0xf]  ;;  %v10406_v33 = vor.u32 %v13564_v26, %v10403_v27  ;;  %v10425_v26 = vld [vmem:[%s21295_s2 + $0x1b0] sm:$0xf]  ;;  %v13571_v27 = vld [vmem:[%s21295_s2 + $0x1b4] sm:$0xf0] }
 0x1a0   : > { %v10402_v32 = vor.u32 %v13565_v24, %v10401_v23 }
 0x1a1   : > { %v2425_v4 = vunpack.c.l.b16 %v1643_v52 }
 0x1a3   : > { %v1198_v47 = vpop.f32.mrf.mxu0 }
 0x1a4   : > { %v1447_v48 = vpop.f32.mrf.mxu1 }
 0x1a5   : > { %v1448_v55 = vadd.f32 %v1447_v48, %v1198_v47  ;;  %v13566_v47 = vld [vmem:[%s21295_s2 + $0x194] sm:$0xf]  ;;  %v10411_v48 = vld [vmem:[%s21295_s2 + $0x198] sm:$0xf0] }
 0x1a6   : > { %v10414_v56 = vor.u32 %v13566_v47, %v10411_v48  ;;  %v10433_v48 = vld [vmem:[%s21295_s2 + $0x1c0] sm:$0xf] }
 0x1a7   : > { %v1644_v59 = vpack.c.bf16 %v1448_v55, %v1448_v55  ;;  %v10410_v55 = vor.u32 %v13567_v46, %v10409_v45 }
 0x1a9   : > { %v2426_v5 = vunpack.c.l.b16 %v1644_v59 }
 0x1ab   : > { %v14796_v8 = vpack.c.b16 %v2426_v5, %v2425_v4  ;;  %v1201_v12 = vpop.f32.mrf.mxu0  ;;  %v13568_v4 = vld [vmem:[%s21295_s2 + $0x1a4] sm:$0xf]  ;;  %v10419_v5 = vld [vmem:[%s21295_s2 + $0x1a8] sm:$0xf0] }
 0x1ac   : > { %v1450_v13 = vpop.f32.mrf.mxu1 }
 0x1ad   : > { %21384 = vst [vmem:[#allocation10_spill] sm:$0xff] %v14796_v8  ;;  %v1451_v14 = vadd.f32 %v1450_v13, %v1201_v12  ;;  %v10418_v12 = vor.u32 %v13569_v3, %v10417_v2  ;;  %v10422_v13 = vor.u32 %v13568_v4, %v10419_v5 }
 0x1ae   : > { %1240 = vmatmul.bf16.gmra.mxu0 %v10394_v10 }
 0x1af   : > { %1489 = vmatmul.bf16.gmra.mxu1 %v10398_v11  ;;  %v1645_v18 = vpack.c.bf16 %v1451_v14, %v1451_v14 }
 0x1b1   : > { %v2427_v28 = vunpack.c.l.b16 %v1645_v18 }
 0x1b3   : > { %v1203_v16 = vpop.f32.mrf.mxu0 }
 0x1b4   : > { %v1452_v17 = vpop.f32.mrf.mxu1 }
 0x1b5   : > { %v1453_v19 = vadd.f32 %v1452_v17, %v1203_v16 }
 0x1b7   : > { %v1646_v22 = vpack.c.bf16 %v1453_v19, %v1453_v19 }
 0x1b9   : > { %v2428_v30 = vunpack.c.l.b16 %v1646_v22 }
 0x1bb   : > { %v14810_v31 = vpack.c.b16 %v2428_v30, %v2427_v28  ;;  %v1206_v35 = vpop.f32.mrf.mxu0  ;;  %v13570_v28 = vld [vmem:[%s21295_s2 + $0x1b4] sm:$0xf]  ;;  %v10427_v30 = vld [vmem:[%s21295_s2 + $0x1b8] sm:$0xf0] }
 0x1bc   : > { %v1455_v36 = vpop.f32.mrf.mxu1 }
 0x1bd   : > { %21385 = vst [vmem:[#allocation11_spill] sm:$0xff] %v14810_v31  ;;  %v1456_v38 = vadd.f32 %v1455_v36, %v1206_v35  ;;  %v10426_v36 = vor.u32 %v13571_v27, %v10425_v26 }
 0x1be   : > { %1245 = vmatmul.bf16.gmra.mxu0 %v10402_v32 }
 0x1bf   : > { %1494 = vmatmul.bf16.gmra.mxu1 %v10406_v33  ;;  %v1647_v41 = vpack.c.bf16 %v1456_v38, %v1456_v38  ;;  %v10430_v38 = vor.u32 %v13570_v28, %v10427_v30 }
 0x1c1   : > { %v1792_v50 = vunpack.c.l.b16 %v1647_v41 }
 0x1c3   : > { %v1208_v39 = vpop.f32.mrf.mxu0 }
 0x1c4   : > { %v1457_v40 = vpop.f32.mrf.mxu1 }
 0x1c5   : > { %v1458_v42 = vadd.f32 %v1457_v40, %v1208_v39 }
 0x1c7   : > { %v1648_v44 = vpack.c.bf16 %v1458_v42, %v1458_v42 }
 0x1c9   : > { %v1793_v51 = vunpack.c.l.b16 %v1648_v44 }
 0x1cb   : > { %v14824_v52 = vpack.c.b16 %v1793_v51, %v1792_v50  ;;  %v1211_v57 = vpop.f32.mrf.mxu0  ;;  %v13573_v50 = vld [vmem:[%s21295_s2 + $0x1c4] sm:$0xf0]  ;;  %v13572_v51 = vld [vmem:[%s21295_s2 + $0x1c4] sm:$0xf] }
 0x1cc   : > { %v1460_v58 = vpop.f32.mrf.mxu1 }
 0x1cd   : > { %10775 = vmatmul.msk.bf16.vlgmr.msra.gmra.mxu2 %vm1960_vm0, %v14824_v52  ;;  %10791 = vmatmul.msk.bf16.vlgmr.msra.gmra.mxu3 %vm1960_vm0, %v14824_v52  ;;  %v1461_v59 = vadd.f32 %v1460_v58, %v1211_v57 }
 0x1ce   : > { %1250 = vmatmul.bf16.gmra.mxu0 %v10410_v55  ;;  %v10435_v55 = vld [vmem:[%s21295_s2 + $0x1c8] sm:$0xf0] }
 0x1cf   : > { %1499 = vmatmul.bf16.gmra.mxu1 %v10414_v56  ;;  %v1649_v63 = vpack.c.bf16 %v1461_v59, %v1461_v59  ;;  %v10434_v59 = vor.u32 %v13573_v50, %v10433_v48 }
 0x1d1   : > { %v1794_v6 = vunpack.c.l.b16 %v1649_v63 }
 0x1d3   : > { %v1213_v60 = vpop.f32.mrf.mxu0 }
 0x1d4   : > { %v1462_v62 = vpop.f32.mrf.mxu1 }
 0x1d5   : > { %v1463_v0 = vadd.f32 %v1462_v62, %v1213_v60  ;;  %v10438_v60 = vor.u32 %v13572_v51, %v10435_v55 }
 0x1d7   : > { %v1650_v1 = vpack.c.bf16 %v1463_v0, %v1463_v0 }
 0x1d9   : > { %v1795_v10 = vunpack.c.l.b16 %v1650_v1 }
 0x1db   : > { %v14842_v11 = vpack.c.b16 %v1795_v10, %v1794_v6  ;;  %v1216_v14 = vpop.f32.mrf.mxu0  ;;  %v10441_v6 = vld [vmem:[%s21295_s2 + $0x1d0] sm:$0xf]  ;;  %v13575_v10 = vld [vmem:[%s21295_s2 + $0x1d4] sm:$0xf0] }
 0x1dc   : > { %v1465_v16 = vpop.f32.mrf.mxu1 }
 0x1dd   : > { %10776 = vmatmul.msk.bf16.gmra.mxu2 %vm1960_vm0, %v14842_v11  ;;  %10792 = vmatmul.msk.bf16.gmra.mxu3 %vm1960_vm0, %v14842_v11  ;;  %v1466_v17 = vadd.f32 %v1465_v16, %v1216_v14 }
 0x1de   : > { %1255 = vmatmul.bf16.gmra.mxu0 %v10418_v12  ;;  %v13574_v12 = vld [vmem:[%s21295_s2 + $0x1d4] sm:$0xf] }
 0x1df   : > { %1504 = vmatmul.bf16.gmra.mxu1 %v10422_v13  ;;  %v1651_v22 = vpack.c.bf16 %v1466_v17, %v1466_v17  ;;  %v10443_v13 = vld [vmem:[%s21295_s2 + $0x1d8] sm:$0xf0] }
 0x1e1   : > { %v1796_v32 = vunpack.c.l.b16 %v1651_v22 }
 0x1e3   : > { %v1218_v18 = vpop.f32.mrf.mxu0 }
 0x1e4   : > { %v1467_v19 = vpop.f32.mrf.mxu1 }
 0x1e5   : > { %v1468_v23 = vadd.f32 %v1467_v19, %v1218_v18  ;;  %v10442_v18 = vor.u32 %v13575_v10, %v10441_v6  ;;  %v10446_v19 = vor.u32 %v13574_v12, %v10443_v13 }
 0x1e7   : > { %v1652_v24 = vpack.c.bf16 %v1468_v23, %v1468_v23 }
 0x1e9   : > { %v1797_v33 = vunpack.c.l.b16 %v1652_v24 }
 0x1eb   : > { %v14860_v35 = vpack.c.b16 %v1797_v33, %v1796_v32  ;;  %v1221_v39 = vpop.f32.mrf.mxu0  ;;  %v10449_v33 = vld [vmem:[%s21295_s2 + $0x1e0] sm:$0xf] }
 0x1ec   : > { %v1470_v40 = vpop.f32.mrf.mxu1 }
 0x1ed   : > { %10777 = vmatmul.msk.bf16.gmra.mxu2 %vm1960_vm0, %v14860_v35  ;;  %10793 = vmatmul.msk.bf16.gmra.mxu3 %vm1960_vm0, %v14860_v35  ;;  %v1471_v41 = vadd.f32 %v1470_v40, %v1221_v39  ;;  %v10451_v39 = vld [vmem:[%s21295_s2 + $0x1e8] sm:$0xf0] }
 0x1ee   : > { %1260 = vmatmul.bf16.gmra.mxu0 %v10426_v36  ;;  %v13577_v36 = vld [vmem:[%s21295_s2 + $0x1e4] sm:$0xf0] }
 0x1ef   : > { %1509 = vmatmul.bf16.gmra.mxu1 %v10430_v38  ;;  %v1653_v45 = vpack.c.bf16 %v1471_v41, %v1471_v41  ;;  %v13576_v38 = vld [vmem:[%s21295_s2 + $0x1e4] sm:$0xf] }
 0x1f1   : > { %v1798_v56 = vunpack.c.l.b16 %v1653_v45  ;;  %v10454_v45 = vor.u32 %v13576_v38, %v10451_v39 }
 0x1f3   : > { %v1223_v42 = vpop.f32.mrf.mxu0 }
 0x1f4   : > { %v1472_v44 = vpop.f32.mrf.mxu1 }
 0x1f5   : > { %v1473_v46 = vadd.f32 %v1472_v44, %v1223_v42  ;;  %v10450_v44 = vor.u32 %v13577_v36, %v10449_v33 }
 0x1f7   : > { %v1654_v47 = vpack.c.bf16 %v1473_v46, %v1473_v46 }
 0x1f9   : > { %v1799_v57 = vunpack.c.l.b16 %v1654_v47 }
 0x1fb   : > { %v14878_v58 = vpack.c.b16 %v1799_v57, %v1798_v56  ;;  %v1226_v62 = vpop.f32.mrf.mxu0 }
 0x1fc   : > { %v1475_v63 = vpop.f32.mrf.mxu1 }
 0x1fd   : > { %10778 = vmatmul.msk.bf16.gmra.mxu2 %vm1960_vm0, %v14878_v58  ;;  %10794 = vmatmul.msk.bf16.gmra.mxu3 %vm1960_vm0, %v14878_v58  ;;  %v1476_v0 = vadd.f32 %v1475_v63, %v1226_v62  ;;  %v13578_v62 = vld [vmem:[%s21295_s2 + $0x1f4] sm:$0xf]  ;;  %v10459_v63 = vld [vmem:[%s21295_s2 + $0x1f8] sm:$0xf0] }
 0x1fe   : > { %1265 = vmatmul.bf16.gmra.mxu0 %v10434_v59  ;;  %v10457_v59 = vld [vmem:[%s21295_s2 + $0x1f0] sm:$0xf] }
 0x1ff   : > { %1514 = vmatmul.bf16.gmra.mxu1 %v10438_v60  ;;  %v1655_v3 = vpack.c.bf16 %v1476_v0, %v1476_v0  ;;  %v13579_v60 = vld [vmem:[%s21295_s2 + $0x1f4] sm:$0xf0] }
 0x201   : > { %v1800_v14 = vunpack.c.l.b16 %v1655_v3  ;;  %v10458_v3 = vor.u32 %v13579_v60, %v10457_v59 }
 0x203   : > { %v1228_v1 = vpop.f32.mrf.mxu0 }
 0x204   : > { %v1477_v2 = vpop.f32.mrf.mxu1 }
 0x205   : > { %v1478_v4 = vadd.f32 %v1477_v2, %v1228_v1 }
 0x207   : > { %v1656_v5 = vpack.c.bf16 %v1478_v4, %v1478_v4  ;;  %v10462_v4 = vor.u32 %v13578_v62, %v10459_v63 }
 0x209   : > { %v1801_v16 = vunpack.c.l.b16 %v1656_v5 }
 0x20b   : > { %v14896_v17 = vpack.c.b16 %v1801_v16, %v1800_v14  ;;  %v1231_v22 = vpop.f32.mrf.mxu0 }
 0x20c   : > { %v1480_v23 = vpop.f32.mrf.mxu1 }
 0x20d   : > { %10779 = vmatmul.msk.bf16.gmra.mxu2 %vm1960_vm0, %v14896_v17  ;;  %10795 = vmatmul.msk.bf16.gmra.mxu3 %vm1960_vm0, %v14896_v17  ;;  %v1481_v24 = vadd.f32 %v1480_v23, %v1231_v22 }
 0x20e   : > { %1270 = vmatmul.bf16.gmra.mxu0 %v10442_v18 }
 0x20f   : > { %1519 = vmatmul.bf16.gmra.mxu1 %v10446_v19  ;;  %v1657_v28 = vpack.c.bf16 %v1481_v24, %v1481_v24 }
 0x211   : > { %v1802_v40 = vunpack.c.l.b16 %v1657_v28 }
 0x213   : > { %v1233_v26 = vpop.f32.mrf.mxu0 }
 0x214   : > { %v1482_v27 = vpop.f32.mrf.mxu1 }
 0x215   : > { %v1483_v30 = vadd.f32 %v1482_v27, %v1233_v26 }
 0x217   : > { %v1658_v32 = vpack.c.bf16 %v1483_v30, %v1483_v30 }
 0x219   : > { %v1803_v41 = vunpack.c.l.b16 %v1658_v32 }
 0x21b   : > { %v14914_v42 = vpack.c.b16 %v1803_v41, %v1802_v40  ;;  %v1236_v46 = vpop.f32.mrf.mxu0 }
 0x21c   : > { %v1485_v47 = vpop.f32.mrf.mxu1 }
 0x21d   : > { %10780 = vmatmul.msk.bf16.gmra.mxu2 %vm1960_vm0, %v14914_v42  ;;  %10796 = vmatmul.msk.bf16.gmra.mxu3 %vm1960_vm0, %v14914_v42  ;;  %v1486_v48 = vadd.f32 %v1485_v47, %v1236_v46 }
 0x21e   : > { %1275 = vmatmul.bf16.gmra.mxu0 %v10450_v44 }
 0x21f   : > { %1524 = vmatmul.bf16.gmra.mxu1 %v10454_v45  ;;  %v1659_v55 = vpack.c.bf16 %v1486_v48, %v1486_v48 }
 0x221   : > { %v1804_v0 = vunpack.c.l.b16 %v1659_v55 }
 0x223   : > { %v1238_v50 = vpop.f32.mrf.mxu0 }
 0x224   : > { %v1487_v51 = vpop.f32.mrf.mxu1 }
 0x225   : > { %v1488_v56 = vadd.f32 %v1487_v51, %v1238_v50 }
 0x227   : > { %v1660_v57 = vpack.c.bf16 %v1488_v56, %v1488_v56 }
 0x229   : > { %v1805_v1 = vunpack.c.l.b16 %v1660_v57 }
 0x22b   : > { %v14932_v2 = vpack.c.b16 %v1805_v1, %v1804_v0  ;;  %v1241_v5 = vpop.f32.mrf.mxu0 }
 0x22c   : > { %v1490_v6 = vpop.f32.mrf.mxu1 }
 0x22d   : > { %10781 = vmatmul.msk.bf16.gmra.mxu2 %vm1960_vm0, %v14932_v2  ;;  %10797 = vmatmul.msk.bf16.gmra.mxu3 %vm1960_vm0, %v14932_v2  ;;  %v1491_v10 = vadd.f32 %v1490_v6, %v1241_v5 }
 0x22e   : > { %1280 = vmatmul.bf16.gmra.mxu0 %v10458_v3 }
 0x22f   : > { %1529 = vmatmul.bf16.gmra.mxu1 %v10462_v4  ;;  %v1661_v14 = vpack.c.bf16 %v1491_v10, %v1491_v10 }
 0x231   : > { %v1806_v19 = vunpack.c.l.b16 %v1661_v14 }
 0x233   : > { %v1243_v12 = vpop.f32.mrf.mxu0 }
 0x234   : > { %v1492_v13 = vpop.f32.mrf.mxu1 }
 0x235   : > { %v1493_v16 = vadd.f32 %v1492_v13, %v1243_v12 }
 0x237   : > { %v1662_v18 = vpack.c.bf16 %v1493_v16, %v1493_v16 }
 0x239   : > { %v1807_v22 = vunpack.c.l.b16 %v1662_v18 }
 0x23b   : > { %v14938_v23 = vpack.c.b16 %v1807_v22, %v1806_v19  ;;  %v1246_v24 = vpop.f32.mrf.mxu0 }
 0x23c   : > { %v1495_v26 = vpop.f32.mrf.mxu1 }
 0x23d   : > { %10782 = vmatmul.msk.bf16.gmra.mxu2 %vm1960_vm0, %v14938_v23  ;;  %10798 = vmatmul.msk.bf16.gmra.mxu3 %vm1960_vm0, %v14938_v23  ;;  %v1496_v27 = vadd.f32 %v1495_v26, %v1246_v24 }
 0x23f   : > { %v1663_v32 = vpack.c.bf16 %v1496_v27, %v1496_v27 }
 0x241   : > { %v1808_v38 = vunpack.c.l.b16 %v1663_v32 }
 0x243   : > { %v1248_v28 = vpop.f32.mrf.mxu0 }
 0x244   : > { %v1497_v30 = vpop.f32.mrf.mxu1 }
 0x245   : > { %v1498_v33 = vadd.f32 %v1497_v30, %v1248_v28 }
 0x247   : > { %v1664_v36 = vpack.c.bf16 %v1498_v33, %v1498_v33 }
 0x249   : > { %v1809_v39 = vunpack.c.l.b16 %v1664_v36 }
 0x24b   : > { %v14944_v40 = vpack.c.b16 %v1809_v39, %v1808_v38  ;;  %v1251_v41 = vpop.f32.mrf.mxu0 }
 0x24c   : > { %v1500_v44 = vpop.f32.mrf.mxu1 }
 0x24d   : > { %10783 = vmatmul.msk.bf16.gmra.mxu2 %vm1960_vm0, %v14944_v40  ;;  %10799 = vmatmul.msk.bf16.gmra.mxu3 %vm1960_vm0, %v14944_v40  ;;  %v1501_v47 = vadd.f32 %v1500_v44, %v1251_v41 }
 0x24f   : > { %v1665_v51 = vpack.c.bf16 %v1501_v47, %v1501_v47 }
 0x250   : > { %v14950_v45 = vpop.f32.mrf.mxu2  ;;  %v14952_v46 = vpop.f32.mrf.mxu3 }
 0x251   : > { %v1810_v60 = vunpack.c.l.b16 %v1665_v51 }
 0x253   : > { %v1253_v48 = vpop.f32.mrf.mxu0 }
 0x254   : > { %v1502_v50 = vpop.f32.mrf.mxu1 }
 0x255   : > { %v1503_v55 = vadd.f32 %v1502_v50, %v1253_v48 }
 0x257   : > { %v1666_v56 = vpack.c.bf16 %v1503_v55, %v1503_v55 }
 0x258   : > { %v14954_v57 = vpop.f32.mrf.mxu2  ;;  %v14956_v59 = vpop.f32.mrf.mxu3 }
 0x259   : > { %v1811_v62 = vunpack.c.l.b16 %v1666_v56 }
 0x25b   : > { %v14958_v63 = vpack.c.b16 %v1811_v62, %v1810_v60  ;;  %v1256_v0 = vpop.f32.mrf.mxu0 }
 0x25c   : > { %v1505_v1 = vpop.f32.mrf.mxu1 }
 0x25d   : > { %10784 = vmatmul.msk.bf16.gmra.mxu2 %vm1960_vm0, %v14958_v63  ;;  %10800 = vmatmul.msk.bf16.gmra.mxu3 %vm1960_vm0, %v14958_v63  ;;  %v1506_v5 = vadd.f32 %v1505_v1, %v1256_v0 }
 0x25f   : > { %v1667_v12 = vpack.c.bf16 %v1506_v5, %v1506_v5 }
 0x260   : > { %v14964_v3 = vpop.f32.mrf.mxu2  ;;  %v14966_v4 = vpop.f32.mrf.mxu3 }
 0x261   : > { %v1812_v19 = vunpack.c.l.b16 %v1667_v12 }
 0x263   : > { %v1258_v6 = vpop.f32.mrf.mxu0 }
 0x264   : > { %v1507_v10 = vpop.f32.mrf.mxu1 }
 0x265   : > { %v1508_v13 = vadd.f32 %v1507_v10, %v1258_v6 }
 0x267   : > { %v1668_v14 = vpack.c.bf16 %v1508_v13, %v1508_v13 }
 0x268   : > { %v14968_v16 = vpop.f32.mrf.mxu2  ;;  %v14970_v18 = vpop.f32.mrf.mxu3 }
 0x269   : > { %v1813_v22 = vunpack.c.l.b16 %v1668_v14 }
 0x26b   : > { %v14972_v24 = vpack.c.b16 %v1813_v22, %v1812_v19  ;;  %v1261_v26 = vpop.f32.mrf.mxu0 }
 0x26c   : > { %v1510_v27 = vpop.f32.mrf.mxu1 }
 0x26d   : > { %10785 = vmatmul.msk.bf16.gmra.mxu2 %vm1960_vm0, %v14972_v24  ;;  %10801 = vmatmul.msk.bf16.gmra.mxu3 %vm1960_vm0, %v14972_v24  ;;  %v1511_v32 = vadd.f32 %v1510_v27, %v1261_v26 }
 0x26f   : > { %v1669_v38 = vpack.c.bf16 %v1511_v32, %v1511_v32 }
 0x270   : > { %v14978_v28 = vpop.f32.mrf.mxu2  ;;  %v14980_v30 = vpop.f32.mrf.mxu3 }
 0x271   : > { %v1814_v48 = vunpack.c.l.b16 %v1669_v38 }
 0x273   : > { %v1263_v33 = vpop.f32.mrf.mxu0 }
 0x274   : > { %v1512_v36 = vpop.f32.mrf.mxu1 }
 0x275   : > { %v1513_v39 = vadd.f32 %v1512_v36, %v1263_v33 }
 0x277   : > { %v1670_v41 = vpack.c.bf16 %v1513_v39, %v1513_v39  ;;  %v10769_v39 = vld [vmem:[%s21382_s1 + $0x168] sm:$0xf] }
 0x278   : > { %v14982_v44 = vpop.f32.mrf.mxu2  ;;  %v14984_v47 = vpop.f32.mrf.mxu3 }
 0x279   : > { %v1815_v50 = vunpack.c.l.b16 %v1670_v41  ;;  %v13659_v41 = vld [vmem:[%s21382_s1 + $0x174] sm:$0xf0] }
 0x27b   : > { %v14986_v51 = vpack.c.b16 %v1815_v50, %v1814_v48  ;;  %v1266_v55 = vpop.f32.mrf.mxu0  ;;  %v13657_v48 = vld [vmem:[%s21382_s1 + $0x16c] sm:$0xf]  ;;  %v10770_v50 = vor.u32 %v13659_v41, %v10769_v39  ;;  %v10755_v39 = vld [vmem:[%s21382_s1 + $0x158] sm:$0xf0] }
 0x27c   : > { %v1515_v56 = vpop.f32.mrf.mxu1 }
 0x27d   : > { %10786 = vmatmul.msk.bf16.gmra.mxu2 %vm1960_vm0, %v14986_v51  ;;  %10802 = vmatmul.msk.bf16.gmra.mxu3 %vm1960_vm0, %v14986_v51  ;;  %v1516_v0 = vadd.f32 %v1515_v56, %v1266_v55  ;;  %v10771_v55 = vld [vmem:[%s21382_s1 + $0x178] sm:$0xf0] }
 0x27e   : > { %v10774_v56 = vor.u32 %v13657_v48, %v10771_v55  ;;  %2189 = vmatpush.bf16.msrb.mxu2 %v10770_v50 }
 0x27f   : > { %v1671_v6 = vpack.c.bf16 %v1516_v0, %v1516_v0 }
 0x280   : > { %v14992_v60 = vpop.f32.mrf.mxu2  ;;  %v14994_v62 = vpop.f32.mrf.mxu3  ;;  %2278 = vmatpush.bf16.msrb.mxu3 %v10774_v56  ;;  %v10737_v56 = vld [vmem:[%s21382_s1 + $0x128] sm:$0xf] }
 0x281   : > { %21386 = vst [vmem:[#allocation12_spill] sm:$0xff] %v14992_v60  ;;  %v1816_v19 = vunpack.c.l.b16 %v1671_v6  ;;  %v13611_v60 = vld [vmem:[%s21295_s2 + $0x2f4] sm:$0xf0] }
 0x282   : > { %21387 = vst [vmem:[#allocation13_spill] sm:$0xff] %v14994_v62 }
 0x283   : > { %v1268_v1 = vpop.f32.mrf.mxu0 }
 0x284   : > { %v1517_v5 = vpop.f32.mrf.mxu1 }
 0x285   : > { %v1518_v10 = vadd.f32 %v1517_v5, %v1268_v1 }
 0x287   : > { %v1672_v12 = vpack.c.bf16 %v1518_v10, %v1518_v10 }
 0x288   : > { %v14996_v13 = vpop.f32.mrf.mxu2  ;;  %v14998_v14 = vpop.f32.mrf.mxu3 }
 0x289   : > { %21388 = vst [vmem:[#allocation14_spill] sm:$0xff] %v14996_v13  ;;  %v1817_v22 = vunpack.c.l.b16 %v1672_v12  ;;  %v10753_v12 = vld [vmem:[%s21382_s1 + $0x148] sm:$0xf] }
 0x28a   : > { %21389 = vst [vmem:[#allocation15_spill] sm:$0xff] %v14998_v14 }
 0x28b   : > { %v15000_v26 = vpack.c.b16 %v1817_v22, %v1816_v19  ;;  %v1271_v27 = vpop.f32.mrf.mxu0  ;;  %v13655_v19 = vld [vmem:[%s21382_s1 + $0x154] sm:$0xf0]  ;;  %v13653_v22 = vld [vmem:[%s21382_s1 + $0x14c] sm:$0xf] }
 0x28c   : > { %v1520_v32 = vpop.f32.mrf.mxu1  ;;  %v10758_v50 = vor.u32 %v13653_v22, %v10755_v39  ;;  %v10721_v22 = vld [vmem:[%s21382_s1 + $0x108] sm:$0xf]  ;;  %v13645_v39 = vld [vmem:[%s21382_s1 + $0x10c] sm:$0xf] }
 0x28d   : > { %10787 = vmatmul.msk.bf16.gmra.mxu2 %vm1960_vm0, %v15000_v26  ;;  %10803 = vmatmul.msk.bf16.gmra.mxu3 %vm1960_vm0, %v15000_v26  ;;  %v1521_v38 = vadd.f32 %v1520_v32, %v1271_v27 }
 0x28e   : > { %2279 = vmatpush.bf16.msrb.mxu3 %v10758_v50 }
 0x28f   : > { %v1673_v5 = vpack.c.bf16 %v1521_v38, %v1521_v38  ;;  %v10754_v38 = vor.u32 %v13655_v19, %v10753_v12  ;;  %v10739_v12 = vld [vmem:[%s21382_s1 + $0x138] sm:$0xf0] }
 0x290   : > { %v15006_v33 = vpop.f32.mrf.mxu2  ;;  %v15008_v36 = vpop.f32.mrf.mxu3 }
 0x291   : > { %21390 = vst [vmem:[#allocation16_spill] sm:$0xff] %v15006_v33  ;;  %v1818_v41 = vunpack.c.l.b16 %v1673_v5  ;;  %2190 = vmatpush.bf16.msrb.mxu2 %v10754_v38  ;;  %v13647_v38 = vld [vmem:[%s21382_s1 + $0x114] sm:$0xf0] }
 0x292   : > { %21391 = vst [vmem:[#allocation17_spill] sm:$0xff] %v15008_v36  ;;  %v10722_v50 = vor.u32 %v13647_v38, %v10721_v22  ;;  %v10707_v22 = vld [vmem:[%s21382_s1 + $0xf8] sm:$0xf0] }
 0x293   : > { %v1273_v0 = vpop.f32.mrf.mxu0 }
 0x294   : > { %v1522_v1 = vpop.f32.mrf.mxu1 }
 0x295   : > { %v1523_v6 = vadd.f32 %v1522_v1, %v1273_v0  ;;  %v13651_v0 = vld [vmem:[%s21382_s1 + $0x134] sm:$0xf0]  ;;  %v13649_v1 = vld [vmem:[%s21382_s1 + $0x12c] sm:$0xf] }
 0x296   : > { %v10742_v19 = vor.u32 %v13649_v1, %v10739_v12  ;;  %v13643_v1 = vld [vmem:[%s21382_s1 + $0xf4] sm:$0xf0] }
 0x297   : > { %v1674_v10 = vpack.c.bf16 %v1523_v6, %v1523_v6 }
 0x298   : > { %v15031_v27 = vpop.f32.mrf.mxu2  ;;  %v15033_v32 = vpop.f32.mrf.mxu3  ;;  %2280 = vmatpush.bf16.msrb.mxu3 %v10742_v19  ;;  %v13641_v19 = vld [vmem:[%s21382_s1 + $0xec] sm:$0xf] }
 0x299   : > { %21392 = vst [vmem:[#allocation18_spill] sm:$0xff] %v15031_v27  ;;  %v1819_v48 = vunpack.c.l.b16 %v1674_v10  ;;  %v10738_v10 = vor.u32 %v13651_v0, %v10737_v56  ;;  %v10723_v56 = vld [vmem:[%s21382_s1 + $0x118] sm:$0xf0]  ;;  %v10705_v0 = vld [vmem:[%s21382_s1 + $0xe8] sm:$0xf] }
 0x29a   : > { %21393 = vst [vmem:[#allocation19_spill] sm:$0xff] %v15033_v32  ;;  %v10726_v12 = vor.u32 %v13645_v39, %v10723_v56  ;;  %v10706_v38 = vor.u32 %v13643_v1, %v10705_v0  ;;  %v10710_v32 = vor.u32 %v13641_v19, %v10707_v22  ;;  %v13637_v39 = vld [vmem:[%s21382_s1 + $0xcc] sm:$0xf] }
 0x29b   : > { %v15038_v55 = vpack.c.b16 %v1819_v48, %v1818_v41  ;;  %v1276_v6 = vpop.f32.mrf.mxu0  ;;  %2191 = vmatpush.bf16.msrb.mxu2 %v10738_v10 }
 0x29c   : > { %v1525_v5 = vpop.f32.mrf.mxu1  ;;  %2281 = vmatpush.bf16.msrb.mxu3 %v10726_v12 }
 0x29d   : > { %10788 = vmatmul.msk.bf16.gmra.mxu2 %vm1960_vm0, %v15038_v55  ;;  %10804 = vmatmul.msk.bf16.gmra.mxu3 %vm1960_vm0, %v15038_v55  ;;  %v1526_v10 = vadd.f32 %v1525_v5, %v1276_v6  ;;  %v10689_v6 = vld [vmem:[%s21382_s1 + $0xc8] sm:$0xf]  ;;  %v13639_v5 = vld [vmem:[%s21382_s1 + $0xd4] sm:$0xf0] }
 0x29f   : > { %2192 = vmatpush.bf16.msrb.mxu2 %v10722_v50  ;;  %v1675_v8 = vpack.c.bf16 %v1526_v10, %v1526_v10 }
 0x2a0   : > { %v15065_v41 = vpop.f32.mrf.mxu2  ;;  %v15067_v48 = vpop.f32.mrf.mxu3  ;;  %2282 = vmatpush.bf16.msrb.mxu3 %v10710_v32 }
 0x2a1   : > { %21394 = vst [vmem:[#allocation20_spill] sm:$0xff] %v15065_v41  ;;  %v1820_v32 = vunpack.c.l.b16 %v1675_v8  ;;  %v10465_v8 = vld [vmem:[%s21295_s2 + $0x200] sm:$0xf] }
 0x2a2   : > { %21395 = vst [vmem:[#allocation21_spill] sm:$0xff] %v15067_v48 }
 0x2a3   : > { %v1278_v27 = vpop.f32.mrf.mxu0  ;;  %2193 = vmatpush.bf16.msrb.mxu2 %v10706_v38  ;;  %v13580_v38 = vld [vmem:[%s21295_s2 + $0x204] sm:$0xf] }
 0x2a4   : > { %v1527_v31 = vpop.f32.mrf.mxu1 }
 0x2a5   : > { %v1528_v48 = vadd.f32 %v1527_v31, %v1278_v27  ;;  %v10690_v31 = vor.u32 %v13639_v5, %v10689_v6  ;;  %v10691_v27 = vld [vmem:[%s21382_s1 + $0xd8] sm:$0xf0] }
 0x2a6   : > { %v10694_v0 = vor.u32 %v13637_v39, %v10691_v27  ;;  %v10467_v39 = vld [vmem:[%s21295_s2 + $0x208] sm:$0xf0] }
 0x2a7   : > { %v1676_v41 = vpack.c.bf16 %v1528_v48, %v1528_v48  ;;  %2194 = vmatpush.bf16.msrb.mxu2 %v10690_v31  ;;  %v10470_v31 = vor.u32 %v13580_v38, %v10467_v39  ;;  %v10475_v38 = vld [vmem:[%s21295_s2 + $0x218] sm:$0xf0] }
 0x2a8   : > { %v15093_v50 = vpop.f32.mrf.mxu2  ;;  %v15095_v56 = vpop.f32.mrf.mxu3  ;;  %2283 = vmatpush.bf16.msrb.mxu3 %v10694_v0 }
 0x2a9   : > { %21396 = vst [vmem:[#allocation22_spill] sm:$0xff] %v15093_v50  ;;  %v1821_v48 = vunpack.c.l.b16 %v1676_v41  ;;  %v13581_v41 = vld [vmem:[%s21295_s2 + $0x204] sm:$0xf0]  ;;  %1534 = vmatmul.bf16.gmra.mxu1 %v10470_v31 }
 0x2aa   : > { %21397 = vst [vmem:[#allocation23_spill] sm:$0xff] %v15095_v56  ;;  %v10466_v5 = vor.u32 %v13581_v41, %v10465_v8  ;;  %v10473_v41 = vld [vmem:[%s21295_s2 + $0x210] sm:$0xf] }
 0x2ab   : > { %v15100_v1 = vpack.c.b16 %v1821_v48, %v1820_v32  ;;  %v1281_v10 = vpop.f32.mrf.mxu0 }
 0x2ac   : > { %v1530_v12 = vpop.f32.mrf.mxu1  ;;  %1285 = vmatmul.bf16.gmra.mxu0 %v10466_v5 }
 0x2ad   : > { %10789 = vmatmul.msk.bf16.gmra.mxu2 %vm1960_vm0, %v15100_v1  ;;  %10805 = vmatmul.msk.bf16.gmra.mxu3 %vm1960_vm0, %v15100_v1  ;;  %v1531_v6 = vadd.f32 %v1530_v12, %v1281_v10 }
 0x2af   : > { %v1677_v48 = vpack.c.bf16 %v1531_v6, %v1531_v6 }
 0x2b0   : > { %v15106_v19 = vpop.f32.mrf.mxu2  ;;  %v15108_v22 = vpop.f32.mrf.mxu3 }
 0x2b1   : > { %21398 = vst [vmem:[#allocation24_spill] sm:$0xff] %v15106_v19  ;;  %v1822_v19 = vunpack.c.l.b16 %v1677_v48  ;;  %v13585_v48 = vld [vmem:[%s21295_s2 + $0x224] sm:$0xf0] }
 0x2b2   : > { %21399 = vst [vmem:[#allocation25_spill] sm:$0xff] %v15108_v22 }
 0x2b3   : > { %v1283_v27 = vpop.f32.mrf.mxu0 }
 0x2b4   : > { %v1532_v32 = vpop.f32.mrf.mxu1 }
 0x2b5   : > { %v1533_v0 = vadd.f32 %v1532_v32, %v1283_v27  ;;  %v10481_v32 = vld [vmem:[%s21295_s2 + $0x220] sm:$0xf] }
 0x2b7   : > { %v1678_v56 = vpack.c.bf16 %v1533_v0, %v1533_v0  ;;  %v13584_v0 = vld [vmem:[%s21295_s2 + $0x224] sm:$0xf] }
 0x2b8   : > { %v15122_v50 = vpop.f32.mrf.mxu2  ;;  %v15124_v22 = vpop.f32.mrf.mxu3 }
 0x2b9   : > { %21400 = vst [vmem:[#allocation26_spill] sm:$0xff] %v15122_v50  ;;  %v1823_v21 = vunpack.c.l.b16 %v1678_v56  ;;  %v13583_v56 = vld [vmem:[%s21295_s2 + $0x214] sm:$0xf0] }
 0x2ba   : > { %21401 = vst [vmem:[#allocation27_spill] sm:$0xff] %v15124_v22 }
 0x2bb   : > { %v15126_v10 = vpack.c.b16 %v1823_v21, %v1822_v19  ;;  %v13582_v21 = vld [vmem:[%s21295_s2 + $0x214] sm:$0xf]  ;;  %v10474_v19 = vor.u32 %v13583_v56, %v10473_v41  ;;  %v10482_v41 = vor.u32 %v13585_v48, %v10481_v32  ;;  %v10489_v32 = vld [vmem:[%s21295_s2 + $0x230] sm:$0xf]  ;;  %v13587_v48 = vld [vmem:[%s21295_s2 + $0x234] sm:$0xf0] }
 0x2bc   : > { %v10478_v6 = vor.u32 %v13582_v21, %v10475_v38 }
 0x2bd   : > { %10790 = vmatmul.msk.bf16.gmra.mxu2 %vm1960_vm0, %v15126_v10  ;;  %10806 = vmatmul.msk.bf16.gmra.mxu3 %vm1960_vm0, %v15126_v10 }
 0x2be   : > { %1290 = vmatmul.bf16.gmra.mxu0 %v10474_v19  ;;  %1539 = vmatmul.bf16.gmra.mxu1 %v10478_v6 }
 0x2c0   : > { %v15132_v12 = vpop.f32.mrf.mxu2  ;;  %v15134_v8 = vpop.f32.mrf.mxu3 }
 0x2c1   : > { %21402 = vst [vmem:[#allocation28_spill] sm:$0xff] %v15132_v12  ;;  %v13682_v12 = vld [vmem:[%s21382_s1 + $0x22c] sm:$0xf0] }
 0x2c2   : > { %21403 = vst [vmem:[#allocation29_spill] sm:$0xff] %v15134_v8 }
 0x2c8   : > { %v15148_v5 = vpop.f32.mrf.mxu2  ;;  %v15150_v39 = vpop.f32.mrf.mxu3 }
 0x2c9   : > { %21404 = vst [vmem:[#allocation30_spill] sm:$0xff] %v15148_v5 }
 0x2ca   : > { %21405 = vst [vmem:[#allocation31_spill] sm:$0xff] %v15150_v39 }
 0x2cd   : > { %10807 = vmatmul.msk.bf16.vlgmr.msrb.gmra.mxu2 %vm1960_vm0, %v14824_v52  ;;  %10823 = vmatmul.msk.bf16.vlgmr.msrb.gmra.mxu3 %vm1960_vm0, %v14824_v52  ;;  %v10483_v52 = vld [vmem:[%s21295_s2 + $0x228] sm:$0xf0] }
 0x2ce   : > { %v10486_v56 = vor.u32 %v13584_v0, %v10483_v52  ;;  %1295 = vmatmul.bf16.gmra.mxu0 %v10482_v41  ;;  %v13586_v0 = vld [vmem:[%s21295_s2 + $0x234] sm:$0xf]  ;;  %v10490_v41 = vor.u32 %v13587_v48, %v10489_v32  ;;  %v10497_v48 = vld [vmem:[%s21295_s2 + $0x240] sm:$0xf] }
 0x2d0   : > { %v15156_v31 = vpop.f32.mrf.mxu2  ;;  %v15158_v27 = vpop.f32.mrf.mxu3  ;;  %1544 = vmatmul.bf16.gmra.mxu1 %v10486_v56 }
 0x2d1   : > { %21406 = vst [vmem:[#allocation32_spill] sm:$0xff] %v15156_v31 }
 0x2d2   : > { %21407 = vst [vmem:[#allocation33_spill] sm:$0xff] %v15158_v27 }
 0x2d8   : > { %v15172_v21 = vpop.f32.mrf.mxu2  ;;  %v15174_v19 = vpop.f32.mrf.mxu3 }
 0x2d9   : > { %21408 = vst [vmem:[#allocation34_spill] sm:$0xff] %v15172_v21 }
 0x2da   : > { %21409 = vst [vmem:[#allocation35_spill] sm:$0xff] %v15174_v19 }
 0x2dd   : > { %10808 = vmatmul.msk.bf16.gmra.mxu2 %vm1960_vm0, %v14842_v11  ;;  %10824 = vmatmul.msk.bf16.gmra.mxu3 %vm1960_vm0, %v14842_v11  ;;  %v10491_v11 = vld [vmem:[%s21295_s2 + $0x238] sm:$0xf0] }
 0x2de   : > { %v10494_v52 = vor.u32 %v13586_v0, %v10491_v11  ;;  %1300 = vmatmul.bf16.gmra.mxu0 %v10490_v41  ;;  %v13589_v0 = vld [vmem:[%s21295_s2 + $0x244] sm:$0xf0]  ;;  %v13588_v41 = vld [vmem:[%s21295_s2 + $0x244] sm:$0xf] }
 0x2df   : > { %v10498_v11 = vor.u32 %v13589_v0, %v10497_v48  ;;  %v10505_v0 = vld [vmem:[%s21295_s2 + $0x250] sm:$0xf] }
 0x2e0   : > { %v15180_v38 = vpop.f32.mrf.mxu2  ;;  %v15182_v6 = vpop.f32.mrf.mxu3  ;;  %1549 = vmatmul.bf16.gmra.mxu1 %v10494_v52 }
 0x2e1   : > { %21410 = vst [vmem:[#allocation36_spill] sm:$0xff] %v15180_v38 }
 0x2e2   : > { %21411 = vst [vmem:[#allocation37_spill] sm:$0xff] %v15182_v6 }
 0x2e8   : > { %v15196_v56 = vpop.f32.mrf.mxu2  ;;  %v15198_v19 = vpop.f32.mrf.mxu3 }
 0x2e9   : > { %21412 = vst [vmem:[#allocation38_spill] sm:$0xff] %v15196_v56 }
 0x2ea   : > { %21413 = vst [vmem:[#allocation39_spill] sm:$0xff] %v15198_v19 }
 0x2ed   : > { %10809 = vmatmul.msk.bf16.gmra.mxu2 %vm1960_vm0, %v14860_v35  ;;  %10825 = vmatmul.msk.bf16.gmra.mxu3 %vm1960_vm0, %v14860_v35  ;;  %v10499_v35 = vld [vmem:[%s21295_s2 + $0x248] sm:$0xf0] }
 0x2ee   : > { %v10502_v52 = vor.u32 %v13588_v41, %v10499_v35  ;;  %1305 = vmatmul.bf16.gmra.mxu0 %v10498_v11  ;;  %v13591_v41 = vld [vmem:[%s21295_s2 + $0x254] sm:$0xf0]  ;;  %v13590_v11 = vld [vmem:[%s21295_s2 + $0x254] sm:$0xf] }
 0x2ef   : > { %v10506_v35 = vor.u32 %v13591_v41, %v10505_v0  ;;  %v10513_v41 = vld [vmem:[%s21295_s2 + $0x260] sm:$0xf] }
 0x2f0   : > { %v15204_v21 = vpop.f32.mrf.mxu2  ;;  %v15206_v32 = vpop.f32.mrf.mxu3  ;;  %1554 = vmatmul.bf16.gmra.mxu1 %v10502_v52 }
 0x2f1   : > { %21414 = vst [vmem:[#allocation40_spill] sm:$0xff] %v15204_v21 }
 0x2f2   : > { %21415 = vst [vmem:[#allocation41_spill] sm:$0xff] %v15206_v32 }
 0x2f8   : > { %v15220_v19 = vpop.f32.mrf.mxu2  ;;  %v15222_v56 = vpop.f32.mrf.mxu3 }
 0x2f9   : > { %21416 = vst [vmem:[#allocation42_spill] sm:$0xff] %v15220_v19 }
 0x2fa   : > { %21417 = vst [vmem:[#allocation43_spill] sm:$0xff] %v15222_v56 }
 0x2fd   : > { %10810 = vmatmul.msk.bf16.gmra.mxu2 %vm1960_vm0, %v14878_v58  ;;  %10826 = vmatmul.msk.bf16.gmra.mxu3 %vm1960_vm0, %v14878_v58  ;;  %v10507_v58 = vld [vmem:[%s21295_s2 + $0x258] sm:$0xf0] }
 0x2fe   : > { %v10510_v52 = vor.u32 %v13590_v11, %v10507_v58  ;;  %1310 = vmatmul.bf16.gmra.mxu0 %v10506_v35  ;;  %v13593_v11 = vld [vmem:[%s21295_s2 + $0x264] sm:$0xf0]  ;;  %v13592_v35 = vld [vmem:[%s21295_s2 + $0x264] sm:$0xf] }
 0x2ff   : > { %v10514_v58 = vor.u32 %v13593_v11, %v10513_v41  ;;  %v10521_v11 = vld [vmem:[%s21295_s2 + $0x270] sm:$0xf] }
 0x300   : > { %v15228_v39 = vpop.f32.mrf.mxu2  ;;  %v15230_v48 = vpop.f32.mrf.mxu3  ;;  %1559 = vmatmul.bf16.gmra.mxu1 %v10510_v52 }
 0x301   : > { %21418 = vst [vmem:[#allocation44_spill] sm:$0xff] %v15228_v39 }
 0x302   : > { %21419 = vst [vmem:[#allocation45_spill] sm:$0xff] %v15230_v48 }
 0x308   : > { %v15244_v56 = vpop.f32.mrf.mxu2  ;;  %v15246_v19 = vpop.f32.mrf.mxu3 }
 0x309   : > { %21420 = vst [vmem:[#allocation46_spill] sm:$0xff] %v15244_v56 }
 0x30a   : > { %21421 = vst [vmem:[#allocation47_spill] sm:$0xff] %v15246_v19 }
 0x30d   : > { %10811 = vmatmul.msk.bf16.gmra.mxu2 %vm1960_vm0, %v14896_v17  ;;  %10827 = vmatmul.msk.bf16.gmra.mxu3 %vm1960_vm0, %v14896_v17  ;;  %v10515_v17 = vld [vmem:[%s21295_s2 + $0x268] sm:$0xf0] }
 0x30e   : > { %v10518_v52 = vor.u32 %v13592_v35, %v10515_v17  ;;  %1315 = vmatmul.bf16.gmra.mxu0 %v10514_v58  ;;  %v13595_v35 = vld [vmem:[%s21295_s2 + $0x274] sm:$0xf0]  ;;  %v13594_v58 = vld [vmem:[%s21295_s2 + $0x274] sm:$0xf] }
 0x30f   : > { %v10522_v17 = vor.u32 %v13595_v35, %v10521_v11  ;;  %v10529_v35 = vld [vmem:[%s21295_s2 + $0x280] sm:$0xf] }
 0x310   : > { %v15252_v5 = vpop.f32.mrf.mxu2  ;;  %v15254_v0 = vpop.f32.mrf.mxu3  ;;  %1564 = vmatmul.bf16.gmra.mxu1 %v10518_v52 }
 0x311   : > { %21422 = vst [vmem:[#allocation48_spill] sm:$0xff] %v15252_v5 }
 0x312   : > { %21423 = vst [vmem:[#allocation49_spill] sm:$0xff] %v15254_v0 }
 0x318   : > { %v15268_v19 = vpop.f32.mrf.mxu2  ;;  %v15270_v56 = vpop.f32.mrf.mxu3 }
 0x319   : > { %21424 = vst [vmem:[#allocation50_spill] sm:$0xff] %v15268_v19 }
 0x31a   : > { %21425 = vst [vmem:[#allocation51_spill] sm:$0xff] %v15270_v56 }
 0x31d   : > { %10812 = vmatmul.msk.bf16.gmra.mxu2 %vm1960_vm0, %v14914_v42  ;;  %10828 = vmatmul.msk.bf16.gmra.mxu3 %vm1960_vm0, %v14914_v42  ;;  %v10523_v42 = vld [vmem:[%s21295_s2 + $0x278] sm:$0xf0] }
 0x31e   : > { %v10526_v52 = vor.u32 %v13594_v58, %v10523_v42  ;;  %1320 = vmatmul.bf16.gmra.mxu0 %v10522_v17  ;;  %v13597_v58 = vld [vmem:[%s21295_s2 + $0x284] sm:$0xf0]  ;;  %v13596_v17 = vld [vmem:[%s21295_s2 + $0x284] sm:$0xf] }
 0x320   : > { %v15276_v22 = vpop.f32.mrf.mxu2  ;;  %v15278_v41 = vpop.f32.mrf.mxu3  ;;  %1569 = vmatmul.bf16.gmra.mxu1 %v10526_v52 }
 0x321   : > { %21426 = vst [vmem:[#allocation52_spill] sm:$0xff] %v15276_v22 }
 0x322   : > { %21427 = vst [vmem:[#allocation53_spill] sm:$0xff] %v15278_v41 }
 0x326   : > { %v1535_v52 = vpop.f32.mrf.mxu1 }
 0x328   : > { %v15292_v41 = vpop.f32.mrf.mxu2  ;;  %v15294_v22 = vpop.f32.mrf.mxu3 }
 0x329   : > { %21428 = vst [vmem:[#allocation54_spill] sm:$0xff] %v15292_v41  ;;  %v1286_v42 = vpop.f32.mrf.mxu0 }
 0x32a   : > { %21429 = vst [vmem:[#allocation55_spill] sm:$0xff] %v15294_v22  ;;  %v10530_v22 = vor.u32 %v13597_v58, %v10529_v35 }
 0x32d   : > { %10813 = vmatmul.msk.bf16.gmra.mxu2 %vm1960_vm0, %v14932_v2  ;;  %10829 = vmatmul.msk.bf16.gmra.mxu3 %vm1960_vm0, %v14932_v2  ;;  %v10531_v2 = vld [vmem:[%s21295_s2 + $0x288] sm:$0xf0] }
 0x32e   : > { %1325 = vmatmul.bf16.gmra.mxu0 %v10530_v22  ;;  %v15324_v0 = vpop.f32.mrf.mxu1  ;;  %v10537_v22 = vld [vmem:[%s21295_s2 + $0x290] sm:$0xf] }
 0x330   : > { %v15300_v56 = vpop.f32.mrf.mxu2  ;;  %v15302_v11 = vpop.f32.mrf.mxu3 }
 0x331   : > { %21430 = vst [vmem:[#allocation56_spill] sm:$0xff] %v15300_v56  ;;  %v10534_v56 = vor.u32 %v13596_v17, %v10531_v2  ;;  %v15322_v50 = vpop.f32.mrf.mxu0  ;;  %v13598_v17 = vld [vmem:[%s21295_s2 + $0x294] sm:$0xf] }
 0x332   : > { %21431 = vst [vmem:[#allocation57_spill] sm:$0xff] %v15302_v11  ;;  %v15316_v11 = vadd.f32 %v1535_v52, %v1286_v42 }
 0x333   : > { %1574 = vmatmul.bf16.gmra.mxu1 %v10534_v56  ;;  %v13599_v56 = vld [vmem:[%s21295_s2 + $0x294] sm:$0xf0] }
 0x334   : > { %v10538_v2 = vor.u32 %v13599_v56, %v10537_v22 }
 0x338   : > { %v15318_v41 = vpop.f32.mrf.mxu2  ;;  %v15320_v19 = vpop.f32.mrf.mxu3 }
 0x339   : > { %21432 = vst [vmem:[#allocation58_spill] sm:$0xff] %v15318_v41 }
 0x33a   : > { %21433 = vst [vmem:[#allocation59_spill] sm:$0xff] %v15320_v19 }
 0x33b   : > { %v1291_v42 = vpop.f32.mrf.mxu0  ;;  %v1540_v52 = vpop.f32.mrf.mxu1 }
 0x33d   : > { %10814 = vmatmul.msk.bf16.gmra.mxu2 %vm1960_vm0, %v14938_v23  ;;  %10830 = vmatmul.msk.bf16.gmra.mxu3 %vm1960_vm0, %v14938_v23  ;;  %v10539_v23 = vld [vmem:[%s21295_s2 + $0x298] sm:$0xf0] }
 0x33e   : > { %1330 = vmatmul.bf16.gmra.mxu0 %v10538_v2 }
 0x340   : > { %v15330_v35 = vpop.f32.mrf.mxu2  ;;  %v15332_v58 = vpop.f32.mrf.mxu3 }
 0x341   : > { %21434 = vst [vmem:[#allocation60_spill] sm:$0xff] %v15330_v35  ;;  %v10542_v35 = vor.u32 %v13598_v17, %v10539_v23  ;;  %v13601_v17 = vld [vmem:[%s21295_s2 + $0x2a4] sm:$0xf0] }
 0x342   : > { %21435 = vst [vmem:[#allocation61_spill] sm:$0xff] %v15332_v58  ;;  %v15346_v58 = vadd.f32 %v1540_v52, %v1291_v42  ;;  %v13600_v42 = vld [vmem:[%s21295_s2 + $0x2a4] sm:$0xf] }
 0x343   : > { %1579 = vmatmul.bf16.gmra.mxu1 %v10542_v35  ;;  %v15352_v5 = vpop.f32.mrf.mxu0  ;;  %v15354_v48 = vpop.f32.mrf.mxu1  ;;  %v10545_v35 = vld [vmem:[%s21295_s2 + $0x2a0] sm:$0xf] }
 0x344   : > { %v10546_v23 = vor.u32 %v13601_v17, %v10545_v35 }
 0x348   : > { %v15348_v19 = vpop.f32.mrf.mxu2  ;;  %v15350_v41 = vpop.f32.mrf.mxu3 }
 0x349   : > { %21436 = vst [vmem:[#allocation62_spill] sm:$0xff] %v15348_v19 }
 0x34a   : > { %21437 = vst [vmem:[#allocation63_spill] sm:$0xff] %v15350_v41 }
 0x34b   : > { %v1296_v52 = vpop.f32.mrf.mxu0 }
 0x34d   : > { %10815 = vmatmul.msk.bf16.gmra.mxu2 %vm1960_vm0, %v14944_v40  ;;  %10831 = vmatmul.msk.bf16.gmra.mxu3 %vm1960_vm0, %v14944_v40  ;;  %v1545_v2 = vpop.f32.mrf.mxu1  ;;  %v10547_v40 = vld [vmem:[%s21295_s2 + $0x2a8] sm:$0xf0] }
 0x34e   : > { %v15376_v41 = vadd.f32 %v1545_v2, %v1296_v52  ;;  %v10550_v19 = vor.u32 %v13600_v42, %v10547_v40  ;;  %1335 = vmatmul.bf16.gmra.mxu0 %v10546_v23  ;;  %v13603_v42 = vld [vmem:[%s21295_s2 + $0x2b4] sm:$0xf0]  ;;  %v13602_v52 = vld [vmem:[%s21295_s2 + $0x2b4] sm:$0xf] }
 0x350   : > { %v15360_v22 = vpop.f32.mrf.mxu2  ;;  %v15362_v56 = vpop.f32.mrf.mxu3 }
 0x351   : > { %21438 = vst [vmem:[#allocation64_spill] sm:$0xff] %v15360_v22 }
 0x352   : > { %21439 = vst [vmem:[#allocation65_spill] sm:$0xff] %v15362_v56 }
 0x353   : > { %1584 = vmatmul.bf16.gmra.mxu1 %v10550_v19  ;;  %v15382_v39 = vpop.f32.mrf.mxu0  ;;  %v10553_v19 = vld [vmem:[%s21295_s2 + $0x2b0] sm:$0xf] }
 0x354   : > { %v10554_v40 = vor.u32 %v13603_v42, %v10553_v19 }
 0x355   : > { %v15384_v32 = vpop.f32.mrf.mxu1 }
 0x358   : > { %v15378_v56 = vpop.f32.mrf.mxu2  ;;  %v15380_v22 = vpop.f32.mrf.mxu3 }
 0x359   : > { %21440 = vst [vmem:[#allocation66_spill] sm:$0xff] %v15378_v56 }
 0x35a   : > { %21441 = vst [vmem:[#allocation67_spill] sm:$0xff] %v15380_v22 }
 0x35b   : > { %v1301_v2 = vpop.f32.mrf.mxu0 }
 0x35d   : > { %10816 = vmatmul.msk.bf16.gmra.mxu2 %vm1960_vm0, %v14958_v63  ;;  %10832 = vmatmul.msk.bf16.gmra.mxu3 %vm1960_vm0, %v14958_v63  ;;  %v1550_v23 = vpop.f32.mrf.mxu1  ;;  %v10555_v63 = vld [vmem:[%s21295_s2 + $0x2b8] sm:$0xf0] }
 0x35e   : > { %1340 = vmatmul.bf16.gmra.mxu0 %v10554_v40 }
 0x360   : > { %v15390_v35 = vpop.f32.mrf.mxu2  ;;  %v15392_v17 = vpop.f32.mrf.mxu3 }
 0x361   : > { %21442 = vst [vmem:[#allocation68_spill] sm:$0xff] %v15390_v35  ;;  %v10558_v35 = vor.u32 %v13602_v52, %v10555_v63  ;;  %v13605_v52 = vld [vmem:[%s21295_s2 + $0x2c4] sm:$0xf0]  ;;  %v10563_v63 = vld [vmem:[%s21295_s2 + $0x2c8] sm:$0xf0] }
 0x362   : > { %21443 = vst [vmem:[#allocation69_spill] sm:$0xff] %v15392_v17  ;;  %v15406_v17 = vadd.f32 %v1550_v23, %v1301_v2  ;;  %v13604_v2 = vld [vmem:[%s21295_s2 + $0x2c4] sm:$0xf] }
 0x363   : > { %1589 = vmatmul.bf16.gmra.mxu1 %v10558_v35  ;;  %v15412_v21 = vpop.f32.mrf.mxu0  ;;  %v10561_v35 = vld [vmem:[%s21295_s2 + $0x2c0] sm:$0xf] }
 0x365   : > { %v15414_v6 = vpop.f32.mrf.mxu1 }
 0x368   : > { %v15408_v22 = vpop.f32.mrf.mxu2  ;;  %v15410_v56 = vpop.f32.mrf.mxu3 }
 0x369   : > { %21444 = vst [vmem:[#allocation70_spill] sm:$0xff] %v15408_v22 }
 0x36a   : > { %21445 = vst [vmem:[#allocation71_spill] sm:$0xff] %v15410_v56 }
 0x36b   : > { %v15433_v23 = vpop.f32.mrf.mxu0 }
 0x36d   : > { %10817 = vmatmul.msk.bf16.gmra.mxu2 %vm1960_vm0, %v14972_v24  ;;  %10833 = vmatmul.msk.bf16.gmra.mxu3 %vm1960_vm0, %v14972_v24  ;;  %v15435_v40 = vpop.f32.mrf.mxu1  ;;  %v10562_v24 = vor.u32 %v13605_v52, %v10561_v35 }
 0x36f   : > { %1345 = vmatmul.bf16.gmra.mxu0 %v10562_v24  ;;  %v13606_v24 = vld [vmem:[%s21295_s2 + $0x2d4] sm:$0xf] }
 0x370   : > { %v15420_v19 = vpop.f32.mrf.mxu2  ;;  %v15422_v42 = vpop.f32.mrf.mxu3 }
 0x371   : > { %21446 = vst [vmem:[#allocation72_spill] sm:$0xff] %v15420_v19 }
 0x372   : > { %21447 = vst [vmem:[#allocation73_spill] sm:$0xff] %v15422_v42  ;;  %v10566_v42 = vor.u32 %v13604_v2, %v10563_v63  ;;  %v13607_v2 = vld [vmem:[%s21295_s2 + $0x2d4] sm:$0xf0] }
 0x373   : > { %v15444_v22 = vpop.f32.mrf.mxu0 }
 0x374   : > { %1594 = vmatmul.bf16.gmra.mxu1 %v10566_v42  ;;  %v10569_v42 = vld [vmem:[%s21295_s2 + $0x2d0] sm:$0xf] }
 0x375   : > { %v15446_v38 = vpop.f32.mrf.mxu1 }
 0x378   : > { %v15440_v19 = vpop.f32.mrf.mxu2  ;;  %v15442_v56 = vpop.f32.mrf.mxu3 }
 0x379   : > { %21448 = vst [vmem:[#allocation74_spill] sm:$0xff] %v15440_v19 }
 0x37a   : > { %21449 = vst [vmem:[#allocation75_spill] sm:$0xff] %v15442_v56 }
 0x37b   : > { %v15465_v63 = vpop.f32.mrf.mxu0 }
 0x37d   : > { %10818 = vmatmul.msk.bf16.gmra.mxu2 %vm1960_vm0, %v14986_v51  ;;  %10834 = vmatmul.msk.bf16.gmra.mxu3 %vm1960_vm0, %v14986_v51  ;;  %v15467_v56 = vpop.f32.mrf.mxu1  ;;  %v10570_v51 = vor.u32 %v13607_v2, %v10569_v42  ;;  %v13632_v42 = vld [vmem:[%s21382_s1 + $0xa4] sm:$0xf] }
 0x37f   : > { %1350 = vmatmul.bf16.gmra.mxu0 %v10570_v51 }
 0x380   : > { %v15452_v35 = vpop.f32.mrf.mxu2  ;;  %v15454_v52 = vpop.f32.mrf.mxu3 }
 0x381   : > { %21450 = vst [vmem:[#allocation76_spill] sm:$0xff] %v15452_v35 }
 0x382   : > { %21451 = vst [vmem:[#allocation77_spill] sm:$0xff] %v15454_v52  ;;  %v10571_v52 = vld [vmem:[%s21295_s2 + $0x2d8] sm:$0xf0] }
 0x383   : > { %v10574_v35 = vor.u32 %v13606_v24, %v10571_v52  ;;  %v15476_v31 = vpop.f32.mrf.mxu0  ;;  %v10921_v52 = vld [vmem:[%s21382_s1 + $0xa0] sm:$0xf]  ;;  %v10923_v24 = vld [vmem:[%s21382_s1 + $0xb0] sm:$0xf0] }
 0x384   : > { %v10926_v51 = vor.u32 %v13632_v42, %v10923_v24 }
 0x385   : > { %1599 = vmatmul.bf16.gmra.mxu1 %v10574_v35  ;;  %v15478_v8 = vpop.f32.mrf.mxu1  ;;  %v13634_v35 = vld [vmem:[%s21382_s1 + $0xac] sm:$0xf0] }
 0x386   : > { %v10922_v2 = vor.u32 %v13634_v35, %v10921_v52  ;;  %v13680_v52 = vld [vmem:[%s21382_s1 + $0x224] sm:$0xf]  ;;  %2704 = vmatpush.bf16.msra.mxu3 %v10926_v51 }
 0x387   : > { %v13608_v51 = vld [vmem:[%s21295_s2 + $0x2e4] sm:$0xf] }
 0x388   : > { %v15472_v19 = vpop.f32.mrf.mxu2  ;;  %v15474_v27 = vpop.f32.mrf.mxu3  ;;  %2615 = vmatpush.bf16.msra.mxu2 %v10922_v2  ;;  %v11107_v2 = vld [vmem:[%s21382_s1 + $0x230] sm:$0xf0] }
 0x389   : > { %21452 = vst [vmem:[#allocation78_spill] sm:$0xff] %v15472_v19  ;;  %v11105_v19 = vld [vmem:[%s21382_s1 + $0x220] sm:$0xf]  ;;  %v11110_v36 = vor.u32 %v13680_v52, %v11107_v2 }
 0x38a   : > { %21453 = vst [vmem:[#allocation79_spill] sm:$0xff] %v15474_v27  ;;  %v11106_v24 = vor.u32 %v13682_v12, %v11105_v19  ;;  %v10579_v12 = vld [vmem:[%s21295_s2 + $0x2e8] sm:$0xf0] }
 0x38b   : > { %v15509_v35 = vpop.f32.mrf.mxu0  ;;  %v10582_v19 = vor.u32 %v13608_v51, %v10579_v12  ;;  %3333 = vmatpush.bf16.msrb.mxu1 %v11110_v36 }
 0x38c   : > { %3244 = vmatpush.bf16.msrb.mxu0 %v11106_v24 }
 0x38d   : > { %10819 = vmatmul.msk.bf16.gmra.mxu2 %vm1960_vm0, %v15000_v26  ;;  %10835 = vmatmul.msk.bf16.gmra.mxu3 %vm1960_vm0, %v15000_v26  ;;  %v15511_v42 = vpop.f32.mrf.mxu1 }
 0x390   : > { %v15496_v27 = vpop.f32.mrf.mxu2  ;;  %v15498_v26 = vpop.f32.mrf.mxu3 }
 0x391   : > { %21454 = vst [vmem:[#allocation80_spill] sm:$0xff] %v15496_v27  ;;  %v13609_v27 = vld [vmem:[%s21295_s2 + $0x2e4] sm:$0xf0] }
 0x392   : > { %21455 = vst [vmem:[#allocation81_spill] sm:$0xff] %v15498_v26  ;;  %v10577_v26 = vld [vmem:[%s21295_s2 + $0x2e0] sm:$0xf] }
 0x393   : > { %v10578_v33 = vor.u32 %v13609_v27, %v10577_v26  ;;  %v13630_v27 = vld [vmem:[%s21382_s1 + $0x8c] sm:$0xf0]  ;;  %v13628_v26 = vld [vmem:[%s21382_s1 + $0x84] sm:$0xf]  ;;  %v15544_v36 = vpop.f32.mrf.mxu0 }
 0x394   : > { %v10906_v24 = vor.u32 %v13630_v27, %v10905_v49  ;;  %v13624_v49 = vld [vmem:[%s21382_s1 + $0x64] sm:$0xf] }
 0x395   : > { %1355 = vmatmul.bf16.gmra.mxu0 %v10578_v33  ;;  %1604 = vmatmul.bf16.gmra.mxu1 %v10582_v19  ;;  %v10907_v33 = vld [vmem:[%s21382_s1 + $0x90] sm:$0xf0]  ;;  %v15546_v51 = vpop.f32.mrf.mxu1  ;;  %v10889_v19 = vld [vmem:[%s21382_s1 + $0x60] sm:$0xf] }
 0x396   : > { %v10910_v12 = vor.u32 %v13628_v26, %v10907_v33  ;;  %2616 = vmatpush.bf16.msra.mxu2 %v10906_v24  ;;  %v10873_v24 = vld [vmem:[%s21382_s1 + $0x40] sm:$0xf]  ;;  %v13620_v33 = vld [vmem:[%s21382_s1 + $0x44] sm:$0xf] }
 0x398   : > { %v15537_v52 = vpop.f32.mrf.mxu2  ;;  %v15539_v2 = vpop.f32.mrf.mxu3  ;;  %2705 = vmatpush.bf16.msra.mxu3 %v10910_v12 }
 0x399   : > { %21456 = vst [vmem:[#allocation82_spill] sm:$0xff] %v15537_v52  ;;  %v10891_v52 = vld [vmem:[%s21382_s1 + $0x70] sm:$0xf0] }
 0x39a   : > { %21457 = vst [vmem:[#allocation83_spill] sm:$0xff] %v15539_v2  ;;  %v13626_v2 = vld [vmem:[%s21382_s1 + $0x6c] sm:$0xf0]  ;;  %v10894_v26 = vor.u32 %v13624_v49, %v10891_v52  ;;  %v10875_v52 = vld [vmem:[%s21382_s1 + $0x50] sm:$0xf0] }
 0x39b   : > { %v10890_v27 = vor.u32 %v13626_v2, %v10889_v19  ;;  %v13622_v2 = vld [vmem:[%s21382_s1 + $0x4c] sm:$0xf0]  ;;  %v11089_v49 = vld [vmem:[%s21382_s1 + $0x200] sm:$0xf] }
 0x39c   : > { %2706 = vmatpush.bf16.msra.mxu3 %v10894_v26  ;;  %v15586_v26 = vpop.f32.mrf.mxu0 }
 0x39d   : > { %10820 = vmatmul.msk.bf16.gmra.mxu2 %vm1960_vm0, %v15038_v55  ;;  %10836 = vmatmul.msk.bf16.gmra.mxu3 %vm1960_vm0, %v15038_v55  ;;  %v10874_v55 = vor.u32 %v13622_v2, %v10873_v24  ;;  %v15588_v14 = vpop.f32.mrf.mxu1  ;;  %v13676_v24 = vld [vmem:[%s21382_s1 + $0x204] sm:$0xf]  ;;  %v11091_v2 = vld [vmem:[%s21382_s1 + $0x210] sm:$0xf0] }
 0x39e   : > { %2617 = vmatpush.bf16.msra.mxu2 %v10890_v27  ;;  %v13678_v27 = vld [vmem:[%s21382_s1 + $0x20c] sm:$0xf0]  ;;  %v11094_v62 = vor.u32 %v13676_v24, %v11091_v2  ;;  %v13616_v2 = vld [vmem:[%s21382_s1 + $0x24] sm:$0xf] }
 0x39f   : > { %v11090_v13 = vor.u32 %v13678_v27, %v11089_v49  ;;  %v13618_v24 = vld [vmem:[%s21382_s1 + $0x2c] sm:$0xf0] }
 0x3a0   : > { %v15573_v12 = vpop.f32.mrf.mxu2  ;;  %v15575_v19 = vpop.f32.mrf.mxu3  ;;  %3334 = vmatpush.bf16.msrb.mxu1 %v11094_v62  ;;  %v13672_v62 = vld [vmem:[%s21382_s1 + $0x1e4] sm:$0xf] }
 0x3a1   : > { %21458 = vst [vmem:[#allocation84_spill] sm:$0xff] %v15573_v12  ;;  %v10878_v12 = vor.u32 %v13620_v33, %v10875_v52  ;;  %v13610_v33 = vld [vmem:[%s21295_s2 + $0x2f4] sm:$0xf]  ;;  %v10587_v52 = vld [vmem:[%s21295_s2 + $0x2f8] sm:$0xf0]  ;;  %3245 = vmatpush.bf16.msrb.mxu0 %v11090_v13 }
 0x3a2   : > { %21459 = vst [vmem:[#allocation85_spill] sm:$0xff] %v15575_v19  ;;  %v10585_v19 = vld [vmem:[%s21295_s2 + $0x2f0] sm:$0xf]  ;;  %2618 = vmatpush.bf16.msra.mxu2 %v10874_v55  ;;  %v10590_v27 = vor.u32 %v13610_v33, %v10587_v52  ;;  %v10857_v55 = vld [vmem:[%s21382_s1 + $0x20] sm:$0xf] }
 0x3a3   : > { %2707 = vmatpush.bf16.msra.mxu3 %v10878_v12  ;;  %v10586_v49 = vor.u32 %v13611_v60, %v10585_v19  ;;  %v10858_v29 = vor.u32 %v13618_v24, %v10857_v55  ;;  %v10859_v13 = vld [vmem:[%s21382_s1 + $0x30] sm:$0xf0]  ;;  %v11073_v60 = vld [vmem:[%s21382_s1 + $0x1e0] sm:$0xf]  ;;  %v13674_v12 = vld [vmem:[%s21382_s1 + $0x1ec] sm:$0xf0]  ;;  %v1538_v55 = vadd.f32 %v15324_v0, %v15322_v50 }
 0x3a4   : > { %v10862_v19 = vor.u32 %v13616_v2, %v10859_v13  ;;  %v11074_v33 = vor.u32 %v13674_v12, %v11073_v60  ;;  %v11075_v52 = vld [vmem:[%s21382_s1 + $0x1f0] sm:$0xf0]  ;;  %v13612_v2 = vld [vmem:[%s21382_s1 + $0x4] sm:$0xf]  ;;  %v11057_v0 = vld [vmem:[%s21382_s1 + $0x1c0] sm:$0xf] }
 0x3a5   : > { %1360 = vmatmul.bf16.gmra.mxu0 %v10586_v49  ;;  %1609 = vmatmul.bf16.gmra.mxu1 %v10590_v27  ;;  %v11078_v24 = vor.u32 %v13672_v62, %v11075_v52  ;;  %v10841_v49 = vld [vmem:[%s21382_s1] sm:$0xf]  ;;  %v13614_v27 = vld [vmem:[%s21382_s1 + $0xc] sm:$0xf0]  ;;  %v10843_v50 = vld [vmem:[%s21382_s1 + $0x10] sm:$0xf0] }
 0x3a6   : > { %2619 = vmatpush.bf16.msra.mxu2 %v10858_v29  ;;  %3246 = vmatpush.bf16.msrb.mxu0 %v11074_v33  ;;  %v10842_v29 = vor.u32 %v13614_v27, %v10841_v49  ;;  %v13670_v12 = vld [vmem:[%s21382_s1 + $0x1cc] sm:$0xf0]  ;;  %v15658_v33 = vpop.f32.mrf.mxu1  ;;  %v10846_v62 = vor.u32 %v13612_v2, %v10843_v50  ;;  %v11059_v49 = vld [vmem:[%s21382_s1 + $0x1d0] sm:$0xf0]  ;;  %v1679_v27 = vpack.c.bf16 %v15316_v11, %v15316_v11  ;;  %v11041_v2 = vld [vmem:[%s21382_s1 + $0x1a0] sm:$0xf] }
 0x3a7   : > { %2708 = vmatpush.bf16.msra.mxu3 %v10862_v19  ;;  %3335 = vmatpush.bf16.msrb.mxu1 %v11078_v24  ;;  %v15656_v19 = vpop.f32.mrf.mxu0  ;;  %v11058_v52 = vor.u32 %v13670_v12, %v11057_v0  ;;  %v13668_v24 = vld [vmem:[%s21382_s1 + $0x1c4] sm:$0xf]  ;;  %v13666_v50 = vld [vmem:[%s21382_s1 + $0x1ac] sm:$0xf0]  ;;  %v11043_v11 = vld [vmem:[%s21382_s1 + $0x1b0] sm:$0xf0] }
 0x3a8   : > { %v15643_v13 = vpop.f32.mrf.mxu2  ;;  %v15645_v60 = vpop.f32.mrf.mxu3  ;;  %v13664_v0 = vld [vmem:[%s21382_s1 + $0x1a4] sm:$0xf]  ;;  %v11042_v12 = vor.u32 %v13666_v50, %v11041_v2 }
 0x3a9   : > { %21460 = vst [vmem:[#allocation86_spill] sm:$0xff] %v15643_v13  ;;  %v11062_v13 = vor.u32 %v13668_v24, %v11059_v49  ;;  %v13660_v24 = vld [vmem:[%s21382_s1 + $0x184] sm:$0xf] }
 0x3aa   : > { %21461 = vst [vmem:[#allocation87_spill] sm:$0xff] %v15645_v60  ;;  %v1680_v60 = vpack.c.bf16 %v1538_v55, %v1538_v55  ;;  %2620 = vmatpush.bf16.msra.mxu2 %v10842_v29  ;;  %3247 = vmatpush.bf16.msrb.mxu0 %v11058_v52  ;;  %v11046_v55 = vor.u32 %v13664_v0, %v11043_v11  ;;  %v3026_v29 = vunpack.c.l.b16 %v1679_v27  ;;  %v11025_v52 = vld [vmem:[%s21382_s1 + $0x180] sm:$0xf] }
 0x3ab   : > { %2709 = vmatpush.bf16.msra.mxu3 %v10846_v62  ;;  %3336 = vmatpush.bf16.msrb.mxu1 %v11062_v13  ;;  %v13662_v13 = vld [vmem:[%s21382_s1 + $0x18c] sm:$0xf0]  ;;  %v1543_v11 = vadd.f32 %v15354_v48, %v15352_v5 }
 0x3ac   : > { %v3027_v62 = vunpack.c.l.b16 %v1680_v60  ;;  %v11027_v60 = vld [vmem:[%s21382_s1 + $0x190] sm:$0xf0] }
 0x3ad   : > { %10821 = vmatmul.msk.bf16.gmra.mxu2 %vm1960_vm0, %v15100_v1  ;;  %10837 = vmatmul.msk.bf16.gmra.mxu3 %vm1960_vm0, %v15100_v1  ;;  %v11026_v1 = vor.u32 %v13662_v13, %v11025_v52  ;;  %v11030_v0 = vor.u32 %v13660_v24, %v11027_v60 }
 0x3ae   : > { %3248 = vmatpush.bf16.msrb.mxu0 %v11042_v12  ;;  %v15704_v12 = vpack.c.b16 %v3027_v62, %v3026_v29  ;;  %v1681_v29 = vpack.c.bf16 %v15346_v58, %v15346_v58  ;;  %v1682_v62 = vpack.c.bf16 %v1543_v11, %v1543_v11  ;;  %v1548_v58 = vadd.f32 %v15384_v32, %v15382_v39 }
 0x3af   : > { %3337 = vmatpush.bf16.msrb.mxu1 %v11046_v55  ;;  %v15700_v27 = vpop.f32.mrf.mxu0 }
 0x3b0   : > { %v15693_v49 = vpop.f32.mrf.mxu2  ;;  %v15695_v2 = vpop.f32.mrf.mxu3  ;;  %21464 = vst [vmem:[#allocation90_spill] sm:$0xff] %v15704_v12  ;;  %v3028_v5 = vunpack.c.l.b16 %v1681_v29  ;;  %v3029_v48 = vunpack.c.l.b16 %v1682_v62 }
 0x3b1   : > { %21462 = vst [vmem:[#allocation88_spill] sm:$0xff] %v15693_v49  ;;  %v15702_v50 = vpop.f32.mrf.mxu1 }
 0x3b2   : > { %21463 = vst [vmem:[#allocation89_spill] sm:$0xff] %v15695_v2  ;;  %3249 = vmatpush.bf16.msrb.mxu0 %v11026_v1 }
 0x3b3   : > { %3338 = vmatpush.bf16.msrb.mxu1 %v11030_v0 }
 0x3b5   : > { %11119 = vmatmul.msk.bf16.vlgmr.msrb.gmra.mxu0 %vm1960_vm0, %v15704_v12 }
 0x3b6   : > { %11135 = vmatmul.msk.bf16.vlgmr.msrb.gmra.mxu1 %vm1960_vm0, %v15704_v12 }
 0x3b7   : > { %v15716_v13 = vpop.f32.mrf.mxu0 }
 0x3b8   : > { %v15712_v55 = vpop.f32.mrf.mxu2  ;;  %v15714_v52 = vpop.f32.mrf.mxu3 }
 0x3b9   : > { %21465 = vst [vmem:[#allocation91_spill] sm:$0xff] %v15712_v55  ;;  %v15718_v24 = vpop.f32.mrf.mxu1  ;;  %v15734_v55 = vpack.c.b16 %v3029_v48, %v3028_v5  ;;  %v1683_v5 = vpack.c.bf16 %v15376_v41, %v15376_v41  ;;  %v1684_v48 = vpack.c.bf16 %v1548_v58, %v1548_v58  ;;  %v1553_v41 = vadd.f32 %v15414_v6, %v15412_v21 }
 0x3ba   : > { %21466 = vst [vmem:[#allocation92_spill] sm:$0xff] %v15714_v52 }
 0x3bb   : > { %21469 = vst [vmem:[#allocation95_spill] sm:$0xff] %v15734_v55  ;;  %v3030_v39 = vunpack.c.l.b16 %v1683_v5  ;;  %v3031_v32 = vunpack.c.l.b16 %v1684_v48 }
 0x3bd   : > { %10822 = vmatmul.msk.bf16.gmra.mxu2 %vm1960_vm0, %v15126_v10  ;;  %10838 = vmatmul.msk.bf16.gmra.mxu3 %vm1960_vm0, %v15126_v10  ;;  %v15764_v2 = vpack.c.b16 %v3031_v32, %v3030_v39  ;;  %v1685_v39 = vpack.c.bf16 %v15406_v17, %v15406_v17  ;;  %v1686_v32 = vpack.c.bf16 %v1553_v41, %v1553_v41 }
 0x3be   : > { %v1556_v17 = vadd.f32 %v15435_v40, %v15433_v23  ;;  %v1558_v41 = vadd.f32 %v15446_v38, %v15444_v22 }
 0x3bf   : > { %v15730_v0 = vpop.f32.mrf.mxu0  ;;  %21474 = vst [vmem:[#allocation100_spill] sm:$0xff] %v15764_v2  ;;  %v3032_v21 = vunpack.c.l.b16 %v1685_v39  ;;  %v3033_v6 = vunpack.c.l.b16 %v1686_v32 }
 0x3c0   : > { %v15726_v1 = vpop.f32.mrf.mxu2  ;;  %v15728_v60 = vpop.f32.mrf.mxu3 }
 0x3c1   : > { %21467 = vst [vmem:[#allocation93_spill] sm:$0xff] %v15726_v1  ;;  %v15732_v52 = vpop.f32.mrf.mxu1 }
 0x3c2   : > { %21468 = vst [vmem:[#allocation94_spill] sm:$0xff] %v15728_v60 }
 0x3c5   : > { %11120 = vmatmul.msk.bf16.gmra.mxu0 %vm1960_vm0, %v15734_v55 }
 0x3c6   : > { %11136 = vmatmul.msk.bf16.gmra.mxu1 %vm1960_vm0, %v15734_v55 }
 0x3c7   : > { %v15746_v29 = vpop.f32.mrf.mxu0 }
 0x3c8   : > { %v15742_v10 = vpop.f32.mrf.mxu2  ;;  %v15744_v11 = vpop.f32.mrf.mxu3 }
 0x3c9   : > { %21470 = vst [vmem:[#allocation96_spill] sm:$0xff] %v15742_v10  ;;  %v15748_v62 = vpop.f32.mrf.mxu1 }
 0x3ca   : > { %21471 = vst [vmem:[#allocation97_spill] sm:$0xff] %v15744_v11 }
 0x3cd   : > { %10935 = vmatmul.msk.bf16.vlgmr.msra.gmra.mxu2 %vm1960_vm0, %v14528_v20  ;;  %10951 = vmatmul.msk.bf16.vlgmr.msra.gmra.mxu3 %vm1960_vm0, %v14528_v20 }
 0x3cf   : > { %v15760_v11 = vpop.f32.mrf.mxu0 }
 0x3d0   : > { %v15756_v60 = vpop.f32.mrf.mxu2  ;;  %v15758_v10 = vpop.f32.mrf.mxu3 }
 0x3d1   : > { %21472 = vst [vmem:[#allocation98_spill] sm:$0xff] %v15756_v60  ;;  %v15762_v1 = vpop.f32.mrf.mxu1 }
 0x3d2   : > { %21473 = vst [vmem:[#allocation99_spill] sm:$0xff] %v15758_v10 }
 0x3d5   : > { %11121 = vmatmul.msk.bf16.gmra.mxu0 %vm1960_vm0, %v15764_v2 }
 0x3d6   : > { %11137 = vmatmul.msk.bf16.gmra.mxu1 %vm1960_vm0, %v15764_v2  ;;  %v15794_v2 = vpack.c.b16 %v3033_v6, %v3032_v21  ;;  %v1687_v6 = vpack.c.bf16 %v1556_v17, %v1556_v17  ;;  %v1561_v17 = vadd.f32 %v15467_v56, %v15465_v63 }
 0x3d7   : > { %v15776_v48 = vpop.f32.mrf.mxu0 }
 0x3d8   : > { %v15772_v58 = vpop.f32.mrf.mxu2  ;;  %v15774_v5 = vpop.f32.mrf.mxu3  ;;  %21479 = vst [vmem:[#allocation105_spill] sm:$0xff] %v15794_v2  ;;  %v3034_v38 = vunpack.c.l.b16 %v1687_v6 }
 0x3d9   : > { %21475 = vst [vmem:[#allocation101_spill] sm:$0xff] %v15772_v58  ;;  %v15778_v10 = vpop.f32.mrf.mxu1 }
 0x3da   : > { %21476 = vst [vmem:[#allocation102_spill] sm:$0xff] %v15774_v5 }
 0x3dd   : > { %10936 = vmatmul.msk.bf16.gmra.mxu2 %vm1960_vm0, %v14542_v37  ;;  %10952 = vmatmul.msk.bf16.gmra.mxu3 %vm1960_vm0, %v14542_v37 }
 0x3df   : > { %v15790_v5 = vpop.f32.mrf.mxu0 }
 0x3e0   : > { %v15786_v60 = vpop.f32.mrf.mxu2  ;;  %v15788_v58 = vpop.f32.mrf.mxu3 }
 0x3e1   : > { %21477 = vst [vmem:[#allocation103_spill] sm:$0xff] %v15786_v60  ;;  %v15792_v49 = vpop.f32.mrf.mxu1  ;;  %v1688_v60 = vpack.c.bf16 %v1558_v41, %v1558_v41  ;;  %v1563_v41 = vadd.f32 %v15478_v8, %v15476_v31 }
 0x3e2   : > { %21478 = vst [vmem:[#allocation104_spill] sm:$0xff] %v15788_v58 }
 0x3e3   : > { %v3035_v22 = vunpack.c.l.b16 %v1688_v60 }
 0x3e5   : > { %11122 = vmatmul.msk.bf16.gmra.mxu0 %vm1960_vm0, %v15794_v2 }
 0x3e6   : > { %11138 = vmatmul.msk.bf16.gmra.mxu1 %vm1960_vm0, %v15794_v2  ;;  %v15824_v2 = vpack.c.b16 %v3035_v22, %v3034_v38  ;;  %v1689_v22 = vpack.c.bf16 %v1561_v17, %v1561_v17  ;;  %v1566_v17 = vadd.f32 %v15511_v42, %v15509_v35 }
 0x3e7   : > { %v15808_v58 = vpop.f32.mrf.mxu0 }
 0x3e8   : > { %v15804_v39 = vpop.f32.mrf.mxu2  ;;  %v15806_v32 = vpop.f32.mrf.mxu3  ;;  %21484 = vst [vmem:[#allocation110_spill] sm:$0xff] %v15824_v2  ;;  %v3036_v8 = vunpack.c.l.b16 %v1689_v22 }
 0x3e9   : > { %21480 = vst [vmem:[#allocation106_spill] sm:$0xff] %v15804_v39  ;;  %v15810_v21 = vpop.f32.mrf.mxu1 }
 0x3ea   : > { %21481 = vst [vmem:[#allocation107_spill] sm:$0xff] %v15806_v32 }
 0x3ed   : > { %10937 = vmatmul.msk.bf16.gmra.mxu2 %vm1960_vm0, %v14556_v54  ;;  %10953 = vmatmul.msk.bf16.gmra.mxu3 %vm1960_vm0, %v14556_v54 }
 0x3ef   : > { %v15820_v39 = vpop.f32.mrf.mxu0 }
 0x3f0   : > { %v15816_v23 = vpop.f32.mrf.mxu2  ;;  %v15818_v40 = vpop.f32.mrf.mxu3 }
 0x3f1   : > { %21482 = vst [vmem:[#allocation108_spill] sm:$0xff] %v15816_v23  ;;  %v15822_v32 = vpop.f32.mrf.mxu1  ;;  %v1690_v23 = vpack.c.bf16 %v1563_v41, %v1563_v41  ;;  %v1568_v41 = vadd.f32 %v15546_v51, %v15544_v36 }
 0x3f2   : > { %21483 = vst [vmem:[#allocation109_spill] sm:$0xff] %v15818_v40 }
 0x3f3   : > { %v3037_v31 = vunpack.c.l.b16 %v1690_v23 }
 0x3f5   : > { %11123 = vmatmul.msk.bf16.gmra.mxu0 %vm1960_vm0, %v15824_v2 }
 0x3f6   : > { %11139 = vmatmul.msk.bf16.gmra.mxu1 %vm1960_vm0, %v15824_v2  ;;  %v15854_v2 = vpack.c.b16 %v3037_v31, %v3036_v8  ;;  %v1691_v31 = vpack.c.bf16 %v1566_v17, %v1566_v17  ;;  %v1571_v17 = vadd.f32 %v15588_v14, %v15586_v26 }
 0x3f7   : > { %v15838_v40 = vpop.f32.mrf.mxu0 }
 0x3f8   : > { %v15834_v60 = vpop.f32.mrf.mxu2  ;;  %v15836_v6 = vpop.f32.mrf.mxu3  ;;  %21489 = vst [vmem:[#allocation115_spill] sm:$0xff] %v15854_v2  ;;  %v3038_v35 = vunpack.c.l.b16 %v1691_v31 }
 0x3f9   : > { %21485 = vst [vmem:[#allocation111_spill] sm:$0xff] %v15834_v60  ;;  %v15840_v38 = vpop.f32.mrf.mxu1 }
 0x3fa   : > { %21486 = vst [vmem:[#allocation112_spill] sm:$0xff] %v15836_v6 }
 0x3fd   : > { %10938 = vmatmul.msk.bf16.gmra.mxu2 %vm1960_vm0, %v14570_v7  ;;  %10954 = vmatmul.msk.bf16.gmra.mxu3 %vm1960_vm0, %v14570_v7 }
 0x3ff   : > { %v15850_v60 = vpop.f32.mrf.mxu0 }
 0x400   : > { %v15846_v56 = vpop.f32.mrf.mxu2  ;;  %v15848_v63 = vpop.f32.mrf.mxu3 }
 0x401   : > { %21487 = vst [vmem:[#allocation113_spill] sm:$0xff] %v15846_v56  ;;  %v1692_v56 = vpack.c.bf16 %v1568_v41, %v1568_v41  ;;  %v1573_v41 = vadd.f32 %v15658_v33, %v15656_v19 }
 0x402   : > { %21488 = vst [vmem:[#allocation114_spill] sm:$0xff] %v15848_v63  ;;  %v15852_v6 = vpop.f32.mrf.mxu1 }
 0x403   : > { %v3039_v42 = vunpack.c.l.b16 %v1692_v56 }
 0x405   : > { %11124 = vmatmul.msk.bf16.gmra.mxu0 %vm1960_vm0, %v15854_v2 }
 0x406   : > { %11140 = vmatmul.msk.bf16.gmra.mxu1 %vm1960_vm0, %v15854_v2 }
 0x407   : > { %v15868_v63 = vpop.f32.mrf.mxu0 }
 0x408   : > { %v15864_v23 = vpop.f32.mrf.mxu2  ;;  %v15866_v22 = vpop.f32.mrf.mxu3 }
 0x409   : > { %21490 = vst [vmem:[#allocation116_spill] sm:$0xff] %v15864_v23 }
 0x40a   : > { %21491 = vst [vmem:[#allocation117_spill] sm:$0xff] %v15866_v22  ;;  %v15870_v8 = vpop.f32.mrf.mxu1  ;;  %v15882_v22 = vpack.c.b16 %v3039_v42, %v3038_v35  ;;  %v1693_v42 = vpack.c.bf16 %v1571_v17, %v1571_v17 }
 0x40c   : > { %21494 = vst [vmem:[#allocation120_spill] sm:$0xff] %v15882_v22  ;;  %v3040_v14 = vunpack.c.l.b16 %v1693_v42 }
 0x40d   : > { %10939 = vmatmul.msk.bf16.gmra.mxu2 %vm1960_vm0, %v14584_v25  ;;  %10955 = vmatmul.msk.bf16.gmra.mxu3 %vm1960_vm0, %v14584_v25 }
 0x410   : > { %v15876_v36 = vpop.f32.mrf.mxu2  ;;  %v15878_v51 = vpop.f32.mrf.mxu3 }
 0x411   : > { %21492 = vst [vmem:[#allocation118_spill] sm:$0xff] %v15876_v36 }
 0x412   : > { %21493 = vst [vmem:[#allocation119_spill] sm:$0xff] %v15878_v51  ;;  %v15880_v23 = vpop.f32.mrf.mxu0  ;;  %v15884_v2 = vpop.f32.mrf.mxu1  ;;  %v1694_v51 = vpack.c.bf16 %v1573_v41, %v1573_v41  ;;  %v1576_v41 = vadd.f32 %v15702_v50, %v15700_v27 }
 0x414   : > { %v3041_v26 = vunpack.c.l.b16 %v1694_v51 }
 0x415   : > { %11125 = vmatmul.msk.bf16.gmra.mxu0 %vm1960_vm0, %v15882_v22 }
 0x416   : > { %11141 = vmatmul.msk.bf16.gmra.mxu1 %vm1960_vm0, %v15882_v22  ;;  %v1578_v22 = vadd.f32 %v15718_v24, %v15716_v13 }
 0x418   : > { %v15894_v56 = vpop.f32.mrf.mxu2  ;;  %v15896_v31 = vpop.f32.mrf.mxu3 }
 0x419   : > { %21495 = vst [vmem:[#allocation121_spill] sm:$0xff] %v15894_v56  ;;  %v15910_v56 = vpack.c.b16 %v3041_v26, %v3040_v14  ;;  %v1695_v14 = vpack.c.bf16 %v1576_v41, %v1576_v41  ;;  %v1696_v26 = vpack.c.bf16 %v1578_v22, %v1578_v22 }
 0x41a   : > { %21496 = vst [vmem:[#allocation122_spill] sm:$0xff] %v15896_v31  ;;  %v15898_v35 = vpop.f32.mrf.mxu0  ;;  %v15900_v36 = vpop.f32.mrf.mxu1 }
 0x41b   : > { %21499 = vst [vmem:[#allocation125_spill] sm:$0xff] %v15910_v56  ;;  %v3042_v27 = vunpack.c.l.b16 %v1695_v14  ;;  %v3043_v50 = vunpack.c.l.b16 %v1696_v26 }
 0x41d   : > { %10940 = vmatmul.msk.bf16.gmra.mxu2 %vm1960_vm0, %v14598_v43  ;;  %10956 = vmatmul.msk.bf16.gmra.mxu3 %vm1960_vm0, %v14598_v43 }
 0x420   : > { %v15906_v19 = vpop.f32.mrf.mxu2  ;;  %v15908_v33 = vpop.f32.mrf.mxu3 }
 0x421   : > { %21497 = vst [vmem:[#allocation123_spill] sm:$0xff] %v15906_v19 }
 0x422   : > { %21498 = vst [vmem:[#allocation124_spill] sm:$0xff] %v15908_v33  ;;  %v15912_v31 = vpop.f32.mrf.mxu0  ;;  %v15914_v17 = vpop.f32.mrf.mxu1 }
 0x425   : > { %11126 = vmatmul.msk.bf16.gmra.mxu0 %vm1960_vm0, %v15910_v56 }
 0x426   : > { %11142 = vmatmul.msk.bf16.gmra.mxu1 %vm1960_vm0, %v15910_v56  ;;  %v1583_v56 = vadd.f32 %v15748_v62, %v15746_v29 }
 0x428   : > { %v15924_v51 = vpop.f32.mrf.mxu2  ;;  %v15926_v42 = vpop.f32.mrf.mxu3 }
 0x429   : > { %21500 = vst [vmem:[#allocation126_spill] sm:$0xff] %v15924_v51  ;;  %v15940_v51 = vpack.c.b16 %v3043_v50, %v3042_v27  ;;  %v1698_v50 = vpack.c.bf16 %v1583_v56, %v1583_v56  ;;  %v1586_v56 = vadd.f32 %v15762_v1, %v15760_v11 }
 0x42a   : > { %21501 = vst [vmem:[#allocation127_spill] sm:$0xff] %v15926_v42  ;;  %v15928_v33 = vpop.f32.mrf.mxu0  ;;  %v15930_v19 = vpop.f32.mrf.mxu1  ;;  %v1581_v42 = vadd.f32 %v15732_v52, %v15730_v0 }
 0x42b   : > { %21504 = vst [vmem:[#allocation130_spill] sm:$0xff] %v15940_v51  ;;  %v3045_v0 = vunpack.c.l.b16 %v1698_v50 }
 0x42c   : > { %v1697_v27 = vpack.c.bf16 %v1581_v42, %v1581_v42  ;;  %v1588_v42 = vadd.f32 %v15778_v10, %v15776_v48 }
 0x42d   : > { %10941 = vmatmul.msk.bf16.gmra.mxu2 %vm1960_vm0, %v14612_v61  ;;  %10957 = vmatmul.msk.bf16.gmra.mxu3 %vm1960_vm0, %v14612_v61 }
 0x42e   : > { %v3044_v52 = vunpack.c.l.b16 %v1697_v27 }
 0x430   : > { %v15936_v13 = vpop.f32.mrf.mxu2  ;;  %v15938_v24 = vpop.f32.mrf.mxu3 }
 0x431   : > { %21502 = vst [vmem:[#allocation128_spill] sm:$0xff] %v15936_v13 }
 0x432   : > { %21503 = vst [vmem:[#allocation129_spill] sm:$0xff] %v15938_v24  ;;  %v3251_v41 = vpop.f32.mrf.mxu0 }
 0x433   : > { %v3340_v22 = vpop.f32.mrf.mxu1 }
 0x435   : > { %11127 = vmatmul.msk.bf16.gmra.mxu0 %vm1960_vm0, %v15940_v51 }
 0x436   : > { %11143 = vmatmul.msk.bf16.gmra.mxu1 %vm1960_vm0, %v15940_v51  ;;  %v15962_v51 = vpack.c.b16 %v3045_v0, %v3044_v52  ;;  %v1699_v52 = vpack.c.bf16 %v1586_v56, %v1586_v56  ;;  %v1700_v0 = vpack.c.bf16 %v1588_v42, %v1588_v42 }
 0x438   : > { %v15950_v14 = vpop.f32.mrf.mxu2  ;;  %v15952_v26 = vpop.f32.mrf.mxu3  ;;  %21509 = vst [vmem:[#allocation135_spill] sm:$0xff] %v15962_v51  ;;  %v3046_v1 = vunpack.c.l.b16 %v1699_v52  ;;  %v3047_v10 = vunpack.c.l.b16 %v1700_v0  ;;  %v1593_v52 = vadd.f32 %v15810_v21, %v15808_v58 }
 0x439   : > { %21505 = vst [vmem:[#allocation131_spill] sm:$0xff] %v15950_v14 }
 0x43a   : > { %21506 = vst [vmem:[#allocation132_spill] sm:$0xff] %v15952_v26  ;;  %v3253_v24 = vpop.f32.mrf.mxu0  ;;  %v15982_v55 = vpack.c.b16 %v3047_v10, %v3046_v1 }
 0x43b   : > { %v3342_v13 = vpop.f32.mrf.mxu1 }
 0x43d   : > { %10942 = vmatmul.msk.bf16.gmra.mxu2 %vm1960_vm0, %v14626_v15  ;;  %10958 = vmatmul.msk.bf16.gmra.mxu3 %vm1960_vm0, %v14626_v15  ;;  %v1591_v15 = vadd.f32 %v15792_v49, %v15790_v5 }
 0x440   : > { %v15958_v29 = vpop.f32.mrf.mxu2  ;;  %v15960_v62 = vpop.f32.mrf.mxu3 }
 0x441   : > { %21507 = vst [vmem:[#allocation133_spill] sm:$0xff] %v15958_v29 }
 0x442   : > { %21508 = vst [vmem:[#allocation134_spill] sm:$0xff] %v15960_v62  ;;  %v3256_v14 = vpop.f32.mrf.mxu0 }
 0x443   : > { %v3345_v26 = vpop.f32.mrf.mxu1 }
 0x445   : > { %11128 = vmatmul.msk.bf16.gmra.mxu0 %vm1960_vm0, %v15962_v51 }
 0x446   : > { %11144 = vmatmul.msk.bf16.gmra.mxu1 %vm1960_vm0, %v15962_v51 }
 0x448   : > { %v15972_v27 = vpop.f32.mrf.mxu2  ;;  %v15974_v50 = vpop.f32.mrf.mxu3 }
 0x449   : > { %21510 = vst [vmem:[#allocation136_spill] sm:$0xff] %v15972_v27 }
 0x44a   : > { %21511 = vst [vmem:[#allocation137_spill] sm:$0xff] %v15974_v50  ;;  %v3258_v62 = vpop.f32.mrf.mxu0 }
 0x44b   : > { %v3347_v29 = vpop.f32.mrf.mxu1 }
 0x44d   : > { %10943 = vmatmul.msk.bf16.gmra.mxu2 %vm1960_vm0, %v14640_v34  ;;  %10959 = vmatmul.msk.bf16.gmra.mxu3 %vm1960_vm0, %v14640_v34 }
 0x450   : > { %v2622_v11 = vpop.f32.mrf.mxu2  ;;  %v2711_v48 = vpop.f32.mrf.mxu3 }
 0x451   : > { %v2623_v51 = vadd.f32 %v2622_v11, %v14950_v45  ;;  %v2712_v27 = vadd.f32 %v2711_v48, %v14952_v46 }
 0x452   : > { %v3261_v50 = vpop.f32.mrf.mxu0 }
 0x453   : > { %v15984_v56 = vadd.f32 %v3251_v41, %v2623_v51  ;;  %v15986_v42 = vadd.f32 %v3340_v22, %v2712_v27  ;;  %v3350_v12 = vpop.f32.mrf.mxu1  ;;  %v1701_v22 = vpack.c.bf16 %v1591_v15, %v1591_v15  ;;  %v1702_v27 = vpack.c.bf16 %v1593_v52, %v1593_v52 }
 0x455   : > { %11129 = vmatmul.msk.bf16.gmra.mxu0 %vm1960_vm0, %v15982_v55  ;;  %v3048_v21 = vunpack.c.l.b16 %v1701_v22  ;;  %v3049_v1 = vunpack.c.l.b16 %v1702_v27 }
 0x456   : > { %11145 = vmatmul.msk.bf16.gmra.mxu1 %vm1960_vm0, %v15982_v55 }
 0x458   : > { %v2624_v45 = vpop.f32.mrf.mxu2  ;;  %v2713_v46 = vpop.f32.mrf.mxu3 }
 0x459   : > { %v2625_v51 = vadd.f32 %v2624_v45, %v14954_v57  ;;  %v2714_v41 = vadd.f32 %v2713_v46, %v14956_v59  ;;  %v1596_v45 = vadd.f32 %v15822_v32, %v15820_v39  ;;  %v1598_v46 = vadd.f32 %v15840_v38, %v15838_v40 }
 0x45a   : > { %v3263_v5 = vpop.f32.mrf.mxu0 }
 0x45b   : > { %v15998_v0 = vadd.f32 %v3253_v24, %v2625_v51  ;;  %v16000_v49 = vadd.f32 %v3342_v13, %v2714_v41  ;;  %v3352_v58 = vpop.f32.mrf.mxu1  ;;  %v16008_v24 = vpack.c.b16 %v3049_v1, %v3048_v21  ;;  %v1703_v51 = vpack.c.bf16 %v1596_v45, %v1596_v45 }
 0x45c   : > { %v1704_v41 = vpack.c.bf16 %v1598_v46, %v1598_v46  ;;  %v1603_v45 = vadd.f32 %v15870_v8, %v15868_v63  ;;  %v21512_v8 = vld [vmem:[#allocation7_spill] sm:$0xff] }
 0x45d   : > { %10944 = vmatmul.msk.bf16.gmra.mxu2 %vm1960_vm0, %v14654_v53  ;;  %10960 = vmatmul.msk.bf16.gmra.mxu3 %vm1960_vm0, %v14654_v53  ;;  %v3050_v38 = vunpack.c.l.b16 %v1703_v51  ;;  %v21513_v51 = vld [vmem:[#allocation12_spill] sm:$0xff] }
 0x45e   : > { %v3051_v27 = vunpack.c.l.b16 %v1704_v41 }
 0x460   : > { %v2627_v10 = vpop.f32.mrf.mxu2  ;;  %v2716_v57 = vpop.f32.mrf.mxu3 }
 0x461   : > { %v2628_v59 = vadd.f32 %v2627_v10, %v14964_v3  ;;  %v2717_v15 = vadd.f32 %v2716_v57, %v14966_v4 }
 0x462   : > { %v3266_v48 = vpop.f32.mrf.mxu0 }
 0x463   : > { %v16010_v13 = vadd.f32 %v3256_v14, %v2628_v59  ;;  %v16012_v11 = vadd.f32 %v3345_v26, %v2717_v15  ;;  %v3355_v52 = vpop.f32.mrf.mxu1  ;;  %v1601_v15 = vadd.f32 %v15852_v6, %v15850_v60 }
 0x465   : > { %11130 = vmatmul.msk.bf16.gmra.mxu0 %vm1960_vm0, %v16008_v24  ;;  %v1705_v46 = vpack.c.bf16 %v1601_v15, %v1601_v15  ;;  %v1608_v15 = vadd.f32 %v15900_v36, %v15898_v35 }
 0x466   : > { %11146 = vmatmul.msk.bf16.gmra.mxu1 %vm1960_vm0, %v16008_v24 }
 0x468   : > { %v2629_v3 = vpop.f32.mrf.mxu2  ;;  %v2718_v4 = vpop.f32.mrf.mxu3 }
 0x469   : > { %v2630_v14 = vadd.f32 %v2629_v3, %v14968_v16  ;;  %v2719_v26 = vadd.f32 %v2718_v4, %v14970_v18  ;;  %v1706_v3 = vpack.c.bf16 %v1603_v45, %v1603_v45 }
 0x46a   : > { %v3268_v32 = vpop.f32.mrf.mxu0 }
 0x46b   : > { %v16024_v22 = vadd.f32 %v3258_v62, %v2630_v14  ;;  %v16026_v39 = vadd.f32 %v3347_v29, %v2719_v26  ;;  %v3357_v40 = vpop.f32.mrf.mxu1  ;;  %v16034_v62 = vpack.c.b16 %v3051_v27, %v3050_v38  ;;  %v3052_v14 = vunpack.c.l.b16 %v1705_v46 }
 0x46c   : > { %v1708_v46 = vpack.c.bf16 %v1608_v15, %v1608_v15 }
 0x46d   : > { %10945 = vmatmul.msk.bf16.gmra.mxu2 %vm1960_vm0, %v14668_v9  ;;  %10961 = vmatmul.msk.bf16.gmra.mxu3 %vm1960_vm0, %v14668_v9 }
 0x470   : > { %v2632_v21 = vpop.f32.mrf.mxu2  ;;  %v2721_v16 = vpop.f32.mrf.mxu3 }
 0x471   : > { %v2633_v18 = vadd.f32 %v2632_v21, %v14978_v28  ;;  %v2722_v1 = vadd.f32 %v2721_v16, %v14980_v30 }
 0x472   : > { %v3271_v57 = vpop.f32.mrf.mxu0 }
 0x473   : > { %v16036_v29 = vadd.f32 %v3261_v50, %v2633_v18  ;;  %v16038_v10 = vadd.f32 %v3350_v12, %v2722_v1  ;;  %v3360_v59 = vpop.f32.mrf.mxu1  ;;  %v1606_v1 = vadd.f32 %v15884_v2, %v15880_v23  ;;  %v21517_v23 = vld [vmem:[#allocation8_spill] sm:$0xff] }
 0x475   : > { %11131 = vmatmul.msk.bf16.gmra.mxu0 %vm1960_vm0, %v16034_v62 }
 0x476   : > { %11147 = vmatmul.msk.bf16.gmra.mxu1 %vm1960_vm0, %v16034_v62 }
 0x478   : > { %v2634_v28 = vpop.f32.mrf.mxu2  ;;  %v2723_v30 = vpop.f32.mrf.mxu3 }
 0x479   : > { %v2635_v50 = vadd.f32 %v2634_v28, %v14982_v44  ;;  %v2724_v12 = vadd.f32 %v2723_v30, %v14984_v47  ;;  %v3053_v44 = vunpack.c.l.b16 %v1706_v3  ;;  %v21516_v30 = vld [vmem:[#allocation15_spill] sm:$0xff] }
 0x47a   : > { %v16054_v6 = vpop.f32.mrf.mxu0 }
 0x47b   : > { %v16050_v4 = vadd.f32 %v3263_v5, %v2635_v50  ;;  %v16052_v60 = vadd.f32 %v3352_v58, %v2724_v12  ;;  %v16056_v63 = vpop.f32.mrf.mxu1  ;;  %v21514_v5 = vld [vmem:[#allocation13_spill] sm:$0xff]  ;;  %v16064_v58 = vpack.c.b16 %v3053_v44, %v3052_v14  ;;  %v1707_v12 = vpack.c.bf16 %v1606_v1, %v1606_v1  ;;  %v21520_v1 = vld [vmem:[#allocation16_spill] sm:$0xff] }
 0x47c   : > { %v10929_v14 = vld [vmem:[%s21382_s1 + $0xa8] sm:$0xf] }
 0x47d   : > { %10946 = vmatmul.msk.bf16.gmra.mxu2 %vm1960_vm0, %v21512_v8  ;;  %10962 = vmatmul.msk.bf16.gmra.mxu3 %vm1960_vm0, %v21512_v8  ;;  %v3054_v44 = vunpack.c.l.b16 %v1707_v12  ;;  %v1613_v12 = vadd.f32 %v15930_v19, %v15928_v33  ;;  %v13629_v19 = vld [vmem:[%s21382_s1 + $0x8c] sm:$0xf] }
 0x480   : > { %v2637_v26 = vpop.f32.mrf.mxu2  ;;  %v2726_v47 = vpop.f32.mrf.mxu3 }
 0x481   : > { %v2638_v41 = vadd.f32 %v2637_v26, %v21513_v51  ;;  %v2727_v38 = vadd.f32 %v2726_v47, %v21514_v5  ;;  %v3055_v26 = vunpack.c.l.b16 %v1708_v46  ;;  %v10931_v51 = vld [vmem:[%s21382_s1 + $0xb8] sm:$0xf0] }
 0x482   : > { %v16070_v16 = vpop.f32.mrf.mxu0 }
 0x483   : > { %v16066_v27 = vadd.f32 %v3266_v48, %v2638_v41  ;;  %v16068_v21 = vadd.f32 %v3355_v52, %v2727_v38  ;;  %v16072_v18 = vpop.f32.mrf.mxu1  ;;  %v21515_v52 = vld [vmem:[#allocation14_spill] sm:$0xff] }
 0x485   : > { %11132 = vmatmul.msk.bf16.gmra.mxu0 %vm1960_vm0, %v16064_v58 }
 0x486   : > { %11148 = vmatmul.msk.bf16.gmra.mxu1 %vm1960_vm0, %v16064_v58 }
 0x488   : > { %v2639_v48 = vpop.f32.mrf.mxu2  ;;  %v2728_v45 = vpop.f32.mrf.mxu3 }
 0x489   : > { %v2640_v28 = vadd.f32 %v2639_v48, %v21515_v52  ;;  %v2729_v50 = vadd.f32 %v2728_v45, %v21516_v30  ;;  %v21521_v48 = vld [vmem:[#allocation17_spill] sm:$0xff]  ;;  %v16110_v52 = vpack.c.b16 %v3055_v26, %v3054_v44  ;;  %v1710_v26 = vpack.c.bf16 %v1613_v12, %v1613_v12  ;;  %v13623_v12 = vld [vmem:[%s21382_s1 + $0x54] sm:$0xf0] }
 0x48a   : > { %v16092_v36 = vpop.f32.mrf.mxu0 }
 0x48b   : > { %v16084_v3 = vadd.f32 %v3268_v32, %v2640_v28  ;;  %v16086_v2 = vadd.f32 %v3357_v40, %v2729_v50  ;;  %21518 = vst [vmem:[#allocation7_spill] sm:$0xff] %v16092_v36  ;;  %v16094_v35 = vpop.f32.mrf.mxu1  ;;  %v13635_v32 = vld [vmem:[%s21382_s1 + $0xb4] sm:$0xf0]  ;;  %v13633_v40 = vld [vmem:[%s21382_s1 + $0xac] sm:$0xf]  ;;  %v1611_v50 = vadd.f32 %v15914_v17, %v15912_v31 }
 0x48c   : > { %21519 = vst [vmem:[#allocation12_spill] sm:$0xff] %v16094_v35  ;;  %v10930_v47 = vor.u32 %v13635_v32, %v10929_v14  ;;  %v10934_v41 = vor.u32 %v13633_v40, %v10931_v51  ;;  %v13631_v31 = vld [vmem:[%s21382_s1 + $0x94] sm:$0xf0]  ;;  %v10915_v32 = vld [vmem:[%s21382_s1 + $0x98] sm:$0xf0] }
 0x48d   : > { %10947 = vmatmul.msk.bf16.gmra.mxu2 %vm1960_vm0, %v21517_v23  ;;  %10963 = vmatmul.msk.bf16.gmra.mxu3 %vm1960_vm0, %v21517_v23  ;;  %21522 = vst [vmem:[#allocation13_spill] sm:$0xff] %v16110_v52  ;;  %v10918_v40 = vor.u32 %v13629_v19, %v10915_v32  ;;  %v1709_v44 = vpack.c.bf16 %v1611_v50, %v1611_v50  ;;  %v13627_v51 = vld [vmem:[%s21382_s1 + $0x74] sm:$0xf0]  ;;  %v10881_v50 = vld [vmem:[%s21382_s1 + $0x48] sm:$0xf] }
 0x48e   : > { %2793 = vmatpush.bf16.msrb.mxu2 %v10930_v47  ;;  %2882 = vmatpush.bf16.msrb.mxu3 %v10934_v41  ;;  %v10897_v47 = vld [vmem:[%s21382_s1 + $0x68] sm:$0xf]  ;;  %v13625_v41 = vld [vmem:[%s21382_s1 + $0x6c] sm:$0xf]  ;;  %v10883_v32 = vld [vmem:[%s21382_s1 + $0x58] sm:$0xf0] }
 0x48f   : > { %v13665_v35 = vld [vmem:[%s21382_s1 + $0x1ac] sm:$0xf] }
 0x490   : > { %v2642_v5 = vpop.f32.mrf.mxu2  ;;  %v2731_v38 = vpop.f32.mrf.mxu3 }
 0x491   : > { %v2643_v15 = vadd.f32 %v2642_v5, %v21520_v1  ;;  %v2732_v45 = vadd.f32 %v2731_v38, %v21521_v48  ;;  %v10898_v5 = vor.u32 %v13627_v51, %v10897_v47  ;;  %v10899_v38 = vld [vmem:[%s21382_s1 + $0x78] sm:$0xf0]  ;;  %v21523_v1 = vld [vmem:[#allocation9_spill] sm:$0xff]  ;;  %v3056_v48 = vunpack.c.l.b16 %v1709_v44 }
 0x492   : > { %v16122_v46 = vpop.f32.mrf.mxu0  ;;  %2883 = vmatpush.bf16.msrb.mxu3 %v10918_v40  ;;  %v21524_v40 = vld [vmem:[#allocation20_spill] sm:$0xff] }
 0x493   : > { %v16112_v28 = vadd.f32 %v3271_v57, %v2643_v15  ;;  %v16114_v30 = vadd.f32 %v3360_v59, %v2732_v45  ;;  %v16124_v14 = vpop.f32.mrf.mxu1  ;;  %v10913_v57 = vld [vmem:[%s21382_s1 + $0x88] sm:$0xf]  ;;  %v10902_v15 = vor.u32 %v13625_v41, %v10899_v38  ;;  %v3057_v45 = vunpack.c.l.b16 %v1710_v26 }
 0x494   : > { %v10914_v59 = vor.u32 %v13631_v31, %v10913_v57  ;;  %v13621_v57 = vld [vmem:[%s21382_s1 + $0x4c] sm:$0xf] }
 0x495   : > { %11133 = vmatmul.msk.bf16.gmra.mxu0 %vm1960_vm0, %v16110_v52  ;;  %v21525_v26 = vld [vmem:[#allocation21_spill] sm:$0xff]  ;;  %v16178_v38 = vpack.c.b16 %v3057_v45, %v3056_v48 }
 0x496   : > { %11149 = vmatmul.msk.bf16.gmra.mxu1 %vm1960_vm0, %v16110_v52  ;;  %2794 = vmatpush.bf16.msrb.mxu2 %v10914_v59  ;;  %v10882_v59 = vor.u32 %v13623_v12, %v10881_v50  ;;  %v10865_v12 = vld [vmem:[%s21382_s1 + $0x28] sm:$0xf]  ;;  %v13617_v48 = vld [vmem:[%s21382_s1 + $0x2c] sm:$0xf] }
 0x497   : > { %2884 = vmatpush.bf16.msrb.mxu3 %v10902_v15  ;;  %21528 = vst [vmem:[#allocation8_spill] sm:$0xff] %v16178_v38  ;;  %v13673_v52 = vld [vmem:[%s21382_s1 + $0x1ec] sm:$0xf] }
 0x498   : > { %v16137_v33 = vpop.f32.mrf.mxu2  ;;  %v16139_v17 = vpop.f32.mrf.mxu3 }
 0x49a   : > { %2795 = vmatpush.bf16.msrb.mxu2 %v10898_v5  ;;  %v16174_v51 = vpop.f32.mrf.mxu0  ;;  %v10886_v5 = vor.u32 %v13621_v57, %v10883_v32  ;;  %v10849_v57 = vld [vmem:[%s21382_s1 + $0x8] sm:$0xf] }
 0x49b   : > { %21526 = vst [vmem:[#allocation14_spill] sm:$0xff] %v16174_v51  ;;  %v16176_v41 = vpop.f32.mrf.mxu1  ;;  %v21540_v51 = vld [vmem:[#allocation11_spill] sm:$0xff] }
 0x49c   : > { %21527 = vst [vmem:[#allocation15_spill] sm:$0xff] %v16176_v41  ;;  %2885 = vmatpush.bf16.msrb.mxu3 %v10886_v5 }
 0x49d   : > { %10948 = vmatmul.msk.bf16.gmra.mxu2 %vm1960_vm0, %v21523_v1  ;;  %10964 = vmatmul.msk.bf16.gmra.mxu3 %vm1960_vm0, %v21523_v1 }
 0x49e   : > { %2796 = vmatpush.bf16.msrb.mxu2 %v10882_v59  ;;  %v13613_v59 = vld [vmem:[%s21382_s1 + $0xc] sm:$0xf] }
 0x4a0   : > { %v2647_v31 = vpop.f32.mrf.mxu2  ;;  %v2736_v19 = vpop.f32.mrf.mxu3 }
 0x4a1   : > { %v2648_v44 = vadd.f32 %v2647_v31, %v21524_v40  ;;  %v2737_v47 = vadd.f32 %v2736_v19, %v21525_v26  ;;  %v13619_v31 = vld [vmem:[%s21382_s1 + $0x34] sm:$0xf0]  ;;  %v10851_v26 = vld [vmem:[%s21382_s1 + $0x18] sm:$0xf0] }
 0x4a2   : > { %v10866_v45 = vor.u32 %v13619_v31, %v10865_v12  ;;  %v13615_v19 = vld [vmem:[%s21382_s1 + $0x14] sm:$0xf0]  ;;  %v3286_v5 = vpop.f32.mrf.mxu0  ;;  %v21531_v31 = vld [vmem:[#allocation10_spill] sm:$0xff] }
 0x4a3   : > { %v16181_v15 = vadd.f32 %v16070_v16, %v2648_v44  ;;  %v16184_v50 = vadd.f32 %v16072_v18, %v2737_v47  ;;  %v10867_v16 = vld [vmem:[%s21382_s1 + $0x38] sm:$0xf0]  ;;  %v10850_v44 = vor.u32 %v13615_v19, %v10849_v57  ;;  %v10854_v47 = vor.u32 %v13613_v59, %v10851_v26  ;;  %v3375_v12 = vpop.f32.mrf.mxu1  ;;  %v21533_v57 = vld [vmem:[#allocation25_spill] sm:$0xff] }
 0x4a4   : > { %v10870_v18 = vor.u32 %v13617_v48, %v10867_v16  ;;  %2797 = vmatpush.bf16.msrb.mxu2 %v10866_v45  ;;  %v21532_v16 = vld [vmem:[#allocation24_spill] sm:$0xff] }
 0x4a5   : > { %21529 = vst [vmem:[#allocation16_spill] sm:$0xff] %v16184_v50  ;;  %11134 = vmatmul.msk.bf16.gmra.mxu0 %vm1960_vm0, %v16178_v38 }
 0x4a6   : > { %11150 = vmatmul.msk.bf16.gmra.mxu1 %vm1960_vm0, %v16178_v38  ;;  %2886 = vmatpush.bf16.msrb.mxu3 %v10870_v18 }
 0x4a8   : > { %v16211_v32 = vpop.f32.mrf.mxu2  ;;  %v16213_v40 = vpop.f32.mrf.mxu3  ;;  %2798 = vmatpush.bf16.msrb.mxu2 %v10850_v44 }
 0x4a9   : > { %21530 = vst [vmem:[#allocation17_spill] sm:$0xff] %v16213_v40  ;;  %v21652_v40 = vld [vmem:[#allocation67_spill] sm:$0xff] }
 0x4aa   : > { %2887 = vmatpush.bf16.msrb.mxu3 %v10854_v47  ;;  %v16230_v44 = vpop.f32.mrf.mxu0 }
 0x4ab   : > { %21536 = vst [vmem:[#allocation21_spill] sm:$0xff] %v16230_v44  ;;  %v16232_v26 = vpop.f32.mrf.mxu1 }
 0x4ac   : > { %21537 = vst [vmem:[#allocation10_spill] sm:$0xff] %v16232_v26 }
 0x4ad   : > { %10949 = vmatmul.msk.bf16.gmra.mxu2 %vm1960_vm0, %v21531_v31  ;;  %10965 = vmatmul.msk.bf16.gmra.mxu3 %vm1960_vm0, %v21531_v31 }
 0x4b0   : > { %v2652_v48 = vpop.f32.mrf.mxu2  ;;  %v2741_v45 = vpop.f32.mrf.mxu3 }
 0x4b1   : > { %v2653_v18 = vadd.f32 %v2652_v48, %v21532_v16  ;;  %v2742_v19 = vadd.f32 %v2741_v45, %v21533_v57  ;;  %v21542_v57 = vld [vmem:[#allocation29_spill] sm:$0xff] }
 0x4b2   : > { %v3291_v48 = vpop.f32.mrf.mxu0 }
 0x4b3   : > { %v16225_v38 = vadd.f32 %v16122_v46, %v2653_v18  ;;  %v16228_v59 = vadd.f32 %v16124_v14, %v2742_v19  ;;  %v3380_v46 = vpop.f32.mrf.mxu1  ;;  %v21541_v14 = vld [vmem:[#allocation28_spill] sm:$0xff] }
 0x4b5   : > { %21534 = vst [vmem:[#allocation9_spill] sm:$0xff] %v16225_v38 }
 0x4b6   : > { %21535 = vst [vmem:[#allocation20_spill] sm:$0xff] %v16228_v59 }
 0x4b8   : > { %v16234_v47 = vpop.f32.mrf.mxu2  ;;  %v16236_v41 = vpop.f32.mrf.mxu3 }
 0x4b9   : > { %21538 = vst [vmem:[#allocation24_spill] sm:$0xff] %v16234_v47 }
 0x4ba   : > { %21539 = vst [vmem:[#allocation25_spill] sm:$0xff] %v16236_v41  ;;  %v16252_v59 = vpop.f32.mrf.mxu0 }
 0x4bb   : > { %21547 = vst [vmem:[#allocation139_spill] sm:$0xff] %v16252_v59  ;;  %v16254_v38 = vpop.f32.mrf.mxu1 }
 0x4bc   : > { %21548 = vst [vmem:[#allocation140_spill] sm:$0xff] %v16254_v38 }
 0x4bd   : > { %10950 = vmatmul.msk.bf16.gmra.mxu2 %vm1960_vm0, %v21540_v51  ;;  %10966 = vmatmul.msk.bf16.gmra.mxu3 %vm1960_vm0, %v21540_v51 }
 0x4c0   : > { %v2657_v45 = vpop.f32.mrf.mxu2  ;;  %v2746_v16 = vpop.f32.mrf.mxu3 }
 0x4c1   : > { %v2658_v18 = vadd.f32 %v2657_v45, %v21541_v14  ;;  %v2747_v19 = vadd.f32 %v2746_v16, %v21542_v57 }
 0x4c3   : > { %v16244_v44 = vadd.f32 %v3286_v5, %v2658_v18  ;;  %v16246_v26 = vadd.f32 %v3375_v12, %v2747_v19  ;;  %v21549_v5 = vld [vmem:[#allocation32_spill] sm:$0xff]  ;;  %v21550_v12 = vld [vmem:[#allocation33_spill] sm:$0xff]  ;;  %v3385_v59 = vpop.f32.mrf.mxu1 }
 0x4c5   : > { %21543 = vst [vmem:[#allocation11_spill] sm:$0xff] %v16244_v44  ;;  %v13675_v44 = vld [vmem:[%s21382_s1 + $0x1f4] sm:$0xf0] }
 0x4c6   : > { %21544 = vst [vmem:[#allocation28_spill] sm:$0xff] %v16246_v26 }
 0x4c8   : > { %v16248_v47 = vpop.f32.mrf.mxu2  ;;  %v16250_v41 = vpop.f32.mrf.mxu3 }
 0x4c9   : > { %21545 = vst [vmem:[#allocation29_spill] sm:$0xff] %v16248_v47 }
 0x4ca   : > { %21546 = vst [vmem:[#allocation138_spill] sm:$0xff] %v16250_v41  ;;  %v3296_v41 = vpop.f32.mrf.mxu0 }
 0x4cd   : > { %10967 = vmatmul.msk.bf16.vlgmr.msrb.gmra.mxu2 %vm1960_vm0, %v14528_v20  ;;  %10983 = vmatmul.msk.bf16.vlgmr.msrb.gmra.mxu3 %vm1960_vm0, %v14528_v20 }
 0x4d0   : > { %v2662_v45 = vpop.f32.mrf.mxu2  ;;  %v2751_v16 = vpop.f32.mrf.mxu3 }
 0x4d1   : > { %v2663_v14 = vadd.f32 %v2662_v45, %v21549_v5  ;;  %v2752_v18 = vadd.f32 %v2751_v16, %v21550_v12  ;;  %v16276_v45 = vpop.f32.mrf.mxu1 }
 0x4d2   : > { %v16274_v20 = vpop.f32.mrf.mxu0  ;;  %21556 = vst [vmem:[#allocation144_spill] sm:$0xff] %v16276_v45 }
 0x4d3   : > { %v16262_v57 = vadd.f32 %v3291_v48, %v2663_v14  ;;  %v16264_v19 = vadd.f32 %v3380_v46, %v2752_v18  ;;  %21555 = vst [vmem:[#allocation143_spill] sm:$0xff] %v16274_v20  ;;  %v21557_v46 = vld [vmem:[#allocation36_spill] sm:$0xff]  ;;  %v21558_v14 = vld [vmem:[#allocation37_spill] sm:$0xff] }
 0x4d5   : > { %21551 = vst [vmem:[#allocation32_spill] sm:$0xff] %v16262_v57 }
 0x4d6   : > { %21552 = vst [vmem:[#allocation33_spill] sm:$0xff] %v16264_v19 }
 0x4d8   : > { %v16266_v47 = vpop.f32.mrf.mxu2  ;;  %v16268_v38 = vpop.f32.mrf.mxu3 }
 0x4d9   : > { %21553 = vst [vmem:[#allocation141_spill] sm:$0xff] %v16266_v47  ;;  %v3390_v19 = vpop.f32.mrf.mxu1 }
 0x4da   : > { %21554 = vst [vmem:[#allocation142_spill] sm:$0xff] %v16268_v38  ;;  %v3301_v38 = vpop.f32.mrf.mxu0 }
 0x4dd   : > { %10968 = vmatmul.msk.bf16.gmra.mxu2 %vm1960_vm0, %v14542_v37  ;;  %10984 = vmatmul.msk.bf16.gmra.mxu3 %vm1960_vm0, %v14542_v37 }
 0x4e0   : > { %v2667_v48 = vpop.f32.mrf.mxu2  ;;  %v2756_v16 = vpop.f32.mrf.mxu3 }
 0x4e1   : > { %v2668_v5 = vadd.f32 %v2667_v48, %v21557_v46  ;;  %v2757_v12 = vadd.f32 %v2756_v16, %v21558_v14  ;;  %v21563_v46 = vld [vmem:[#allocation40_spill] sm:$0xff]  ;;  %v16296_v14 = vpop.f32.mrf.mxu1 }
 0x4e3   : > { %v16280_v18 = vadd.f32 %v3296_v41, %v2668_v5  ;;  %v16282_v47 = vadd.f32 %v3385_v59, %v2757_v12  ;;  %v21564_v41 = vld [vmem:[#allocation41_spill] sm:$0xff]  ;;  %v16294_v59 = vpop.f32.mrf.mxu0 }
 0x4e4   : > { %21565 = vst [vmem:[#allocation40_spill] sm:$0xff] %v16294_v59 }
 0x4e5   : > { %21559 = vst [vmem:[#allocation36_spill] sm:$0xff] %v16280_v18  ;;  %v11081_v18 = vld [vmem:[%s21382_s1 + $0x1e8] sm:$0xf] }
 0x4e6   : > { %21560 = vst [vmem:[#allocation37_spill] sm:$0xff] %v16282_v47  ;;  %v13679_v47 = vld [vmem:[%s21382_s1 + $0x214] sm:$0xf0] }
 0x4e7   : > { %21566 = vst [vmem:[#allocation41_spill] sm:$0xff] %v16296_v14 }
 0x4e8   : > { %v16284_v57 = vpop.f32.mrf.mxu2  ;;  %v16286_v26 = vpop.f32.mrf.mxu3 }
 0x4e9   : > { %21561 = vst [vmem:[#allocation145_spill] sm:$0xff] %v16284_v57 }
 0x4ea   : > { %21562 = vst [vmem:[#allocation146_spill] sm:$0xff] %v16286_v26 }
 0x4eb   : > { %v3306_v57 = vpop.f32.mrf.mxu0 }
 0x4ed   : > { %10969 = vmatmul.msk.bf16.gmra.mxu2 %vm1960_vm0, %v14556_v54  ;;  %10985 = vmatmul.msk.bf16.gmra.mxu3 %vm1960_vm0, %v14556_v54  ;;  %v3395_v54 = vpop.f32.mrf.mxu1 }
 0x4f0   : > { %v2672_v37 = vpop.f32.mrf.mxu2  ;;  %v2761_v48 = vpop.f32.mrf.mxu3 }
 0x4f1   : > { %v2673_v16 = vadd.f32 %v2672_v37, %v21563_v46  ;;  %v2762_v5 = vadd.f32 %v2761_v48, %v21564_v41  ;;  %v21571_v46 = vld [vmem:[#allocation44_spill] sm:$0xff] }
 0x4f3   : > { %v16298_v12 = vadd.f32 %v3301_v38, %v2673_v16  ;;  %v16300_v45 = vadd.f32 %v3390_v19, %v2762_v5  ;;  %v21572_v38 = vld [vmem:[#allocation45_spill] sm:$0xff]  ;;  %v16316_v14 = vpop.f32.mrf.mxu0 }
 0x4f4   : > { %21575 = vst [vmem:[#allocation151_spill] sm:$0xff] %v16316_v14 }
 0x4f5   : > { %21567 = vst [vmem:[#allocation147_spill] sm:$0xff] %v16298_v12  ;;  %v16318_v59 = vpop.f32.mrf.mxu1  ;;  %v11097_v12 = vld [vmem:[%s21382_s1 + $0x208] sm:$0xf] }
 0x4f6   : > { %21568 = vst [vmem:[#allocation148_spill] sm:$0xff] %v16300_v45 }
 0x4f7   : > { %21576 = vst [vmem:[#allocation152_spill] sm:$0xff] %v16318_v59 }
 0x4f8   : > { %v16302_v20 = vpop.f32.mrf.mxu2  ;;  %v16304_v26 = vpop.f32.mrf.mxu3 }
 0x4f9   : > { %21569 = vst [vmem:[#allocation149_spill] sm:$0xff] %v16302_v20 }
 0x4fa   : > { %21570 = vst [vmem:[#allocation150_spill] sm:$0xff] %v16304_v26 }
 0x4fd   : > { %10970 = vmatmul.msk.bf16.gmra.mxu2 %vm1960_vm0, %v14570_v7  ;;  %10986 = vmatmul.msk.bf16.gmra.mxu3 %vm1960_vm0, %v14570_v7  ;;  %v3311_v7 = vpop.f32.mrf.mxu0 }
 0x500   : > { %v2677_v37 = vpop.f32.mrf.mxu2  ;;  %v2766_v48 = vpop.f32.mrf.mxu3 }
 0x501   : > { %v2678_v41 = vadd.f32 %v2677_v37, %v21571_v46  ;;  %v2767_v16 = vadd.f32 %v2766_v48, %v21572_v38  ;;  %v3400_v37 = vpop.f32.mrf.mxu1 }
 0x503   : > { %v16312_v19 = vadd.f32 %v3306_v57, %v2678_v41  ;;  %v16314_v5 = vadd.f32 %v3395_v54, %v2767_v16  ;;  %v21579_v54 = vld [vmem:[#allocation48_spill] sm:$0xff]  ;;  %v21580_v41 = vld [vmem:[#allocation49_spill] sm:$0xff] }
 0x505   : > { %21573 = vst [vmem:[#allocation44_spill] sm:$0xff] %v16312_v19 }
 0x506   : > { %21574 = vst [vmem:[#allocation45_spill] sm:$0xff] %v16314_v5  ;;  %v11115_v5 = vld [vmem:[%s21382_s1 + $0x238] sm:$0xf0] }
 0x508   : > { %v16320_v26 = vpop.f32.mrf.mxu2  ;;  %v16322_v20 = vpop.f32.mrf.mxu3 }
 0x509   : > { %21577 = vst [vmem:[#allocation153_spill] sm:$0xff] %v16320_v26 }
 0x50a   : > { %21578 = vst [vmem:[#allocation154_spill] sm:$0xff] %v16322_v20 }
 0x50d   : > { %10971 = vmatmul.msk.bf16.gmra.mxu2 %vm1960_vm0, %v14584_v25  ;;  %10987 = vmatmul.msk.bf16.gmra.mxu3 %vm1960_vm0, %v14584_v25 }
 0x510   : > { %v2682_v57 = vpop.f32.mrf.mxu2  ;;  %v2771_v48 = vpop.f32.mrf.mxu3 }
 0x511   : > { %v2683_v46 = vadd.f32 %v2682_v57, %v21579_v54  ;;  %v2772_v38 = vadd.f32 %v2771_v48, %v21580_v41 }
 0x513   : > { %v16330_v16 = vadd.f32 %v3311_v7, %v2683_v46  ;;  %v16332_v59 = vadd.f32 %v3400_v37, %v2772_v38  ;;  %v21593_v46 = vld [vmem:[#allocation6_spill] sm:$0xff] }
 0x515   : > { %21581 = vst [vmem:[#allocation48_spill] sm:$0xff] %v16330_v16 }
 0x516   : > { %21582 = vst [vmem:[#allocation49_spill] sm:$0xff] %v16332_v59  ;;  %v13681_v59 = vld [vmem:[%s21382_s1 + $0x22c] sm:$0xf] }
 0x517   : > { %v11118_v19 = vor.u32 %v13681_v59, %v11115_v5  ;;  %v11098_v5 = vor.u32 %v13679_v47, %v11097_v12  ;;  %v11082_v47 = vor.u32 %v13675_v44, %v11081_v18  ;;  %v11083_v12 = vld [vmem:[%s21382_s1 + $0x1f8] sm:$0xf0]  ;;  %v13671_v44 = vld [vmem:[%s21382_s1 + $0x1d4] sm:$0xf0]  ;;  %v13669_v18 = vld [vmem:[%s21382_s1 + $0x1cc] sm:$0xf] }
 0x518   : > { %v16334_v14 = vpop.f32.mrf.mxu2  ;;  %v16336_v20 = vpop.f32.mrf.mxu3 }
 0x519   : > { %21583 = vst [vmem:[#allocation155_spill] sm:$0xff] %v16334_v14  ;;  %v11113_v14 = vld [vmem:[%s21382_s1 + $0x228] sm:$0xf]  ;;  %3511 = vmatpush.bf16.msra.mxu3 %v11118_v19  ;;  %v11099_v19 = vld [vmem:[%s21382_s1 + $0x218] sm:$0xf0] }
 0x51a   : > { %21584 = vst [vmem:[#allocation156_spill] sm:$0xff] %v16336_v20 }
 0x51d   : > { %10972 = vmatmul.msk.bf16.gmra.mxu2 %vm1960_vm0, %v14598_v43  ;;  %10988 = vmatmul.msk.bf16.gmra.mxu3 %vm1960_vm0, %v14598_v43 }
 0x520   : > { %v16342_v25 = vpop.f32.mrf.mxu2  ;;  %v16344_v26 = vpop.f32.mrf.mxu3 }
 0x521   : > { %21585 = vst [vmem:[#allocation157_spill] sm:$0xff] %v16342_v25 }
 0x522   : > { %21586 = vst [vmem:[#allocation158_spill] sm:$0xff] %v16344_v26 }
 0x528   : > { %v16346_v57 = vpop.f32.mrf.mxu2  ;;  %v16348_v7 = vpop.f32.mrf.mxu3 }
 0x529   : > { %21587 = vst [vmem:[#allocation159_spill] sm:$0xff] %v16346_v57 }
 0x52a   : > { %21588 = vst [vmem:[#allocation160_spill] sm:$0xff] %v16348_v7 }
 0x52d   : > { %10973 = vmatmul.msk.bf16.gmra.mxu2 %vm1960_vm0, %v14612_v61  ;;  %10989 = vmatmul.msk.bf16.gmra.mxu3 %vm1960_vm0, %v14612_v61 }
 0x530   : > { %v16354_v37 = vpop.f32.mrf.mxu2  ;;  %v16356_v48 = vpop.f32.mrf.mxu3 }
 0x531   : > { %21589 = vst [vmem:[#allocation161_spill] sm:$0xff] %v16354_v37 }
 0x532   : > { %21590 = vst [vmem:[#allocation162_spill] sm:$0xff] %v16356_v48 }
 0x538   : > { %v16358_v54 = vpop.f32.mrf.mxu2  ;;  %v16360_v43 = vpop.f32.mrf.mxu3 }
 0x539   : > { %21591 = vst [vmem:[#allocation163_spill] sm:$0xff] %v16358_v54 }
 0x53a   : > { %21592 = vst [vmem:[#allocation164_spill] sm:$0xff] %v16360_v43 }
 0x53d   : > { %10974 = vmatmul.msk.bf16.gmra.mxu2 %vm1960_vm0, %v21593_v46  ;;  %10990 = vmatmul.msk.bf16.gmra.mxu3 %vm1960_vm0, %v21593_v46 }
 0x540   : > { %v16366_v41 = vpop.f32.mrf.mxu2  ;;  %v16368_v38 = vpop.f32.mrf.mxu3 }
 0x541   : > { %21594 = vst [vmem:[#allocation6_spill] sm:$0xff] %v16366_v41 }
 0x542   : > { %21595 = vst [vmem:[#allocation165_spill] sm:$0xff] %v16368_v38 }
 0x548   : > { %v16370_v7 = vpop.f32.mrf.mxu2  ;;  %v16372_v61 = vpop.f32.mrf.mxu3 }
 0x549   : > { %21596 = vst [vmem:[#allocation166_spill] sm:$0xff] %v16370_v7 }
 0x54a   : > { %21597 = vst [vmem:[#allocation167_spill] sm:$0xff] %v16372_v61 }
 0x54d   : > { %10975 = vmatmul.msk.bf16.gmra.mxu2 %vm1960_vm0, %v14640_v34  ;;  %10991 = vmatmul.msk.bf16.gmra.mxu3 %vm1960_vm0, %v14640_v34 }
 0x550   : > { %v16378_v43 = vpop.f32.mrf.mxu2  ;;  %v16380_v54 = vpop.f32.mrf.mxu3 }
 0x558   : > { %v16382_v48 = vpop.f32.mrf.mxu2  ;;  %v16384_v46 = vpop.f32.mrf.mxu3 }
 0x55d   : > { %10976 = vmatmul.msk.bf16.gmra.mxu2 %vm1960_vm0, %v14654_v53  ;;  %10992 = vmatmul.msk.bf16.gmra.mxu3 %vm1960_vm0, %v14654_v53 }
 0x560   : > { %v16390_v61 = vpop.f32.mrf.mxu2  ;;  %v16392_v7 = vpop.f32.mrf.mxu3 }
 0x568   : > { %v16394_v38 = vpop.f32.mrf.mxu2  ;;  %v16396_v34 = vpop.f32.mrf.mxu3 }
 0x56d   : > { %10977 = vmatmul.msk.bf16.gmra.mxu2 %vm1960_vm0, %v14668_v9  ;;  %10993 = vmatmul.msk.bf16.gmra.mxu3 %vm1960_vm0, %v14668_v9 }
 0x570   : > { %v16402_v41 = vpop.f32.mrf.mxu2  ;;  %v16404_v37 = vpop.f32.mrf.mxu3 }
 0x578   : > { %v16406_v57 = vpop.f32.mrf.mxu2  ;;  %v16408_v53 = vpop.f32.mrf.mxu3 }
 0x57d   : > { %10978 = vmatmul.msk.bf16.gmra.mxu2 %vm1960_vm0, %v21512_v8  ;;  %10994 = vmatmul.msk.bf16.gmra.mxu3 %vm1960_vm0, %v21512_v8  ;;  %v13683_v8 = vld [vmem:[%s21382_s1 + $0x234] sm:$0xf0] }
 0x57e   : > { %v11114_v16 = vor.u32 %v13683_v8, %v11113_v14  ;;  %v13677_v14 = vld [vmem:[%s21382_s1 + $0x20c] sm:$0xf] }
 0x580   : > { %v16414_v26 = vpop.f32.mrf.mxu2  ;;  %v16416_v25 = vpop.f32.mrf.mxu3  ;;  %3422 = vmatpush.bf16.msra.mxu2 %v11114_v16  ;;  %v11102_v16 = vor.u32 %v13677_v14, %v11099_v19  ;;  %v11086_v14 = vor.u32 %v13673_v52, %v11083_v12  ;;  %v11067_v52 = vld [vmem:[%s21382_s1 + $0x1d8] sm:$0xf0]  ;;  %v11049_v12 = vld [vmem:[%s21382_s1 + $0x1a8] sm:$0xf] }
 0x582   : > { %3512 = vmatpush.bf16.msra.mxu3 %v11102_v16 }
 0x584   : > { %3423 = vmatpush.bf16.msra.mxu2 %v11098_v5  ;;  %v11065_v5 = vld [vmem:[%s21382_s1 + $0x1c8] sm:$0xf] }
 0x586   : > { %3513 = vmatpush.bf16.msra.mxu3 %v11086_v14  ;;  %v13667_v14 = vld [vmem:[%s21382_s1 + $0x1b4] sm:$0xf0] }
 0x587   : > { %v11050_v36 = vor.u32 %v13667_v14, %v11049_v12 }
 0x588   : > { %v16418_v20 = vpop.f32.mrf.mxu2  ;;  %v16420_v9 = vpop.f32.mrf.mxu3  ;;  %3424 = vmatpush.bf16.msra.mxu2 %v11082_v47  ;;  %v11070_v47 = vor.u32 %v13669_v18, %v11067_v52  ;;  %v11033_v18 = vld [vmem:[%s21382_s1 + $0x188] sm:$0xf]  ;;  %v13663_v52 = vld [vmem:[%s21382_s1 + $0x194] sm:$0xf0] }
 0x58a   : > { %3514 = vmatpush.bf16.msra.mxu3 %v11070_v47  ;;  %v11034_v47 = vor.u32 %v13663_v52, %v11033_v18 }
 0x58d   : > { %10979 = vmatmul.msk.bf16.gmra.mxu2 %vm1960_vm0, %v21517_v23  ;;  %10995 = vmatmul.msk.bf16.gmra.mxu3 %vm1960_vm0, %v21517_v23 }
 0x590   : > { %v16438_v45 = vpop.f32.mrf.mxu2  ;;  %v16440_v23 = vpop.f32.mrf.mxu3 }
 0x598   : > { %v16451_v8 = vpop.f32.mrf.mxu2  ;;  %v16453_v59 = vpop.f32.mrf.mxu3 }
 0x59d   : > { %10980 = vmatmul.msk.bf16.gmra.mxu2 %vm1960_vm0, %v21523_v1  ;;  %10996 = vmatmul.msk.bf16.gmra.mxu3 %vm1960_vm0, %v21523_v1  ;;  %v11066_v1 = vor.u32 %v13671_v44, %v11065_v5  ;;  %v11051_v5 = vld [vmem:[%s21382_s1 + $0x1b8] sm:$0xf0] }
 0x59e   : > { %v11054_v44 = vor.u32 %v13665_v35, %v11051_v5 }
 0x59f   : > { %3425 = vmatpush.bf16.msra.mxu2 %v11066_v1  ;;  %v13661_v1 = vld [vmem:[%s21382_s1 + $0x18c] sm:$0xf] }
 0x5a0   : > { %v16483_v19 = vpop.f32.mrf.mxu2  ;;  %v16485_v16 = vpop.f32.mrf.mxu3  ;;  %3515 = vmatpush.bf16.msra.mxu3 %v11054_v44 }
 0x5a3   : > { %3426 = vmatpush.bf16.msra.mxu2 %v11050_v36  ;;  %v11035_v36 = vld [vmem:[%s21382_s1 + $0x198] sm:$0xf0]  ;;  %s13496_s1 = sshll.u32 %s14358_s25, 3  ;;  %s10126_s25 = scalar_lea.sflag [#allocation3], %s404_s29 }
 0x5a4   : > { %v11038_v35 = vor.u32 %v13661_v1, %v11035_v36  ;;  %v21608_v36 = vld [vmem:[#allocation90_spill] sm:$0xff]  ;;  %s10136_s0 = scalar_lea.hbm %s21305_s12, %s13496_s1 }
 0x5a5   : > { %s10140_s26 = sshll.u32 %s10136_s0, 4  ;;  %s10141_s26 = int_to_ptr.hbm [resolvable:$true] %s10140_s26 }
 0x5a6   : > { %3516 = vmatpush.bf16.msra.mxu3 %v11038_v35  ;;  %s14222_s28 = sshra.s32 %s10141_s26, 4  ;;  %s14223_s28 = int_to_ptr.hbm [resolvable:$true] %s14222_s28 }
 0x5a7   : > { %3427 = vmatpush.bf16.msra.mxu2 %v11034_v47  ;;  %s14224_s19 = scalar_lea.hbm %s14223_s28, 8  ;;  %p14229_p0 = scmp.lt.s32.totalorder %s14223_s28, %s21305_s12 }
 0x5a8   : > { %v16511_v12 = vpop.f32.mrf.mxu2  ;;  %v16513_v14 = vpop.f32.mrf.mxu3  ;;  %p14225_p11 = scmp.ne.s32.totalorder %s14223_s28, %s14224_s19  ;;  %p14230_p1 = scmp.lt.s32.totalorder %s14228_s15, %s14224_s19 }
 0x5a9   : > { %21598 = vst [vmem:[#allocation168_spill] sm:$0xff] %v16511_v12 }
 0x5aa   : > { %21599 = vst [vmem:[#allocation169_spill] sm:$0xff] %v16513_v14  ;;  %v21651_v14 = vld [vmem:[#allocation66_spill] sm:$0xff]  ;;  %p14226_p12 = pnand %p14225_p11, %p14375_p5  ;;  %p14231_p2 = por %p14230_p1, %p14229_p0 }
 0x5ac   : > { %p14227_p13 = pneg %p14226_p12 }
 0x5ad   : > { %10981 = vmatmul.msk.bf16.gmra.mxu2 %vm1960_vm0, %v21531_v31  ;;  %10997 = vmatmul.msk.bf16.gmra.mxu3 %vm1960_vm0, %v21531_v31 }
 0x5ae   : > { %p14232_p3 = pnand %p14231_p2, %p14227_p13 }
 0x5b0   : > { %v16522_v5 = vpop.f32.mrf.mxu2  ;;  %v16524_v44 = vpop.f32.mrf.mxu3 }
 0x5b1   : > { %21600 = vst [vmem:[#allocation170_spill] sm:$0xff] %v16522_v5 }
 0x5b2   : > { %21601 = vst [vmem:[#allocation171_spill] sm:$0xff] %v16524_v44 }
 0x5b8   : > { %v16526_v12 = vpop.f32.mrf.mxu2  ;;  %v16528_v18 = vpop.f32.mrf.mxu3 }
 0x5b9   : > { %21602 = vst [vmem:[#allocation172_spill] sm:$0xff] %v16526_v12 }
 0x5ba   : > { %21603 = vst [vmem:[#allocation173_spill] sm:$0xff] %v16528_v18 }
 0x5bd   : > { %10982 = vmatmul.msk.bf16.gmra.mxu2 %vm1960_vm0, %v21540_v51  ;;  %10998 = vmatmul.msk.bf16.gmra.mxu3 %vm1960_vm0, %v21540_v51 }
 0x5c0   : > { %v16534_v52 = vpop.f32.mrf.mxu2  ;;  %v16536_v1 = vpop.f32.mrf.mxu3 }
 0x5c1   : > { %21604 = vst [vmem:[#allocation174_spill] sm:$0xff] %v16534_v52  ;;  %v21613_v52 = vld [vmem:[#allocation95_spill] sm:$0xff] }
 0x5c2   : > { %21605 = vst [vmem:[#allocation175_spill] sm:$0xff] %v16536_v1 }
 0x5c8   : > { %v16538_v47 = vpop.f32.mrf.mxu2  ;;  %v16540_v31 = vpop.f32.mrf.mxu3 }
 0x5c9   : > { %21606 = vst [vmem:[#allocation176_spill] sm:$0xff] %v16538_v47 }
 0x5ca   : > { %21607 = vst [vmem:[#allocation177_spill] sm:$0xff] %v16540_v31 }
 0x5cd   : > { %11151 = vmatmul.msk.bf16.vlgmr.msra.gmra.mxu2 %vm1960_vm0, %v21608_v36  ;;  %11167 = vmatmul.msk.bf16.vlgmr.msra.gmra.mxu3 %vm1960_vm0, %v21608_v36 }
 0x5d0   : > { %v16546_v35 = vpop.f32.mrf.mxu2  ;;  %v16548_v18 = vpop.f32.mrf.mxu3 }
 0x5d1   : > { %21609 = vst [vmem:[#allocation90_spill] sm:$0xff] %v16546_v35  ;;  %v21618_v35 = vld [vmem:[#allocation100_spill] sm:$0xff] }
 0x5d2   : > { %21610 = vst [vmem:[#allocation178_spill] sm:$0xff] %v16548_v18 }
 0x5d8   : > { %v16550_v12 = vpop.f32.mrf.mxu2  ;;  %v16552_v51 = vpop.f32.mrf.mxu3 }
 0x5d9   : > { %21611 = vst [vmem:[#allocation179_spill] sm:$0xff] %v16550_v12 }
 0x5da   : > { %21612 = vst [vmem:[#allocation180_spill] sm:$0xff] %v16552_v51 }
 0x5dd   : > { %11152 = vmatmul.msk.bf16.gmra.mxu2 %vm1960_vm0, %v21613_v52  ;;  %11168 = vmatmul.msk.bf16.gmra.mxu3 %vm1960_vm0, %v21613_v52 }
 0x5e0   : > { %v16558_v31 = vpop.f32.mrf.mxu2  ;;  %v16560_v47 = vpop.f32.mrf.mxu3 }
 0x5e1   : > { %21614 = vst [vmem:[#allocation95_spill] sm:$0xff] %v16558_v31  ;;  %v21623_v31 = vld [vmem:[#allocation105_spill] sm:$0xff] }
 0x5e2   : > { %21615 = vst [vmem:[#allocation181_spill] sm:$0xff] %v16560_v47 }
 0x5e8   : > { %v16562_v1 = vpop.f32.mrf.mxu2  ;;  %v16564_v36 = vpop.f32.mrf.mxu3 }
 0x5e9   : > { %21616 = vst [vmem:[#allocation182_spill] sm:$0xff] %v16562_v1 }
 0x5ea   : > { %21617 = vst [vmem:[#allocation183_spill] sm:$0xff] %v16564_v36 }
 0x5ed   : > { %11153 = vmatmul.msk.bf16.gmra.mxu2 %vm1960_vm0, %v21618_v35  ;;  %11169 = vmatmul.msk.bf16.gmra.mxu3 %vm1960_vm0, %v21618_v35 }
 0x5f0   : > { %v16570_v51 = vpop.f32.mrf.mxu2  ;;  %v16572_v12 = vpop.f32.mrf.mxu3 }
 0x5f1   : > { %21619 = vst [vmem:[#allocation100_spill] sm:$0xff] %v16570_v51  ;;  %v21628_v51 = vld [vmem:[#allocation110_spill] sm:$0xff] }
 0x5f2   : > { %21620 = vst [vmem:[#allocation184_spill] sm:$0xff] %v16572_v12 }
 0x5f8   : > { %v16574_v18 = vpop.f32.mrf.mxu2  ;;  %v16576_v52 = vpop.f32.mrf.mxu3 }
 0x5f9   : > { %21621 = vst [vmem:[#allocation185_spill] sm:$0xff] %v16574_v18 }
 0x5fa   : > { %21622 = vst [vmem:[#allocation186_spill] sm:$0xff] %v16576_v52 }
 0x5fd   : > { %11154 = vmatmul.msk.bf16.gmra.mxu2 %vm1960_vm0, %v21623_v31  ;;  %11170 = vmatmul.msk.bf16.gmra.mxu3 %vm1960_vm0, %v21623_v31 }
 0x600   : > { %v16582_v36 = vpop.f32.mrf.mxu2  ;;  %v16584_v1 = vpop.f32.mrf.mxu3 }
 0x601   : > { %21624 = vst [vmem:[#allocation105_spill] sm:$0xff] %v16582_v36  ;;  %v21633_v36 = vld [vmem:[#allocation115_spill] sm:$0xff] }
 0x602   : > { %21625 = vst [vmem:[#allocation187_spill] sm:$0xff] %v16584_v1 }
 0x608   : > { %v16586_v47 = vpop.f32.mrf.mxu2  ;;  %v16588_v35 = vpop.f32.mrf.mxu3 }
 0x609   : > { %21626 = vst [vmem:[#allocation188_spill] sm:$0xff] %v16586_v47 }
 0x60a   : > { %21627 = vst [vmem:[#allocation189_spill] sm:$0xff] %v16588_v35 }
 0x60d   : > { %11155 = vmatmul.msk.bf16.gmra.mxu2 %vm1960_vm0, %v21628_v51  ;;  %11171 = vmatmul.msk.bf16.gmra.mxu3 %vm1960_vm0, %v21628_v51 }
 0x610   : > { %v16594_v52 = vpop.f32.mrf.mxu2  ;;  %v16596_v18 = vpop.f32.mrf.mxu3 }
 0x611   : > { %21629 = vst [vmem:[#allocation110_spill] sm:$0xff] %v16594_v52  ;;  %v21638_v52 = vld [vmem:[#allocation120_spill] sm:$0xff] }
 0x612   : > { %21630 = vst [vmem:[#allocation190_spill] sm:$0xff] %v16596_v18 }
 0x618   : > { %v16598_v12 = vpop.f32.mrf.mxu2  ;;  %v16600_v31 = vpop.f32.mrf.mxu3 }
 0x619   : > { %21631 = vst [vmem:[#allocation191_spill] sm:$0xff] %v16598_v12 }
 0x61a   : > { %21632 = vst [vmem:[#allocation192_spill] sm:$0xff] %v16600_v31 }
 0x61d   : > { %11156 = vmatmul.msk.bf16.gmra.mxu2 %vm1960_vm0, %v21633_v36  ;;  %11172 = vmatmul.msk.bf16.gmra.mxu3 %vm1960_vm0, %v21633_v36 }
 0x620   : > { %v16606_v35 = vpop.f32.mrf.mxu2  ;;  %v16608_v47 = vpop.f32.mrf.mxu3 }
 0x621   : > { %21634 = vst [vmem:[#allocation115_spill] sm:$0xff] %v16606_v35  ;;  %v21643_v35 = vld [vmem:[#allocation125_spill] sm:$0xff] }
 0x622   : > { %21635 = vst [vmem:[#allocation193_spill] sm:$0xff] %v16608_v47 }
 0x628   : > { %v16610_v1 = vpop.f32.mrf.mxu2  ;;  %v16612_v51 = vpop.f32.mrf.mxu3 }
 0x629   : > { %21636 = vst [vmem:[#allocation194_spill] sm:$0xff] %v16610_v1 }
 0x62a   : > { %21637 = vst [vmem:[#allocation195_spill] sm:$0xff] %v16612_v51 }
 0x62d   : > { %11157 = vmatmul.msk.bf16.gmra.mxu2 %vm1960_vm0, %v21638_v52  ;;  %11173 = vmatmul.msk.bf16.gmra.mxu3 %vm1960_vm0, %v21638_v52 }
 0x630   : > { %v16618_v31 = vpop.f32.mrf.mxu2  ;;  %v16620_v12 = vpop.f32.mrf.mxu3 }
 0x631   : > { %21639 = vst [vmem:[#allocation120_spill] sm:$0xff] %v16618_v31  ;;  %v21648_v31 = vld [vmem:[#allocation130_spill] sm:$0xff] }
 0x632   : > { %21640 = vst [vmem:[#allocation196_spill] sm:$0xff] %v16620_v12  ;;  %v21650_v12 = vld [vmem:[#allocation65_spill] sm:$0xff] }
 0x638   : > { %v16622_v18 = vpop.f32.mrf.mxu2  ;;  %v16624_v36 = vpop.f32.mrf.mxu3 }
 0x639   : > { %21641 = vst [vmem:[#allocation197_spill] sm:$0xff] %v16622_v18 }
 0x63a   : > { %21642 = vst [vmem:[#allocation198_spill] sm:$0xff] %v16624_v36  ;;  %v21649_v36 = vld [vmem:[#allocation64_spill] sm:$0xff] }
 0x63b   : > { %v2801_v18 = vadd.f32 %v16378_v43, %v21649_v36  ;;  %v2892_v43 = vadd.f32 %v16384_v46, %v21652_v40  ;;  %v21655_v46 = vld [vmem:[#allocation69_spill] sm:$0xff] }
 0x63d   : > { %11158 = vmatmul.msk.bf16.gmra.mxu2 %vm1960_vm0, %v21643_v35  ;;  %11174 = vmatmul.msk.bf16.gmra.mxu3 %vm1960_vm0, %v21643_v35  ;;  %v2890_v35 = vadd.f32 %v16380_v54, %v21650_v12 }
 0x640   : > { %v16630_v51 = vpop.f32.mrf.mxu2  ;;  %v16632_v1 = vpop.f32.mrf.mxu3 }
 0x641   : > { %21644 = vst [vmem:[#allocation125_spill] sm:$0xff] %v16630_v51 }
 0x642   : > { %21645 = vst [vmem:[#allocation199_spill] sm:$0xff] %v16632_v1 }
 0x648   : > { %v16634_v47 = vpop.f32.mrf.mxu2  ;;  %v16636_v52 = vpop.f32.mrf.mxu3 }
 0x649   : > { %21646 = vst [vmem:[#allocation200_spill] sm:$0xff] %v16634_v47  ;;  %v21656_v47 = vld [vmem:[#allocation70_spill] sm:$0xff] }
 0x64a   : > { %21647 = vst [vmem:[#allocation201_spill] sm:$0xff] %v16636_v52  ;;  %v21657_v52 = vld [vmem:[#allocation71_spill] sm:$0xff] }
 0x64d   : > { %11159 = vmatmul.msk.bf16.gmra.mxu2 %vm1960_vm0, %v21648_v31  ;;  %11175 = vmatmul.msk.bf16.gmra.mxu3 %vm1960_vm0, %v21648_v31  ;;  %v2803_v31 = vadd.f32 %v16382_v48, %v21651_v14  ;;  %v21654_v48 = vld [vmem:[#allocation68_spill] sm:$0xff]  ;;  %v2895_v14 = vadd.f32 %v16392_v7, %v21655_v46 }
 0x64e   : > { %v2806_v40 = vadd.f32 %v16390_v61, %v21654_v48  ;;  %v2897_v61 = vadd.f32 %v16396_v34, %v21657_v52 }
 0x650   : > { %v3429_v44 = vpop.f32.mrf.mxu2  ;;  %v3518_v51 = vpop.f32.mrf.mxu3 }
 0x651   : > { %v16646_v5 = vadd.f32 %v3429_v44, %v2801_v18  ;;  %v16648_v1 = vadd.f32 %v3518_v51, %v2890_v35  ;;  %v21653_v35 = vld [vmem:[#allocation135_spill] sm:$0xff]  ;;  %v21697_v51 = vld [vmem:[#allocation26_spill] sm:$0xff] }
 0x652   : > { %v21661_v18 = vld [vmem:[#allocation75_spill] sm:$0xff] }
 0x658   : > { %v3431_v36 = vpop.f32.mrf.mxu2  ;;  %v3520_v54 = vpop.f32.mrf.mxu3 }
 0x659   : > { %v16658_v12 = vadd.f32 %v3431_v36, %v2803_v31  ;;  %v16660_v44 = vadd.f32 %v3520_v54, %v2892_v43 }
 0x65d   : > { %11160 = vmatmul.msk.bf16.gmra.mxu2 %vm1960_vm0, %v21653_v35  ;;  %11176 = vmatmul.msk.bf16.gmra.mxu3 %vm1960_vm0, %v21653_v35  ;;  %v2808_v35 = vadd.f32 %v16394_v38, %v21656_v47  ;;  %v21658_v38 = vld [vmem:[#allocation72_spill] sm:$0xff]  ;;  %v21659_v47 = vld [vmem:[#allocation73_spill] sm:$0xff] }
 0x65e   : > { %v2811_v34 = vadd.f32 %v16402_v41, %v21658_v38  ;;  %v2900_v52 = vadd.f32 %v16404_v37, %v21659_v47  ;;  %v2902_v41 = vadd.f32 %v16408_v53, %v21661_v18  ;;  %v21663_v18 = vld [vmem:[#allocation77_spill] sm:$0xff] }
 0x660   : > { %v3434_v31 = vpop.f32.mrf.mxu2  ;;  %v3523_v43 = vpop.f32.mrf.mxu3 }
 0x661   : > { %v16674_v36 = vadd.f32 %v3434_v31, %v2806_v40  ;;  %v16676_v54 = vadd.f32 %v3523_v43, %v2895_v14  ;;  %v21660_v14 = vld [vmem:[#allocation74_spill] sm:$0xff]  ;;  %v21665_v31 = vld [vmem:[#allocation79_spill] sm:$0xff] }
 0x668   : > { %v3436_v48 = vpop.f32.mrf.mxu2  ;;  %v3525_v7 = vpop.f32.mrf.mxu3 }
 0x669   : > { %v16686_v46 = vadd.f32 %v3436_v48, %v2808_v35  ;;  %v16688_v40 = vadd.f32 %v3525_v7, %v2897_v61 }
 0x66d   : > { %11161 = vmatmul.msk.bf16.gmra.mxu2 %vm1960_vm0, %v15982_v55  ;;  %11177 = vmatmul.msk.bf16.gmra.mxu3 %vm1960_vm0, %v15982_v55  ;;  %v2813_v55 = vadd.f32 %v16406_v57, %v21660_v14  ;;  %v21662_v57 = vld [vmem:[#allocation76_spill] sm:$0xff]  ;;  %v2905_v14 = vadd.f32 %v16416_v25, %v21663_v18 }
 0x66e   : > { %v2816_v53 = vadd.f32 %v16414_v26, %v21662_v57  ;;  %v2907_v26 = vadd.f32 %v16420_v9, %v21665_v31  ;;  %v21667_v31 = vld [vmem:[#allocation81_spill] sm:$0xff] }
 0x670   : > { %v3439_v43 = vpop.f32.mrf.mxu2  ;;  %v3528_v35 = vpop.f32.mrf.mxu3 }
 0x671   : > { %v16702_v61 = vadd.f32 %v3439_v43, %v2811_v34  ;;  %v16704_v48 = vadd.f32 %v3528_v35, %v2900_v52  ;;  %v21664_v52 = vld [vmem:[#allocation78_spill] sm:$0xff]  ;;  %v21669_v43 = vld [vmem:[#allocation19_spill] sm:$0xff] }
 0x678   : > { %v3441_v38 = vpop.f32.mrf.mxu2  ;;  %v3530_v37 = vpop.f32.mrf.mxu3 }
 0x679   : > { %v16714_v47 = vadd.f32 %v3441_v38, %v2813_v55  ;;  %v16716_v34 = vadd.f32 %v3530_v37, %v2902_v41 }
 0x67d   : > { %11162 = vmatmul.msk.bf16.gmra.mxu2 %vm1960_vm0, %v16008_v24  ;;  %11178 = vmatmul.msk.bf16.gmra.mxu3 %vm1960_vm0, %v16008_v24  ;;  %v2818_v24 = vadd.f32 %v16418_v20, %v21664_v52  ;;  %v21666_v20 = vld [vmem:[#allocation80_spill] sm:$0xff]  ;;  %v2910_v52 = vadd.f32 %v16440_v23, %v21667_v31  ;;  %v21671_v31 = vld [vmem:[#allocation83_spill] sm:$0xff] }
 0x67e   : > { %v2821_v9 = vadd.f32 %v16438_v45, %v21666_v20  ;;  %v2734_v45 = vadd.f32 %v16139_v17, %v21669_v43  ;;  %v21670_v20 = vld [vmem:[#allocation82_spill] sm:$0xff]  ;;  %v21682_v17 = vld [vmem:[#allocation7_spill] sm:$0xff] }
 0x67f   : > { %v2823_v23 = vadd.f32 %v16451_v8, %v21670_v20  ;;  %v21680_v8 = vld [vmem:[#allocation87_spill] sm:$0xff] }
 0x680   : > { %v3444_v35 = vpop.f32.mrf.mxu2  ;;  %v3533_v55 = vpop.f32.mrf.mxu3 }
 0x681   : > { %v16730_v41 = vadd.f32 %v3444_v35, %v2816_v53  ;;  %v16732_v38 = vadd.f32 %v3533_v55, %v2905_v14  ;;  %v21668_v14 = vld [vmem:[#allocation18_spill] sm:$0xff] }
 0x688   : > { %v3446_v57 = vpop.f32.mrf.mxu2  ;;  %v3535_v25 = vpop.f32.mrf.mxu3 }
 0x689   : > { %v16742_v18 = vadd.f32 %v3446_v57, %v2818_v24  ;;  %v16744_v53 = vadd.f32 %v3535_v25, %v2907_v26  ;;  %v16778_v25 = vadd.f32 %v16056_v63, %v2734_v45 }
 0x68d   : > { %11163 = vmatmul.msk.bf16.gmra.mxu2 %vm1960_vm0, %v16034_v62  ;;  %11179 = vmatmul.msk.bf16.gmra.mxu3 %vm1960_vm0, %v16034_v62  ;;  %v2645_v62 = vadd.f32 %v16137_v33, %v21668_v14 }
 0x690   : > { %v3449_v55 = vpop.f32.mrf.mxu2  ;;  %v3538_v24 = vpop.f32.mrf.mxu3 }
 0x691   : > { %v16758_v26 = vadd.f32 %v3449_v55, %v2821_v9  ;;  %v16760_v57 = vadd.f32 %v3538_v24, %v2910_v52  ;;  %v2912_v9 = vadd.f32 %v16453_v59, %v21671_v31  ;;  %v16775_v24 = vadd.f32 %v16054_v6, %v2645_v62  ;;  %v21672_v6 = vld [vmem:[#allocation84_spill] sm:$0xff]  ;;  %v21673_v59 = vld [vmem:[#allocation85_spill] sm:$0xff] }
 0x692   : > { %v2826_v63 = vadd.f32 %v16483_v19, %v21672_v6  ;;  %v2915_v43 = vadd.f32 %v16485_v16, %v21673_v59  ;;  %v21677_v19 = vld [vmem:[#allocation17_spill] sm:$0xff]  ;;  %v21678_v6 = vld [vmem:[#allocation86_spill] sm:$0xff]  ;;  %v21679_v16 = vld [vmem:[#allocation168_spill] sm:$0xff] }
 0x693   : > { %v2828_v59 = vadd.f32 %v21679_v16, %v21678_v6 }
 0x698   : > { %v3451_v52 = vpop.f32.mrf.mxu2  ;;  %v3540_v55 = vpop.f32.mrf.mxu3 }
 0x699   : > { %v16780_v35 = vadd.f32 %v3451_v52, %v2823_v23  ;;  %v16782_v33 = vadd.f32 %v3540_v55, %v2912_v9  ;;  %v21675_v9 = vld [vmem:[#allocation22_spill] sm:$0xff]  ;;  %v21676_v52 = vld [vmem:[#allocation23_spill] sm:$0xff]  ;;  %v21684_v23 = vld [vmem:[#allocation12_spill] sm:$0xff] }
 0x69a   : > { %v2739_v55 = vadd.f32 %v21677_v19, %v21676_v52  ;;  %v21688_v19 = vld [vmem:[#allocation13_spill] sm:$0xff] }
 0x69b   : > { %v21728_v52 = vld [vmem:[#allocation21_spill] sm:$0xff] }
 0x69c   : > { %v16816_v7 = vadd.f32 %v21684_v23, %v2739_v55  ;;  %v21692_v55 = vld [vmem:[#allocation171_spill] sm:$0xff] }
 0x69d   : > { %11164 = vmatmul.msk.bf16.gmra.mxu2 %vm1960_vm0, %v16064_v58  ;;  %11180 = vmatmul.msk.bf16.gmra.mxu3 %vm1960_vm0, %v16064_v58  ;;  %v2650_v58 = vadd.f32 %v16211_v32, %v21675_v9 }
 0x69e   : > { %21685 = vst [vmem:[#allocation65_spill] sm:$0xff] %v16816_v7  ;;  %v21699_v7 = vld [vmem:[#allocation27_spill] sm:$0xff] }
 0x69f   : > { %v16813_v37 = vadd.f32 %v21682_v17, %v2650_v58  ;;  %v21689_v17 = vld [vmem:[#allocation88_spill] sm:$0xff]  ;;  %v21691_v58 = vld [vmem:[#allocation89_spill] sm:$0xff] }
 0x6a0   : > { %v3454_v14 = vpop.f32.mrf.mxu2  ;;  %v3543_v62 = vpop.f32.mrf.mxu3  ;;  %v2920_v6 = vadd.f32 %v21692_v55, %v21691_v58  ;;  %v21702_v58 = vld [vmem:[#allocation172_spill] sm:$0xff] }
 0x6a1   : > { %v16796_v45 = vadd.f32 %v3454_v14, %v2826_v63  ;;  %v16798_v20 = vadd.f32 %v3543_v62, %v2915_v43  ;;  %v21681_v63 = vld [vmem:[#allocation169_spill] sm:$0xff]  ;;  %21683 = vst [vmem:[#allocation64_spill] sm:$0xff] %v16813_v37  ;;  %v21703_v37 = vld [vmem:[#allocation92_spill] sm:$0xff] }
 0x6a2   : > { %v2917_v14 = vadd.f32 %v21681_v63, %v21680_v8  ;;  %v21690_v8 = vld [vmem:[#allocation170_spill] sm:$0xff] }
 0x6a3   : > { %21674 = vst [vmem:[#allocation130_spill] sm:$0xff] %v16798_v20  ;;  %v2831_v23 = vadd.f32 %v21690_v8, %v21689_v17  ;;  %v21700_v17 = vld [vmem:[#allocation25_spill] sm:$0xff]  ;;  %v21705_v20 = vld [vmem:[#allocation14_spill] sm:$0xff] }
 0x6a4   : > { %v2744_v8 = vadd.f32 %v21700_v17, %v21699_v7  ;;  %v21715_v17 = vld [vmem:[#allocation175_spill] sm:$0xff] }
 0x6a8   : > { %v3456_v43 = vpop.f32.mrf.mxu2  ;;  %v3545_v62 = vpop.f32.mrf.mxu3 }
 0x6a9   : > { %v16818_v31 = vadd.f32 %v3456_v43, %v2828_v59  ;;  %v16820_v32 = vadd.f32 %v3545_v62, %v2917_v14  ;;  %v21707_v62 = vld [vmem:[#allocation15_spill] sm:$0xff] }
 0x6ab   : > { %21686 = vst [vmem:[#allocation66_spill] sm:$0xff] %v16818_v31  ;;  %v21701_v31 = vld [vmem:[#allocation91_spill] sm:$0xff] }
 0x6ac   : > { %21687 = vst [vmem:[#allocation67_spill] sm:$0xff] %v16820_v32  ;;  %v2833_v55 = vadd.f32 %v21702_v58, %v21701_v31  ;;  %v21739_v31 = vld [vmem:[#allocation34_spill] sm:$0xff] }
 0x6ad   : > { %11165 = vmatmul.msk.bf16.gmra.mxu2 %vm1960_vm0, %v21688_v19  ;;  %11181 = vmatmul.msk.bf16.gmra.mxu3 %vm1960_vm0, %v21688_v19  ;;  %v21698_v19 = vld [vmem:[#allocation24_spill] sm:$0xff] }
 0x6ae   : > { %v2655_v32 = vadd.f32 %v21698_v19, %v21697_v51  ;;  %v21711_v19 = vld [vmem:[#allocation8_spill] sm:$0xff] }
 0x6b0   : > { %v3459_v16 = vpop.f32.mrf.mxu2  ;;  %v3548_v59 = vpop.f32.mrf.mxu3  ;;  %v16851_v50 = vadd.f32 %v21705_v20, %v2655_v32  ;;  %v21713_v20 = vld [vmem:[#allocation174_spill] sm:$0xff] }
 0x6b1   : > { %v16834_v63 = vadd.f32 %v3459_v16, %v2831_v23  ;;  %v16836_v14 = vadd.f32 %v3548_v59, %v2920_v6  ;;  %v21704_v23 = vld [vmem:[#allocation173_spill] sm:$0xff] }
 0x6b2   : > { %v2922_v16 = vadd.f32 %v21704_v23, %v21703_v37  ;;  %21706 = vst [vmem:[#allocation69_spill] sm:$0xff] %v16851_v50  ;;  %v21712_v37 = vld [vmem:[#allocation93_spill] sm:$0xff]  ;;  %v21724_v50 = vld [vmem:[#allocation96_spill] sm:$0xff] }
 0x6b3   : > { %21693 = vst [vmem:[#allocation135_spill] sm:$0xff] %v16834_v63  ;;  %v16854_v63 = vadd.f32 %v21707_v62, %v2744_v8  ;;  %v2836_v32 = vadd.f32 %v21713_v20, %v21712_v37  ;;  %v21714_v62 = vld [vmem:[#allocation94_spill] sm:$0xff] }
 0x6b4   : > { %21694 = vst [vmem:[#allocation68_spill] sm:$0xff] %v16836_v14  ;;  %v2925_v8 = vadd.f32 %v21715_v17, %v21714_v62  ;;  %v21723_v37 = vld [vmem:[#allocation138_spill] sm:$0xff]  ;;  %v21725_v62 = vld [vmem:[#allocation176_spill] sm:$0xff]  ;;  %v21726_v14 = vld [vmem:[#allocation97_spill] sm:$0xff] }
 0x6b5   : > { %21708 = vst [vmem:[#allocation70_spill] sm:$0xff] %v16854_v63  ;;  %v2838_v17 = vadd.f32 %v21725_v62, %v21724_v50  ;;  %v21735_v62 = vld [vmem:[#allocation99_spill] sm:$0xff] }
 0x6b8   : > { %v3461_v6 = vpop.f32.mrf.mxu2  ;;  %v3550_v59 = vpop.f32.mrf.mxu3 }
 0x6b9   : > { %v16856_v9 = vadd.f32 %v3461_v6, %v2833_v55  ;;  %v16858_v51 = vadd.f32 %v3550_v59, %v2922_v16  ;;  %v21730_v59 = vld [vmem:[#allocation10_spill] sm:$0xff]  ;;  %v21740_v6 = vld [vmem:[#allocation141_spill] sm:$0xff] }
 0x6bb   : > { %21709 = vst [vmem:[#allocation71_spill] sm:$0xff] %v16856_v9  ;;  %v21722_v9 = vld [vmem:[#allocation31_spill] sm:$0xff] }
 0x6bc   : > { %21710 = vst [vmem:[#allocation72_spill] sm:$0xff] %v16858_v51  ;;  %v21720_v51 = vld [vmem:[#allocation30_spill] sm:$0xff]  ;;  %v2749_v20 = vadd.f32 %v21723_v37, %v21722_v9  ;;  %v2665_v9 = vadd.f32 %v21740_v6, %v21739_v31  ;;  %v21748_v31 = vld [vmem:[#allocation180_spill] sm:$0xff] }
 0x6bd   : > { %11166 = vmatmul.msk.bf16.gmra.mxu2 %vm1960_vm0, %v21711_v19  ;;  %11182 = vmatmul.msk.bf16.gmra.mxu3 %vm1960_vm0, %v21711_v19  ;;  %v21721_v19 = vld [vmem:[#allocation29_spill] sm:$0xff] }
 0x6be   : > { %v2660_v63 = vadd.f32 %v21721_v19, %v21720_v51  ;;  %v21733_v19 = vld [vmem:[#allocation98_spill] sm:$0xff] }
 0x6c0   : > { %v3464_v58 = vpop.f32.mrf.mxu2  ;;  %v3553_v55 = vpop.f32.mrf.mxu3  ;;  %v16889_v43 = vadd.f32 %v21728_v52, %v2660_v63 }
 0x6c1   : > { %v16872_v23 = vadd.f32 %v3464_v58, %v2836_v32  ;;  %v16874_v16 = vadd.f32 %v3553_v55, %v2925_v8  ;;  %v21727_v32 = vld [vmem:[#allocation177_spill] sm:$0xff] }
 0x6c2   : > { %v2927_v58 = vadd.f32 %v21727_v32, %v21726_v14  ;;  %21729 = vst [vmem:[#allocation75_spill] sm:$0xff] %v16889_v43  ;;  %v21734_v14 = vld [vmem:[#allocation90_spill] sm:$0xff] }
 0x6c3   : > { %21716 = vst [vmem:[#allocation73_spill] sm:$0xff] %v16872_v23  ;;  %v16892_v23 = vadd.f32 %v21730_v59, %v2749_v20  ;;  %v2841_v37 = vadd.f32 %v21734_v14, %v21733_v19  ;;  %v21736_v32 = vld [vmem:[#allocation178_spill] sm:$0xff]  ;;  %v21743_v19 = vmax.f32 %v15984_v56, %v16646_v5  ;;  %v21749_v5 = vld [vmem:[#allocation139_spill] sm:$0xff] }
 0x6c4   : > { %21717 = vst [vmem:[#allocation74_spill] sm:$0xff] %v16874_v16  ;;  %v2930_v52 = vadd.f32 %v21736_v32, %v21735_v62  ;;  %v21742_v43 = vld [vmem:[#allocation142_spill] sm:$0xff]  ;;  %v21744_v62 = vmax.f32 %v15986_v42, %v16648_v1  ;;  %v21750_v42 = vld [vmem:[#allocation140_spill] sm:$0xff] }
 0x6c8   : > { %v3466_v8 = vpop.f32.mrf.mxu2  ;;  %v3555_v55 = vpop.f32.mrf.mxu3 }
 0x6c9   : > { %v16894_v7 = vadd.f32 %v3466_v8, %v2838_v17  ;;  %v16896_v51 = vadd.f32 %v3555_v55, %v2927_v58  ;;  %v21737_v17 = vld [vmem:[#allocation32_spill] sm:$0xff]  ;;  %v21738_v58 = vld [vmem:[#allocation33_spill] sm:$0xff] }
 0x6cb   : > { %21731 = vst [vmem:[#allocation76_spill] sm:$0xff] %v16894_v7  ;;  %v21741_v7 = vld [vmem:[#allocation35_spill] sm:$0xff] }
 0x6cc   : > { %21732 = vst [vmem:[#allocation77_spill] sm:$0xff] %v16896_v51  ;;  %v2754_v50 = vadd.f32 %v21742_v43, %v21741_v7  ;;  %v21753_v51 = vld [vmem:[#allocation103_spill] sm:$0xff] }
 0x6ce   : > { %v3667_v1 = vadd.f32 %v21750_v42, %v2754_v50  ;;  %v21755_v50 = vld [vmem:[#allocation104_spill] sm:$0xff] }
 0x6d0   : > { %v3469_v63 = vpop.f32.mrf.mxu2  ;;  %v3558_v16 = vpop.f32.mrf.mxu3 }
 0x6d1   : > { %v3664_v59 = vadd.f32 %v3469_v63, %v2841_v37  ;;  %v3665_v20 = vadd.f32 %v3558_v16, %v2930_v52  ;;  %v3822_v16 = vld [vmem:[%s21296_s3] sm:$0x3]  ;;  %v21745_v37 = vld [vmem:[#allocation101_spill] sm:$0xff]  ;;  %v21746_v52 = vld [vmem:[#allocation179_spill] sm:$0xff] }
 0x6d2   : > { %v2843_v63 = vadd.f32 %v21746_v52, %v21745_v37  ;;  %v16925_v7 = vperm.slane %v3822_v16, 0  ;;  %v16927_v56 = vperm.slane %v3822_v16, 1  ;;  %v21751_v52 = vmax.f32 %v15998_v0, %v16658_v12 }
 0x6d3   : > { %v3758_v8 = vmax.f32 %v21737_v17, %v3664_v59  ;;  %v3759_v55 = vmax.f32 %v21738_v58, %v3665_v20  ;;  %v21747_v59 = vld [vmem:[#allocation102_spill] sm:$0xff]  ;;  %v3666_v17 = vadd.f32 %v21749_v5, %v2665_v9  ;;  %v21752_v16 = vmax.f32 %v16000_v49, %v16660_v44  ;;  %v21754_v9 = vld [vmem:[#allocation95_spill] sm:$0xff]  ;;  %v21757_v49 = vld [vmem:[#allocation36_spill] sm:$0xff] }
 0x6d4   : > { %v2932_v6 = vadd.f32 %v21748_v31, %v21747_v59  ;;  %v2846_v5 = vadd.f32 %v21754_v9, %v21753_v51  ;;  %v21762_v9 = vld [vmem:[#allocation146_spill] sm:$0xff] }
 0x6d5   : > { %v3790_v14 = vmax.f32 %v21743_v19, %v3758_v8  ;;  %v3791_v32 = vmax.f32 %v21744_v62, %v3759_v55 }
 0x6d7   : > { %v3828_v62 = vadd.f32 %v16925_v7, %v3790_v14  ;;  %v3829_v37 = vadd.f32 %v16927_v56, %v3791_v32 }
 0x6d8   : > { %v3471_v20 = vpop.f32.mrf.mxu2  ;;  %v3560_v43 = vpop.f32.mrf.mxu3 }
 0x6d9   : > { %v3668_v8 = vadd.f32 %v3471_v20, %v2843_v63  ;;  %v3669_v58 = vadd.f32 %v3560_v43, %v2932_v6  ;;  %v21756_v63 = vld [vmem:[#allocation181_spill] sm:$0xff]  ;;  %v3861_v42 = vmax.f32 %v3829_v37, 0.0 }
 0x6da   : > { %v2935_v6 = vadd.f32 %v21756_v63, %v21755_v50 }
 0x6db   : > { %v3760_v55 = vmax.f32 %v3666_v17, %v3668_v8  ;;  %v3761_v19 = vmax.f32 %v3667_v1, %v3669_v58  ;;  %v3860_v17 = vmax.f32 %v3828_v62, 0.0  ;;  %v21758_v58 = vld [vmem:[#allocation37_spill] sm:$0xff]  ;;  %v21763_v62 = vmax.f32 %v16010_v13, %v16674_v36 }
 0x6dd   : > { %v3792_v59 = vmax.f32 %v21751_v52, %v3760_v55  ;;  %v3793_v31 = vmax.f32 %v21752_v16, %v3761_v19  ;;  %v21759_v52 = vld [vmem:[#allocation38_spill] sm:$0xff] }
 0x6df   : > { %v3830_v20 = vadd.f32 %v16925_v7, %v3792_v59  ;;  %v3831_v14 = vadd.f32 %v16927_v56, %v3793_v31  ;;  %v21760_v59 = vld [vmem:[#allocation145_spill] sm:$0xff]  ;;  %v21761_v31 = vld [vmem:[#allocation39_spill] sm:$0xff] }
 0x6e0   : > { %v3474_v43 = vpop.f32.mrf.mxu2  ;;  %v3563_v32 = vpop.f32.mrf.mxu3  ;;  %v2670_v16 = vadd.f32 %v21760_v59, %v21759_v52  ;;  %v2759_v50 = vadd.f32 %v21762_v9, %v21761_v31  ;;  %v21772_v59 = vmax.f32 %v16026_v39, %v16688_v40  ;;  %v21773_v9 = vld [vmem:[#allocation108_spill] sm:$0xff]  ;;  %v21777_v39 = vld [vmem:[#allocation147_spill] sm:$0xff] }
 0x6e1   : > { %v3672_v0 = vadd.f32 %v3474_v43, %v2846_v5  ;;  %v3673_v12 = vadd.f32 %v3563_v32, %v2935_v6  ;;  %v3862_v1 = vmax.f32 %v3830_v20, 0.0  ;;  %v3863_v8 = vmax.f32 %v3831_v14, 0.0  ;;  %v21765_v6 = vld [vmem:[#allocation106_spill] sm:$0xff]  ;;  %v21767_v43 = vld [vmem:[#allocation107_spill] sm:$0xff] }
 0x6e2   : > { %v21764_v5 = vmax.f32 %v16012_v11, %v16676_v54  ;;  %v21766_v20 = vld [vmem:[#allocation182_spill] sm:$0xff]  ;;  %v21768_v32 = vld [vmem:[#allocation183_spill] sm:$0xff]  ;;  %v21771_v54 = vmax.f32 %v16024_v22, %v16686_v46 }
 0x6e3   : > { %v3762_v44 = vmax.f32 %v21757_v49, %v3672_v0  ;;  %v3763_v55 = vmax.f32 %v21758_v58, %v3673_v12  ;;  %v16947_v51 = vpack.c.bf16 %v3862_v1, %v3860_v17  ;;  %v16949_v19 = vpack.c.bf16 %v3863_v8, %v3861_v42  ;;  %v21769_v12 = vld [vmem:[#allocation143_spill] sm:$0xff]  ;;  %v21770_v8 = vld [vmem:[#allocation144_spill] sm:$0xff] }
 0x6e4   : > { %v2848_v14 = vadd.f32 %v21766_v20, %v21765_v6  ;;  %v2937_v17 = vadd.f32 %v21768_v32, %v21767_v43  ;;  %v3674_v1 = vadd.f32 %v21769_v12, %v2670_v16  ;;  %v3675_v49 = vadd.f32 %v21770_v8, %v2759_v50  ;;  %v21774_v16 = vld [vmem:[#allocation100_spill] sm:$0xff]  ;;  %v21775_v50 = vld [vmem:[#allocation109_spill] sm:$0xff] }
 0x6e5   : > { %v3794_v37 = vmax.f32 %v21763_v62, %v3762_v44  ;;  %v3795_v63 = vmax.f32 %v21764_v5, %v3763_v55  ;;  %v2851_v62 = vadd.f32 %v21774_v16, %v21773_v9  ;;  %v21776_v5 = vld [vmem:[#allocation184_spill] sm:$0xff]  ;;  %v21786_v9 = vld [vmem:[#allocation185_spill] sm:$0xff] }
 0x6e6   : > { %v2940_v6 = vadd.f32 %v21776_v5, %v21775_v50  ;;  %v21788_v50 = vld [vmem:[#allocation186_spill] sm:$0xff] }
 0x6e7   : > { %v3832_v44 = vadd.f32 %v16925_v7, %v3794_v37  ;;  %v3833_v11 = vadd.f32 %v16927_v56, %v3795_v63 }
 0x6e8   : > { %v3476_v42 = vpop.f32.mrf.mxu2  ;;  %v3565_v0 = vpop.f32.mrf.mxu3 }
 0x6e9   : > { %v3676_v58 = vadd.f32 %v3476_v42, %v2848_v14  ;;  %v3677_v52 = vadd.f32 %v3565_v0, %v2937_v17  ;;  %v3864_v43 = vmax.f32 %v3832_v44, 0.0  ;;  %v3865_v32 = vmax.f32 %v3833_v11, 0.0  ;;  %v21778_v0 = vld [vmem:[#allocation148_spill] sm:$0xff] }
 0x6ea   : > { %v21783_v44 = vmax.f32 %v16036_v29, %v16702_v61 }
 0x6eb   : > { %v3764_v13 = vmax.f32 %v3674_v1, %v3676_v58  ;;  %v3765_v36 = vmax.f32 %v3675_v49, %v3677_v52  ;;  %v21779_v49 = vld [vmem:[#allocation42_spill] sm:$0xff]  ;;  %v21780_v58 = vld [vmem:[#allocation149_spill] sm:$0xff] }
 0x6ec   : > { %v2675_v52 = vadd.f32 %v21780_v58, %v21779_v49  ;;  %v21795_v49 = vld [vmem:[#allocation114_spill] sm:$0xff]  ;;  %v21796_v58 = vld [vmem:[#allocation187_spill] sm:$0xff] }
 0x6ed   : > { %v3796_v55 = vmax.f32 %v21771_v54, %v3764_v13  ;;  %v3797_v31 = vmax.f32 %v21772_v59, %v3765_v36  ;;  %v21781_v13 = vld [vmem:[#allocation43_spill] sm:$0xff]  ;;  %v21782_v36 = vld [vmem:[#allocation150_spill] sm:$0xff] }
 0x6ee   : > { %v2764_v54 = vadd.f32 %v21782_v36, %v21781_v13 }
 0x6ef   : > { %v3834_v20 = vadd.f32 %v16925_v7, %v3796_v55  ;;  %v3835_v37 = vadd.f32 %v16927_v56, %v3797_v31  ;;  %v21784_v55 = vmax.f32 %v16038_v10, %v16704_v48  ;;  %v21785_v31 = vld [vmem:[#allocation111_spill] sm:$0xff]  ;;  %v21791_v48 = vmax.f32 %v16050_v4, %v16714_v47 }
 0x6f0   : > { %v3479_v14 = vpop.f32.mrf.mxu2  ;;  %v3568_v63 = vpop.f32.mrf.mxu3  ;;  %v2853_v16 = vadd.f32 %v21786_v9, %v21785_v31  ;;  %v21798_v9 = vld [vmem:[#allocation45_spill] sm:$0xff] }
 0x6f1   : > { %v3680_v22 = vadd.f32 %v3479_v14, %v2851_v62  ;;  %v3681_v46 = vadd.f32 %v3568_v63, %v2940_v6  ;;  %v3866_v17 = vmax.f32 %v3834_v20, 0.0  ;;  %v3867_v42 = vmax.f32 %v3835_v37, 0.0  ;;  %v21787_v62 = vld [vmem:[#allocation112_spill] sm:$0xff]  ;;  %v21790_v63 = vld [vmem:[#allocation41_spill] sm:$0xff] }
 0x6f2   : > { %v2942_v5 = vadd.f32 %v21788_v50, %v21787_v62  ;;  %v21789_v37 = vld [vmem:[#allocation40_spill] sm:$0xff] }
 0x6f3   : > { %v3766_v40 = vmax.f32 %v21777_v39, %v3680_v22  ;;  %v3767_v12 = vmax.f32 %v21778_v0, %v3681_v46  ;;  %v16983_v1 = vpack.c.bf16 %v3866_v17, %v3864_v43  ;;  %v16985_v8 = vpack.c.bf16 %v3867_v42, %v3865_v32  ;;  %v21794_v0 = vld [vmem:[#allocation105_spill] sm:$0xff] }
 0x6f4   : > { %v3682_v14 = vadd.f32 %v21789_v37, %v2675_v52  ;;  %v3683_v43 = vadd.f32 %v21790_v63, %v2764_v54  ;;  %v21792_v42 = vmax.f32 %v16052_v60, %v16716_v34  ;;  %v2945_v52 = vadd.f32 %v21796_v58, %v21795_v49  ;;  %v21797_v60 = vld [vmem:[#allocation44_spill] sm:$0xff]  ;;  %v21801_v37 = vld [vmem:[#allocation47_spill] sm:$0xff] }
 0x6f5   : > { %v3798_v11 = vmax.f32 %v21783_v44, %v3766_v40  ;;  %v3799_v59 = vmax.f32 %v21784_v55, %v3767_v12  ;;  %v21793_v40 = vld [vmem:[#allocation113_spill] sm:$0xff]  ;;  %v21810_v49 = vld [vmem:[#allocation152_spill] sm:$0xff] }
 0x6f6   : > { %v2856_v12 = vadd.f32 %v21794_v0, %v21793_v40  ;;  %v21809_v0 = vld [vmem:[#allocation151_spill] sm:$0xff] }
 0x6f7   : > { %v3836_v46 = vadd.f32 %v16925_v7, %v3798_v11  ;;  %v3837_v10 = vadd.f32 %v16927_v56, %v3799_v59 }
 0x6f8   : > { %v3481_v6 = vpop.f32.mrf.mxu2  ;;  %v3570_v20 = vpop.f32.mrf.mxu3 }
 0x6f9   : > { %v3684_v32 = vadd.f32 %v3481_v6, %v2853_v16  ;;  %v3685_v22 = vadd.f32 %v3570_v20, %v2942_v5  ;;  %v3868_v11 = vmax.f32 %v3836_v46, 0.0  ;;  %v3869_v55 = vmax.f32 %v3837_v10, 0.0  ;;  %v21799_v5 = vld [vmem:[#allocation46_spill] sm:$0xff]  ;;  %v21800_v6 = vld [vmem:[#allocation153_spill] sm:$0xff]  ;;  %v21806_v46 = vld [vmem:[#allocation188_spill] sm:$0xff] }
 0x6fa   : > { %v2680_v20 = vadd.f32 %v21800_v6, %v21799_v5 }
 0x6fb   : > { %v3768_v29 = vmax.f32 %v3682_v14, %v3684_v32  ;;  %v3769_v61 = vmax.f32 %v3683_v43, %v3685_v22  ;;  %v21802_v14 = vld [vmem:[#allocation154_spill] sm:$0xff]  ;;  %v21803_v43 = vmax.f32 %v16066_v27, %v16730_v41  ;;  %v21804_v22 = vmax.f32 %v16068_v21, %v16732_v38 }
 0x6fc   : > { %v2769_v63 = vadd.f32 %v21802_v14, %v21801_v37 }
 0x6fd   : > { %v3800_v17 = vmax.f32 %v21791_v48, %v3768_v29  ;;  %v3801_v39 = vmax.f32 %v21792_v42, %v3769_v61  ;;  %v21805_v61 = vld [vmem:[#allocation116_spill] sm:$0xff]  ;;  %v21807_v48 = vld [vmem:[#allocation117_spill] sm:$0xff] }
 0x6fe   : > { %v2858_v10 = vadd.f32 %v21806_v46, %v21805_v61  ;;  %v3691_v58 = vadd.f32 %v21810_v49, %v2769_v63 }
 0x6ff   : > { %v3838_v13 = vadd.f32 %v16925_v7, %v3800_v17  ;;  %v3839_v36 = vadd.f32 %v16927_v56, %v3801_v39  ;;  %v21808_v17 = vld [vmem:[#allocation189_spill] sm:$0xff] }
 0x700   : > { %v3484_v54 = vpop.f32.mrf.mxu2  ;;  %v3573_v44 = vpop.f32.mrf.mxu3  ;;  %v2947_v42 = vadd.f32 %v21808_v17, %v21807_v48  ;;  %v21819_v48 = vld [vmem:[#allocation50_spill] sm:$0xff]  ;;  %v21820_v17 = vld [vmem:[#allocation155_spill] sm:$0xff] }
 0x701   : > { %v3688_v4 = vadd.f32 %v3484_v54, %v2856_v12  ;;  %v3689_v47 = vadd.f32 %v3573_v44, %v2945_v52  ;;  %v3870_v59 = vmax.f32 %v3838_v13, 0.0  ;;  %v3871_v31 = vmax.f32 %v3839_v36, 0.0  ;;  %v3313_v52 = vpop.f32.mrf.mxu0  ;;  %v3402_v13 = vpop.f32.mrf.mxu1 }
 0x702   : > { %v3690_v12 = vadd.f32 %v21809_v0, %v2680_v20  ;;  %v21811_v44 = vmax.f32 %v16084_v3, %v16742_v18 }
 0x703   : > { %v3770_v34 = vmax.f32 %v21797_v60, %v3688_v4  ;;  %v3771_v16 = vmax.f32 %v21798_v9, %v3689_v47  ;;  %v17019_v62 = vpack.c.bf16 %v3870_v59, %v3868_v11  ;;  %v17021_v50 = vpack.c.bf16 %v3871_v31, %v3869_v55  ;;  %v21813_v47 = vld [vmem:[#allocation118_spill] sm:$0xff]  ;;  %v21815_v60 = vld [vmem:[#allocation119_spill] sm:$0xff] }
 0x704   : > { %v21812_v55 = vmax.f32 %v16086_v2, %v16744_v53  ;;  %v21814_v59 = vld [vmem:[#allocation110_spill] sm:$0xff] }
 0x705   : > { %v3802_v32 = vmax.f32 %v21803_v43, %v3770_v34  ;;  %v3803_v29 = vmax.f32 %v21804_v22, %v3771_v16  ;;  %v2861_v31 = vadd.f32 %v21814_v59, %v21813_v47  ;;  %v21816_v34 = vld [vmem:[#allocation190_spill] sm:$0xff] }
 0x706   : > { %v2950_v9 = vadd.f32 %v21816_v34, %v21815_v60 }
 0x707   : > { %v3840_v21 = vadd.f32 %v16925_v7, %v3802_v32  ;;  %v3841_v38 = vadd.f32 %v16927_v56, %v3803_v29  ;;  %v21817_v32 = vld [vmem:[#allocation48_spill] sm:$0xff]  ;;  %v21818_v29 = vld [vmem:[#allocation49_spill] sm:$0xff] }
 0x708   : > { %v3486_v39 = vpop.f32.mrf.mxu2  ;;  %v3575_v40 = vpop.f32.mrf.mxu3 }
 0x709   : > { %v3692_v27 = vadd.f32 %v3486_v39, %v2858_v10  ;;  %v3693_v41 = vadd.f32 %v3575_v40, %v2947_v42  ;;  %v3872_v37 = vmax.f32 %v3840_v21, 0.0  ;;  %v3873_v14 = vmax.f32 %v3841_v38, 0.0  ;;  %v3316_v2 = vpop.f32.mrf.mxu0  ;;  %v3405_v53 = vpop.f32.mrf.mxu1  ;;  %v21821_v39 = vld [vmem:[#allocation51_spill] sm:$0xff]  ;;  %v21822_v40 = vld [vmem:[#allocation156_spill] sm:$0xff]  ;;  %v21827_v21 = vld [vmem:[#allocation122_spill] sm:$0xff] }
 0x70a   : > { %v2685_v42 = vadd.f32 %v21820_v17, %v21819_v48  ;;  %v2774_v0 = vadd.f32 %v21822_v40, %v21821_v39  ;;  %v21828_v38 = vld [vmem:[#allocation192_spill] sm:$0xff] }
 0x70b   : > { %v3772_v36 = vmax.f32 %v3690_v12, %v3692_v27  ;;  %v3773_v54 = vmax.f32 %v3691_v58, %v3693_v41  ;;  %v21823_v12 = vmax.f32 %v16112_v28, %v16758_v26  ;;  %v21824_v58 = vmax.f32 %v16114_v30, %v16760_v57  ;;  %v21825_v41 = vld [vmem:[#allocation121_spill] sm:$0xff]  ;;  %v21829_v28 = vld [vmem:[#allocation52_spill] sm:$0xff]  ;;  %v21832_v30 = vld [vmem:[#allocation158_spill] sm:$0xff] }
 0x70c   : > { %v3699_v47 = vadd.f32 %v3402_v13, %v2774_v0  ;;  %v21830_v26 = vld [vmem:[#allocation157_spill] sm:$0xff] }
 0x70d   : > { %v3804_v11 = vmax.f32 %v21811_v44, %v3772_v36  ;;  %v3805_v4 = vmax.f32 %v21812_v55, %v3773_v54  ;;  %v21826_v36 = vld [vmem:[#allocation191_spill] sm:$0xff]  ;;  %v2952_v44 = vadd.f32 %v21828_v38, %v21827_v21 }
 0x70e   : > { %v2863_v54 = vadd.f32 %v21826_v36, %v21825_v41  ;;  %v21839_v36 = vld [vmem:[#allocation54_spill] sm:$0xff]  ;;  %v21841_v38 = vld [vmem:[#allocation55_spill] sm:$0xff] }
 0x70f   : > { %v3842_v16 = vadd.f32 %v16925_v7, %v3804_v11  ;;  %v3843_v5 = vadd.f32 %v16927_v56, %v3805_v4  ;;  %v3698_v4 = vadd.f32 %v3313_v52, %v2685_v42  ;;  %v21833_v52 = vmax.f32 %v16775_v24, %v16780_v35 }
 0x710   : > { %v3489_v6 = vpop.f32.mrf.mxu2  ;;  %v3578_v20 = vpop.f32.mrf.mxu3 }
 0x711   : > { %v3696_v3 = vadd.f32 %v3489_v6, %v2861_v31  ;;  %v3697_v18 = vadd.f32 %v3578_v20, %v2950_v9  ;;  %v3874_v63 = vmax.f32 %v3842_v16, 0.0  ;;  %v3875_v43 = vmax.f32 %v3843_v5, 0.0  ;;  %v21831_v16 = vld [vmem:[#allocation53_spill] sm:$0xff]  ;;  %v3318_v20 = vpop.f32.mrf.mxu0 }
 0x712   : > { %v2688_v9 = vadd.f32 %v21830_v26, %v21829_v28  ;;  %v2777_v57 = vadd.f32 %v21832_v30, %v21831_v16  ;;  %v21848_v28 = vld [vmem:[#allocation194_spill] sm:$0xff]  ;;  %v21850_v16 = vld [vmem:[#allocation195_spill] sm:$0xff] }
 0x713   : > { %v3774_v22 = vmax.f32 %v21817_v32, %v3696_v3  ;;  %v3775_v61 = vmax.f32 %v21818_v29, %v3697_v18  ;;  %v17055_v46 = vpack.c.bf16 %v3874_v63, %v3872_v37  ;;  %v17057_v10 = vpack.c.bf16 %v3875_v43, %v3873_v14  ;;  %v3407_v37 = vpop.f32.mrf.mxu1  ;;  %v21835_v18 = vld [vmem:[#allocation123_spill] sm:$0xff]  ;;  %v21837_v32 = vld [vmem:[#allocation124_spill] sm:$0xff] }
 0x714   : > { %v21834_v14 = vmax.f32 %v16778_v25, %v16782_v33  ;;  %v21836_v63 = vld [vmem:[#allocation115_spill] sm:$0xff]  ;;  %v3702_v17 = vadd.f32 %v3316_v2, %v2688_v9  ;;  %v3703_v42 = vadd.f32 %v3405_v53, %v2777_v57  ;;  %v21842_v2 = vld [vmem:[#allocation160_spill] sm:$0xff] }
 0x715   : > { %v3806_v49 = vmax.f32 %v21823_v12, %v3774_v22  ;;  %v3807_v27 = vmax.f32 %v21824_v58, %v3775_v61  ;;  %v2866_v43 = vadd.f32 %v21836_v63, %v21835_v18  ;;  %v21838_v22 = vld [vmem:[#allocation193_spill] sm:$0xff]  ;;  %v2779_v53 = vadd.f32 %v21842_v2, %v21841_v38  ;;  %v21849_v9 = vld [vmem:[#allocation127_spill] sm:$0xff] }
 0x716   : > { %v2955_v29 = vadd.f32 %v21838_v22, %v21837_v32  ;;  %v2957_v30 = vadd.f32 %v21850_v16, %v21849_v9  ;;  %v21852_v18 = vld [vmem:[#allocation161_spill] sm:$0xff]  ;;  %v21854_v32 = vld [vmem:[#allocation162_spill] sm:$0xff] }
 0x717   : > { %v3844_v5 = vadd.f32 %v16925_v7, %v3806_v49  ;;  %v3845_v6 = vadd.f32 %v16927_v56, %v3807_v27 }
 0x718   : > { %v3491_v11 = vpop.f32.mrf.mxu2  ;;  %v3580_v55 = vpop.f32.mrf.mxu3 }
 0x719   : > { %v3700_v59 = vadd.f32 %v3491_v11, %v2863_v54  ;;  %v3701_v31 = vadd.f32 %v3580_v55, %v2952_v44  ;;  %v3876_v35 = vmax.f32 %v3844_v5, 0.0  ;;  %v3877_v24 = vmax.f32 %v3845_v6, 0.0  ;;  %v21840_v54 = vld [vmem:[#allocation159_spill] sm:$0xff]  ;;  %v21844_v55 = vld [vmem:[#allocation16_spill] sm:$0xff] }
 0x71a   : > { %v2690_v21 = vadd.f32 %v21840_v54, %v21839_v36  ;;  %v21843_v44 = vmax.f32 %v16181_v15, %v16796_v45 }
 0x71b   : > { %v3776_v60 = vmax.f32 %v3698_v4, %v3700_v59  ;;  %v3777_v34 = vmax.f32 %v3699_v47, %v3701_v31  ;;  %v21845_v4 = vld [vmem:[#allocation130_spill] sm:$0xff]  ;;  %v3321_v31 = vpop.f32.mrf.mxu0 }
 0x71c   : > { %v21846_v47 = vmax.f32 %v21844_v55, %v21845_v4  ;;  %v3706_v6 = vadd.f32 %v3318_v20, %v2690_v21  ;;  %v21858_v20 = vld [vmem:[#allocation65_spill] sm:$0xff] }
 0x71d   : > { %v3808_v13 = vmax.f32 %v21833_v52, %v3776_v60  ;;  %v3809_v3 = vmax.f32 %v21834_v14, %v3777_v34  ;;  %v3410_v60 = vpop.f32.mrf.mxu1  ;;  %v21847_v34 = vld [vmem:[#allocation126_spill] sm:$0xff]  ;;  %v3707_v52 = vadd.f32 %v3407_v37, %v2779_v53  ;;  %v21859_v37 = vld [vmem:[#allocation67_spill] sm:$0xff] }
 0x71e   : > { %v2868_v26 = vadd.f32 %v21848_v28, %v21847_v34 }
 0x71f   : > { %v3846_v61 = vadd.f32 %v16925_v7, %v3808_v13  ;;  %v3847_v48 = vadd.f32 %v16927_v56, %v3809_v3  ;;  %v21851_v3 = vld [vmem:[#allocation56_spill] sm:$0xff] }
 0x720   : > { %v3494_v39 = vpop.f32.mrf.mxu2  ;;  %v3583_v40 = vpop.f32.mrf.mxu3  ;;  %v2693_v63 = vadd.f32 %v21852_v18, %v21851_v3  ;;  %v21873_v3 = vld [vmem:[#allocation68_spill] sm:$0xff] }
 0x721   : > { %v3704_v0 = vadd.f32 %v3494_v39, %v2866_v43  ;;  %v3705_v12 = vadd.f32 %v3583_v40, %v2955_v29  ;;  %v3878_v25 = vmax.f32 %v3846_v61, 0.0  ;;  %v3879_v33 = vmax.f32 %v3847_v48, 0.0  ;;  %v21853_v43 = vld [vmem:[#allocation57_spill] sm:$0xff]  ;;  %v21855_v48 = vld [vmem:[#allocation64_spill] sm:$0xff] }
 0x722   : > { %v2782_v22 = vadd.f32 %v21854_v32, %v21853_v43  ;;  %v21860_v40 = vmax.f32 %v21858_v20, %v21859_v37  ;;  %v3710_v54 = vadd.f32 %v3321_v31, %v2693_v63  ;;  %v21875_v43 = vld [vmem:[#allocation131_spill] sm:$0xff]  ;;  %v21876_v32 = vld [vmem:[#allocation197_spill] sm:$0xff] }
 0x723   : > { %v3778_v49 = vmax.f32 %v3702_v17, %v3704_v0  ;;  %v3779_v58 = vmax.f32 %v3703_v42, %v3705_v12  ;;  %v17091_v27 = vpack.c.bf16 %v3878_v25, %v3876_v35  ;;  %v17093_v41 = vpack.c.bf16 %v3879_v33, %v3877_v24  ;;  %v21856_v17 = vld [vmem:[#allocation66_spill] sm:$0xff]  ;;  %v21861_v24 = vld [vmem:[#allocation128_spill] sm:$0xff]  ;;  %v21863_v25 = vld [vmem:[#allocation129_spill] sm:$0xff] }
 0x724   : > { %v21857_v42 = vmax.f32 %v21855_v48, %v21856_v17  ;;  %v21862_v0 = vld [vmem:[#allocation120_spill] sm:$0xff]  ;;  %v3711_v21 = vadd.f32 %v3410_v60, %v2782_v22  ;;  %v21867_v60 = vld [vmem:[#allocation59_spill] sm:$0xff]  ;;  %v2873_v22 = vadd.f32 %v21876_v32, %v21875_v43 }
 0x725   : > { %v3810_v11 = vmax.f32 %v21843_v44, %v3778_v49  ;;  %v3811_v59 = vmax.f32 %v21846_v47, %v3779_v58  ;;  %v2871_v12 = vadd.f32 %v21862_v0, %v21861_v24  ;;  %v21864_v33 = vld [vmem:[#allocation196_spill] sm:$0xff]  ;;  %v3412_v34 = vpop.f32.mrf.mxu1 }
 0x726   : > { %v2960_v49 = vadd.f32 %v21864_v33, %v21863_v25  ;;  %v21879_v0 = vld [vmem:[#allocation60_spill] sm:$0xff]  ;;  %v21881_v33 = vld [vmem:[#allocation61_spill] sm:$0xff] }
 0x727   : > { %v3848_v29 = vadd.f32 %v16925_v7, %v3810_v11  ;;  %v3849_v61 = vadd.f32 %v16927_v56, %v3811_v59  ;;  %v3323_v59 = vpop.f32.mrf.mxu0 }
 0x728   : > { %v3496_v57 = vpop.f32.mrf.mxu2  ;;  %v3585_v5 = vpop.f32.mrf.mxu3 }
 0x729   : > { %v3708_v13 = vadd.f32 %v3496_v57, %v2868_v26  ;;  %v3709_v14 = vadd.f32 %v3585_v5, %v2957_v30  ;;  %v3880_v53 = vmax.f32 %v3848_v29, 0.0  ;;  %v3881_v44 = vmax.f32 %v3849_v61, 0.0  ;;  %v21865_v30 = vld [vmem:[#allocation58_spill] sm:$0xff]  ;;  %v21866_v57 = vld [vmem:[#allocation163_spill] sm:$0xff]  ;;  %v21868_v5 = vld [vmem:[#allocation164_spill] sm:$0xff] }
 0x72a   : > { %v2695_v31 = vadd.f32 %v21866_v57, %v21865_v30  ;;  %v21877_v29 = vld [vmem:[#allocation132_spill] sm:$0xff]  ;;  %v21878_v61 = vld [vmem:[#allocation198_spill] sm:$0xff]  ;;  %v21892_v57 = vld [vmem:[#allocation199_spill] sm:$0xff] }
 0x72b   : > { %v3780_v15 = vmax.f32 %v3706_v6, %v3708_v13  ;;  %v3781_v45 = vmax.f32 %v3707_v52, %v3709_v14  ;;  %v2784_v6 = vadd.f32 %v21868_v5, %v21867_v60  ;;  %v21869_v52 = vld [vmem:[#allocation9_spill] sm:$0xff]  ;;  %v21870_v13 = vld [vmem:[#allocation135_spill] sm:$0xff]  ;;  %v2962_v48 = vadd.f32 %v21878_v61, %v21877_v29  ;;  %v21891_v30 = vld [vmem:[#allocation134_spill] sm:$0xff] }
 0x72c   : > { %v21871_v14 = vmax.f32 %v21869_v52, %v21870_v13 }
 0x72d   : > { %v3812_v39 = vmax.f32 %v21857_v42, %v3780_v15  ;;  %v3813_v35 = vmax.f32 %v21860_v40, %v3781_v45  ;;  %v21872_v45 = vld [vmem:[#allocation20_spill] sm:$0xff]  ;;  %v3715_v20 = vadd.f32 %v3412_v34, %v2784_v6  ;;  %v21889_v34 = vld [vmem:[#allocation133_spill] sm:$0xff] }
 0x72e   : > { %v21874_v18 = vmax.f32 %v21872_v45, %v21873_v3 }
 0x72f   : > { %v3850_v58 = vadd.f32 %v16925_v7, %v3812_v39  ;;  %v3851_v36 = vadd.f32 %v16927_v56, %v3813_v35  ;;  %v3714_v39 = vadd.f32 %v3323_v59, %v2695_v31  ;;  %v2965_v31 = vadd.f32 %v21892_v57, %v21891_v30 }
 0x730   : > { %v3499_v38 = vpop.f32.mrf.mxu2  ;;  %v3588_v2 = vpop.f32.mrf.mxu3 }
 0x731   : > { %v3712_v11 = vadd.f32 %v3499_v38, %v2871_v12  ;;  %v3713_v55 = vadd.f32 %v3588_v2, %v2960_v49  ;;  %v3882_v4 = vmax.f32 %v3850_v58, 0.0  ;;  %v3883_v47 = vmax.f32 %v3851_v36, 0.0  ;;  %v21880_v12 = vld [vmem:[#allocation6_spill] sm:$0xff]  ;;  %v21882_v49 = vld [vmem:[#allocation165_spill] sm:$0xff]  ;;  %v3326_v36 = vpop.f32.mrf.mxu0 }
 0x732   : > { %v2698_v25 = vadd.f32 %v21880_v12, %v21879_v0  ;;  %v2787_v58 = vadd.f32 %v21882_v49, %v21881_v33  ;;  %v21883_v2 = vld [vmem:[#allocation69_spill] sm:$0xff]  ;;  %v21900_v12 = vld [vmem:[#allocation28_spill] sm:$0xff] }
 0x733   : > { %v3782_v28 = vmax.f32 %v3710_v54, %v3712_v11  ;;  %v3783_v26 = vmax.f32 %v3711_v21, %v3713_v55  ;;  %v17127_v9 = vpack.c.bf16 %v3882_v4, %v3880_v53  ;;  %v17129_v16 = vpack.c.bf16 %v3883_v47, %v3881_v44  ;;  %v3415_v54 = vpop.f32.mrf.mxu1  ;;  %v21884_v53 = vld [vmem:[#allocation71_spill] sm:$0xff]  ;;  %v21886_v55 = vld [vmem:[#allocation70_spill] sm:$0xff]  ;;  %v21887_v4 = vld [vmem:[#allocation72_spill] sm:$0xff] }
 0x734   : > { %v21885_v44 = vmax.f32 %v21883_v2, %v21884_v53  ;;  %v21888_v47 = vmax.f32 %v21886_v55, %v21887_v4  ;;  %v3718_v6 = vadd.f32 %v3326_v36, %v2698_v25  ;;  %v3719_v52 = vadd.f32 %v3415_v54, %v2787_v58  ;;  %v21901_v25 = vld [vmem:[#allocation74_spill] sm:$0xff]  ;;  %v21903_v54 = vld [vmem:[#allocation136_spill] sm:$0xff]  ;;  %v21905_v2 = vld [vmem:[#allocation137_spill] sm:$0xff] }
 0x735   : > { %v3814_v15 = vmax.f32 %v21871_v14, %v3782_v28  ;;  %v3815_v63 = vmax.f32 %v21874_v18, %v3783_v26  ;;  %v21890_v28 = vld [vmem:[#allocation125_spill] sm:$0xff]  ;;  %v21902_v33 = vmax.f32 %v21900_v12, %v21901_v25 }
 0x736   : > { %v2876_v26 = vadd.f32 %v21890_v28, %v21889_v34  ;;  %v21906_v53 = vld [vmem:[#allocation201_spill] sm:$0xff] }
 0x737   : > { %v3852_v21 = vadd.f32 %v16925_v7, %v3814_v15  ;;  %v3853_v38 = vadd.f32 %v16927_v56, %v3815_v63 }
 0x738   : > { %v3501_v17 = vpop.f32.mrf.mxu2  ;;  %v3590_v42 = vpop.f32.mrf.mxu3 }
 0x739   : > { %v3716_v37 = vadd.f32 %v3501_v17, %v2873_v22  ;;  %v3717_v40 = vadd.f32 %v3590_v42, %v2962_v48  ;;  %v3884_v15 = vmax.f32 %v3852_v21, 0.0  ;;  %v3885_v45 = vmax.f32 %v3853_v38, 0.0  ;;  %v21893_v48 = vld [vmem:[#allocation62_spill] sm:$0xff]  ;;  %v3328_v58 = vpop.f32.mrf.mxu0  ;;  %v21904_v21 = vld [vmem:[#allocation200_spill] sm:$0xff] }
 0x73a   : > { %v21894_v17 = vld [vmem:[#allocation166_spill] sm:$0xff]  ;;  %v2878_v38 = vadd.f32 %v21904_v21, %v21903_v54 }
 0x73b   : > { %v3784_v35 = vmax.f32 %v3714_v39, %v3716_v37  ;;  %v3785_v24 = vmax.f32 %v3715_v20, %v3717_v40  ;;  %v2700_v42 = vadd.f32 %v21894_v17, %v21893_v48  ;;  %v21895_v39 = vld [vmem:[#allocation63_spill] sm:$0xff]  ;;  %v3417_v36 = vpop.f32.mrf.mxu1  ;;  %v13694_v21 = vld [vmem:[%s21298_s5 + $0x50] sm:$0xff] }
 0x73c   : > { %v21896_v20 = vld [vmem:[#allocation167_spill] sm:$0xff] }
 0x73d   : > { %v3816_v11 = vmax.f32 %v21885_v44, %v3784_v35  ;;  %v3817_v59 = vmax.f32 %v21888_v47, %v3785_v24  ;;  %v2789_v37 = vadd.f32 %v21896_v20, %v21895_v39  ;;  %v21897_v40 = vld [vmem:[#allocation11_spill] sm:$0xff]  ;;  %v21898_v35 = vld [vmem:[#allocation73_spill] sm:$0xff]  ;;  %v2967_v44 = vadd.f32 %v21906_v53, %v21905_v2 }
 0x73e   : > { %v21899_v24 = vmax.f32 %v21897_v40, %v21898_v35  ;;  %v3722_v4 = vadd.f32 %v3328_v58, %v2700_v42  ;;  %v13693_v20 = vld [vmem:[%s21298_s5 + $0x48] sm:$0xff] }
 0x73f   : > { %v3854_v60 = vadd.f32 %v16925_v7, %v3816_v11  ;;  %v3855_v5 = vadd.f32 %v16927_v56, %v3817_v59  ;;  %v3723_v47 = vadd.f32 %v3417_v36, %v2789_v37 }
 0x740   : > { %v3504_v13 = vpop.f32.mrf.mxu2  ;;  %v3593_v14 = vpop.f32.mrf.mxu3 }
 0x741   : > { %v3720_v3 = vadd.f32 %v3504_v13, %v2876_v26  ;;  %v3721_v18 = vadd.f32 %v3593_v14, %v2965_v31  ;;  %v3886_v63 = vmax.f32 %v3854_v60, 0.0  ;;  %v3887_v43 = vmax.f32 %v3855_v5, 0.0  ;;  %v21907_v31 = vld [vmem:[#allocation75_spill] sm:$0xff]  ;;  %v21908_v60 = vld [vmem:[#allocation76_spill] sm:$0xff] }
 0x742   : > { %v21909_v5 = vmax.f32 %v21907_v31, %v21908_v60 }
 0x743   : > { %v3786_v32 = vmax.f32 %v3718_v6, %v3720_v3  ;;  %v3787_v22 = vmax.f32 %v3719_v52, %v3721_v18  ;;  %v3904_v29 = vpack.c.bf16 %v3886_v63, %v3884_v15  ;;  %v3905_v61 = vpack.c.bf16 %v3887_v43, %v3885_v45  ;;  %v21910_v52 = vld [vmem:[#allocation77_spill] sm:$0xff] }
 0x744   : > { %v21911_v13 = vmax.f32 %v16892_v23, %v21910_v52  ;;  %v13684_v23 = vld [vmem:[%s21298_s5] sm:$0xff] }
 0x745   : > { %v3818_v0 = vmax.f32 %v21899_v24, %v3786_v32  ;;  %v3819_v49 = vmax.f32 %v21902_v33, %v3787_v22 }
 0x747   : > { %v3856_v30 = vadd.f32 %v16925_v7, %v3818_v0  ;;  %v3857_v57 = vadd.f32 %v16927_v56, %v3819_v49 }
 0x748   : > { %v3506_v11 = vpop.f32.mrf.mxu2  ;;  %v3595_v55 = vpop.f32.mrf.mxu3 }
 0x749   : > { %v3724_v59 = vadd.f32 %v3506_v11, %v2878_v38  ;;  %v3725_v34 = vadd.f32 %v3595_v55, %v2967_v44  ;;  %v3888_v3 = vmax.f32 %v3856_v30, 0.0  ;;  %v3889_v18 = vmax.f32 %v3857_v57, 0.0  ;;  %v13695_v30 = vld [vmem:[%s21298_s5 + $0x58] sm:$0xff] }
 0x74b   : > { %v3788_v28 = vmax.f32 %v3722_v4, %v3724_v59  ;;  %v3789_v26 = vmax.f32 %v3723_v47, %v3725_v34 }
 0x74d   : > { %v3820_v6 = vmax.f32 %v21909_v5, %v3788_v28  ;;  %v3821_v14 = vmax.f32 %v21911_v13, %v3789_v26 }
 0x74f   : > { %v3858_v15 = vadd.f32 %v16925_v7, %v3820_v6  ;;  %v3859_v45 = vadd.f32 %v16927_v56, %v3821_v14  ;;  %v13685_v7 = vld [vmem:[%s21298_s5 + $0x8] sm:$0xff]  ;;  %v13686_v56 = vld [vmem:[%s21298_s5 + $0x10] sm:$0xff] }
 0x751   : > { %v3890_v63 = vmax.f32 %v3858_v15, 0.0  ;;  %v3891_v43 = vmax.f32 %v3859_v45, 0.0 }
 0x753   : > { %v3906_v32 = vpack.c.bf16 %v3890_v63, %v3888_v3  ;;  %v3907_v22 = vpack.c.bf16 %v3891_v43, %v3889_v18  ;;  %v13696_v63 = vld [vmem:[%s21298_s5 + $0x60] sm:$0xff] }
 0x755   : > { %4100 = vmatpush.bf16.msra.mxu0 %v3906_v32  ;;  %4229 = vmatpush.bf16.msra.mxu1 %v3907_v22 }
 0x759   : > { %4101 = vmatpush.bf16.msra.mxu0 %v3904_v29  ;;  %4230 = vmatpush.bf16.msra.mxu1 %v3905_v61 }
 0x75d   : > { %4102 = vmatpush.bf16.msra.mxu0 %v17127_v9  ;;  %4231 = vmatpush.bf16.msra.mxu1 %v17129_v16 }
 0x761   : > { %4103 = vmatpush.bf16.msra.mxu0 %v17091_v27  ;;  %4232 = vmatpush.bf16.msra.mxu1 %v17093_v41 }
 0x765   : > { %4104 = vmatpush.bf16.msra.mxu0 %v17055_v46  ;;  %4233 = vmatpush.bf16.msra.mxu1 %v17057_v10 }
 0x769   : > { %4105 = vmatpush.bf16.msra.mxu0 %v17019_v62  ;;  %4234 = vmatpush.bf16.msra.mxu1 %v17021_v50  ;;  %v13691_v62 = vld [vmem:[%s21298_s5 + $0x38] sm:$0xff]  ;;  %v13692_v50 = vld [vmem:[%s21298_s5 + $0x40] sm:$0xff] }
 0x76d   : > { %4106 = vmatpush.bf16.msra.mxu0 %v16983_v1  ;;  %4235 = vmatpush.bf16.msra.mxu1 %v16985_v8  ;;  %v13689_v1 = vld [vmem:[%s21298_s5 + $0x28] sm:$0xff]  ;;  %v13690_v8 = vld [vmem:[%s21298_s5 + $0x30] sm:$0xff] }
 0x771   : > { %4107 = vmatpush.bf16.msra.mxu0 %v16947_v51  ;;  %4236 = vmatpush.bf16.msra.mxu1 %v16949_v19  ;;  %v13687_v51 = vld [vmem:[%s21298_s5 + $0x18] sm:$0xff]  ;;  %v13688_v19 = vld [vmem:[%s21298_s5 + $0x20] sm:$0xff] }
 0x774   : > { %4108 = vmatmul.bf16.vlgmr.msra.gmra.mxu0 %v13684_v23  ;;  %4237 = vmatmul.bf16.vlgmr.msra.gmra.mxu1 %v13684_v23 }
 0x784   : > { %4113 = vmatmul.bf16.gmra.mxu0 %v13685_v7  ;;  %4242 = vmatmul.bf16.gmra.mxu1 %v13685_v7 }
 0x794   : > { %4118 = vmatmul.bf16.gmra.mxu0 %v13686_v56  ;;  %4247 = vmatmul.bf16.gmra.mxu1 %v13686_v56 }
 0x7a4   : > { %4123 = vmatmul.bf16.gmra.mxu0 %v13687_v51  ;;  %4252 = vmatmul.bf16.gmra.mxu1 %v13687_v51 }
 0x7b4   : > { %4128 = vmatmul.bf16.gmra.mxu0 %v13688_v19  ;;  %4257 = vmatmul.bf16.gmra.mxu1 %v13688_v19 }
 0x7c4   : > { %4133 = vmatmul.bf16.gmra.mxu0 %v13689_v1  ;;  %4262 = vmatmul.bf16.gmra.mxu1 %v13689_v1 }
 0x7d4   : > { %4138 = vmatmul.bf16.gmra.mxu0 %v13690_v8  ;;  %4267 = vmatmul.bf16.gmra.mxu1 %v13690_v8 }
 0x7e4   : > { %4143 = vmatmul.bf16.gmra.mxu0 %v13691_v62  ;;  %4272 = vmatmul.bf16.gmra.mxu1 %v13691_v62 }
 0x7f1   : > { %v4109_v46 = vpop.f32.mrf.mxu0  ;;  %v4238_v10 = vpop.f32.mrf.mxu1 }
 0x7f2   : > { %v4358_v27 = vpack.c.bf16 %v4238_v10, %v4109_v46  ;;  %v11457_v46 = vld [vmem:[%s21297_s4 + $0x2e0] sm:$0xf]  ;;  %v13802_v10 = vld [vmem:[%s21297_s4 + $0x2ec] sm:$0xf0] }
 0x7f4   : > { %4148 = vmatmul.bf16.gmra.mxu0 %v13692_v50  ;;  %4277 = vmatmul.bf16.gmra.mxu1 %v13692_v50  ;;  %v5343_v29 = vunpack.c.l.b16 %v4358_v27  ;;  %v5344_v61 = vunpack.c.h.b16 %v4358_v27  ;;  %v11585_v27 = vld [vmem:[%s21297_s4 + $0x3e0] sm:$0xf] }
 0x7f9   : > { %v4111_v41 = vpop.f32.mrf.mxu0  ;;  %v4240_v9 = vpop.f32.mrf.mxu1 }
 0x7fa   : > { %v4359_v16 = vpack.c.bf16 %v4240_v9, %v4111_v41  ;;  %v11458_v41 = vor.u32 %v13802_v10, %v11457_v46  ;;  %v13834_v9 = vld [vmem:[%s21297_s4 + $0x3ec] sm:$0xf0]  ;;  %v11489_v10 = vld [vmem:[%s21297_s4 + $0x320] sm:$0xf] }
 0x7fb   : > { %v13778_v46 = vld [vmem:[%s21297_s4 + $0x22c] sm:$0xf0] }
 0x7fc   : > { %v5345_v48 = vunpack.c.l.b16 %v4359_v16  ;;  %v5346_v17 = vunpack.c.h.b16 %v4359_v16  ;;  %v13697_v16 = vld [vmem:[%s21298_s5 + $0x68] sm:$0xff]  ;;  %4935 = vmatpush.bf16.msrb.mxu2 %v11458_v41  ;;  %v13810_v41 = vld [vmem:[%s21297_s4 + $0x32c] sm:$0xf0] }
 0x7fe   : > { %v17226_v42 = vpack.c.b16 %v5345_v48, %v5343_v29  ;;  %v17228_v39 = vpack.c.b16 %v5346_v17, %v5344_v61  ;;  %v11586_v29 = vor.u32 %v13834_v9, %v11585_v27  ;;  %v11490_v9 = vor.u32 %v13810_v41, %v11489_v10 }
 0x800   : > { %4984 = vmatpush.bf16.msrb.mxu3 %v11586_v29 }
 0x801   : > { %v4114_v37 = vpop.f32.mrf.mxu0  ;;  %v4243_v40 = vpop.f32.mrf.mxu1 }
 0x802   : > { %v4360_v35 = vpack.c.bf16 %v4243_v40, %v4114_v37  ;;  %v13798_v37 = vld [vmem:[%s21297_s4 + $0x2cc] sm:$0xf0] }
 0x804   : > { %4153 = vmatmul.bf16.gmra.mxu0 %v13693_v20  ;;  %4282 = vmatmul.bf16.gmra.mxu1 %v13693_v20  ;;  %v5347_v25 = vunpack.c.l.b16 %v4360_v35  ;;  %v5348_v33 = vunpack.c.h.b16 %v4360_v35  ;;  %v11441_v20 = vld [vmem:[%s21297_s4 + $0x2c0] sm:$0xf] }
 0x805   : > { %v11442_v40 = vor.u32 %v13798_v37, %v11441_v20  ;;  %v11569_v35 = vld [vmem:[%s21297_s4 + $0x3c0] sm:$0xf] }
 0x806   : > { %v11473_v20 = vld [vmem:[%s21297_s4 + $0x300] sm:$0xf] }
 0x807   : > { %4936 = vmatpush.bf16.msrb.mxu2 %v11442_v40 }
 0x809   : > { %v4116_v24 = vpop.f32.mrf.mxu0  ;;  %v4245_v0 = vpop.f32.mrf.mxu1 }
 0x80a   : > { %v4361_v12 = vpack.c.bf16 %v4245_v0, %v4116_v24  ;;  %v13830_v24 = vld [vmem:[%s21297_s4 + $0x3cc] sm:$0xf0] }
 0x80b   : > { %v11570_v0 = vor.u32 %v13830_v24, %v11569_v35  ;;  %v13806_v35 = vld [vmem:[%s21297_s4 + $0x30c] sm:$0xf0] }
 0x80c   : > { %v5349_v49 = vunpack.c.l.b16 %v4361_v12  ;;  %v5350_v58 = vunpack.c.h.b16 %v4361_v12  ;;  %v11425_v12 = vld [vmem:[%s21297_s4 + $0x2a0] sm:$0xf] }
 0x80d   : > { %4985 = vmatpush.bf16.msrb.mxu3 %v11570_v0 }
 0x80e   : > { %v17233_v36 = vpack.c.b16 %v5349_v49, %v5347_v25  ;;  %v17235_v54 = vpack.c.b16 %v5350_v58, %v5348_v33  ;;  %v13794_v25 = vld [vmem:[%s21297_s4 + $0x2ac] sm:$0xf0]  ;;  %v11553_v33 = vld [vmem:[%s21297_s4 + $0x3a0] sm:$0xf] }
 0x80f   : > { %v11426_v49 = vor.u32 %v13794_v25, %v11425_v12  ;;  %v13826_v58 = vld [vmem:[%s21297_s4 + $0x3ac] sm:$0xf0]  ;;  %v11474_v25 = vor.u32 %v13806_v35, %v11473_v20 }
 0x811   : > { %v4119_v38 = vpop.f32.mrf.mxu0  ;;  %v4248_v2 = vpop.f32.mrf.mxu1  ;;  %4937 = vmatpush.bf16.msrb.mxu2 %v11426_v49 }
 0x812   : > { %v4362_v53 = vpack.c.bf16 %v4248_v2, %v4119_v38 }
 0x814   : > { %4158 = vmatmul.bf16.gmra.mxu0 %v13694_v21  ;;  %4287 = vmatmul.bf16.gmra.mxu1 %v13694_v21  ;;  %v5351_v4 = vunpack.c.l.b16 %v4362_v53  ;;  %v5352_v47 = vunpack.c.h.b16 %v4362_v53  ;;  %v11554_v21 = vor.u32 %v13826_v58, %v11553_v33  ;;  %v13699_v58 = vld [vmem:[%s21298_s5 + $0x78] sm:$0xff] }
 0x816   : > { %4986 = vmatpush.bf16.msrb.mxu3 %v11554_v21 }
 0x819   : > { %v4121_v44 = vpop.f32.mrf.mxu0  ;;  %v4250_v11 = vpop.f32.mrf.mxu1 }
 0x81a   : > { %v4363_v55 = vpack.c.bf16 %v4250_v11, %v4121_v44  ;;  %v11409_v44 = vld [vmem:[%s21297_s4 + $0x280] sm:$0xf]  ;;  %v13790_v11 = vld [vmem:[%s21297_s4 + $0x28c] sm:$0xf0] }
 0x81c   : > { %v5353_v59 = vunpack.c.l.b16 %v4363_v55  ;;  %v5354_v34 = vunpack.c.h.b16 %v4363_v55  ;;  %v11537_v55 = vld [vmem:[%s21297_s4 + $0x380] sm:$0xf] }
 0x81e   : > { %v17240_v28 = vpack.c.b16 %v5353_v59, %v5351_v4  ;;  %v17242_v26 = vpack.c.b16 %v5354_v34, %v5352_v47  ;;  %v11410_v47 = vor.u32 %v13790_v11, %v11409_v44  ;;  %v13822_v59 = vld [vmem:[%s21297_s4 + $0x38c] sm:$0xf0] }
 0x820   : > { %4938 = vmatpush.bf16.msrb.mxu2 %v11410_v47 }
 0x821   : > { %v4124_v57 = vpop.f32.mrf.mxu0  ;;  %v4253_v31 = vpop.f32.mrf.mxu1 }
 0x822   : > { %v4364_v60 = vpack.c.bf16 %v4253_v31, %v4124_v57  ;;  %v11538_v31 = vor.u32 %v13822_v59, %v11537_v55 }
 0x824   : > { %4163 = vmatmul.bf16.gmra.mxu0 %v13695_v30  ;;  %4292 = vmatmul.bf16.gmra.mxu1 %v13695_v30  ;;  %v5355_v13 = vunpack.c.l.b16 %v4364_v60  ;;  %v5356_v14 = vunpack.c.h.b16 %v4364_v60 }
 0x825   : > { %4987 = vmatpush.bf16.msrb.mxu3 %v11538_v31 }
 0x829   : > { %v4126_v5 = vpop.f32.mrf.mxu0  ;;  %v4255_v6 = vpop.f32.mrf.mxu1 }
 0x82a   : > { %v4365_v52 = vpack.c.bf16 %v4255_v6, %v4126_v5  ;;  %v11393_v6 = vld [vmem:[%s21297_s4 + $0x260] sm:$0xf] }
 0x82c   : > { %v5357_v15 = vunpack.c.l.b16 %v4365_v52  ;;  %v5358_v45 = vunpack.c.h.b16 %v4365_v52  ;;  %v13786_v52 = vld [vmem:[%s21297_s4 + $0x26c] sm:$0xf0] }
 0x82e   : > { %v17247_v3 = vpack.c.b16 %v5357_v15, %v5355_v13  ;;  %v17249_v18 = vpack.c.b16 %v5358_v45, %v5356_v14  ;;  %v11521_v13 = vld [vmem:[%s21297_s4 + $0x360] sm:$0xf]  ;;  %v11394_v14 = vor.u32 %v13786_v52, %v11393_v6  ;;  %v13818_v15 = vld [vmem:[%s21297_s4 + $0x36c] sm:$0xf0] }
 0x82f   : > { %v13698_v45 = vld [vmem:[%s21298_s5 + $0x70] sm:$0xff] }
 0x830   : > { %4939 = vmatpush.bf16.msrb.mxu2 %v11394_v14 }
 0x831   : > { %v4129_v43 = vpop.f32.mrf.mxu0  ;;  %v4258_v32 = vpop.f32.mrf.mxu1 }
 0x832   : > { %v4366_v22 = vpack.c.bf16 %v4258_v32, %v4129_v43 }
 0x834   : > { %4168 = vmatmul.bf16.gmra.mxu0 %v13696_v63  ;;  %4297 = vmatmul.bf16.gmra.mxu1 %v13696_v63  ;;  %v5359_v51 = vunpack.c.l.b16 %v4366_v22  ;;  %v5360_v19 = vunpack.c.h.b16 %v4366_v22  ;;  %v11522_v63 = vor.u32 %v13818_v15, %v11521_v13 }
 0x836   : > { %4988 = vmatpush.bf16.msrb.mxu3 %v11522_v63 }
 0x839   : > { %v4131_v23 = vpop.f32.mrf.mxu0  ;;  %v4260_v7 = vpop.f32.mrf.mxu1 }
 0x83a   : > { %v4367_v56 = vpack.c.bf16 %v4260_v7, %v4131_v23  ;;  %v11377_v23 = vld [vmem:[%s21297_s4 + $0x240] sm:$0xf]  ;;  %v13782_v7 = vld [vmem:[%s21297_s4 + $0x24c] sm:$0xf0] }
 0x83c   : > { %v5361_v1 = vunpack.c.l.b16 %v4367_v56  ;;  %v5362_v8 = vunpack.c.h.b16 %v4367_v56  ;;  %v11378_v56 = vor.u32 %v13782_v7, %v11377_v23  ;;  %v13701_v7 = vld [vmem:[%s21298_s5 + $0x88] sm:$0xff] }
 0x83e   : > { %v17254_v62 = vpack.c.b16 %v5361_v1, %v5359_v51  ;;  %v17256_v50 = vpack.c.b16 %v5362_v8, %v5360_v19  ;;  %v11505_v51 = vld [vmem:[%s21297_s4 + $0x340] sm:$0xf]  ;;  %v13814_v19 = vld [vmem:[%s21297_s4 + $0x34c] sm:$0xf0]  ;;  %4940 = vmatpush.bf16.msrb.mxu2 %v11378_v56 }
 0x83f   : > { %v11506_v1 = vor.u32 %v13814_v19, %v11505_v51  ;;  %v11361_v8 = vld [vmem:[%s21297_s4 + $0x220] sm:$0xf] }
 0x840   : > { %v11362_v27 = vor.u32 %v13778_v46, %v11361_v8 }
 0x841   : > { %v4134_v61 = vpop.f32.mrf.mxu0  ;;  %v4263_v48 = vpop.f32.mrf.mxu1  ;;  %4989 = vmatpush.bf16.msrb.mxu3 %v11506_v1 }
 0x842   : > { %v4368_v17 = vpack.c.bf16 %v4263_v48, %v4134_v61  ;;  %4941 = vmatpush.bf16.msrb.mxu2 %v11362_v27  ;;  %v11345_v48 = vld [vmem:[%s21297_s4 + $0x200] sm:$0xf] }
 0x844   : > { %4173 = vmatmul.bf16.gmra.mxu0 %v13697_v16  ;;  %4302 = vmatmul.bf16.gmra.mxu1 %v13697_v16  ;;  %v5363_v4 = vunpack.c.l.b16 %v4368_v17  ;;  %v5364_v34 = vunpack.c.h.b16 %v4368_v17  ;;  %v13774_v17 = vld [vmem:[%s21297_s4 + $0x20c] sm:$0xf0] }
 0x845   : > { %4990 = vmatpush.bf16.msrb.mxu3 %v11490_v9  ;;  %v11346_v40 = vor.u32 %v13774_v17, %v11345_v48 }
 0x847   : > { %4942 = vmatpush.bf16.msrb.mxu2 %v11346_v40 }
 0x849   : > { %v4136_v38 = vpop.f32.mrf.mxu0  ;;  %v4265_v2 = vpop.f32.mrf.mxu1  ;;  %4991 = vmatpush.bf16.msrb.mxu3 %v11474_v25 }
 0x84a   : > { %v4369_v53 = vpack.c.bf16 %v4265_v2, %v4136_v38 }
 0x84c   : > { %v5365_v30 = vunpack.c.l.b16 %v4369_v53  ;;  %v5366_v57 = vunpack.c.h.b16 %v4369_v53 }
 0x84e   : > { %v17309_v60 = vpack.c.b16 %v5365_v30, %v5363_v4  ;;  %v17311_v5 = vpack.c.b16 %v5366_v57, %v5364_v34  ;;  %v13700_v57 = vld [vmem:[%s21298_s5 + $0x80] sm:$0xff] }
 0x851   : > { %v4139_v43 = vpop.f32.mrf.mxu0  ;;  %v4268_v32 = vpop.f32.mrf.mxu1 }
 0x852   : > { %v4370_v22 = vpack.c.bf16 %v4268_v32, %v4139_v43 }
 0x854   : > { %4178 = vmatmul.bf16.gmra.mxu0 %v13698_v45  ;;  %4307 = vmatmul.bf16.gmra.mxu1 %v13698_v45  ;;  %v5367_v37 = vunpack.c.l.b16 %v4370_v22  ;;  %v5368_v24 = vunpack.c.h.b16 %v4370_v22 }
 0x859   : > { %v4141_v16 = vpop.f32.mrf.mxu0  ;;  %v4270_v29 = vpop.f32.mrf.mxu1 }
 0x85a   : > { %v4371_v61 = vpack.c.bf16 %v4270_v29, %v4141_v16 }
 0x85c   : > { %v5369_v0 = vunpack.c.l.b16 %v4371_v61  ;;  %v5370_v12 = vunpack.c.h.b16 %v4371_v61  ;;  %v13702_v61 = vld [vmem:[%s21298_s5 + $0x90] sm:$0xff] }
 0x85e   : > { %v17364_v33 = vpack.c.b16 %v5369_v0, %v5367_v37  ;;  %v17366_v49 = vpack.c.b16 %v5370_v12, %v5368_v24 }
 0x861   : > { %v4144_v21 = vpop.f32.mrf.mxu0  ;;  %v4273_v38 = vpop.f32.mrf.mxu1 }
 0x862   : > { %v4372_v2 = vpack.c.bf16 %v4273_v38, %v4144_v21  ;;  %v13703_v38 = vld [vmem:[%s21298_s5 + $0x98] sm:$0xff] }
 0x864   : > { %4183 = vmatmul.bf16.gmra.mxu0 %v13699_v58  ;;  %4312 = vmatmul.bf16.gmra.mxu1 %v13699_v58  ;;  %v5371_v55 = vunpack.c.l.b16 %v4372_v2  ;;  %v5372_v4 = vunpack.c.h.b16 %v4372_v2 }
 0x869   : > { %v4146_v53 = vpop.f32.mrf.mxu0  ;;  %v4275_v44 = vpop.f32.mrf.mxu1 }
 0x86a   : > { %v4373_v11 = vpack.c.bf16 %v4275_v44, %v4146_v53 }
 0x86c   : > { %v5373_v47 = vunpack.c.l.b16 %v4373_v11  ;;  %v5374_v59 = vunpack.c.h.b16 %v4373_v11 }
 0x86e   : > { %v17371_v34 = vpack.c.b16 %v5373_v47, %v5371_v55  ;;  %v17373_v30 = vpack.c.b16 %v5374_v59, %v5372_v4 }
 0x871   : > { %v4149_v31 = vpop.f32.mrf.mxu0  ;;  %v4278_v6 = vpop.f32.mrf.mxu1 }
 0x872   : > { %v4374_v52 = vpack.c.bf16 %v4278_v6, %v4149_v31 }
 0x874   : > { %4188 = vmatmul.bf16.gmra.mxu0 %v13700_v57  ;;  %4317 = vmatmul.bf16.gmra.mxu1 %v13700_v57  ;;  %v4551_v45 = vunpack.c.l.b16 %v4374_v52  ;;  %v4552_v63 = vunpack.c.h.b16 %v4374_v52 }
 0x879   : > { %v4151_v13 = vpop.f32.mrf.mxu0  ;;  %v4280_v14 = vpop.f32.mrf.mxu1 }
 0x87a   : > { %v4375_v15 = vpack.c.bf16 %v4280_v14, %v4151_v13  ;;  %v13704_v13 = vld [vmem:[%s21298_s5 + $0xa0] sm:$0xff] }
 0x87c   : > { %v4553_v43 = vunpack.c.l.b16 %v4375_v15  ;;  %v4554_v32 = vunpack.c.h.b16 %v4375_v15 }
 0x87e   : > { %v17378_v22 = vpack.c.b16 %v4553_v43, %v4551_v45  ;;  %v17380_v23 = vpack.c.b16 %v4554_v32, %v4552_v63  ;;  %v11465_v45 = vld [vmem:[%s21297_s4 + $0x2e8] sm:$0xf]  ;;  %v13803_v63 = vld [vmem:[%s21297_s4 + $0x2f4] sm:$0xf0] }
 0x87f   : > { %v11466_v43 = vor.u32 %v13803_v63, %v11465_v45  ;;  %v11593_v32 = vld [vmem:[%s21297_s4 + $0x3e8] sm:$0xf] }
 0x880   : > { %4943 = vmatmul.bf16.vlgmr.msrb.gmra.mxu2 %v17378_v22  ;;  %4992 = vmatmul.bf16.vlgmr.msrb.gmra.mxu3 %v17380_v23 }
 0x881   : > { %v4154_v56 = vpop.f32.mrf.mxu0  ;;  %v4283_v51 = vpop.f32.mrf.mxu1  ;;  %5131 = vmatpush.bf16.msrb.mxu0 %v11466_v43 }
 0x882   : > { %v4376_v19 = vpack.c.bf16 %v4283_v51, %v4154_v56  ;;  %v11449_v51 = vld [vmem:[%s21297_s4 + $0x2c8] sm:$0xf] }
 0x884   : > { %4193 = vmatmul.bf16.gmra.mxu0 %v13701_v7  ;;  %4322 = vmatmul.bf16.gmra.mxu1 %v13701_v7  ;;  %v4555_v10 = vunpack.c.l.b16 %v4376_v19  ;;  %v4556_v27 = vunpack.c.h.b16 %v4376_v19  ;;  %v13835_v7 = vld [vmem:[%s21297_s4 + $0x3f4] sm:$0xf0] }
 0x885   : > { %v11594_v56 = vor.u32 %v13835_v7, %v11593_v32  ;;  %v13799_v19 = vld [vmem:[%s21297_s4 + $0x2d4] sm:$0xf0]  ;;  %v13796_v32 = vld [vmem:[%s21297_s4 + $0x2c4] sm:$0xf]  ;;  %v11443_v7 = vld [vmem:[%s21297_s4 + $0x2d0] sm:$0xf0] }
 0x887   : > { %5180 = vmatpush.bf16.msrb.mxu1 %v11594_v56  ;;  %v11446_v56 = vor.u32 %v13796_v32, %v11443_v7 }
 0x889   : > { %v4156_v1 = vpop.f32.mrf.mxu0  ;;  %v4285_v8 = vpop.f32.mrf.mxu1 }
 0x88a   : > { %v4377_v46 = vpack.c.bf16 %v4285_v8, %v4156_v1  ;;  %v11577_v1 = vld [vmem:[%s21297_s4 + $0x3c8] sm:$0xf] }
 0x88c   : > { %v4557_v41 = vunpack.c.l.b16 %v4377_v46  ;;  %v4558_v9 = vunpack.c.h.b16 %v4377_v46  ;;  %v11450_v46 = vor.u32 %v13799_v19, %v11449_v51  ;;  %v13828_v51 = vld [vmem:[%s21297_s4 + $0x3c4] sm:$0xf]  ;;  %v11571_v19 = vld [vmem:[%s21297_s4 + $0x3d0] sm:$0xf0] }
 0x88e   : > { %v17387_v16 = vpack.c.b16 %v4557_v41, %v4555_v10  ;;  %v17389_v29 = vpack.c.b16 %v4558_v9, %v4556_v27  ;;  %v13831_v10 = vld [vmem:[%s21297_s4 + $0x3d4] sm:$0xf0]  ;;  %5132 = vmatpush.bf16.msrb.mxu0 %v11450_v46 }
 0x88f   : > { %v11578_v27 = vor.u32 %v13831_v10, %v11577_v1  ;;  %v11401_v1 = vld [vmem:[%s21297_s4 + $0x268] sm:$0xf]  ;;  %v13787_v46 = vld [vmem:[%s21297_s4 + $0x274] sm:$0xf0] }
 0x890   : > { %4948 = vmatmul.bf16.gmra.mxu2 %v17387_v16  ;;  %4997 = vmatmul.bf16.gmra.mxu3 %v17389_v29  ;;  %v11529_v10 = vld [vmem:[%s21297_s4 + $0x368] sm:$0xf] }
 0x891   : > { %v4159_v48 = vpop.f32.mrf.mxu0  ;;  %v4288_v17 = vpop.f32.mrf.mxu1  ;;  %5181 = vmatpush.bf16.msrb.mxu1 %v11578_v27  ;;  %v13819_v27 = vld [vmem:[%s21297_s4 + $0x374] sm:$0xf0] }
 0x892   : > { %v4378_v20 = vpack.c.bf16 %v4288_v17, %v4159_v48  ;;  %v11433_v48 = vld [vmem:[%s21297_s4 + $0x2a8] sm:$0xf]  ;;  %v13795_v17 = vld [vmem:[%s21297_s4 + $0x2b4] sm:$0xf0] }
 0x894   : > { %4198 = vmatmul.bf16.gmra.mxu0 %v13702_v61  ;;  %4327 = vmatmul.bf16.gmra.mxu1 %v13702_v61  ;;  %v4559_v24 = vunpack.c.l.b16 %v4378_v20  ;;  %v4560_v0 = vunpack.c.h.b16 %v4378_v20  ;;  %v11561_v20 = vld [vmem:[%s21297_s4 + $0x3a8] sm:$0xf] }
 0x899   : > { %v4161_v37 = vpop.f32.mrf.mxu0  ;;  %v4290_v40 = vpop.f32.mrf.mxu1 }
 0x89a   : > { %v4379_v35 = vpack.c.bf16 %v4290_v40, %v4161_v37  ;;  %v11434_v40 = vor.u32 %v13795_v17, %v11433_v48  ;;  %v11427_v48 = vld [vmem:[%s21297_s4 + $0x2b0] sm:$0xf0]  ;;  %v13824_v17 = vld [vmem:[%s21297_s4 + $0x3a4] sm:$0xf] }
 0x89c   : > { %v4561_v12 = vunpack.c.l.b16 %v4379_v35  ;;  %v4562_v25 = vunpack.c.h.b16 %v4379_v35  ;;  %v13827_v35 = vld [vmem:[%s21297_s4 + $0x3b4] sm:$0xf0]  ;;  %5133 = vmatpush.bf16.msrb.mxu0 %v11434_v40  ;;  %v11555_v40 = vld [vmem:[%s21297_s4 + $0x3b0] sm:$0xf0] }
 0x89e   : > { %v17396_v58 = vpack.c.b16 %v4561_v12, %v4559_v24  ;;  %v17398_v21 = vpack.c.b16 %v4562_v25, %v4560_v0  ;;  %v11562_v25 = vor.u32 %v13827_v35, %v11561_v20  ;;  %v11385_v35 = vld [vmem:[%s21297_s4 + $0x248] sm:$0xf] }
 0x8a0   : > { %4953 = vmatmul.bf16.gmra.mxu2 %v17396_v58  ;;  %5002 = vmatmul.bf16.gmra.mxu3 %v17398_v21 }
 0x8a1   : > { %v4164_v2 = vpop.f32.mrf.mxu0  ;;  %v4293_v53 = vpop.f32.mrf.mxu1  ;;  %5182 = vmatpush.bf16.msrb.mxu1 %v11562_v25  ;;  %v11513_v25 = vld [vmem:[%s21297_s4 + $0x348] sm:$0xf] }
 0x8a2   : > { %v4380_v44 = vpack.c.bf16 %v4293_v53, %v4164_v2  ;;  %v13800_v53 = vld [vmem:[%s21297_s4 + $0x2e4] sm:$0xf] }
 0x8a4   : > { %4203 = vmatmul.bf16.gmra.mxu0 %v13703_v38  ;;  %4332 = vmatmul.bf16.gmra.mxu1 %v13703_v38  ;;  %v4563_v47 = vunpack.c.l.b16 %v4380_v44  ;;  %v4564_v59 = vunpack.c.h.b16 %v4380_v44  ;;  %v11459_v44 = vld [vmem:[%s21297_s4 + $0x2f0] sm:$0xf0] }
 0x8a9   : > { %v4166_v11 = vpop.f32.mrf.mxu0  ;;  %v4295_v55 = vpop.f32.mrf.mxu1 }
 0x8aa   : > { %v4381_v4 = vpack.c.bf16 %v4295_v55, %v4166_v11  ;;  %v13832_v11 = vld [vmem:[%s21297_s4 + $0x3e4] sm:$0xf]  ;;  %v11462_v55 = vor.u32 %v13800_v53, %v11459_v44  ;;  %v13815_v53 = vld [vmem:[%s21297_s4 + $0x354] sm:$0xf0] }
 0x8ac   : > { %v4565_v57 = vunpack.c.l.b16 %v4381_v4  ;;  %v4566_v31 = vunpack.c.h.b16 %v4381_v4  ;;  %v11587_v4 = vld [vmem:[%s21297_s4 + $0x3f0] sm:$0xf0]  ;;  %5033 = vmatpush.bf16.msra.mxu2 %v11462_v55  ;;  %v11514_v55 = vor.u32 %v13815_v53, %v11513_v25  ;;  %v13780_v53 = vld [vmem:[%s21297_s4 + $0x244] sm:$0xf] }
 0x8ae   : > { %v17405_v6 = vpack.c.b16 %v4565_v57, %v4563_v47  ;;  %v17407_v52 = vpack.c.b16 %v4566_v31, %v4564_v59  ;;  %v11417_v47 = vld [vmem:[%s21297_s4 + $0x288] sm:$0xf]  ;;  %v13791_v59 = vld [vmem:[%s21297_s4 + $0x294] sm:$0xf0]  ;;  %v11590_v31 = vor.u32 %v13832_v11, %v11587_v4 }
 0x8af   : > { %v13705_v57 = vld [vmem:[%s21298_s5 + $0xa8] sm:$0xff] }
 0x8b0   : > { %4958 = vmatmul.bf16.gmra.mxu2 %v17405_v6  ;;  %5007 = vmatmul.bf16.gmra.mxu3 %v17407_v52 }
 0x8b1   : > { %v4169_v14 = vpop.f32.mrf.mxu0  ;;  %v4298_v15 = vpop.f32.mrf.mxu1  ;;  %5082 = vmatpush.bf16.msra.mxu3 %v11590_v31  ;;  %5034 = vmatpush.bf16.msra.mxu2 %v11446_v56 }
 0x8b2   : > { %v4382_v8 = vpack.c.bf16 %v4298_v15, %v4169_v14  ;;  %v11545_v14 = vld [vmem:[%s21297_s4 + $0x388] sm:$0xf]  ;;  %v13823_v15 = vld [vmem:[%s21297_s4 + $0x394] sm:$0xf0] }
 0x8b3   : > { %v11546_v43 = vor.u32 %v13823_v15, %v11545_v14  ;;  %v11539_v15 = vld [vmem:[%s21297_s4 + $0x390] sm:$0xf0] }
 0x8b4   : > { %4208 = vmatmul.bf16.gmra.mxu0 %v13704_v13  ;;  %4337 = vmatmul.bf16.gmra.mxu1 %v13704_v13  ;;  %v4567_v37 = vunpack.c.l.b16 %v4382_v8  ;;  %v4568_v24 = vunpack.c.h.b16 %v4382_v8  ;;  %v11418_v13 = vor.u32 %v13791_v59, %v11417_v47  ;;  %v11574_v8 = vor.u32 %v13828_v51, %v11571_v19  ;;  %v13788_v47 = vld [vmem:[%s21297_s4 + $0x284] sm:$0xf]  ;;  %v11411_v59 = vld [vmem:[%s21297_s4 + $0x290] sm:$0xf0]  ;;  %v11497_v51 = vld [vmem:[%s21297_s4 + $0x328] sm:$0xf] }
 0x8b5   : > { %5183 = vmatpush.bf16.msrb.mxu1 %v11546_v43  ;;  %v11414_v14 = vor.u32 %v13788_v47, %v11411_v59  ;;  %v13811_v19 = vld [vmem:[%s21297_s4 + $0x334] sm:$0xf0]  ;;  %v13776_v59 = vld [vmem:[%s21297_s4 + $0x224] sm:$0xf] }
 0x8b6   : > { %5134 = vmatpush.bf16.msrb.mxu0 %v11418_v13  ;;  %5083 = vmatpush.bf16.msra.mxu3 %v11574_v8 }
 0x8b9   : > { %v4171_v41 = vpop.f32.mrf.mxu0  ;;  %v4300_v9 = vpop.f32.mrf.mxu1 }
 0x8ba   : > { %v4383_v61 = vpack.c.bf16 %v4300_v9, %v4171_v41  ;;  %v11402_v41 = vor.u32 %v13787_v46, %v11401_v1  ;;  %v11530_v9 = vor.u32 %v13819_v27, %v11529_v10  ;;  %v11498_v1 = vor.u32 %v13811_v19, %v11497_v51  ;;  %v13784_v10 = vld [vmem:[%s21297_s4 + $0x264] sm:$0xf]  ;;  %v11395_v27 = vld [vmem:[%s21297_s4 + $0x270] sm:$0xf0] }
 0x8bb   : > { %v13804_v51 = vld [vmem:[%s21297_s4 + $0x304] sm:$0xf] }
 0x8bc   : > { %v4569_v0 = vunpack.c.l.b16 %v4383_v61  ;;  %v4570_v12 = vunpack.c.h.b16 %v4383_v61  ;;  %v13792_v61 = vld [vmem:[%s21297_s4 + $0x2a4] sm:$0xf]  ;;  %5135 = vmatpush.bf16.msrb.mxu0 %v11402_v41  ;;  %5184 = vmatpush.bf16.msrb.mxu1 %v11530_v9  ;;  %v11398_v9 = vor.u32 %v13784_v10, %v11395_v27  ;;  %v11475_v10 = vld [vmem:[%s21297_s4 + $0x310] sm:$0xf0] }
 0x8bd   : > { %v13816_v41 = vld [vmem:[%s21297_s4 + $0x364] sm:$0xf] }
 0x8be   : > { %v17450_v38 = vpack.c.b16 %v4569_v0, %v4567_v37  ;;  %v17452_v2 = vpack.c.b16 %v4570_v12, %v4568_v24  ;;  %v11430_v37 = vor.u32 %v13792_v61, %v11427_v48  ;;  %v13783_v24 = vld [vmem:[%s21297_s4 + $0x254] sm:$0xf0]  ;;  %v11558_v0 = vor.u32 %v13824_v17, %v11555_v40  ;;  %v11523_v61 = vld [vmem:[%s21297_s4 + $0x370] sm:$0xf0]  ;;  %v11353_v48 = vld [vmem:[%s21297_s4 + $0x208] sm:$0xf] }
 0x8bf   : > { %v11386_v12 = vor.u32 %v13783_v24, %v11385_v35  ;;  %v13775_v17 = vld [vmem:[%s21297_s4 + $0x214] sm:$0xf0]  ;;  %v11481_v35 = vld [vmem:[%s21297_s4 + $0x308] sm:$0xf] }
 0x8c0   : > { %4963 = vmatmul.bf16.gmra.mxu2 %v17450_v38  ;;  %5012 = vmatmul.bf16.gmra.mxu3 %v17452_v2  ;;  %v11354_v40 = vor.u32 %v13775_v17, %v11353_v48  ;;  %v13807_v24 = vld [vmem:[%s21297_s4 + $0x314] sm:$0xf0] }
 0x8c1   : > { %v4174_v45 = vpop.f32.mrf.mxu0  ;;  %v4303_v63 = vpop.f32.mrf.mxu1  ;;  %5035 = vmatpush.bf16.msra.mxu2 %v11430_v37  ;;  %5084 = vmatpush.bf16.msra.mxu3 %v11558_v0  ;;  %v11526_v37 = vor.u32 %v13816_v41, %v11523_v61  ;;  %v11482_v25 = vor.u32 %v13807_v24, %v11481_v35  ;;  %v11478_v61 = vor.u32 %v13804_v51, %v11475_v10 }
 0x8c2   : > { %v4384_v20 = vpack.c.bf16 %v4303_v63, %v4174_v45  ;;  %5136 = vmatpush.bf16.msrb.mxu0 %v11386_v12  ;;  %5185 = vmatpush.bf16.msrb.mxu1 %v11514_v55  ;;  %v11369_v45 = vld [vmem:[%s21297_s4 + $0x228] sm:$0xf]  ;;  %v13779_v63 = vld [vmem:[%s21297_s4 + $0x234] sm:$0xf0] }
 0x8c3   : > { %v11370_v56 = vor.u32 %v13779_v63, %v11369_v45 }
 0x8c4   : > { %4213 = vmatmul.bf16.gmra.mxu0 %v13705_v57  ;;  %4342 = vmatmul.bf16.gmra.mxu1 %v13705_v57  ;;  %v13820_v57 = vld [vmem:[%s21297_s4 + $0x384] sm:$0xf]  ;;  %v4571_v31 = vunpack.c.l.b16 %v4384_v20  ;;  %v4572_v13 = vunpack.c.h.b16 %v4384_v20  ;;  %v13706_v20 = vld [vmem:[%s21298_s5 + $0xb0] sm:$0xff] }
 0x8c5   : > { %v11542_v7 = vor.u32 %v13820_v57, %v11539_v15  ;;  %5036 = vmatpush.bf16.msra.mxu2 %v11414_v14  ;;  %v11363_v57 = vld [vmem:[%s21297_s4 + $0x230] sm:$0xf0] }
 0x8c6   : > { %5137 = vmatpush.bf16.msrb.mxu0 %v11370_v56  ;;  %5186 = vmatpush.bf16.msrb.mxu1 %v11498_v1  ;;  %v11366_v14 = vor.u32 %v13776_v59, %v11363_v57  ;;  %v11491_v15 = vld [vmem:[%s21297_s4 + $0x330] sm:$0xf0] }
 0x8c7   : > { %5085 = vmatpush.bf16.msra.mxu3 %v11542_v7  ;;  %v13772_v7 = vld [vmem:[%s21297_s4 + $0x204] sm:$0xf]  ;;  %v11347_v56 = vld [vmem:[%s21297_s4 + $0x210] sm:$0xf0] }
 0x8c8   : > { %v11350_v1 = vor.u32 %v13772_v7, %v11347_v56 }
 0x8c9   : > { %v4176_v44 = vpop.f32.mrf.mxu0  ;;  %v4305_v11 = vpop.f32.mrf.mxu1  ;;  %5037 = vmatpush.bf16.msra.mxu2 %v11398_v9 }
 0x8ca   : > { %v4385_v4 = vpack.c.bf16 %v4305_v11, %v4176_v44  ;;  %v11379_v44 = vld [vmem:[%s21297_s4 + $0x250] sm:$0xf0]  ;;  %v13812_v11 = vld [vmem:[%s21297_s4 + $0x344] sm:$0xf]  ;;  %5138 = vmatpush.bf16.msrb.mxu0 %v11354_v40  ;;  %5187 = vmatpush.bf16.msrb.mxu1 %v11482_v25 }
 0x8cb   : > { %5086 = vmatpush.bf16.msra.mxu3 %v11526_v37  ;;  %v11382_v55 = vor.u32 %v13780_v53, %v11379_v44 }
 0x8cc   : > { %v4573_v43 = vunpack.c.l.b16 %v4385_v4  ;;  %v4574_v32 = vunpack.c.h.b16 %v4385_v4  ;;  %v11507_v4 = vld [vmem:[%s21297_s4 + $0x350] sm:$0xf0] }
 0x8cd   : > { %v11510_v47 = vor.u32 %v13812_v11, %v11507_v4  ;;  %5038 = vmatpush.bf16.msra.mxu2 %v11382_v55 }
 0x8ce   : > { %v17555_v8 = vpack.c.b16 %v4573_v43, %v4571_v31  ;;  %v17557_v46 = vpack.c.b16 %v4574_v32, %v4572_v13  ;;  %v13808_v31 = vld [vmem:[%s21297_s4 + $0x324] sm:$0xf] }
 0x8cf   : > { %5087 = vmatpush.bf16.msra.mxu3 %v11510_v47  ;;  %v11494_v45 = vor.u32 %v13808_v31, %v11491_v15 }
 0x8d0   : > { %4968 = vmatmul.bf16.gmra.mxu2 %v17555_v8  ;;  %5017 = vmatmul.bf16.gmra.mxu3 %v17557_v46 }
 0x8d1   : > { %v4179_v0 = vpop.f32.mrf.mxu0  ;;  %v4308_v12 = vpop.f32.mrf.mxu1  ;;  %5039 = vmatpush.bf16.msra.mxu2 %v11366_v14 }
 0x8d2   : > { %v4386_v13 = vpack.c.bf16 %v4308_v12, %v4179_v0 }
 0x8d3   : > { %5088 = vmatpush.bf16.msra.mxu3 %v11494_v45 }
 0x8d4   : > { %4218 = vmatmul.bf16.gmra.mxu0 %v13706_v20  ;;  %4347 = vmatmul.bf16.gmra.mxu1 %v13706_v20  ;;  %v4575_v19 = vunpack.c.l.b16 %v4386_v13  ;;  %v4576_v27 = vunpack.c.h.b16 %v4386_v13  ;;  %v13707_v20 = vld [vmem:[%s21298_s5 + $0xb8] sm:$0xff] }
 0x8d5   : > { %5040 = vmatpush.bf16.msra.mxu2 %v11350_v1 }
 0x8d7   : > { %5089 = vmatpush.bf16.msra.mxu3 %v11478_v61 }
 0x8d9   : > { %v4181_v63 = vpop.f32.mrf.mxu0  ;;  %v4310_v43 = vpop.f32.mrf.mxu1 }
 0x8da   : > { %v4387_v32 = vpack.c.bf16 %v4310_v43, %v4181_v63 }
 0x8dc   : > { %v4577_v41 = vunpack.c.l.b16 %v4387_v32  ;;  %v4578_v9 = vunpack.c.h.b16 %v4387_v32 }
 0x8de   : > { %v17624_v48 = vpack.c.b16 %v4577_v41, %v4575_v19  ;;  %v17626_v17 = vpack.c.b16 %v4578_v9, %v4576_v27 }
 0x8e0   : > { %4973 = vmatmul.bf16.gmra.mxu2 %v17624_v48  ;;  %5022 = vmatmul.bf16.gmra.mxu3 %v17626_v17 }
 0x8e1   : > { %v4184_v37 = vpop.f32.mrf.mxu0  ;;  %v4313_v40 = vpop.f32.mrf.mxu1 }
 0x8e2   : > { %v4388_v35 = vpack.c.bf16 %v4313_v40, %v4184_v37 }
 0x8e4   : > { %4223 = vmatmul.bf16.gmra.mxu0 %v13707_v20  ;;  %4352 = vmatmul.bf16.gmra.mxu1 %v13707_v20  ;;  %v4579_v25 = vunpack.c.l.b16 %v4388_v35  ;;  %v4580_v53 = vunpack.c.h.b16 %v4388_v35 }
 0x8e9   : > { %v4186_v24 = vpop.f32.mrf.mxu0  ;;  %v4315_v0 = vpop.f32.mrf.mxu1 }
 0x8ea   : > { %v4389_v12 = vpack.c.bf16 %v4315_v0, %v4186_v24 }
 0x8ec   : > { %v4581_v44 = vunpack.c.l.b16 %v4389_v12  ;;  %v4582_v11 = vunpack.c.h.b16 %v4389_v12 }
 0x8ee   : > { %v17633_v55 = vpack.c.b16 %v4581_v44, %v4579_v25  ;;  %v17635_v4 = vpack.c.b16 %v4582_v11, %v4580_v53 }
 0x8f0   : > { %4978 = vmatmul.bf16.gmra.mxu2 %v17633_v55  ;;  %5027 = vmatmul.bf16.gmra.mxu3 %v17635_v4 }
 0x8f1   : > { %v4189_v47 = vpop.f32.mrf.mxu0  ;;  %v4318_v59 = vpop.f32.mrf.mxu1 }
 0x8f2   : > { %v4390_v57 = vpack.c.bf16 %v4318_v59, %v4189_v47 }
 0x8f4   : > { %5139 = vmatmul.bf16.vlgmr.msrb.gmra.mxu0 %v17378_v22  ;;  %5188 = vmatmul.bf16.vlgmr.msrb.gmra.mxu1 %v17380_v23  ;;  %v6200_v14 = vunpack.c.l.b16 %v4390_v57  ;;  %v6201_v15 = vunpack.c.h.b16 %v4390_v57 }
 0x8f9   : > { %v4191_v31 = vpop.f32.mrf.mxu0  ;;  %v4320_v13 = vpop.f32.mrf.mxu1 }
 0x8fa   : > { %v4391_v45 = vpack.c.bf16 %v4320_v13, %v4191_v31 }
 0x8fc   : > { %v6202_v63 = vunpack.c.l.b16 %v4391_v45  ;;  %v6203_v43 = vunpack.c.h.b16 %v4391_v45 }
 0x8fe   : > { %v17641_v32 = vpack.c.b16 %v6202_v63, %v6200_v14  ;;  %v17643_v7 = vpack.c.b16 %v6203_v43, %v6201_v15 }
 0x900   : > { %21912 = vst [vmem:[#allocation78_spill] sm:$0xff] %v17643_v7  ;;  %5041 = vmatmul.bf16.vlgmr.msra.gmra.mxu2 %v17378_v22  ;;  %5090 = vmatmul.bf16.vlgmr.msra.gmra.mxu3 %v17380_v23 }
 0x901   : > { %v4194_v56 = vpop.f32.mrf.mxu0  ;;  %v4323_v51 = vpop.f32.mrf.mxu1 }
 0x902   : > { %v4392_v19 = vpack.c.bf16 %v4323_v51, %v4194_v56 }
 0x903   : > { %v4944_v1 = vpop.f32.mrf.mxu2  ;;  %v4993_v10 = vpop.f32.mrf.mxu3 }
 0x904   : > { %v17647_v27 = vadd.f32 %v4993_v10, %v4944_v1  ;;  %5144 = vmatmul.bf16.gmra.mxu0 %v17387_v16  ;;  %5193 = vmatmul.bf16.gmra.mxu1 %v17389_v29  ;;  %v6204_v61 = vunpack.c.l.b16 %v4392_v19  ;;  %v6205_v20 = vunpack.c.h.b16 %v4392_v19 }
 0x909   : > { %v4196_v41 = vpop.f32.mrf.mxu0  ;;  %v4325_v9 = vpop.f32.mrf.mxu1 }
 0x90a   : > { %v4393_v37 = vpack.c.bf16 %v4325_v9, %v4196_v41 }
 0x90b   : > { %v4946_v40 = vpop.f32.mrf.mxu2  ;;  %v4995_v35 = vpop.f32.mrf.mxu3 }
 0x90c   : > { %v6206_v24 = vunpack.c.l.b16 %v4393_v37  ;;  %v6207_v0 = vunpack.c.h.b16 %v4393_v37  ;;  %v17651_v12 = vadd.f32 %v4995_v35, %v4946_v40 }
 0x90e   : > { %v17653_v25 = vpack.c.b16 %v6206_v24, %v6204_v61  ;;  %v17655_v53 = vpack.c.b16 %v6207_v0, %v6205_v20 }
 0x910   : > { %21913 = vst [vmem:[#allocation79_spill] sm:$0xff] %v17653_v25  ;;  %5046 = vmatmul.bf16.gmra.mxu2 %v17387_v16  ;;  %5095 = vmatmul.bf16.gmra.mxu3 %v17389_v29 }
 0x911   : > { %21914 = vst [vmem:[#allocation80_spill] sm:$0xff] %v17655_v53  ;;  %v4199_v44 = vpop.f32.mrf.mxu0  ;;  %v4328_v11 = vpop.f32.mrf.mxu1 }
 0x912   : > { %v4394_v47 = vpack.c.bf16 %v4328_v11, %v4199_v44 }
 0x913   : > { %v4949_v59 = vpop.f32.mrf.mxu2  ;;  %v4998_v57 = vpop.f32.mrf.mxu3 }
 0x914   : > { %v17659_v31 = vadd.f32 %v4998_v57, %v4949_v59  ;;  %5149 = vmatmul.bf16.gmra.mxu0 %v17396_v58  ;;  %5198 = vmatmul.bf16.gmra.mxu1 %v17398_v21  ;;  %v6208_v15 = vunpack.c.l.b16 %v4394_v47  ;;  %v6209_v45 = vunpack.c.h.b16 %v4394_v47 }
 0x919   : > { %v4201_v13 = vpop.f32.mrf.mxu0  ;;  %v4330_v14 = vpop.f32.mrf.mxu1 }
 0x91a   : > { %v4395_v63 = vpack.c.bf16 %v4330_v14, %v4201_v13 }
 0x91b   : > { %v4951_v43 = vpop.f32.mrf.mxu2  ;;  %v5000_v56 = vpop.f32.mrf.mxu3 }
 0x91c   : > { %v6210_v51 = vunpack.c.l.b16 %v4395_v63  ;;  %v6211_v19 = vunpack.c.h.b16 %v4395_v63  ;;  %v17663_v1 = vadd.f32 %v5000_v56, %v4951_v43 }
 0x91e   : > { %v17665_v10 = vpack.c.b16 %v6210_v51, %v6208_v15  ;;  %v17667_v41 = vpack.c.b16 %v6211_v19, %v6209_v45  ;;  %v11713_v19 = vld [vmem:[%s21297_s4 + $0xe0] sm:$0xf] }
 0x920   : > { %21915 = vst [vmem:[#allocation81_spill] sm:$0xff] %v17665_v10  ;;  %5051 = vmatmul.bf16.gmra.mxu2 %v17396_v58  ;;  %5100 = vmatmul.bf16.gmra.mxu3 %v17398_v21 }
 0x921   : > { %21916 = vst [vmem:[#allocation18_spill] sm:$0xff] %v17667_v41  ;;  %v4204_v9 = vpop.f32.mrf.mxu0  ;;  %v4333_v61 = vpop.f32.mrf.mxu1 }
 0x922   : > { %v4396_v20 = vpack.c.bf16 %v4333_v61, %v4204_v9  ;;  %v13738_v9 = vld [vmem:[%s21297_s4 + $0xec] sm:$0xf0]  ;;  %v11841_v61 = vld [vmem:[%s21297_s4 + $0x1e0] sm:$0xf] }
 0x923   : > { %v4954_v37 = vpop.f32.mrf.mxu2  ;;  %v5003_v40 = vpop.f32.mrf.mxu3 }
 0x924   : > { %v17671_v35 = vadd.f32 %v5003_v40, %v4954_v37  ;;  %5154 = vmatmul.bf16.gmra.mxu0 %v17405_v6  ;;  %5203 = vmatmul.bf16.gmra.mxu1 %v17407_v52  ;;  %v6212_v44 = vunpack.c.l.b16 %v4396_v20  ;;  %v6213_v11 = vunpack.c.h.b16 %v4396_v20  ;;  %v11714_v40 = vor.u32 %v13738_v9, %v11713_v19 }
 0x926   : > { %5727 = vmatpush.bf16.msra.mxu0 %v11714_v40  ;;  %v11809_v40 = vld [vmem:[%s21297_s4 + $0x1a0] sm:$0xf] }
 0x929   : > { %v4206_v24 = vpop.f32.mrf.mxu0  ;;  %v4335_v0 = vpop.f32.mrf.mxu1 }
 0x92a   : > { %v4397_v47 = vpack.c.bf16 %v4335_v0, %v4206_v24  ;;  %v13770_v24 = vld [vmem:[%s21297_s4 + $0x1ec] sm:$0xf0] }
 0x92b   : > { %v4956_v59 = vpop.f32.mrf.mxu2  ;;  %v5005_v57 = vpop.f32.mrf.mxu3 }
 0x92c   : > { %v6214_v13 = vunpack.c.l.b16 %v4397_v47  ;;  %v6215_v14 = vunpack.c.h.b16 %v4397_v47  ;;  %v17675_v15 = vadd.f32 %v5005_v57, %v4956_v59  ;;  %v13734_v47 = vld [vmem:[%s21297_s4 + $0xcc] sm:$0xf0]  ;;  %v11825_v59 = vld [vmem:[%s21297_s4 + $0x1c0] sm:$0xf] }
 0x92e   : > { %v17677_v45 = vpack.c.b16 %v6214_v13, %v6212_v44  ;;  %v17679_v63 = vpack.c.b16 %v6215_v14, %v6213_v11  ;;  %v11842_v44 = vor.u32 %v13770_v24, %v11841_v61  ;;  %v11697_v11 = vld [vmem:[%s21297_s4 + $0xc0] sm:$0xf]  ;;  %v13766_v13 = vld [vmem:[%s21297_s4 + $0x1cc] sm:$0xf0] }
 0x92f   : > { %v11698_v57 = vor.u32 %v13734_v47, %v11697_v11  ;;  %v11826_v14 = vor.u32 %v13766_v13, %v11825_v59 }
 0x930   : > { %21917 = vst [vmem:[#allocation19_spill] sm:$0xff] %v17677_v45  ;;  %5056 = vmatmul.bf16.gmra.mxu2 %v17405_v6  ;;  %5105 = vmatmul.bf16.gmra.mxu3 %v17407_v52 }
 0x931   : > { %21918 = vst [vmem:[#allocation82_spill] sm:$0xff] %v17679_v63  ;;  %v4209_v43 = vpop.f32.mrf.mxu0  ;;  %v4338_v56 = vpop.f32.mrf.mxu1  ;;  %5776 = vmatpush.bf16.msra.mxu1 %v11842_v44  ;;  %5728 = vmatpush.bf16.msra.mxu0 %v11698_v57 }
 0x932   : > { %v4398_v51 = vpack.c.bf16 %v4338_v56, %v4209_v43 }
 0x933   : > { %v4959_v20 = vpop.f32.mrf.mxu2  ;;  %v5008_v37 = vpop.f32.mrf.mxu3 }
 0x934   : > { %v17695_v0 = vadd.f32 %v5008_v37, %v4959_v20  ;;  %5159 = vmatmul.bf16.gmra.mxu0 %v17450_v38  ;;  %5208 = vmatmul.bf16.gmra.mxu1 %v17452_v2  ;;  %v6216_v19 = vunpack.c.l.b16 %v4398_v51  ;;  %v6217_v9 = vunpack.c.h.b16 %v4398_v51  ;;  %v11681_v20 = vld [vmem:[%s21297_s4 + $0xa0] sm:$0xf]  ;;  %v13730_v37 = vld [vmem:[%s21297_s4 + $0xac] sm:$0xf0] }
 0x935   : > { %5777 = vmatpush.bf16.msra.mxu1 %v11826_v14  ;;  %v11682_v11 = vor.u32 %v13730_v37, %v11681_v20  ;;  %v13762_v51 = vld [vmem:[%s21297_s4 + $0x1ac] sm:$0xf0]  ;;  %v11467_v20 = vld [vmem:[%s21297_s4 + $0x2f8] sm:$0xf0] }
 0x936   : > { %v11810_v13 = vor.u32 %v13762_v51, %v11809_v40  ;;  %v13726_v40 = vld [vmem:[%s21297_s4 + $0x8c] sm:$0xf0] }
 0x937   : > { %5729 = vmatpush.bf16.msra.mxu0 %v11682_v11  ;;  %v11793_v11 = vld [vmem:[%s21297_s4 + $0x180] sm:$0xf]  ;;  %v13758_v51 = vld [vmem:[%s21297_s4 + $0x18c] sm:$0xf0] }
 0x939   : > { %v4211_v43 = vpop.f32.mrf.mxu0  ;;  %v4340_v56 = vpop.f32.mrf.mxu1  ;;  %5778 = vmatpush.bf16.msra.mxu1 %v11810_v13  ;;  %v11794_v13 = vor.u32 %v13758_v51, %v11793_v11  ;;  %v13722_v11 = vld [vmem:[%s21297_s4 + $0x6c] sm:$0xf0] }
 0x93a   : > { %v4399_v61 = vpack.c.bf16 %v4340_v56, %v4211_v43  ;;  %v13801_v56 = vld [vmem:[%s21297_s4 + $0x2ec] sm:$0xf] }
 0x93b   : > { %v4961_v24 = vpop.f32.mrf.mxu2  ;;  %v5010_v44 = vpop.f32.mrf.mxu3  ;;  %v11470_v37 = vor.u32 %v13801_v56, %v11467_v20  ;;  %v13797_v20 = vld [vmem:[%s21297_s4 + $0x2cc] sm:$0xf] }
 0x93c   : > { %v6218_v47 = vunpack.c.l.b16 %v4399_v61  ;;  %v6219_v59 = vunpack.c.h.b16 %v4399_v61  ;;  %v17723_v57 = vadd.f32 %v5010_v44, %v4961_v24  ;;  %v13833_v61 = vld [vmem:[%s21297_s4 + $0x3ec] sm:$0xf] }
 0x93d   : > { %5229 = vmatpush.bf16.msrb.mxu2 %v11470_v37  ;;  %5779 = vmatpush.bf16.msra.mxu1 %v11794_v13  ;;  %v13754_v13 = vld [vmem:[%s21297_s4 + $0x16c] sm:$0xf0] }
 0x93e   : > { %v17725_v14 = vpack.c.b16 %v6218_v47, %v6216_v19  ;;  %v17727_v43 = vpack.c.b16 %v6219_v59, %v6217_v9  ;;  %v11595_v19 = vld [vmem:[%s21297_s4 + $0x3f8] sm:$0xf0]  ;;  %v11665_v9 = vld [vmem:[%s21297_s4 + $0x80] sm:$0xf] }
 0x93f   : > { %v11598_v24 = vor.u32 %v13833_v61, %v11595_v19  ;;  %v11666_v44 = vor.u32 %v13726_v40, %v11665_v9  ;;  %v11451_v61 = vld [vmem:[%s21297_s4 + $0x2d8] sm:$0xf0]  ;;  %v13829_v19 = vld [vmem:[%s21297_s4 + $0x3cc] sm:$0xf] }
 0x940   : > { %21919 = vst [vmem:[#allocation83_spill] sm:$0xff] %v17725_v14  ;;  %5061 = vmatmul.bf16.gmra.mxu2 %v17450_v38  ;;  %5110 = vmatmul.bf16.gmra.mxu3 %v17452_v2  ;;  %v11454_v37 = vor.u32 %v13797_v20, %v11451_v61 }
 0x941   : > { %21920 = vst [vmem:[#allocation84_spill] sm:$0xff] %v17727_v43  ;;  %v4214_v47 = vpop.f32.mrf.mxu0  ;;  %v4343_v59 = vpop.f32.mrf.mxu1  ;;  %5278 = vmatpush.bf16.msrb.mxu3 %v11598_v24  ;;  %5730 = vmatpush.bf16.msra.mxu0 %v11666_v44  ;;  %v11579_v24 = vld [vmem:[%s21297_s4 + $0x3d8] sm:$0xf0]  ;;  %v11649_v44 = vld [vmem:[%s21297_s4 + $0x60] sm:$0xf] }
 0x942   : > { %v17755_v56 = vpack.c.bf16 %v4343_v59, %v4214_v47  ;;  %v11582_v47 = vor.u32 %v13829_v19, %v11579_v24  ;;  %v11777_v59 = vld [vmem:[%s21297_s4 + $0x160] sm:$0xf]  ;;  %5230 = vmatpush.bf16.msrb.mxu2 %v11454_v37  ;;  %v11650_v20 = vor.u32 %v13722_v11, %v11649_v44  ;;  %v11435_v19 = vld [vmem:[%s21297_s4 + $0x2b8] sm:$0xf0]  ;;  %v13718_v11 = vld [vmem:[%s21297_s4 + $0x4c] sm:$0xf0] }
 0x943   : > { %v4964_v9 = vpop.f32.mrf.mxu2  ;;  %v5013_v40 = vpop.f32.mrf.mxu3  ;;  %v11778_v61 = vor.u32 %v13754_v13, %v11777_v59  ;;  %v11563_v37 = vld [vmem:[%s21297_s4 + $0x3b8] sm:$0xf0]  ;;  %v11633_v44 = vld [vmem:[%s21297_s4 + $0x40] sm:$0xf] }
 0x944   : > { %v17775_v51 = vadd.f32 %v5013_v40, %v4964_v9  ;;  %5164 = vmatmul.bf16.gmra.mxu0 %v17555_v8  ;;  %5213 = vmatmul.bf16.gmra.mxu1 %v17557_v46  ;;  %v13793_v9 = vld [vmem:[%s21297_s4 + $0x2ac] sm:$0xf]  ;;  %v11634_v59 = vor.u32 %v13718_v11, %v11633_v44  ;;  %v11761_v13 = vld [vmem:[%s21297_s4 + $0x140] sm:$0xf]  ;;  %v6220_v43 = vunpack.c.l.b16 %v17755_v56  ;;  %v6221_v14 = vunpack.c.h.b16 %v17755_v56  ;;  %v11547_v56 = vld [vmem:[%s21297_s4 + $0x398] sm:$0xf0] }
 0x945   : > { %5279 = vmatpush.bf16.msrb.mxu3 %v11582_v47  ;;  %v13825_v40 = vld [vmem:[%s21297_s4 + $0x3ac] sm:$0xf]  ;;  %5731 = vmatpush.bf16.msra.mxu0 %v11650_v20  ;;  %v11438_v24 = vor.u32 %v13793_v9, %v11435_v19  ;;  %v13750_v20 = vld [vmem:[%s21297_s4 + $0x14c] sm:$0xf0] }
 0x946   : > { %5780 = vmatpush.bf16.msra.mxu1 %v11778_v61  ;;  %v11566_v47 = vor.u32 %v13825_v40, %v11563_v37  ;;  %v11762_v19 = vor.u32 %v13750_v20, %v11761_v13  ;;  %v13789_v40 = vld [vmem:[%s21297_s4 + $0x28c] sm:$0xf]  ;;  %v11419_v37 = vld [vmem:[%s21297_s4 + $0x298] sm:$0xf0]  ;;  %v13714_v20 = vld [vmem:[%s21297_s4 + $0x2c] sm:$0xf0] }
 0x947   : > { %5231 = vmatpush.bf16.msrb.mxu2 %v11438_v24  ;;  %v13821_v44 = vld [vmem:[%s21297_s4 + $0x38c] sm:$0xf]  ;;  %v11422_v13 = vor.u32 %v13789_v40, %v11419_v37 }
 0x948   : > { %v11550_v41 = vor.u32 %v13821_v44, %v11547_v56  ;;  %v11403_v44 = vld [vmem:[%s21297_s4 + $0x278] sm:$0xf0] }
 0x949   : > { %v4216_v61 = vpop.f32.mrf.mxu0  ;;  %v4345_v9 = vpop.f32.mrf.mxu1  ;;  %5280 = vmatpush.bf16.msrb.mxu3 %v11566_v47  ;;  %5732 = vmatpush.bf16.msra.mxu0 %v11634_v59  ;;  %v11617_v47 = vld [vmem:[%s21297_s4 + $0x20] sm:$0xf] }
 0x94a   : > { %v4401_v63 = vpack.c.bf16 %v4345_v9, %v4216_v61  ;;  %5781 = vmatpush.bf16.msra.mxu1 %v11762_v19  ;;  %v11745_v59 = vld [vmem:[%s21297_s4 + $0x120] sm:$0xf]  ;;  %v13746_v19 = vld [vmem:[%s21297_s4 + $0x12c] sm:$0xf0]  ;;  %v11618_v40 = vor.u32 %v13714_v20, %v11617_v47 }
 0x94b   : > { %v4966_v24 = vpop.f32.mrf.mxu2  ;;  %v5015_v11 = vpop.f32.mrf.mxu3  ;;  %5232 = vmatpush.bf16.msrb.mxu2 %v11422_v13  ;;  %v11746_v37 = vor.u32 %v13746_v19, %v11745_v59  ;;  %v11729_v47 = vld [vmem:[%s21297_s4 + $0x100] sm:$0xf]  ;;  %v13742_v20 = vld [vmem:[%s21297_s4 + $0x10c] sm:$0xf0] }
 0x94c   : > { %v6222_v61 = vunpack.c.l.b16 %v4401_v63  ;;  %v6223_v9 = vunpack.c.h.b16 %v4401_v63  ;;  %v17829_v45 = vadd.f32 %v5015_v11, %v4966_v24  ;;  %v13785_v63 = vld [vmem:[%s21297_s4 + $0x26c] sm:$0xf]  ;;  %v11730_v59 = vor.u32 %v13742_v20, %v11729_v47 }
 0x94d   : > { %5281 = vmatpush.bf16.msrb.mxu3 %v11550_v41  ;;  %v13817_v24 = vld [vmem:[%s21297_s4 + $0x36c] sm:$0xf]  ;;  %5733 = vmatpush.bf16.msra.mxu0 %v11618_v40  ;;  %v11406_v11 = vor.u32 %v13785_v63, %v11403_v44  ;;  %v11601_v41 = vld [vmem:[%s21297_s4] sm:$0xf] }
 0x94e   : > { %v17837_v10 = vpack.c.b16 %v6222_v61, %v6220_v43  ;;  %v17839_v53 = vpack.c.b16 %v6223_v9, %v6221_v14  ;;  %5782 = vmatpush.bf16.msra.mxu1 %v11746_v37  ;;  %v11531_v14 = vld [vmem:[%s21297_s4 + $0x378] sm:$0xf0]  ;;  %v13710_v43 = vld [vmem:[%s21297_s4 + $0xc] sm:$0xf0]  ;;  %v13781_v40 = vld [vmem:[%s21297_s4 + $0x24c] sm:$0xf] }
 0x94f   : > { %v11534_v13 = vor.u32 %v13817_v24, %v11531_v14  ;;  %v11602_v56 = vor.u32 %v13710_v43, %v11601_v41  ;;  %5233 = vmatpush.bf16.msrb.mxu2 %v11406_v11  ;;  %v11387_v37 = vld [vmem:[%s21297_s4 + $0x258] sm:$0xf0]  ;;  %v13813_v63 = vld [vmem:[%s21297_s4 + $0x34c] sm:$0xf] }
 0x950   : > { %21921 = vst [vmem:[#allocation85_spill] sm:$0xff] %v17837_v10  ;;  %5066 = vmatmul.bf16.gmra.mxu2 %v17555_v8  ;;  %5115 = vmatmul.bf16.gmra.mxu3 %v17557_v46  ;;  %v11390_v11 = vor.u32 %v13781_v40, %v11387_v37  ;;  %v11515_v14 = vld [vmem:[%s21297_s4 + $0x358] sm:$0xf0]  ;;  %v13809_v47 = vld [vmem:[%s21297_s4 + $0x32c] sm:$0xf] }
 0x951   : > { %21922 = vst [vmem:[#allocation22_spill] sm:$0xff] %v17839_v53  ;;  %v4219_v61 = vpop.f32.mrf.mxu0  ;;  %v4348_v9 = vpop.f32.mrf.mxu1  ;;  %5282 = vmatpush.bf16.msrb.mxu3 %v11534_v13  ;;  %5734 = vmatpush.bf16.msra.mxu0 %v11602_v56  ;;  %v11518_v43 = vor.u32 %v13813_v63, %v11515_v14  ;;  %v13777_v13 = vld [vmem:[%s21297_s4 + $0x22c] sm:$0xf]  ;;  %v11371_v56 = vld [vmem:[%s21297_s4 + $0x238] sm:$0xf0] }
 0x952   : > { %v4402_v19 = vpack.c.bf16 %v4348_v9, %v4219_v61  ;;  %5783 = vmatpush.bf16.msra.mxu1 %v11730_v59  ;;  %v11374_v20 = vor.u32 %v13777_v13, %v11371_v56  ;;  %v11499_v61 = vld [vmem:[%s21297_s4 + $0x338] sm:$0xf0]  ;;  %v13805_v14 = vld [vmem:[%s21297_s4 + $0x30c] sm:$0xf] }
 0x953   : > { %v4969_v44 = vpop.f32.mrf.mxu2  ;;  %v5018_v24 = vpop.f32.mrf.mxu3  ;;  %5234 = vmatpush.bf16.msrb.mxu2 %v11390_v11  ;;  %v11502_v9 = vor.u32 %v13809_v47, %v11499_v61  ;;  %v11355_v11 = vld [vmem:[%s21297_s4 + $0x218] sm:$0xf0] }
 0x954   : > { %v17879_v41 = vadd.f32 %v5018_v24, %v4969_v44  ;;  %5169 = vmatmul.bf16.gmra.mxu0 %v17624_v48  ;;  %5218 = vmatmul.bf16.gmra.mxu1 %v17626_v17  ;;  %v6224_v37 = vunpack.c.l.b16 %v4402_v19  ;;  %v6225_v63 = vunpack.c.h.b16 %v4402_v19  ;;  %v13773_v24 = vld [vmem:[%s21297_s4 + $0x20c] sm:$0xf]  ;;  %v11483_v19 = vld [vmem:[%s21297_s4 + $0x318] sm:$0xf0] }
 0x955   : > { %5283 = vmatpush.bf16.msrb.mxu3 %v11518_v43  ;;  %v11358_v56 = vor.u32 %v13773_v24, %v11355_v11 }
 0x957   : > { %5235 = vmatpush.bf16.msrb.mxu2 %v11374_v20 }
 0x959   : > { %v4221_v59 = vpop.f32.mrf.mxu0  ;;  %v4350_v40 = vpop.f32.mrf.mxu1  ;;  %5284 = vmatpush.bf16.msrb.mxu3 %v11502_v9  ;;  %v11486_v9 = vor.u32 %v13805_v14, %v11483_v19 }
 0x95a   : > { %v4403_v44 = vpack.c.bf16 %v4350_v40, %v4221_v59 }
 0x95b   : > { %v4971_v43 = vpop.f32.mrf.mxu2  ;;  %v5020_v13 = vpop.f32.mrf.mxu3  ;;  %5236 = vmatpush.bf16.msrb.mxu2 %v11358_v56 }
 0x95c   : > { %v6226_v47 = vunpack.c.l.b16 %v4403_v44  ;;  %v6227_v20 = vunpack.c.h.b16 %v4403_v44  ;;  %v17907_v61 = vadd.f32 %v5020_v13, %v4971_v43 }
 0x95d   : > { %5285 = vmatpush.bf16.msrb.mxu3 %v11486_v9 }
 0x95e   : > { %v17909_v59 = vpack.c.b16 %v6226_v47, %v6224_v37  ;;  %v17911_v40 = vpack.c.b16 %v6227_v20, %v6225_v63 }
 0x960   : > { %21923 = vst [vmem:[#allocation23_spill] sm:$0xff] %v17909_v59  ;;  %5071 = vmatmul.bf16.gmra.mxu2 %v17624_v48  ;;  %5120 = vmatmul.bf16.gmra.mxu3 %v17626_v17 }
 0x961   : > { %21924 = vst [vmem:[#allocation17_spill] sm:$0xff] %v17911_v40  ;;  %v4224_v24 = vpop.f32.mrf.mxu0  ;;  %v4353_v11 = vpop.f32.mrf.mxu1 }
 0x962   : > { %v4404_v53 = vpack.c.bf16 %v4353_v11, %v4224_v24 }
 0x963   : > { %v4974_v10 = vpop.f32.mrf.mxu2  ;;  %v5023_v25 = vpop.f32.mrf.mxu3 }
 0x964   : > { %v17915_v7 = vadd.f32 %v5023_v25, %v4974_v10  ;;  %5174 = vmatmul.bf16.gmra.mxu0 %v17633_v55  ;;  %5223 = vmatmul.bf16.gmra.mxu1 %v17635_v4  ;;  %v6228_v63 = vunpack.c.l.b16 %v4404_v53  ;;  %v6229_v14 = vunpack.c.h.b16 %v4404_v53 }
 0x969   : > { %v4226_v37 = vpop.f32.mrf.mxu0  ;;  %v4355_v44 = vpop.f32.mrf.mxu1 }
 0x96a   : > { %v4405_v43 = vpack.c.bf16 %v4355_v44, %v4226_v37 }
 0x96b   : > { %v4976_v13 = vpop.f32.mrf.mxu2  ;;  %v5025_v56 = vpop.f32.mrf.mxu3 }
 0x96c   : > { %v6230_v19 = vunpack.c.l.b16 %v4405_v43  ;;  %v6231_v47 = vunpack.c.h.b16 %v4405_v43  ;;  %v17919_v20 = vadd.f32 %v5025_v56, %v4976_v13 }
 0x96e   : > { %v17921_v9 = vpack.c.b16 %v6230_v19, %v6228_v63  ;;  %v17923_v24 = vpack.c.b16 %v6231_v47, %v6229_v14 }
 0x970   : > { %21925 = vst [vmem:[#allocation86_spill] sm:$0xff] %v17921_v9  ;;  %5076 = vmatmul.bf16.gmra.mxu2 %v17633_v55  ;;  %5125 = vmatmul.bf16.gmra.mxu3 %v17635_v4 }
 0x971   : > { %21926 = vst [vmem:[#allocation168_spill] sm:$0xff] %v17923_v24  ;;  %v5140_v25 = vpop.f32.mrf.mxu0  ;;  %v5189_v10 = vpop.f32.mrf.mxu1 }
 0x972   : > { %v17927_v11 = vadd.f32 %v5189_v10, %v5140_v25 }
 0x973   : > { %v4979_v53 = vpop.f32.mrf.mxu2  ;;  %v5028_v37 = vpop.f32.mrf.mxu3 }
 0x974   : > { %v17929_v44 = vadd.f32 %v5028_v37, %v4979_v53  ;;  %5735 = vmatmul.bf16.vlgmr.msra.gmra.mxu0 %v17226_v42  ;;  %5784 = vmatmul.bf16.vlgmr.msra.gmra.mxu1 %v17228_v39 }
 0x979   : > { %v5142_v63 = vpop.f32.mrf.mxu0  ;;  %v5191_v43 = vpop.f32.mrf.mxu1 }
 0x97a   : > { %v17933_v14 = vadd.f32 %v5191_v43, %v5142_v63 }
 0x97b   : > { %v4981_v13 = vpop.f32.mrf.mxu2  ;;  %v5030_v56 = vpop.f32.mrf.mxu3 }
 0x97c   : > { %v17935_v19 = vadd.f32 %v5030_v56, %v4981_v13 }
 0x980   : > { %5237 = vmatmul.bf16.vlgmr.msrb.gmra.mxu2 %v17378_v22  ;;  %5286 = vmatmul.bf16.vlgmr.msrb.gmra.mxu3 %v17380_v23 }
 0x981   : > { %v5145_v47 = vpop.f32.mrf.mxu0  ;;  %v5194_v25 = vpop.f32.mrf.mxu1 }
 0x982   : > { %v17939_v10 = vadd.f32 %v5194_v25, %v5145_v47 }
 0x983   : > { %v5042_v53 = vpop.f32.mrf.mxu2  ;;  %v5091_v37 = vpop.f32.mrf.mxu3 }
 0x984   : > { %v17941_v24 = vadd.f32 %v5091_v37, %v5042_v53  ;;  %5740 = vmatmul.bf16.gmra.mxu0 %v17233_v36  ;;  %5789 = vmatmul.bf16.gmra.mxu1 %v17235_v54 }
 0x989   : > { %v5147_v63 = vpop.f32.mrf.mxu0  ;;  %v5196_v43 = vpop.f32.mrf.mxu1 }
 0x98a   : > { %v17945_v13 = vadd.f32 %v5196_v43, %v5147_v63 }
 0x98b   : > { %v5044_v56 = vpop.f32.mrf.mxu2  ;;  %v5093_v22 = vpop.f32.mrf.mxu3 }
 0x98c   : > { %v17947_v9 = vadd.f32 %v5093_v22, %v5044_v56 }
 0x990   : > { %5242 = vmatmul.bf16.gmra.mxu2 %v17387_v16  ;;  %5291 = vmatmul.bf16.gmra.mxu3 %v17389_v29 }
 0x991   : > { %v5150_v23 = vpop.f32.mrf.mxu0  ;;  %v5199_v47 = vpop.f32.mrf.mxu1 }
 0x992   : > { %v17951_v25 = vadd.f32 %v5199_v47, %v5150_v23 }
 0x993   : > { %v5047_v53 = vpop.f32.mrf.mxu2  ;;  %v5096_v37 = vpop.f32.mrf.mxu3 }
 0x994   : > { %v17953_v40 = vadd.f32 %v5096_v37, %v5047_v53  ;;  %5745 = vmatmul.bf16.gmra.mxu0 %v17240_v28  ;;  %5794 = vmatmul.bf16.gmra.mxu1 %v17242_v26 }
 0x996   : > { %21927 = vst [vmem:[#allocation87_spill] sm:$0xff] %v17953_v40 }
 0x999   : > { %v5152_v63 = vpop.f32.mrf.mxu0  ;;  %v5201_v43 = vpop.f32.mrf.mxu1 }
 0x99a   : > { %v17957_v56 = vadd.f32 %v5201_v43, %v5152_v63 }
 0x99b   : > { %v5049_v22 = vpop.f32.mrf.mxu2  ;;  %v5098_v16 = vpop.f32.mrf.mxu3 }
 0x99c   : > { %v17959_v59 = vadd.f32 %v5098_v16, %v5049_v22 }
 0x99e   : > { %21928 = vst [vmem:[#allocation169_spill] sm:$0xff] %v17959_v59 }
 0x9a0   : > { %5247 = vmatmul.bf16.gmra.mxu2 %v17396_v58  ;;  %5296 = vmatmul.bf16.gmra.mxu3 %v17398_v21 }
 0x9a1   : > { %v5155_v29 = vpop.f32.mrf.mxu0  ;;  %v5204_v23 = vpop.f32.mrf.mxu1 }
 0x9a2   : > { %v17963_v47 = vadd.f32 %v5204_v23, %v5155_v29 }
 0x9a3   : > { %v5052_v53 = vpop.f32.mrf.mxu2  ;;  %v5101_v37 = vpop.f32.mrf.mxu3 }
 0x9a4   : > { %v17965_v40 = vadd.f32 %v5101_v37, %v5052_v53  ;;  %5750 = vmatmul.bf16.gmra.mxu0 %v17247_v3  ;;  %5799 = vmatmul.bf16.gmra.mxu1 %v17249_v18  ;;  %v11721_v53 = vld [vmem:[%s21297_s4 + $0xe8] sm:$0xf]  ;;  %v13739_v37 = vld [vmem:[%s21297_s4 + $0xf4] sm:$0xf0] }
 0x9a9   : > { %v5157_v63 = vpop.f32.mrf.mxu0  ;;  %v5206_v43 = vpop.f32.mrf.mxu1 }
 0x9aa   : > { %v17969_v22 = vadd.f32 %v5206_v43, %v5157_v63  ;;  %v11849_v63 = vld [vmem:[%s21297_s4 + $0x1e8] sm:$0xf] }
 0x9ab   : > { %v5054_v16 = vpop.f32.mrf.mxu2  ;;  %v5103_v58 = vpop.f32.mrf.mxu3 }
 0x9ac   : > { %21929 = vst [vmem:[#allocation7_spill] sm:$0xff] %v17969_v22  ;;  %v17971_v59 = vadd.f32 %v5103_v58, %v5054_v16  ;;  %v11722_v16 = vor.u32 %v13739_v37, %v11721_v53  ;;  %v13735_v53 = vld [vmem:[%s21297_s4 + $0xd4] sm:$0xf0]  ;;  %v11833_v37 = vld [vmem:[%s21297_s4 + $0x1c8] sm:$0xf] }
 0x9ae   : > { %21930 = vst [vmem:[#allocation12_spill] sm:$0xff] %v17971_v59  ;;  %5923 = vmatpush.bf16.msrb.mxu0 %v11722_v16 }
 0x9b0   : > { %5252 = vmatmul.bf16.gmra.mxu2 %v17405_v6  ;;  %5301 = vmatmul.bf16.gmra.mxu3 %v17407_v52  ;;  %v13771_v52 = vld [vmem:[%s21297_s4 + $0x1f4] sm:$0xf0] }
 0x9b1   : > { %v5160_v21 = vpop.f32.mrf.mxu0  ;;  %v5209_v29 = vpop.f32.mrf.mxu1 }
 0x9b2   : > { %v17975_v23 = vadd.f32 %v5209_v29, %v5160_v21  ;;  %v11850_v21 = vor.u32 %v13771_v52, %v11849_v63  ;;  %v11705_v29 = vld [vmem:[%s21297_s4 + $0xc8] sm:$0xf] }
 0x9b3   : > { %v5057_v43 = vpop.f32.mrf.mxu2  ;;  %v5106_v6 = vpop.f32.mrf.mxu3 }
 0x9b4   : > { %21931 = vst [vmem:[#allocation13_spill] sm:$0xff] %v17975_v23  ;;  %v17989_v58 = vadd.f32 %v5106_v6, %v5057_v43  ;;  %5755 = vmatmul.bf16.gmra.mxu0 %v17254_v62  ;;  %5804 = vmatmul.bf16.gmra.mxu1 %v17256_v50  ;;  %v11706_v43 = vor.u32 %v13735_v53, %v11705_v29  ;;  %v13767_v6 = vld [vmem:[%s21297_s4 + $0x1d4] sm:$0xf0]  ;;  %v11817_v29 = vld [vmem:[%s21297_s4 + $0x1a8] sm:$0xf] }
 0x9b5   : > { %5972 = vmatpush.bf16.msrb.mxu1 %v11850_v21  ;;  %v11834_v63 = vor.u32 %v13767_v6, %v11833_v37  ;;  %v13731_v23 = vld [vmem:[%s21297_s4 + $0xb4] sm:$0xf0] }
 0x9b6   : > { %21932 = vst [vmem:[#allocation88_spill] sm:$0xff] %v17989_v58  ;;  %5924 = vmatpush.bf16.msrb.mxu0 %v11706_v43  ;;  %v11689_v58 = vld [vmem:[%s21297_s4 + $0xa8] sm:$0xf]  ;;  %v13763_v43 = vld [vmem:[%s21297_s4 + $0x1b4] sm:$0xf0] }
 0x9b7   : > { %v11690_v6 = vor.u32 %v13731_v23, %v11689_v58  ;;  %v13768_v23 = vld [vmem:[%s21297_s4 + $0x1e4] sm:$0xf] }
 0x9b9   : > { %v5162_v16 = vpop.f32.mrf.mxu0  ;;  %v5211_v52 = vpop.f32.mrf.mxu1  ;;  %5973 = vmatpush.bf16.msrb.mxu1 %v11834_v63 }
 0x9ba   : > { %v18005_v21 = vadd.f32 %v5211_v52, %v5162_v16  ;;  %v11818_v16 = vor.u32 %v13763_v43, %v11817_v29  ;;  %5925 = vmatpush.bf16.msrb.mxu0 %v11690_v6  ;;  %v13736_v52 = vld [vmem:[%s21297_s4 + $0xe4] sm:$0xf]  ;;  %v11673_v29 = vld [vmem:[%s21297_s4 + $0x88] sm:$0xf] }
 0x9bb   : > { %v5059_v53 = vpop.f32.mrf.mxu2  ;;  %v5108_v37 = vpop.f32.mrf.mxu3 }
 0x9bc   : > { %21933 = vst [vmem:[#allocation170_spill] sm:$0xff] %v18005_v21  ;;  %v18019_v63 = vadd.f32 %v5108_v37, %v5059_v53  ;;  %v11715_v21 = vld [vmem:[%s21297_s4 + $0xf0] sm:$0xf0]  ;;  %v13727_v37 = vld [vmem:[%s21297_s4 + $0x94] sm:$0xf0] }
 0x9bd   : > { %5974 = vmatpush.bf16.msrb.mxu1 %v11818_v16  ;;  %v11718_v58 = vor.u32 %v13736_v52, %v11715_v21  ;;  %v11843_v53 = vld [vmem:[%s21297_s4 + $0x1f0] sm:$0xf0]  ;;  %v11674_v43 = vor.u32 %v13727_v37, %v11673_v29  ;;  %v11801_v21 = vld [vmem:[%s21297_s4 + $0x188] sm:$0xf]  ;;  %v13759_v16 = vld [vmem:[%s21297_s4 + $0x194] sm:$0xf0] }
 0x9be   : > { %21934 = vst [vmem:[#allocation89_spill] sm:$0xff] %v18019_v63  ;;  %v11846_v6 = vor.u32 %v13768_v23, %v11843_v53  ;;  %v11802_v59 = vor.u32 %v13759_v16, %v11801_v21  ;;  %v13764_v23 = vld [vmem:[%s21297_s4 + $0x1c4] sm:$0xf]  ;;  %v11657_v37 = vld [vmem:[%s21297_s4 + $0x68] sm:$0xf] }
 0x9bf   : > { %5825 = vmatpush.bf16.msra.mxu2 %v11718_v58  ;;  %5926 = vmatpush.bf16.msrb.mxu0 %v11674_v43  ;;  %v11785_v16 = vld [vmem:[%s21297_s4 + $0x168] sm:$0xf] }
 0x9c0   : > { %5257 = vmatmul.bf16.gmra.mxu2 %v17450_v38  ;;  %5306 = vmatmul.bf16.gmra.mxu3 %v17452_v2  ;;  %v13732_v38 = vld [vmem:[%s21297_s4 + $0xc4] sm:$0xf]  ;;  %v11699_v2 = vld [vmem:[%s21297_s4 + $0xd0] sm:$0xf0] }
 0x9c1   : > { %v5165_v52 = vpop.f32.mrf.mxu0  ;;  %v5214_v63 = vpop.f32.mrf.mxu1  ;;  %5874 = vmatpush.bf16.msra.mxu3 %v11846_v6  ;;  %5975 = vmatpush.bf16.msrb.mxu1 %v11802_v59  ;;  %v11702_v58 = vor.u32 %v13732_v38, %v11699_v2  ;;  %v13723_v6 = vld [vmem:[%s21297_s4 + $0x74] sm:$0xf0]  ;;  %v13728_v2 = vld [vmem:[%s21297_s4 + $0xa4] sm:$0xf] }
 0x9c2   : > { %v18047_v22 = vadd.f32 %v5214_v63, %v5165_v52  ;;  %v11827_v63 = vld [vmem:[%s21297_s4 + $0x1d0] sm:$0xf0]  ;;  %v11658_v21 = vor.u32 %v13723_v6, %v11657_v37  ;;  %v13755_v52 = vld [vmem:[%s21297_s4 + $0x174] sm:$0xf0] }
 0x9c3   : > { %v5062_v53 = vpop.f32.mrf.mxu2  ;;  %v5111_v29 = vpop.f32.mrf.mxu3  ;;  %v11830_v59 = vor.u32 %v13764_v23, %v11827_v63  ;;  %5826 = vmatpush.bf16.msra.mxu2 %v11702_v58  ;;  %v11786_v38 = vor.u32 %v13755_v52, %v11785_v16  ;;  %v11683_v23 = vld [vmem:[%s21297_s4 + $0xb0] sm:$0xf0]  ;;  %v11641_v63 = vld [vmem:[%s21297_s4 + $0x48] sm:$0xf]  ;;  %v13719_v37 = vld [vmem:[%s21297_s4 + $0x54] sm:$0xf0] }
 0x9c4   : > { %v18067_v43 = vadd.f32 %v5111_v29, %v5062_v53  ;;  %5760 = vmatmul.bf16.gmra.mxu0 %v17309_v60  ;;  %5809 = vmatmul.bf16.gmra.mxu1 %v17311_v5  ;;  %v13760_v53 = vld [vmem:[%s21297_s4 + $0x1a4] sm:$0xf]  ;;  %v11686_v29 = vor.u32 %v13728_v2, %v11683_v23  ;;  %v11811_v58 = vld [vmem:[%s21297_s4 + $0x1b0] sm:$0xf0]  ;;  %v13751_v16 = vld [vmem:[%s21297_s4 + $0x154] sm:$0xf0] }
 0x9c5   : > { %5875 = vmatpush.bf16.msra.mxu3 %v11830_v59  ;;  %5927 = vmatpush.bf16.msrb.mxu0 %v11658_v21  ;;  %v11814_v6 = vor.u32 %v13760_v53, %v11811_v58  ;;  %v11642_v59 = vor.u32 %v13719_v37, %v11641_v63  ;;  %v11769_v21 = vld [vmem:[%s21297_s4 + $0x148] sm:$0xf]  ;;  %v13724_v53 = vld [vmem:[%s21297_s4 + $0x84] sm:$0xf]  ;;  %v11667_v58 = vld [vmem:[%s21297_s4 + $0x90] sm:$0xf0] }
 0x9c6   : > { %21935 = vst [vmem:[#allocation171_spill] sm:$0xff] %v18067_v43  ;;  %5976 = vmatpush.bf16.msrb.mxu1 %v11786_v38  ;;  %v11770_v2 = vor.u32 %v13751_v16, %v11769_v21  ;;  %v13756_v63 = vld [vmem:[%s21297_s4 + $0x184] sm:$0xf]  ;;  %v13715_v21 = vld [vmem:[%s21297_s4 + $0x34] sm:$0xf0] }
 0x9c7   : > { %5827 = vmatpush.bf16.msra.mxu2 %v11686_v29  ;;  %v11670_v29 = vor.u32 %v13724_v53, %v11667_v58  ;;  %v13747_v53 = vld [vmem:[%s21297_s4 + $0x134] sm:$0xf0] }
 0x9c9   : > { %v5167_v52 = vpop.f32.mrf.mxu0  ;;  %v5216_v38 = vpop.f32.mrf.mxu1  ;;  %5876 = vmatpush.bf16.msra.mxu3 %v11814_v6  ;;  %5928 = vmatpush.bf16.msrb.mxu0 %v11642_v59  ;;  %v11795_v6 = vld [vmem:[%s21297_s4 + $0x190] sm:$0xf0]  ;;  %v11625_v59 = vld [vmem:[%s21297_s4 + $0x28] sm:$0xf] }
 0x9ca   : > { %v18101_v23 = vadd.f32 %v5216_v38, %v5167_v52  ;;  %5977 = vmatpush.bf16.msrb.mxu1 %v11770_v2  ;;  %v11798_v52 = vor.u32 %v13756_v63, %v11795_v6  ;;  %v11626_v38 = vor.u32 %v13715_v21, %v11625_v59  ;;  %v11753_v2 = vld [vmem:[%s21297_s4 + $0x128] sm:$0xf]  ;;  %v13752_v63 = vld [vmem:[%s21297_s4 + $0x164] sm:$0xf]  ;;  %v13711_v59 = vld [vmem:[%s21297_s4 + $0x14] sm:$0xf0] }
 0x9cb   : > { %v5064_v37 = vpop.f32.mrf.mxu2  ;;  %v5113_v43 = vpop.f32.mrf.mxu3  ;;  %5828 = vmatpush.bf16.msra.mxu2 %v11670_v29  ;;  %v11754_v58 = vor.u32 %v13747_v53, %v11753_v2  ;;  %v11779_v29 = vld [vmem:[%s21297_s4 + $0x170] sm:$0xf0]  ;;  %v11609_v6 = vld [vmem:[%s21297_s4 + $0x8] sm:$0xf] }
 0x9cc   : > { %21936 = vst [vmem:[#allocation26_spill] sm:$0xff] %v18101_v23  ;;  %v18121_v16 = vadd.f32 %v5113_v43, %v5064_v37  ;;  %v13720_v23 = vld [vmem:[%s21297_s4 + $0x64] sm:$0xf]  ;;  %v11651_v43 = vld [vmem:[%s21297_s4 + $0x70] sm:$0xf0]  ;;  %v11782_v21 = vor.u32 %v13752_v63, %v11779_v29 }
 0x9cd   : > { %5877 = vmatpush.bf16.msra.mxu3 %v11798_v52  ;;  %5929 = vmatpush.bf16.msrb.mxu0 %v11626_v38  ;;  %v11654_v37 = vor.u32 %v13720_v23, %v11651_v43  ;;  %v11610_v52 = vor.u32 %v13711_v59, %v11609_v6  ;;  %v11737_v23 = vld [vmem:[%s21297_s4 + $0x108] sm:$0xf]  ;;  %v13743_v38 = vld [vmem:[%s21297_s4 + $0x114] sm:$0xf0]  ;;  %v13748_v63 = vld [vmem:[%s21297_s4 + $0x144] sm:$0xf] }
 0x9ce   : > { %5978 = vmatpush.bf16.msrb.mxu1 %v11754_v58  ;;  %v11738_v58 = vor.u32 %v13743_v38, %v11737_v23  ;;  %v11763_v59 = vld [vmem:[%s21297_s4 + $0x150] sm:$0xf0]  ;;  %v13712_v23 = vld [vmem:[%s21297_s4 + $0x24] sm:$0xf] }
 0x9cf   : > { %5829 = vmatpush.bf16.msra.mxu2 %v11654_v37  ;;  %v11619_v38 = vld [vmem:[%s21297_s4 + $0x30] sm:$0xf0] }
 0x9d0   : > { %5262 = vmatmul.bf16.gmra.mxu2 %v17555_v8  ;;  %5311 = vmatmul.bf16.gmra.mxu3 %v17557_v46  ;;  %v13716_v8 = vld [vmem:[%s21297_s4 + $0x44] sm:$0xf]  ;;  %v11635_v46 = vld [vmem:[%s21297_s4 + $0x50] sm:$0xf0] }
 0x9d1   : > { %v5170_v2 = vpop.f32.mrf.mxu0  ;;  %v5219_v53 = vpop.f32.mrf.mxu1  ;;  %5878 = vmatpush.bf16.msra.mxu3 %v11782_v21  ;;  %5930 = vmatpush.bf16.msrb.mxu0 %v11610_v52  ;;  %v11638_v37 = vor.u32 %v13716_v8, %v11635_v46  ;;  %v11766_v52 = vor.u32 %v13748_v63, %v11763_v59  ;;  %v13740_v59 = vld [vmem:[%s21297_s4 + $0x104] sm:$0xf] }
 0x9d2   : > { %v18155_v43 = vadd.f32 %v5219_v53, %v5170_v2  ;;  %5979 = vmatpush.bf16.msrb.mxu1 %v11738_v58  ;;  %v13744_v2 = vld [vmem:[%s21297_s4 + $0x124] sm:$0xf]  ;;  %v11622_v53 = vor.u32 %v13712_v23, %v11619_v38  ;;  %v11747_v58 = vld [vmem:[%s21297_s4 + $0x130] sm:$0xf0] }
 0x9d3   : > { %v5067_v29 = vpop.f32.mrf.mxu2  ;;  %v5116_v6 = vpop.f32.mrf.mxu3  ;;  %5830 = vmatpush.bf16.msra.mxu2 %v11638_v37  ;;  %v11750_v8 = vor.u32 %v13744_v2, %v11747_v58  ;;  %v11603_v37 = vld [vmem:[%s21297_s4 + $0x10] sm:$0xf0] }
 0x9d4   : > { %v18169_v21 = vadd.f32 %v5116_v6, %v5067_v29  ;;  %5765 = vmatmul.bf16.gmra.mxu0 %v17364_v33  ;;  %5814 = vmatmul.bf16.gmra.mxu1 %v17366_v49  ;;  %v13708_v6 = vld [vmem:[%s21297_s4 + $0x4] sm:$0xf]  ;;  %v11731_v2 = vld [vmem:[%s21297_s4 + $0x110] sm:$0xf0] }
 0x9d5   : > { %5879 = vmatpush.bf16.msra.mxu3 %v11766_v52  ;;  %v11606_v38 = vor.u32 %v13708_v6, %v11603_v37  ;;  %v11734_v58 = vor.u32 %v13740_v59, %v11731_v2 }
 0x9d6   : > { %21937 = vst [vmem:[#allocation24_spill] sm:$0xff] %v18169_v21 }
 0x9d7   : > { %5831 = vmatpush.bf16.msra.mxu2 %v11622_v53 }
 0x9d9   : > { %v5172_v46 = vpop.f32.mrf.mxu0  ;;  %v5221_v63 = vpop.f32.mrf.mxu1  ;;  %5880 = vmatpush.bf16.msra.mxu3 %v11750_v8 }
 0x9da   : > { %v18185_v29 = vadd.f32 %v5221_v63, %v5172_v46 }
 0x9db   : > { %v5069_v52 = vpop.f32.mrf.mxu2  ;;  %v5118_v23 = vpop.f32.mrf.mxu3  ;;  %5832 = vmatpush.bf16.msra.mxu2 %v11606_v38 }
 0x9dc   : > { %21938 = vst [vmem:[#allocation27_spill] sm:$0xff] %v18185_v29  ;;  %v18199_v53 = vadd.f32 %v5118_v23, %v5069_v52 }
 0x9dd   : > { %5881 = vmatpush.bf16.msra.mxu3 %v11734_v58 }
 0x9e0   : > { %5267 = vmatmul.bf16.gmra.mxu2 %v17624_v48  ;;  %5316 = vmatmul.bf16.gmra.mxu3 %v17626_v17 }
 0x9e1   : > { %v5175_v8 = vpop.f32.mrf.mxu0  ;;  %v5224_v46 = vpop.f32.mrf.mxu1 }
 0x9e2   : > { %v18203_v63 = vadd.f32 %v5224_v46, %v5175_v8 }
 0x9e3   : > { %v5072_v29 = vpop.f32.mrf.mxu2  ;;  %v5121_v21 = vpop.f32.mrf.mxu3 }
 0x9e4   : > { %v18205_v6 = vadd.f32 %v5121_v21, %v5072_v29  ;;  %5770 = vmatmul.bf16.gmra.mxu0 %v17371_v34  ;;  %5819 = vmatmul.bf16.gmra.mxu1 %v17373_v30 }
 0x9e9   : > { %v5177_v37 = vpop.f32.mrf.mxu0  ;;  %v5226_v59 = vpop.f32.mrf.mxu1 }
 0x9ea   : > { %v18209_v52 = vadd.f32 %v5226_v59, %v5177_v37 }
 0x9eb   : > { %v5074_v23 = vpop.f32.mrf.mxu2  ;;  %v5123_v48 = vpop.f32.mrf.mxu3 }
 0x9ec   : > { %v18211_v38 = vadd.f32 %v5123_v48, %v5074_v23 }
 0x9ee   : > { %21939 = vst [vmem:[#allocation25_spill] sm:$0xff] %v18211_v38 }
 0x9f0   : > { %5272 = vmatmul.bf16.gmra.mxu2 %v17633_v55  ;;  %5321 = vmatmul.bf16.gmra.mxu3 %v17635_v4 }
 0x9f1   : > { %v5736_v17 = vpop.f32.mrf.mxu0  ;;  %v5785_v2 = vpop.f32.mrf.mxu1 }
 0x9f2   : > { %v5737_v21 = vadd.f32 %v5736_v17, %v17647_v27 }
 0x9f3   : > { %v5077_v29 = vpop.f32.mrf.mxu2  ;;  %v5126_v58 = vpop.f32.mrf.mxu3 }
 0x9f4   : > { %v18216_v8 = vadd.f32 %v5785_v2, %v5737_v21  ;;  %v18218_v46 = vadd.f32 %v5126_v58, %v5077_v29  ;;  %5931 = vmatmul.bf16.vlgmr.msrb.gmra.mxu0 %v17226_v42  ;;  %5980 = vmatmul.bf16.vlgmr.msrb.gmra.mxu1 %v17228_v39 }
 0x9f6   : > { %21940 = vst [vmem:[#allocation91_spill] sm:$0xff] %v18218_v46 }
 0x9f9   : > { %v5738_v37 = vpop.f32.mrf.mxu0  ;;  %v5787_v59 = vpop.f32.mrf.mxu1 }
 0x9fa   : > { %v5739_v55 = vadd.f32 %v5738_v37, %v17651_v12 }
 0x9fb   : > { %v5079_v23 = vpop.f32.mrf.mxu2  ;;  %v5128_v4 = vpop.f32.mrf.mxu3 }
 0x9fc   : > { %v18223_v48 = vadd.f32 %v5787_v59, %v5739_v55  ;;  %v18225_v38 = vadd.f32 %v5128_v4, %v5079_v23 }
 0x9fe   : > { %21941 = vst [vmem:[#allocation172_spill] sm:$0xff] %v18225_v38 }
 0xa00   : > { %5833 = vmatmul.bf16.vlgmr.msra.gmra.mxu2 %v17226_v42  ;;  %5882 = vmatmul.bf16.vlgmr.msra.gmra.mxu3 %v17228_v39 }
 0xa01   : > { %v5741_v27 = vpop.f32.mrf.mxu0  ;;  %v5790_v17 = vpop.f32.mrf.mxu1 }
 0xa02   : > { %v5742_v2 = vadd.f32 %v5741_v27, %v17659_v31 }
 0xa03   : > { %v5238_v21 = vpop.f32.mrf.mxu2  ;;  %v5287_v29 = vpop.f32.mrf.mxu3 }
 0xa04   : > { %v18230_v58 = vadd.f32 %v5790_v17, %v5742_v2  ;;  %v18232_v46 = vadd.f32 %v5287_v29, %v5238_v21  ;;  %5936 = vmatmul.bf16.gmra.mxu0 %v17233_v36  ;;  %5985 = vmatmul.bf16.gmra.mxu1 %v17235_v54 }
 0xa06   : > { %21942 = vst [vmem:[#allocation92_spill] sm:$0xff] %v18232_v46 }
 0xa09   : > { %v5743_v12 = vpop.f32.mrf.mxu0  ;;  %v5792_v37 = vpop.f32.mrf.mxu1 }
 0xa0a   : > { %v5744_v59 = vadd.f32 %v5743_v12, %v17663_v1 }
 0xa0b   : > { %v5240_v55 = vpop.f32.mrf.mxu2  ;;  %v5289_v23 = vpop.f32.mrf.mxu3 }
 0xa0c   : > { %v18237_v4 = vadd.f32 %v5792_v37, %v5744_v59  ;;  %v18239_v38 = vadd.f32 %v5289_v23, %v5240_v55 }
 0xa0e   : > { %21943 = vst [vmem:[#allocation173_spill] sm:$0xff] %v18239_v38 }
 0xa10   : > { %5838 = vmatmul.bf16.gmra.mxu2 %v17233_v36  ;;  %5887 = vmatmul.bf16.gmra.mxu3 %v17235_v54 }
 0xa11   : > { %v5746_v31 = vpop.f32.mrf.mxu0  ;;  %v5795_v27 = vpop.f32.mrf.mxu1 }
 0xa12   : > { %v5747_v17 = vadd.f32 %v5746_v31, %v17671_v35 }
 0xa13   : > { %v5243_v2 = vpop.f32.mrf.mxu2  ;;  %v5292_v21 = vpop.f32.mrf.mxu3 }
 0xa14   : > { %v18244_v29 = vadd.f32 %v5795_v27, %v5747_v17  ;;  %v18246_v46 = vadd.f32 %v5292_v21, %v5243_v2  ;;  %5941 = vmatmul.bf16.gmra.mxu0 %v17240_v28  ;;  %5990 = vmatmul.bf16.gmra.mxu1 %v17242_v26 }
 0xa16   : > { %21944 = vst [vmem:[#allocation14_spill] sm:$0xff] %v18246_v46 }
 0xa19   : > { %v5748_v1 = vpop.f32.mrf.mxu0  ;;  %v5797_v12 = vpop.f32.mrf.mxu1 }
 0xa1a   : > { %v5749_v37 = vadd.f32 %v5748_v1, %v17675_v15 }
 0xa1b   : > { %v5245_v59 = vpop.f32.mrf.mxu2  ;;  %v5294_v55 = vpop.f32.mrf.mxu3 }
 0xa1c   : > { %v18251_v23 = vadd.f32 %v5797_v12, %v5749_v37  ;;  %v18253_v38 = vadd.f32 %v5294_v55, %v5245_v59 }
 0xa1e   : > { %21945 = vst [vmem:[#allocation15_spill] sm:$0xff] %v18253_v38 }
 0xa20   : > { %5843 = vmatmul.bf16.gmra.mxu2 %v17240_v28  ;;  %5892 = vmatmul.bf16.gmra.mxu3 %v17242_v26 }
 0xa21   : > { %v5751_v35 = vpop.f32.mrf.mxu0  ;;  %v5800_v31 = vpop.f32.mrf.mxu1 }
 0xa22   : > { %v5752_v27 = vadd.f32 %v5751_v35, %v17695_v0 }
 0xa23   : > { %v5248_v17 = vpop.f32.mrf.mxu2  ;;  %v5297_v2 = vpop.f32.mrf.mxu3 }
 0xa24   : > { %v18258_v21 = vadd.f32 %v5800_v31, %v5752_v27  ;;  %v18260_v46 = vadd.f32 %v5297_v2, %v5248_v17  ;;  %5946 = vmatmul.bf16.gmra.mxu0 %v17247_v3  ;;  %5995 = vmatmul.bf16.gmra.mxu1 %v17249_v18  ;;  %v12033_v27 = vld [vmem:[%s21297_s4 + $0x4e0] sm:$0xf] }
 0xa25   : > { %v12161_v17 = vld [vmem:[%s21297_s4 + $0x5e0] sm:$0xf] }
 0xa29   : > { %v5753_v15 = vpop.f32.mrf.mxu0  ;;  %v5802_v1 = vpop.f32.mrf.mxu1 }
 0xa2a   : > { %v5754_v12 = vadd.f32 %v5753_v15, %v17723_v57  ;;  %v13866_v57 = vld [vmem:[%s21297_s4 + $0x4ec] sm:$0xf0] }
 0xa2b   : > { %v5250_v37 = vpop.f32.mrf.mxu2  ;;  %v5299_v59 = vpop.f32.mrf.mxu3 }
 0xa2c   : > { %v18265_v55 = vadd.f32 %v5802_v1, %v5754_v12  ;;  %v18267_v38 = vadd.f32 %v5299_v59, %v5250_v37  ;;  %v12034_v1 = vor.u32 %v13866_v57, %v12033_v27  ;;  %v13898_v12 = vld [vmem:[%s21297_s4 + $0x5ec] sm:$0xf0] }
 0xa2d   : > { %v12162_v59 = vor.u32 %v13898_v12, %v12161_v17  ;;  %v13862_v27 = vld [vmem:[%s21297_s4 + $0x4cc] sm:$0xf0]  ;;  %v12001_v12 = vld [vmem:[%s21297_s4 + $0x4a0] sm:$0xf] }
 0xa2e   : > { %21946 = vst [vmem:[#allocation8_spill] sm:$0xff] %v18267_v38  ;;  %6584 = vmatpush.bf16.msra.mxu0 %v12034_v1  ;;  %v13894_v57 = vld [vmem:[%s21297_s4 + $0x5cc] sm:$0xf0] }
 0xa2f   : > { %6633 = vmatpush.bf16.msra.mxu1 %v12162_v59  ;;  %v13858_v59 = vld [vmem:[%s21297_s4 + $0x4ac] sm:$0xf0] }
 0xa30   : > { %5848 = vmatmul.bf16.gmra.mxu2 %v17247_v3  ;;  %5897 = vmatmul.bf16.gmra.mxu3 %v17249_v18 }
 0xa31   : > { %v5756_v0 = vpop.f32.mrf.mxu0  ;;  %v5805_v35 = vpop.f32.mrf.mxu1 }
 0xa32   : > { %v5757_v31 = vadd.f32 %v5756_v0, %v17775_v51  ;;  %v12017_v0 = vld [vmem:[%s21297_s4 + $0x4c0] sm:$0xf] }
 0xa33   : > { %v5253_v2 = vpop.f32.mrf.mxu2  ;;  %v5302_v15 = vpop.f32.mrf.mxu3 }
 0xa34   : > { %v18284_v51 = vadd.f32 %v5805_v35, %v5757_v31  ;;  %v18286_v37 = vadd.f32 %v5302_v15, %v5253_v2  ;;  %5951 = vmatmul.bf16.gmra.mxu0 %v17254_v62  ;;  %6000 = vmatmul.bf16.gmra.mxu1 %v17256_v50  ;;  %v12145_v35 = vld [vmem:[%s21297_s4 + $0x5c0] sm:$0xf]  ;;  %v12018_v31 = vor.u32 %v13862_v27, %v12017_v0 }
 0xa35   : > { %v12146_v17 = vor.u32 %v13894_v57, %v12145_v35  ;;  %v12129_v0 = vld [vmem:[%s21297_s4 + $0x5a0] sm:$0xf]  ;;  %v12002_v57 = vor.u32 %v13858_v59, %v12001_v12  ;;  %v13769_v12 = vld [vmem:[%s21297_s4 + $0x1ec] sm:$0xf] }
 0xa36   : > { %21947 = vst [vmem:[#allocation93_spill] sm:$0xff] %v18284_v51  ;;  %6585 = vmatpush.bf16.msra.mxu0 %v12018_v31  ;;  %v11723_v51 = vld [vmem:[%s21297_s4 + $0xf8] sm:$0xf0] }
 0xa37   : > { %21948 = vst [vmem:[#allocation174_spill] sm:$0xff] %v18286_v37  ;;  %6634 = vmatpush.bf16.msra.mxu1 %v12146_v17  ;;  %v13737_v37 = vld [vmem:[%s21297_s4 + $0xec] sm:$0xf] }
 0xa38   : > { %v11726_v59 = vor.u32 %v13737_v37, %v11723_v51  ;;  %v12113_v51 = vld [vmem:[%s21297_s4 + $0x580] sm:$0xf]  ;;  %v13886_v37 = vld [vmem:[%s21297_s4 + $0x58c] sm:$0xf0] }
 0xa39   : > { %v5758_v2 = vpop.f32.mrf.mxu0  ;;  %v5807_v15 = vpop.f32.mrf.mxu1 }
 0xa3a   : > { %v5759_v1 = vadd.f32 %v5758_v2, %v17829_v45  ;;  %v13890_v45 = vld [vmem:[%s21297_s4 + $0x5ac] sm:$0xf0]  ;;  %6586 = vmatpush.bf16.msra.mxu0 %v12002_v57  ;;  %6021 = vmatpush.bf16.msrb.mxu2 %v11726_v59 }
 0xa3b   : > { %v5255_v27 = vpop.f32.mrf.mxu2  ;;  %v5304_v35 = vpop.f32.mrf.mxu3  ;;  %v12130_v2 = vor.u32 %v13890_v45, %v12129_v0  ;;  %v13854_v0 = vld [vmem:[%s21297_s4 + $0x48c] sm:$0xf0] }
 0xa3c   : > { %v18315_v31 = vadd.f32 %v5807_v15, %v5759_v1  ;;  %v18317_v17 = vadd.f32 %v5304_v35, %v5255_v27  ;;  %v11851_v15 = vld [vmem:[%s21297_s4 + $0x1f8] sm:$0xf0]  ;;  %v11985_v1 = vld [vmem:[%s21297_s4 + $0x480] sm:$0xf] }
 0xa3d   : > { %6635 = vmatpush.bf16.msra.mxu1 %v12130_v2  ;;  %v11854_v27 = vor.u32 %v13769_v12, %v11851_v15  ;;  %v11986_v35 = vor.u32 %v13854_v0, %v11985_v1  ;;  %v12114_v2 = vor.u32 %v13886_v37, %v12113_v51  ;;  %v13733_v12 = vld [vmem:[%s21297_s4 + $0xcc] sm:$0xf]  ;;  %v11707_v15 = vld [vmem:[%s21297_s4 + $0xd8] sm:$0xf0] }
 0xa3e   : > { %21949 = vst [vmem:[#allocation94_spill] sm:$0xff] %v18315_v31  ;;  %v13765_v1 = vld [vmem:[%s21297_s4 + $0x1cc] sm:$0xf]  ;;  %v11710_v59 = vor.u32 %v13733_v12, %v11707_v15  ;;  %v13882_v12 = vld [vmem:[%s21297_s4 + $0x56c] sm:$0xf0] }
 0xa3f   : > { %21950 = vst [vmem:[#allocation175_spill] sm:$0xff] %v18317_v17  ;;  %6070 = vmatpush.bf16.msrb.mxu3 %v11854_v27  ;;  %6587 = vmatpush.bf16.msra.mxu0 %v11986_v35  ;;  %v11969_v27 = vld [vmem:[%s21297_s4 + $0x460] sm:$0xf]  ;;  %v13850_v35 = vld [vmem:[%s21297_s4 + $0x46c] sm:$0xf0] }
 0xa40   : > { %5853 = vmatmul.bf16.gmra.mxu2 %v17254_v62  ;;  %5902 = vmatmul.bf16.gmra.mxu3 %v17256_v50  ;;  %v11970_v15 = vor.u32 %v13850_v35, %v11969_v27 }
 0xa41   : > { %v5761_v57 = vpop.f32.mrf.mxu0  ;;  %v5810_v45 = vpop.f32.mrf.mxu1  ;;  %6636 = vmatpush.bf16.msra.mxu1 %v12114_v2  ;;  %v12097_v2 = vld [vmem:[%s21297_s4 + $0x560] sm:$0xf]  ;;  %6022 = vmatpush.bf16.msrb.mxu2 %v11710_v59 }
 0xa42   : > { %v5762_v31 = vadd.f32 %v5761_v57, %v17879_v41  ;;  %v11835_v41 = vld [vmem:[%s21297_s4 + $0x1d8] sm:$0xf0]  ;;  %v12098_v38 = vor.u32 %v13882_v12, %v12097_v2  ;;  %v11953_v59 = vld [vmem:[%s21297_s4 + $0x440] sm:$0xf] }
 0xa43   : > { %v5258_v0 = vpop.f32.mrf.mxu2  ;;  %v5307_v17 = vpop.f32.mrf.mxu3  ;;  %v11838_v57 = vor.u32 %v13765_v1, %v11835_v41  ;;  %6588 = vmatpush.bf16.msra.mxu0 %v11970_v15  ;;  %v13846_v41 = vld [vmem:[%s21297_s4 + $0x44c] sm:$0xf0] }
 0xa44   : > { %v18364_v51 = vadd.f32 %v5810_v45, %v5762_v31  ;;  %v18366_v37 = vadd.f32 %v5307_v17, %v5258_v0  ;;  %5956 = vmatmul.bf16.gmra.mxu0 %v17309_v60  ;;  %6005 = vmatmul.bf16.gmra.mxu1 %v17311_v5  ;;  %v13729_v31 = vld [vmem:[%s21297_s4 + $0xac] sm:$0xf]  ;;  %v11691_v17 = vld [vmem:[%s21297_s4 + $0xb8] sm:$0xf0]  ;;  %v11954_v35 = vor.u32 %v13846_v41, %v11953_v59 }
 0xa45   : > { %6071 = vmatpush.bf16.msrb.mxu3 %v11838_v57  ;;  %v13761_v45 = vld [vmem:[%s21297_s4 + $0x1ac] sm:$0xf]  ;;  %6637 = vmatpush.bf16.msra.mxu1 %v12098_v38  ;;  %v11694_v1 = vor.u32 %v13729_v31, %v11691_v17  ;;  %v11819_v0 = vld [vmem:[%s21297_s4 + $0x1b8] sm:$0xf0]  ;;  %v12081_v57 = vld [vmem:[%s21297_s4 + $0x540] sm:$0xf] }
 0xa46   : > { %21951 = vst [vmem:[#allocation30_spill] sm:$0xff] %v18366_v37  ;;  %v11822_v27 = vor.u32 %v13761_v45, %v11819_v0  ;;  %v13878_v38 = vld [vmem:[%s21297_s4 + $0x54c] sm:$0xf0]  ;;  %v13725_v17 = vld [vmem:[%s21297_s4 + $0x8c] sm:$0xf] }
 0xa47   : > { %6023 = vmatpush.bf16.msrb.mxu2 %v11694_v1  ;;  %v12082_v15 = vor.u32 %v13878_v38, %v12081_v57  ;;  %v11675_v45 = vld [vmem:[%s21297_s4 + $0x98] sm:$0xf0]  ;;  %v13757_v0 = vld [vmem:[%s21297_s4 + $0x18c] sm:$0xf]  ;;  %6589 = vmatpush.bf16.msra.mxu0 %v11954_v35  ;;  %v13842_v57 = vld [vmem:[%s21297_s4 + $0x42c] sm:$0xf0] }
 0xa48   : > { %v11678_v1 = vor.u32 %v13725_v17, %v11675_v45  ;;  %v13874_v17 = vld [vmem:[%s21297_s4 + $0x52c] sm:$0xf0] }
 0xa49   : > { %v5763_v2 = vpop.f32.mrf.mxu0  ;;  %v5812_v12 = vpop.f32.mrf.mxu1  ;;  %6072 = vmatpush.bf16.msrb.mxu3 %v11822_v27  ;;  %6638 = vmatpush.bf16.msra.mxu1 %v12082_v15  ;;  %v11937_v27 = vld [vmem:[%s21297_s4 + $0x420] sm:$0xf] }
 0xa4a   : > { %v5764_v31 = vadd.f32 %v5763_v2, %v17907_v61  ;;  %v11803_v61 = vld [vmem:[%s21297_s4 + $0x198] sm:$0xf0]  ;;  %v11938_v35 = vor.u32 %v13842_v57, %v11937_v27  ;;  %v12065_v15 = vld [vmem:[%s21297_s4 + $0x520] sm:$0xf] }
 0xa4b   : > { %v5260_v59 = vpop.f32.mrf.mxu2  ;;  %v5309_v41 = vpop.f32.mrf.mxu3  ;;  %v11806_v37 = vor.u32 %v13757_v0, %v11803_v61  ;;  %6024 = vmatpush.bf16.msrb.mxu2 %v11678_v1  ;;  %v12066_v45 = vor.u32 %v13874_v17, %v12065_v15  ;;  %v13753_v0 = vld [vmem:[%s21297_s4 + $0x16c] sm:$0xf]  ;;  %v13838_v1 = vld [vmem:[%s21297_s4 + $0x40c] sm:$0xf0]  ;;  %v12049_v57 = vld [vmem:[%s21297_s4 + $0x500] sm:$0xf] }
 0xa4c   : > { %v18419_v38 = vadd.f32 %v5812_v12, %v5764_v31  ;;  %v18421_v2 = vadd.f32 %v5309_v41, %v5260_v59  ;;  %v13721_v12 = vld [vmem:[%s21297_s4 + $0x6c] sm:$0xf]  ;;  %v11659_v31 = vld [vmem:[%s21297_s4 + $0x78] sm:$0xf0]  ;;  %6590 = vmatpush.bf16.msra.mxu0 %v11938_v35  ;;  %v13870_v35 = vld [vmem:[%s21297_s4 + $0x50c] sm:$0xf0] }
 0xa4d   : > { %6073 = vmatpush.bf16.msrb.mxu3 %v11806_v37  ;;  %6639 = vmatpush.bf16.msra.mxu1 %v12066_v45  ;;  %v11662_v59 = vor.u32 %v13721_v12, %v11659_v31  ;;  %v11787_v41 = vld [vmem:[%s21297_s4 + $0x178] sm:$0xf0]  ;;  %v11921_v37 = vld [vmem:[%s21297_s4 + $0x400] sm:$0xf]  ;;  %v12050_v45 = vor.u32 %v13870_v35, %v12049_v57  ;;  %v13717_v31 = vld [vmem:[%s21297_s4 + $0x4c] sm:$0xf] }
 0xa4e   : > { %21952 = vst [vmem:[#allocation29_spill] sm:$0xff] %v18419_v38  ;;  %v11790_v61 = vor.u32 %v13753_v0, %v11787_v41  ;;  %v11922_v27 = vor.u32 %v13838_v1, %v11921_v37  ;;  %v11643_v0 = vld [vmem:[%s21297_s4 + $0x58] sm:$0xf0]  ;;  %v13749_v41 = vld [vmem:[%s21297_s4 + $0x14c] sm:$0xf] }
 0xa4f   : > { %6025 = vmatpush.bf16.msrb.mxu2 %v11662_v59  ;;  %v11646_v59 = vor.u32 %v13717_v31, %v11643_v0 }
 0xa50   : > { %5858 = vmatmul.bf16.gmra.mxu2 %v17309_v60  ;;  %5907 = vmatmul.bf16.gmra.mxu3 %v17311_v5 }
 0xa51   : > { %v5766_v15 = vpop.f32.mrf.mxu0  ;;  %v5815_v17 = vpop.f32.mrf.mxu1  ;;  %6074 = vmatpush.bf16.msrb.mxu3 %v11790_v61  ;;  %6591 = vmatpush.bf16.msra.mxu0 %v11922_v27  ;;  %v13713_v27 = vld [vmem:[%s21297_s4 + $0x2c] sm:$0xf] }
 0xa52   : > { %v5767_v12 = vadd.f32 %v5766_v15, %v17915_v7  ;;  %6640 = vmatpush.bf16.msra.mxu1 %v12050_v45  ;;  %v11771_v7 = vld [vmem:[%s21297_s4 + $0x158] sm:$0xf0] }
 0xa53   : > { %v5263_v37 = vpop.f32.mrf.mxu2  ;;  %v5312_v1 = vpop.f32.mrf.mxu3  ;;  %v11774_v35 = vor.u32 %v13749_v41, %v11771_v7  ;;  %6026 = vmatpush.bf16.msrb.mxu2 %v11646_v59  ;;  %v11627_v15 = vld [vmem:[%s21297_s4 + $0x38] sm:$0xf0]  ;;  %v13741_v7 = vld [vmem:[%s21297_s4 + $0x10c] sm:$0xf] }
 0xa54   : > { %v18468_v61 = vadd.f32 %v5815_v17, %v5767_v12  ;;  %v18470_v57 = vadd.f32 %v5312_v1, %v5263_v37  ;;  %5961 = vmatmul.bf16.gmra.mxu0 %v17364_v33  ;;  %6010 = vmatmul.bf16.gmra.mxu1 %v17366_v49  ;;  %v13745_v17 = vld [vmem:[%s21297_s4 + $0x12c] sm:$0xf]  ;;  %v11630_v45 = vor.u32 %v13713_v27, %v11627_v15  ;;  %v11755_v12 = vld [vmem:[%s21297_s4 + $0x138] sm:$0xf0] }
 0xa55   : > { %6075 = vmatpush.bf16.msrb.mxu3 %v11774_v35  ;;  %v11758_v31 = vor.u32 %v13745_v17, %v11755_v12  ;;  %v13709_v1 = vld [vmem:[%s21297_s4 + $0xc] sm:$0xf]  ;;  %v11611_v59 = vld [vmem:[%s21297_s4 + $0x18] sm:$0xf0] }
 0xa56   : > { %21953 = vst [vmem:[#allocation31_spill] sm:$0xff] %v18468_v61  ;;  %v11614_v15 = vor.u32 %v13709_v1, %v11611_v59 }
 0xa57   : > { %21954 = vst [vmem:[#allocation138_spill] sm:$0xff] %v18470_v57  ;;  %6027 = vmatpush.bf16.msrb.mxu2 %v11630_v45 }
 0xa59   : > { %v5768_v0 = vpop.f32.mrf.mxu0  ;;  %v5817_v41 = vpop.f32.mrf.mxu1  ;;  %6076 = vmatpush.bf16.msrb.mxu3 %v11758_v31 }
 0xa5a   : > { %v5769_v37 = vadd.f32 %v5768_v0, %v17919_v20  ;;  %v11739_v20 = vld [vmem:[%s21297_s4 + $0x118] sm:$0xf0] }
 0xa5b   : > { %v5265_v35 = vpop.f32.mrf.mxu2  ;;  %v5314_v27 = vpop.f32.mrf.mxu3  ;;  %v11742_v12 = vor.u32 %v13741_v7, %v11739_v20  ;;  %6028 = vmatpush.bf16.msrb.mxu2 %v11614_v15 }
 0xa5c   : > { %v18499_v17 = vadd.f32 %v5817_v41, %v5769_v37  ;;  %v18501_v45 = vadd.f32 %v5314_v27, %v5265_v35 }
 0xa5d   : > { %6077 = vmatpush.bf16.msrb.mxu3 %v11742_v12 }
 0xa5e   : > { %21955 = vst [vmem:[#allocation96_spill] sm:$0xff] %v18499_v17 }
 0xa60   : > { %5863 = vmatmul.bf16.gmra.mxu2 %v17364_v33  ;;  %5912 = vmatmul.bf16.gmra.mxu3 %v17366_v49 }
 0xa61   : > { %v5771_v31 = vpop.f32.mrf.mxu0  ;;  %v5820_v0 = vpop.f32.mrf.mxu1 }
 0xa62   : > { %v5772_v38 = vadd.f32 %v5771_v31, %v17929_v44 }
 0xa63   : > { %v5268_v1 = vpop.f32.mrf.mxu2  ;;  %v5317_v59 = vpop.f32.mrf.mxu3 }
 0xa64   : > { %v18506_v57 = vadd.f32 %v5820_v0, %v5772_v38  ;;  %v18508_v61 = vadd.f32 %v5317_v59, %v5268_v1  ;;  %5966 = vmatmul.bf16.gmra.mxu0 %v17371_v34  ;;  %6015 = vmatmul.bf16.gmra.mxu1 %v17373_v30 }
 0xa69   : > { %v5773_v41 = vpop.f32.mrf.mxu0  ;;  %v5822_v37 = vpop.f32.mrf.mxu1 }
 0xa6a   : > { %v5774_v7 = vadd.f32 %v5773_v41, %v17935_v19  ;;  %v21957_v19 = vld [vmem:[#allocation78_spill] sm:$0xff] }
 0xa6b   : > { %v5270_v35 = vpop.f32.mrf.mxu2  ;;  %v5319_v27 = vpop.f32.mrf.mxu3 }
 0xa6c   : > { %v18513_v15 = vadd.f32 %v5822_v37, %v5774_v7  ;;  %v18515_v20 = vadd.f32 %v5319_v27, %v5270_v35 }
 0xa6e   : > { %21956 = vst [vmem:[#allocation176_spill] sm:$0xff] %v18513_v15 }
 0xa70   : > { %5868 = vmatmul.bf16.gmra.mxu2 %v17371_v34  ;;  %5917 = vmatmul.bf16.gmra.mxu3 %v17373_v30 }
 0xa71   : > { %v5932_v44 = vpop.f32.mrf.mxu0  ;;  %v5981_v38 = vpop.f32.mrf.mxu1 }
 0xa72   : > { %v5933_v12 = vadd.f32 %v5932_v44, %v17927_v11 }
 0xa73   : > { %v5273_v31 = vpop.f32.mrf.mxu2  ;;  %v5322_v0 = vpop.f32.mrf.mxu3 }
 0xa74   : > { %v18520_v1 = vadd.f32 %v5981_v38, %v5933_v12  ;;  %v18522_v59 = vadd.f32 %v5322_v0, %v5273_v31  ;;  %6592 = vmatmul.bf16.vlgmr.msra.gmra.mxu0 %v17641_v32  ;;  %6641 = vmatmul.bf16.vlgmr.msra.gmra.mxu1 %v21957_v19 }
 0xa79   : > { %v5934_v41 = vpop.f32.mrf.mxu0  ;;  %v5983_v37 = vpop.f32.mrf.mxu1 }
 0xa7a   : > { %v5935_v7 = vadd.f32 %v5934_v41, %v17933_v14  ;;  %v21960_v41 = vld [vmem:[#allocation79_spill] sm:$0xff] }
 0xa7b   : > { %v5275_v35 = vpop.f32.mrf.mxu2  ;;  %v5324_v27 = vpop.f32.mrf.mxu3 }
 0xa7c   : > { %v18527_v15 = vadd.f32 %v5983_v37, %v5935_v7  ;;  %v18529_v17 = vadd.f32 %v5324_v27, %v5275_v35  ;;  %v21961_v37 = vld [vmem:[#allocation80_spill] sm:$0xff] }
 0xa7e   : > { %21958 = vst [vmem:[#allocation97_spill] sm:$0xff] %v18527_v15 }
 0xa7f   : > { %21959 = vst [vmem:[#allocation177_spill] sm:$0xff] %v18529_v17 }
 0xa80   : > { %6029 = vmatmul.bf16.vlgmr.msrb.gmra.mxu2 %v17226_v42  ;;  %6078 = vmatmul.bf16.vlgmr.msrb.gmra.mxu3 %v17228_v39 }
 0xa81   : > { %v5937_v11 = vpop.f32.mrf.mxu0  ;;  %v5986_v44 = vpop.f32.mrf.mxu1 }
 0xa82   : > { %v5938_v38 = vadd.f32 %v5937_v11, %v17939_v10 }
 0xa83   : > { %v5834_v12 = vpop.f32.mrf.mxu2  ;;  %v5883_v31 = vpop.f32.mrf.mxu3 }
 0xa84   : > { %v18534_v0 = vadd.f32 %v5986_v44, %v5938_v38  ;;  %v5835_v14 = vadd.f32 %v5834_v12, %v17941_v24  ;;  %6597 = vmatmul.bf16.gmra.mxu0 %v21960_v41  ;;  %6646 = vmatmul.bf16.gmra.mxu1 %v21961_v37 }
 0xa86   : > { %v18539_v7 = vadd.f32 %v5883_v31, %v5835_v14 }
 0xa89   : > { %v5939_v35 = vpop.f32.mrf.mxu0  ;;  %v5988_v42 = vpop.f32.mrf.mxu1 }
 0xa8a   : > { %v5940_v39 = vadd.f32 %v5939_v35, %v17945_v13  ;;  %v21963_v13 = vld [vmem:[#allocation87_spill] sm:$0xff] }
 0xa8b   : > { %v5836_v27 = vpop.f32.mrf.mxu2  ;;  %v5885_v17 = vpop.f32.mrf.mxu3 }
 0xa8c   : > { %v18542_v15 = vadd.f32 %v5988_v42, %v5940_v39  ;;  %v5837_v10 = vadd.f32 %v5836_v27, %v17947_v9  ;;  %v21964_v42 = vld [vmem:[#allocation81_spill] sm:$0xff]  ;;  %v21965_v39 = vld [vmem:[#allocation18_spill] sm:$0xff] }
 0xa8e   : > { %v18545_v11 = vadd.f32 %v5885_v17, %v5837_v10 }
 0xa90   : > { %21962 = vst [vmem:[#allocation21_spill] sm:$0xff] %v18545_v11  ;;  %6034 = vmatmul.bf16.gmra.mxu2 %v17233_v36  ;;  %6083 = vmatmul.bf16.gmra.mxu3 %v17235_v54 }
 0xa91   : > { %v5942_v24 = vpop.f32.mrf.mxu0  ;;  %v5991_v44 = vpop.f32.mrf.mxu1 }
 0xa92   : > { %v5943_v38 = vadd.f32 %v5942_v24, %v17951_v25  ;;  %v21967_v25 = vld [vmem:[#allocation169_spill] sm:$0xff] }
 0xa93   : > { %v5839_v12 = vpop.f32.mrf.mxu2  ;;  %v5888_v31 = vpop.f32.mrf.mxu3 }
 0xa94   : > { %v18550_v14 = vadd.f32 %v5991_v44, %v5943_v38  ;;  %v5840_v35 = vadd.f32 %v5839_v12, %v21963_v13  ;;  %6602 = vmatmul.bf16.gmra.mxu0 %v21964_v42  ;;  %6651 = vmatmul.bf16.gmra.mxu1 %v21965_v39 }
 0xa96   : > { %v18555_v9 = vadd.f32 %v5888_v31, %v5840_v35 }
 0xa98   : > { %21966 = vst [vmem:[#allocation10_spill] sm:$0xff] %v18555_v9 }
 0xa99   : > { %v5944_v17 = vpop.f32.mrf.mxu0  ;;  %v5993_v36 = vpop.f32.mrf.mxu1 }
 0xa9a   : > { %v5945_v54 = vadd.f32 %v5944_v17, %v17957_v56  ;;  %v21969_v17 = vld [vmem:[#allocation19_spill] sm:$0xff] }
 0xa9b   : > { %v5841_v27 = vpop.f32.mrf.mxu2  ;;  %v5890_v10 = vpop.f32.mrf.mxu3 }
 0xa9c   : > { %v18558_v11 = vadd.f32 %v5993_v36, %v5945_v54  ;;  %v5842_v24 = vadd.f32 %v5841_v27, %v21967_v25  ;;  %v21970_v36 = vld [vmem:[#allocation82_spill] sm:$0xff] }
 0xa9e   : > { %v18561_v44 = vadd.f32 %v5890_v10, %v5842_v24  ;;  %v21972_v10 = vld [vmem:[#allocation7_spill] sm:$0xff] }
 0xaa0   : > { %21968 = vst [vmem:[#allocation98_spill] sm:$0xff] %v18561_v44  ;;  %6039 = vmatmul.bf16.gmra.mxu2 %v17240_v28  ;;  %6088 = vmatmul.bf16.gmra.mxu3 %v17242_v26 }
 0xaa1   : > { %v5947_v38 = vpop.f32.mrf.mxu0  ;;  %v5996_v12 = vpop.f32.mrf.mxu1 }
 0xaa2   : > { %v5948_v31 = vadd.f32 %v5947_v38, %v17963_v47  ;;  %v21974_v47 = vld [vmem:[#allocation12_spill] sm:$0xff] }
 0xaa3   : > { %v5844_v13 = vpop.f32.mrf.mxu2  ;;  %v5893_v35 = vpop.f32.mrf.mxu3 }
 0xaa4   : > { %v18566_v9 = vadd.f32 %v5996_v12, %v5948_v31  ;;  %v5845_v56 = vadd.f32 %v5844_v13, %v17965_v40  ;;  %6607 = vmatmul.bf16.gmra.mxu0 %v21969_v17  ;;  %6656 = vmatmul.bf16.gmra.mxu1 %v21970_v36  ;;  %v21976_v13 = vld [vmem:[#allocation13_spill] sm:$0xff] }
 0xaa6   : > { %v18571_v54 = vadd.f32 %v5893_v35, %v5845_v56  ;;  %v12041_v56 = vld [vmem:[%s21297_s4 + $0x4e8] sm:$0xf] }
 0xaa8   : > { %21971 = vst [vmem:[#allocation90_spill] sm:$0xff] %v18571_v54 }
 0xaa9   : > { %v5949_v27 = vpop.f32.mrf.mxu0  ;;  %v5998_v28 = vpop.f32.mrf.mxu1 }
 0xaaa   : > { %v5950_v26 = vadd.f32 %v5949_v27, %v21972_v10  ;;  %v13867_v27 = vld [vmem:[%s21297_s4 + $0x4f4] sm:$0xf0] }
 0xaab   : > { %v5846_v25 = vpop.f32.mrf.mxu2  ;;  %v5895_v24 = vpop.f32.mrf.mxu3 }
 0xaac   : > { %v18574_v44 = vadd.f32 %v5998_v28, %v5950_v26  ;;  %v5847_v38 = vadd.f32 %v5846_v25, %v21974_v47  ;;  %v12169_v28 = vld [vmem:[%s21297_s4 + $0x5e8] sm:$0xf]  ;;  %v12042_v26 = vor.u32 %v13867_v27, %v12041_v56 }
 0xaad   : > { %v12025_v56 = vld [vmem:[%s21297_s4 + $0x4c8] sm:$0xf] }
 0xaae   : > { %21973 = vst [vmem:[#allocation99_spill] sm:$0xff] %v18574_v44  ;;  %v18577_v12 = vadd.f32 %v5895_v24, %v5847_v38  ;;  %v21978_v24 = vld [vmem:[#allocation88_spill] sm:$0xff]  ;;  %v21979_v38 = vld [vmem:[#allocation83_spill] sm:$0xff]  ;;  %6780 = vmatpush.bf16.msrb.mxu0 %v12042_v26 }
 0xaaf   : > { %v13864_v44 = vld [vmem:[%s21297_s4 + $0x4e4] sm:$0xf] }
 0xab0   : > { %21975 = vst [vmem:[#allocation178_spill] sm:$0xff] %v18577_v12  ;;  %6044 = vmatmul.bf16.gmra.mxu2 %v17247_v3  ;;  %6093 = vmatmul.bf16.gmra.mxu3 %v17249_v18  ;;  %v13899_v18 = vld [vmem:[%s21297_s4 + $0x5f4] sm:$0xf0] }
 0xab1   : > { %v5952_v40 = vpop.f32.mrf.mxu0  ;;  %v6001_v31 = vpop.f32.mrf.mxu1 }
 0xab2   : > { %v5953_v35 = vadd.f32 %v5952_v40, %v21976_v13  ;;  %v21980_v40 = vld [vmem:[#allocation84_spill] sm:$0xff]  ;;  %v12170_v13 = vor.u32 %v13899_v18, %v12169_v28  ;;  %v13895_v28 = vld [vmem:[%s21297_s4 + $0x5d4] sm:$0xf0]  ;;  %v21982_v18 = vld [vmem:[#allocation170_spill] sm:$0xff] }
 0xab3   : > { %v5849_v10 = vpop.f32.mrf.mxu2  ;;  %v5898_v3 = vpop.f32.mrf.mxu3 }
 0xab4   : > { %v18594_v25 = vadd.f32 %v6001_v31, %v5953_v35  ;;  %v5850_v47 = vadd.f32 %v5849_v10, %v21978_v24  ;;  %6612 = vmatmul.bf16.gmra.mxu0 %v21979_v38  ;;  %6661 = vmatmul.bf16.gmra.mxu1 %v21980_v40  ;;  %v13863_v31 = vld [vmem:[%s21297_s4 + $0x4d4] sm:$0xf0]  ;;  %v12153_v35 = vld [vmem:[%s21297_s4 + $0x5c8] sm:$0xf] }
 0xab5   : > { %6829 = vmatpush.bf16.msrb.mxu1 %v12170_v13  ;;  %v12026_v27 = vor.u32 %v13863_v31, %v12025_v56  ;;  %v12154_v10 = vor.u32 %v13895_v28, %v12153_v35  ;;  %v13859_v13 = vld [vmem:[%s21297_s4 + $0x4b4] sm:$0xf0]  ;;  %v12137_v56 = vld [vmem:[%s21297_s4 + $0x5a8] sm:$0xf] }
 0xab6   : > { %21977 = vst [vmem:[#allocation32_spill] sm:$0xff] %v18594_v25  ;;  %v18599_v12 = vadd.f32 %v5898_v3, %v5850_v47  ;;  %v12009_v47 = vld [vmem:[%s21297_s4 + $0x4a8] sm:$0xf] }
 0xab7   : > { %6781 = vmatpush.bf16.msrb.mxu0 %v12026_v27  ;;  %v12010_v28 = vor.u32 %v13859_v13, %v12009_v47  ;;  %v13891_v27 = vld [vmem:[%s21297_s4 + $0x5b4] sm:$0xf0]  ;;  %v12035_v47 = vld [vmem:[%s21297_s4 + $0x4f0] sm:$0xf0] }
 0xab8   : > { %21981 = vst [vmem:[#allocation33_spill] sm:$0xff] %v18599_v12  ;;  %v12138_v12 = vor.u32 %v13891_v27, %v12137_v56  ;;  %v12163_v13 = vld [vmem:[%s21297_s4 + $0x5f0] sm:$0xf0]  ;;  %v13855_v56 = vld [vmem:[%s21297_s4 + $0x494] sm:$0xf0] }
 0xab9   : > { %v5954_v3 = vpop.f32.mrf.mxu0  ;;  %v6003_v26 = vpop.f32.mrf.mxu1  ;;  %6830 = vmatpush.bf16.msrb.mxu1 %v12154_v10 }
 0xaba   : > { %v5955_v24 = vadd.f32 %v5954_v3, %v21982_v18  ;;  %v21984_v3 = vld [vmem:[#allocation89_spill] sm:$0xff] }
 0xabb   : > { %v5851_v31 = vpop.f32.mrf.mxu2  ;;  %v5900_v35 = vpop.f32.mrf.mxu3  ;;  %6782 = vmatpush.bf16.msrb.mxu0 %v12010_v28  ;;  %v13887_v28 = vld [vmem:[%s21297_s4 + $0x594] sm:$0xf0] }
 0xabc   : > { %v18626_v10 = vadd.f32 %v6003_v26, %v5955_v24  ;;  %v5852_v18 = vadd.f32 %v5851_v31, %v21984_v3  ;;  %v13896_v26 = vld [vmem:[%s21297_s4 + $0x5e4] sm:$0xf]  ;;  %v12038_v24 = vor.u32 %v13864_v44, %v12035_v47  ;;  %v12121_v44 = vld [vmem:[%s21297_s4 + $0x588] sm:$0xf] }
 0xabd   : > { %6831 = vmatpush.bf16.msrb.mxu1 %v12138_v12  ;;  %v11993_v12 = vld [vmem:[%s21297_s4 + $0x488] sm:$0xf]  ;;  %v12166_v31 = vor.u32 %v13896_v26, %v12163_v13  ;;  %v13892_v26 = vld [vmem:[%s21297_s4 + $0x5c4] sm:$0xf] }
 0xabe   : > { %21983 = vst [vmem:[#allocation34_spill] sm:$0xff] %v18626_v10  ;;  %v18629_v25 = vadd.f32 %v5900_v35, %v5852_v18  ;;  %v11994_v35 = vor.u32 %v13855_v56, %v11993_v12  ;;  %6682 = vmatpush.bf16.msra.mxu2 %v12038_v24  ;;  %v12122_v18 = vor.u32 %v13887_v28, %v12121_v44  ;;  %v11977_v56 = vld [vmem:[%s21297_s4 + $0x468] sm:$0xf]  ;;  %v21987_v44 = vld [vmem:[#allocation171_spill] sm:$0xff] }
 0xabf   : > { %6731 = vmatpush.bf16.msra.mxu3 %v12166_v31  ;;  %v13851_v31 = vld [vmem:[%s21297_s4 + $0x474] sm:$0xf0] }
 0xac0   : > { %21985 = vst [vmem:[#allocation141_spill] sm:$0xff] %v18629_v25  ;;  %6049 = vmatmul.bf16.gmra.mxu2 %v17254_v62  ;;  %6098 = vmatmul.bf16.gmra.mxu3 %v17256_v50  ;;  %v13860_v62 = vld [vmem:[%s21297_s4 + $0x4c4] sm:$0xf]  ;;  %v12019_v50 = vld [vmem:[%s21297_s4 + $0x4d0] sm:$0xf0]  ;;  %v11978_v10 = vor.u32 %v13851_v31, %v11977_v56 }
 0xac1   : > { %v5957_v27 = vpop.f32.mrf.mxu0  ;;  %v6006_v3 = vpop.f32.mrf.mxu1  ;;  %6783 = vmatpush.bf16.msrb.mxu0 %v11994_v35  ;;  %6832 = vmatpush.bf16.msrb.mxu1 %v12122_v18  ;;  %v12022_v24 = vor.u32 %v13860_v62, %v12019_v50  ;;  %v21989_v18 = vld [vmem:[#allocation22_spill] sm:$0xff]  ;;  %v12105_v50 = vld [vmem:[%s21297_s4 + $0x568] sm:$0xf]  ;;  %v13883_v25 = vld [vmem:[%s21297_s4 + $0x574] sm:$0xf0] }
 0xac2   : > { %v5958_v47 = vadd.f32 %v5957_v27, %v18047_v22  ;;  %v12147_v22 = vld [vmem:[%s21297_s4 + $0x5d0] sm:$0xf0]  ;;  %v21988_v27 = vld [vmem:[#allocation85_spill] sm:$0xff]  ;;  %v12106_v54 = vor.u32 %v13883_v25, %v12105_v50 }
 0xac3   : > { %v5854_v13 = vpop.f32.mrf.mxu2  ;;  %v5903_v12 = vpop.f32.mrf.mxu3  ;;  %v12150_v62 = vor.u32 %v13892_v26, %v12147_v22  ;;  %6683 = vmatpush.bf16.msra.mxu2 %v12022_v24  ;;  %v12003_v26 = vld [vmem:[%s21297_s4 + $0x4b0] sm:$0xf0]  ;;  %v13847_v22 = vld [vmem:[%s21297_s4 + $0x454] sm:$0xf0] }
 0xac4   : > { %v18676_v35 = vadd.f32 %v6006_v3, %v5958_v47  ;;  %v5855_v28 = vadd.f32 %v5854_v13, %v21987_v44  ;;  %6617 = vmatmul.bf16.gmra.mxu0 %v21988_v27  ;;  %6666 = vmatmul.bf16.gmra.mxu1 %v21989_v18  ;;  %v13856_v47 = vld [vmem:[%s21297_s4 + $0x4a4] sm:$0xf]  ;;  %v12131_v25 = vld [vmem:[%s21297_s4 + $0x5b0] sm:$0xf0] }
 0xac5   : > { %6732 = vmatpush.bf16.msra.mxu3 %v12150_v62  ;;  %v13888_v13 = vld [vmem:[%s21297_s4 + $0x5a4] sm:$0xf]  ;;  %6784 = vmatpush.bf16.msrb.mxu0 %v11978_v10  ;;  %v12006_v24 = vor.u32 %v13856_v47, %v12003_v26  ;;  %v12089_v10 = vld [vmem:[%s21297_s4 + $0x548] sm:$0xf]  ;;  %v21991_v50 = vld [vmem:[#allocation26_spill] sm:$0xff] }
 0xac6   : > { %21986 = vst [vmem:[#allocation35_spill] sm:$0xff] %v18676_v35  ;;  %v18687_v3 = vadd.f32 %v5903_v12, %v5855_v28  ;;  %6833 = vmatpush.bf16.msrb.mxu1 %v12106_v54  ;;  %v11961_v12 = vld [vmem:[%s21297_s4 + $0x448] sm:$0xf]  ;;  %v12134_v56 = vor.u32 %v13888_v13, %v12131_v25  ;;  %v13879_v54 = vld [vmem:[%s21297_s4 + $0x554] sm:$0xf0] }
 0xac7   : > { %v11962_v31 = vor.u32 %v13847_v22, %v11961_v12  ;;  %6684 = vmatpush.bf16.msra.mxu2 %v12006_v24  ;;  %v12090_v62 = vor.u32 %v13879_v54, %v12089_v10  ;;  %v13852_v26 = vld [vmem:[%s21297_s4 + $0x484] sm:$0xf]  ;;  %v11987_v13 = vld [vmem:[%s21297_s4 + $0x490] sm:$0xf0]  ;;  %v11945_v10 = vld [vmem:[%s21297_s4 + $0x428] sm:$0xf] }
 0xac8   : > { %21990 = vst [vmem:[#allocation142_spill] sm:$0xff] %v18687_v3  ;;  %v13884_v25 = vld [vmem:[%s21297_s4 + $0x584] sm:$0xf]  ;;  %v11990_v24 = vor.u32 %v13852_v26, %v11987_v13  ;;  %v13843_v54 = vld [vmem:[%s21297_s4 + $0x434] sm:$0xf0] }
 0xac9   : > { %v5959_v44 = vpop.f32.mrf.mxu0  ;;  %v6008_v28 = vpop.f32.mrf.mxu1  ;;  %6733 = vmatpush.bf16.msra.mxu3 %v12134_v56  ;;  %6785 = vmatpush.bf16.msrb.mxu0 %v11962_v31  ;;  %v12115_v56 = vld [vmem:[%s21297_s4 + $0x590] sm:$0xf0]  ;;  %v11946_v31 = vor.u32 %v13843_v54, %v11945_v10  ;;  %v13875_v26 = vld [vmem:[%s21297_s4 + $0x534] sm:$0xf0]  ;;  %v12057_v10 = vld [vmem:[%s21297_s4 + $0x508] sm:$0xf] }
 0xaca   : > { %v5960_v47 = vadd.f32 %v5959_v44, %v21991_v50  ;;  %6834 = vmatpush.bf16.msrb.mxu1 %v12090_v62  ;;  %v12118_v3 = vor.u32 %v13884_v25, %v12115_v56  ;;  %v12073_v62 = vld [vmem:[%s21297_s4 + $0x528] sm:$0xf]  ;;  %v13871_v54 = vld [vmem:[%s21297_s4 + $0x514] sm:$0xf0] }
 0xacb   : > { %v5856_v12 = vpop.f32.mrf.mxu2  ;;  %v5905_v22 = vpop.f32.mrf.mxu3  ;;  %6685 = vmatpush.bf16.msra.mxu2 %v11990_v24  ;;  %v12074_v13 = vor.u32 %v13875_v26, %v12073_v62  ;;  %v12058_v62 = vor.u32 %v13871_v54, %v12057_v10 }
 0xacc   : > { %v18732_v44 = vadd.f32 %v6008_v28, %v5960_v47  ;;  %v5857_v50 = vadd.f32 %v5856_v12, %v18121_v16  ;;  %v13848_v28 = vld [vmem:[%s21297_s4 + $0x464] sm:$0xf]  ;;  %v11971_v16 = vld [vmem:[%s21297_s4 + $0x470] sm:$0xf0] }
 0xacd   : > { %6734 = vmatpush.bf16.msra.mxu3 %v12118_v3  ;;  %v13880_v47 = vld [vmem:[%s21297_s4 + $0x564] sm:$0xf]  ;;  %6786 = vmatpush.bf16.msrb.mxu0 %v11946_v31  ;;  %v11974_v25 = vor.u32 %v13848_v28, %v11971_v16  ;;  %v12099_v12 = vld [vmem:[%s21297_s4 + $0x570] sm:$0xf0]  ;;  %v11929_v3 = vld [vmem:[%s21297_s4 + $0x408] sm:$0xf] }
 0xace   : > { %v18741_v35 = vadd.f32 %v5905_v22, %v5857_v50  ;;  %6835 = vmatpush.bf16.msrb.mxu1 %v12074_v13  ;;  %v13839_v22 = vld [vmem:[%s21297_s4 + $0x414] sm:$0xf0]  ;;  %v12102_v24 = vor.u32 %v13880_v47, %v12099_v12  ;;  %v13876_v13 = vld [vmem:[%s21297_s4 + $0x544] sm:$0xf] }
 0xacf   : > { %v11930_v56 = vor.u32 %v13839_v22, %v11929_v3  ;;  %6686 = vmatpush.bf16.msra.mxu2 %v11974_v25  ;;  %v21993_v12 = vld [vmem:[#allocation24_spill] sm:$0xff]  ;;  %v21994_v22 = vld [vmem:[#allocation23_spill] sm:$0xff] }
 0xad0   : > { %21992 = vst [vmem:[#allocation101_spill] sm:$0xff] %v18741_v35  ;;  %6054 = vmatmul.bf16.gmra.mxu2 %v17309_v60  ;;  %6103 = vmatmul.bf16.gmra.mxu3 %v17311_v5  ;;  %v13844_v60 = vld [vmem:[%s21297_s4 + $0x444] sm:$0xf]  ;;  %v11955_v5 = vld [vmem:[%s21297_s4 + $0x450] sm:$0xf0] }
 0xad1   : > { %v5962_v50 = vpop.f32.mrf.mxu0  ;;  %v6011_v31 = vpop.f32.mrf.mxu1  ;;  %6735 = vmatpush.bf16.msra.mxu3 %v12102_v24  ;;  %6787 = vmatpush.bf16.msrb.mxu0 %v11930_v56  ;;  %v11958_v47 = vor.u32 %v13844_v60, %v11955_v5  ;;  %v21995_v24 = vld [vmem:[#allocation17_spill] sm:$0xff]  ;;  %v13840_v56 = vld [vmem:[%s21297_s4 + $0x424] sm:$0xf] }
 0xad2   : > { %v5963_v26 = vadd.f32 %v5962_v50, %v18155_v43  ;;  %6836 = vmatpush.bf16.msrb.mxu1 %v12058_v62  ;;  %v12083_v43 = vld [vmem:[%s21297_s4 + $0x550] sm:$0xf0] }
 0xad3   : > { %v5859_v28 = vpop.f32.mrf.mxu2  ;;  %v5908_v16 = vpop.f32.mrf.mxu3  ;;  %v12086_v10 = vor.u32 %v13876_v13, %v12083_v43  ;;  %6687 = vmatpush.bf16.msra.mxu2 %v11958_v47  ;;  %v11939_v50 = vld [vmem:[%s21297_s4 + $0x430] sm:$0xf0]  ;;  %v13836_v47 = vld [vmem:[%s21297_s4 + $0x404] sm:$0xf] }
 0xad4   : > { %v18782_v25 = vadd.f32 %v6011_v31, %v5963_v26  ;;  %v5860_v3 = vadd.f32 %v5859_v28, %v21993_v12  ;;  %6622 = vmatmul.bf16.gmra.mxu0 %v21994_v22  ;;  %6671 = vmatmul.bf16.gmra.mxu1 %v21995_v24  ;;  %v13872_v31 = vld [vmem:[%s21297_s4 + $0x524] sm:$0xf]  ;;  %v11942_v62 = vor.u32 %v13840_v56, %v11939_v50  ;;  %v12067_v26 = vld [vmem:[%s21297_s4 + $0x530] sm:$0xf0]  ;;  %v21997_v28 = vld [vmem:[#allocation27_spill] sm:$0xff] }
 0xad5   : > { %6736 = vmatpush.bf16.msra.mxu3 %v12086_v10  ;;  %v12070_v60 = vor.u32 %v13872_v31, %v12067_v26  ;;  %v11923_v43 = vld [vmem:[%s21297_s4 + $0x410] sm:$0xf0]  ;;  %v13868_v12 = vld [vmem:[%s21297_s4 + $0x504] sm:$0xf] }
 0xad6   : > { %v18787_v54 = vadd.f32 %v5908_v16, %v5860_v3  ;;  %v11926_v56 = vor.u32 %v13836_v47, %v11923_v43  ;;  %v12051_v50 = vld [vmem:[%s21297_s4 + $0x510] sm:$0xf0] }
 0xad7   : > { %6688 = vmatpush.bf16.msra.mxu2 %v11942_v62  ;;  %v12054_v26 = vor.u32 %v13868_v12, %v12051_v50 }
 0xad8   : > { %21996 = vst [vmem:[#allocation179_spill] sm:$0xff] %v18787_v54 }
 0xad9   : > { %v5964_v5 = vpop.f32.mrf.mxu0  ;;  %v6013_v13 = vpop.f32.mrf.mxu1  ;;  %6737 = vmatpush.bf16.msra.mxu3 %v12070_v60 }
 0xada   : > { %v5965_v16 = vadd.f32 %v5964_v5, %v21997_v28 }
 0xadb   : > { %v5861_v3 = vpop.f32.mrf.mxu2  ;;  %v5910_v10 = vpop.f32.mrf.mxu3  ;;  %6689 = vmatpush.bf16.msra.mxu2 %v11926_v56 }
 0xadc   : > { %v18814_v31 = vadd.f32 %v6013_v13, %v5965_v16  ;;  %v5862_v62 = vadd.f32 %v5861_v3, %v18199_v53  ;;  %v21999_v53 = vld [vmem:[#allocation86_spill] sm:$0xff]  ;;  %v22000_v16 = vld [vmem:[#allocation168_spill] sm:$0xff] }
 0xadd   : > { %6738 = vmatpush.bf16.msra.mxu3 %v12054_v26 }
 0xade   : > { %v18817_v60 = vadd.f32 %v5910_v10, %v5862_v62 }
 0xae0   : > { %21998 = vst [vmem:[#allocation102_spill] sm:$0xff] %v18817_v60  ;;  %6059 = vmatmul.bf16.gmra.mxu2 %v17364_v33  ;;  %6108 = vmatmul.bf16.gmra.mxu3 %v17366_v49 }
 0xae1   : > { %v5967_v5 = vpop.f32.mrf.mxu0  ;;  %v6016_v28 = vpop.f32.mrf.mxu1 }
 0xae2   : > { %v5968_v47 = vadd.f32 %v5967_v5, %v18203_v63  ;;  %v22003_v63 = vld [vmem:[#allocation25_spill] sm:$0xff] }
 0xae3   : > { %v5864_v43 = vpop.f32.mrf.mxu2  ;;  %v5913_v35 = vpop.f32.mrf.mxu3 }
 0xae4   : > { %v18822_v54 = vadd.f32 %v6016_v28, %v5968_v47  ;;  %v5865_v13 = vadd.f32 %v5864_v43, %v18205_v6  ;;  %6627 = vmatmul.bf16.gmra.mxu0 %v21999_v53  ;;  %6676 = vmatmul.bf16.gmra.mxu1 %v22000_v16 }
 0xae6   : > { %v18827_v12 = vadd.f32 %v5913_v35, %v5865_v13 }
 0xae8   : > { %22001 = vst [vmem:[#allocation180_spill] sm:$0xff] %v18827_v12 }
 0xae9   : > { %v5969_v3 = vpop.f32.mrf.mxu0  ;;  %v6018_v33 = vpop.f32.mrf.mxu1 }
 0xaea   : > { %v5970_v49 = vadd.f32 %v5969_v3, %v18209_v52  ;;  %v22005_v52 = vld [vmem:[#allocation91_spill] sm:$0xff] }
 0xaeb   : > { %v5866_v10 = vpop.f32.mrf.mxu2  ;;  %v5915_v56 = vpop.f32.mrf.mxu3 }
 0xaec   : > { %v18830_v50 = vadd.f32 %v6018_v33, %v5970_v49  ;;  %v5867_v62 = vadd.f32 %v5866_v10, %v22003_v63  ;;  %v22007_v63 = vld [vmem:[#allocation172_spill] sm:$0xff] }
 0xaee   : > { %22002 = vst [vmem:[#allocation139_spill] sm:$0xff] %v18830_v50  ;;  %v18833_v26 = vadd.f32 %v5915_v56, %v5867_v62 }
 0xaf0   : > { %22004 = vst [vmem:[#allocation140_spill] sm:$0xff] %v18833_v26  ;;  %6064 = vmatmul.bf16.gmra.mxu2 %v17371_v34  ;;  %6113 = vmatmul.bf16.gmra.mxu3 %v17373_v30 }
 0xaf1   : > { %v6593_v6 = vpop.f32.mrf.mxu0  ;;  %v6642_v5 = vpop.f32.mrf.mxu1 }
 0xaf2   : > { %v6643_v35 = vadd.f32 %v6642_v5, %v6593_v6 }
 0xaf3   : > { %v5869_v28 = vpop.f32.mrf.mxu2  ;;  %v5918_v47 = vpop.f32.mrf.mxu3 }
 0xaf4   : > { %v18838_v43 = vadd.f32 %v6643_v35, %v18216_v8  ;;  %v5870_v13 = vadd.f32 %v5869_v28, %v22005_v52  ;;  %6788 = vmatmul.bf16.vlgmr.msrb.gmra.mxu0 %v17641_v32  ;;  %6837 = vmatmul.bf16.vlgmr.msrb.gmra.mxu1 %v21957_v19 }
 0xaf6   : > { %v18843_v3 = vadd.f32 %v5918_v47, %v5870_v13  ;;  %v22009_v13 = vld [vmem:[#allocation92_spill] sm:$0xff] }
 0xaf8   : > { %22006 = vst [vmem:[#allocation103_spill] sm:$0xff] %v18843_v3 }
 0xaf9   : > { %v6595_v33 = vpop.f32.mrf.mxu0  ;;  %v6644_v34 = vpop.f32.mrf.mxu1 }
 0xafa   : > { %v6645_v49 = vadd.f32 %v6644_v34, %v6595_v33 }
 0xafb   : > { %v5871_v30 = vpop.f32.mrf.mxu2  ;;  %v5920_v10 = vpop.f32.mrf.mxu3 }
 0xafc   : > { %v18846_v56 = vadd.f32 %v6645_v49, %v18223_v48  ;;  %v5872_v62 = vadd.f32 %v5871_v30, %v22007_v63 }
 0xafe   : > { %v18849_v8 = vadd.f32 %v5920_v10, %v5872_v62 }
 0xb00   : > { %22008 = vst [vmem:[#allocation95_spill] sm:$0xff] %v18849_v8  ;;  %6690 = vmatmul.bf16.vlgmr.msra.gmra.mxu2 %v17641_v32  ;;  %6739 = vmatmul.bf16.vlgmr.msra.gmra.mxu3 %v21957_v19 }
 0xb01   : > { %v6598_v6 = vpop.f32.mrf.mxu0  ;;  %v6647_v5 = vpop.f32.mrf.mxu1 }
 0xb02   : > { %v6648_v35 = vadd.f32 %v6647_v5, %v6598_v6  ;;  %v22011_v6 = vld [vmem:[#allocation173_spill] sm:$0xff] }
 0xb03   : > { %v6030_v28 = vpop.f32.mrf.mxu2  ;;  %v6079_v47 = vpop.f32.mrf.mxu3 }
 0xb04   : > { %v18854_v52 = vadd.f32 %v6648_v35, %v18230_v58  ;;  %v6031_v33 = vadd.f32 %v6030_v28, %v22009_v13  ;;  %6793 = vmatmul.bf16.gmra.mxu0 %v21960_v41  ;;  %6842 = vmatmul.bf16.gmra.mxu1 %v21961_v37 }
 0xb06   : > { %v18859_v48 = vadd.f32 %v6079_v47, %v6031_v33 }
 0xb08   : > { %22010 = vst [vmem:[#allocation104_spill] sm:$0xff] %v18859_v48 }
 0xb09   : > { %v6600_v34 = vpop.f32.mrf.mxu0  ;;  %v6649_v49 = vpop.f32.mrf.mxu1 }
 0xb0a   : > { %v6650_v30 = vadd.f32 %v6649_v49, %v6600_v34  ;;  %v22013_v49 = vld [vmem:[#allocation14_spill] sm:$0xff] }
 0xb0b   : > { %v6032_v10 = vpop.f32.mrf.mxu2  ;;  %v6081_v63 = vpop.f32.mrf.mxu3 }
 0xb0c   : > { %v18862_v62 = vadd.f32 %v6650_v30, %v18237_v4  ;;  %v6033_v5 = vadd.f32 %v6032_v10, %v22011_v6 }
 0xb0e   : > { %v18865_v58 = vadd.f32 %v6081_v63, %v6033_v5 }
 0xb10   : > { %22012 = vst [vmem:[#allocation181_spill] sm:$0xff] %v18865_v58  ;;  %6695 = vmatmul.bf16.gmra.mxu2 %v21960_v41  ;;  %6744 = vmatmul.bf16.gmra.mxu3 %v21961_v37 }
 0xb11   : > { %v6603_v35 = vpop.f32.mrf.mxu0  ;;  %v6652_v28 = vpop.f32.mrf.mxu1 }
 0xb12   : > { %v6653_v47 = vadd.f32 %v6652_v28, %v6603_v35  ;;  %v22015_v28 = vld [vmem:[#allocation15_spill] sm:$0xff] }
 0xb13   : > { %v6035_v13 = vpop.f32.mrf.mxu2  ;;  %v6084_v33 = vpop.f32.mrf.mxu3 }
 0xb14   : > { %v18870_v34 = vadd.f32 %v6653_v47, %v18244_v29  ;;  %v6036_v8 = vadd.f32 %v6035_v13, %v22013_v49  ;;  %6798 = vmatmul.bf16.gmra.mxu0 %v21964_v42  ;;  %6847 = vmatmul.bf16.gmra.mxu1 %v21965_v39 }
 0xb16   : > { %v18875_v4 = vadd.f32 %v6084_v33, %v6036_v8 }
 0xb18   : > { %22014 = vst [vmem:[#allocation36_spill] sm:$0xff] %v18875_v4  ;;  %v11979_v4 = vld [vmem:[%s21297_s4 + $0x478] sm:$0xf0] }
 0xb19   : > { %v6605_v30 = vpop.f32.mrf.mxu0  ;;  %v6654_v10 = vpop.f32.mrf.mxu1 }
 0xb1a   : > { %v6655_v63 = vadd.f32 %v6654_v10, %v6605_v30 }
 0xb1b   : > { %v6037_v6 = vpop.f32.mrf.mxu2  ;;  %v6086_v5 = vpop.f32.mrf.mxu3 }
 0xb1c   : > { %v18878_v35 = vadd.f32 %v6655_v63, %v18251_v23  ;;  %v6038_v26 = vadd.f32 %v6037_v6, %v22015_v28 }
 0xb1e   : > { %v18881_v29 = vadd.f32 %v6086_v5, %v6038_v26 }
 0xb20   : > { %22016 = vst [vmem:[#allocation37_spill] sm:$0xff] %v18881_v29  ;;  %6700 = vmatmul.bf16.gmra.mxu2 %v21964_v42  ;;  %6749 = vmatmul.bf16.gmra.mxu3 %v21965_v39 }
 0xb21   : > { %v6608_v47 = vpop.f32.mrf.mxu0  ;;  %v6657_v13 = vpop.f32.mrf.mxu1 }
 0xb22   : > { %v6658_v8 = vadd.f32 %v6657_v13, %v6608_v47  ;;  %v22018_v13 = vld [vmem:[#allocation8_spill] sm:$0xff] }
 0xb23   : > { %v6040_v33 = vpop.f32.mrf.mxu2  ;;  %v6089_v49 = vpop.f32.mrf.mxu3 }
 0xb24   : > { %v18886_v30 = vadd.f32 %v6658_v8, %v18258_v21  ;;  %v6041_v10 = vadd.f32 %v6040_v33, %v18260_v46  ;;  %6803 = vmatmul.bf16.gmra.mxu0 %v21969_v17  ;;  %6852 = vmatmul.bf16.gmra.mxu1 %v21970_v36 }
 0xb26   : > { %v18891_v23 = vadd.f32 %v6089_v49, %v6041_v10 }
 0xb28   : > { %22017 = vst [vmem:[#allocation38_spill] sm:$0xff] %v18891_v23  ;;  %v22020_v23 = vld [vmem:[#allocation93_spill] sm:$0xff] }
 0xb29   : > { %v6610_v26 = vpop.f32.mrf.mxu0  ;;  %v6659_v63 = vpop.f32.mrf.mxu1 }
 0xb2a   : > { %v6660_v6 = vadd.f32 %v6659_v63, %v6610_v26  ;;  %v22021_v63 = vld [vmem:[#allocation174_spill] sm:$0xff] }
 0xb2b   : > { %v6042_v5 = vpop.f32.mrf.mxu2  ;;  %v6091_v28 = vpop.f32.mrf.mxu3 }
 0xb2c   : > { %v18894_v47 = vadd.f32 %v6660_v6, %v18265_v55  ;;  %v6043_v60 = vadd.f32 %v6042_v5, %v22018_v13  ;;  %v22023_v13 = vld [vmem:[#allocation175_spill] sm:$0xff] }
 0xb2e   : > { %v18897_v21 = vadd.f32 %v6091_v28, %v6043_v60 }
 0xb30   : > { %22019 = vst [vmem:[#allocation145_spill] sm:$0xff] %v18897_v21  ;;  %6705 = vmatmul.bf16.gmra.mxu2 %v21969_v17  ;;  %6754 = vmatmul.bf16.gmra.mxu3 %v21970_v36 }
 0xb31   : > { %v6613_v46 = vpop.f32.mrf.mxu0  ;;  %v6662_v8 = vpop.f32.mrf.mxu1 }
 0xb32   : > { %v6663_v33 = vadd.f32 %v6662_v8, %v6613_v46 }
 0xb33   : > { %v6045_v49 = vpop.f32.mrf.mxu2  ;;  %v6094_v10 = vpop.f32.mrf.mxu3 }
 0xb34   : > { %v18902_v26 = vadd.f32 %v6663_v33, %v22020_v23  ;;  %v6046_v29 = vadd.f32 %v6045_v49, %v22021_v63  ;;  %6808 = vmatmul.bf16.gmra.mxu0 %v21979_v38  ;;  %6857 = vmatmul.bf16.gmra.mxu1 %v21980_v40  ;;  %v13865_v23 = vld [vmem:[%s21297_s4 + $0x4ec] sm:$0xf]  ;;  %v12043_v33 = vld [vmem:[%s21297_s4 + $0x4f8] sm:$0xf0] }
 0xb35   : > { %v12046_v49 = vor.u32 %v13865_v23, %v12043_v33  ;;  %v12027_v23 = vld [vmem:[%s21297_s4 + $0x4d8] sm:$0xf0]  ;;  %v13893_v33 = vld [vmem:[%s21297_s4 + $0x5cc] sm:$0xf] }
 0xb36   : > { %v18907_v55 = vadd.f32 %v6094_v10, %v6046_v29  ;;  %v13897_v29 = vld [vmem:[%s21297_s4 + $0x5ec] sm:$0xf]  ;;  %v12171_v10 = vld [vmem:[%s21297_s4 + $0x5f8] sm:$0xf0] }
 0xb37   : > { %v12174_v63 = vor.u32 %v13897_v29, %v12171_v10  ;;  %6878 = vmatpush.bf16.msrb.mxu2 %v12046_v49  ;;  %v12155_v49 = vld [vmem:[%s21297_s4 + $0x5d8] sm:$0xf0] }
 0xb38   : > { %22022 = vst [vmem:[#allocation39_spill] sm:$0xff] %v18907_v55 }
 0xb39   : > { %v18909_v60 = vpop.f32.mrf.mxu0  ;;  %v18911_v6 = vpop.f32.mrf.mxu1  ;;  %6927 = vmatpush.bf16.msrb.mxu3 %v12174_v63  ;;  %v22025_v63 = vld [vmem:[#allocation30_spill] sm:$0xff] }
 0xb3b   : > { %v6047_v5 = vpop.f32.mrf.mxu2  ;;  %v6096_v28 = vpop.f32.mrf.mxu3 }
 0xb3c   : > { %v6048_v46 = vadd.f32 %v6047_v5, %v22023_v13 }
 0xb3e   : > { %v18914_v8 = vadd.f32 %v6096_v28, %v6048_v46  ;;  %v13861_v46 = vld [vmem:[%s21297_s4 + $0x4cc] sm:$0xf] }
 0xb3f   : > { %v12030_v29 = vor.u32 %v13861_v46, %v12027_v23  ;;  %v13857_v46 = vld [vmem:[%s21297_s4 + $0x4ac] sm:$0xf]  ;;  %v12139_v23 = vld [vmem:[%s21297_s4 + $0x5b8] sm:$0xf0] }
 0xb40   : > { %22024 = vst [vmem:[#allocation146_spill] sm:$0xff] %v18914_v8  ;;  %6710 = vmatmul.bf16.gmra.mxu2 %v21979_v38  ;;  %6759 = vmatmul.bf16.gmra.mxu3 %v21980_v40 }
 0xb41   : > { %v6618_v5 = vpop.f32.mrf.mxu0  ;;  %v6667_v28 = vpop.f32.mrf.mxu1  ;;  %6879 = vmatpush.bf16.msrb.mxu2 %v12030_v29 }
 0xb42   : > { %v6668_v13 = vadd.f32 %v6667_v28, %v6618_v5  ;;  %v12158_v28 = vor.u32 %v13893_v33, %v12155_v49  ;;  %v13853_v49 = vld [vmem:[%s21297_s4 + $0x48c] sm:$0xf] }
 0xb43   : > { %v6050_v8 = vpop.f32.mrf.mxu2  ;;  %v6099_v55 = vpop.f32.mrf.mxu3 }
 0xb44   : > { %v18943_v10 = vadd.f32 %v6668_v13, %v18364_v51  ;;  %v6051_v5 = vadd.f32 %v6050_v8, %v22025_v63  ;;  %6813 = vmatmul.bf16.gmra.mxu0 %v21988_v27  ;;  %6862 = vmatmul.bf16.gmra.mxu1 %v21989_v18  ;;  %v12011_v51 = vld [vmem:[%s21297_s4 + $0x4b8] sm:$0xf0]  ;;  %v13889_v8 = vld [vmem:[%s21297_s4 + $0x5ac] sm:$0xf] }
 0xb45   : > { %6928 = vmatpush.bf16.msrb.mxu3 %v12158_v28  ;;  %v12014_v13 = vor.u32 %v13857_v46, %v12011_v51  ;;  %v11995_v63 = vld [vmem:[%s21297_s4 + $0x498] sm:$0xf0] }
 0xb46   : > { %v18948_v21 = vadd.f32 %v6099_v55, %v6051_v5  ;;  %v12142_v55 = vor.u32 %v13889_v8, %v12139_v23  ;;  %v13885_v5 = vld [vmem:[%s21297_s4 + $0x58c] sm:$0xf]  ;;  %v11998_v51 = vor.u32 %v13853_v49, %v11995_v63  ;;  %v12123_v8 = vld [vmem:[%s21297_s4 + $0x598] sm:$0xf0] }
 0xb47   : > { %6880 = vmatpush.bf16.msrb.mxu2 %v12014_v13  ;;  %v12126_v23 = vor.u32 %v13885_v5, %v12123_v8  ;;  %v13881_v49 = vld [vmem:[%s21297_s4 + $0x56c] sm:$0xf] }
 0xb48   : > { %22026 = vst [vmem:[#allocation106_spill] sm:$0xff] %v18948_v21  ;;  %v13849_v21 = vld [vmem:[%s21297_s4 + $0x46c] sm:$0xf] }
 0xb49   : > { %v18962_v33 = vpop.f32.mrf.mxu0  ;;  %v18964_v29 = vpop.f32.mrf.mxu1  ;;  %6929 = vmatpush.bf16.msrb.mxu3 %v12142_v55  ;;  %v11982_v63 = vor.u32 %v13849_v21, %v11979_v4  ;;  %v13845_v8 = vld [vmem:[%s21297_s4 + $0x44c] sm:$0xf]  ;;  %v11963_v4 = vld [vmem:[%s21297_s4 + $0x458] sm:$0xf0] }
 0xb4a   : > { %v13877_v21 = vld [vmem:[%s21297_s4 + $0x54c] sm:$0xf] }
 0xb4b   : > { %v6052_v28 = vpop.f32.mrf.mxu2  ;;  %v6101_v46 = vpop.f32.mrf.mxu3  ;;  %6881 = vmatpush.bf16.msrb.mxu2 %v11998_v51 }
 0xb4c   : > { %v6053_v13 = vadd.f32 %v6052_v28, %v18421_v2  ;;  %v12107_v2 = vld [vmem:[%s21297_s4 + $0x578] sm:$0xf0] }
 0xb4d   : > { %6930 = vmatpush.bf16.msrb.mxu3 %v12126_v23  ;;  %v12110_v5 = vor.u32 %v13881_v49, %v12107_v2  ;;  %v11966_v49 = vor.u32 %v13845_v8, %v11963_v4  ;;  %v22028_v2 = vld [vmem:[#allocation31_spill] sm:$0xff]  ;;  %v13841_v8 = vld [vmem:[%s21297_s4 + $0x42c] sm:$0xf] }
 0xb4e   : > { %v18979_v55 = vadd.f32 %v6101_v46, %v6053_v13  ;;  %v13873_v4 = vld [vmem:[%s21297_s4 + $0x52c] sm:$0xf] }
 0xb4f   : > { %6882 = vmatpush.bf16.msrb.mxu2 %v11982_v63  ;;  %v12091_v63 = vld [vmem:[%s21297_s4 + $0x558] sm:$0xf0] }
 0xb50   : > { %22027 = vst [vmem:[#allocation182_spill] sm:$0xff] %v18979_v55  ;;  %6715 = vmatmul.bf16.gmra.mxu2 %v21988_v27  ;;  %6764 = vmatmul.bf16.gmra.mxu3 %v21989_v18  ;;  %v12094_v55 = vor.u32 %v13877_v21, %v12091_v63  ;;  %v12075_v21 = vld [vmem:[%s21297_s4 + $0x538] sm:$0xf0]  ;;  %v13837_v63 = vld [vmem:[%s21297_s4 + $0x40c] sm:$0xf] }
 0xb51   : > { %v6623_v28 = vpop.f32.mrf.mxu0  ;;  %v6672_v46 = vpop.f32.mrf.mxu1  ;;  %6931 = vmatpush.bf16.msrb.mxu3 %v12110_v5 }
 0xb52   : > { %v6673_v51 = vadd.f32 %v6672_v46, %v6623_v28  ;;  %v22029_v28 = vld [vmem:[#allocation138_spill] sm:$0xff] }
 0xb53   : > { %v6055_v13 = vpop.f32.mrf.mxu2  ;;  %v6104_v23 = vpop.f32.mrf.mxu3  ;;  %6883 = vmatpush.bf16.msrb.mxu2 %v11966_v49 }
 0xb54   : > { %v19008_v5 = vadd.f32 %v6673_v51, %v22028_v2  ;;  %v6056_v46 = vadd.f32 %v6055_v13, %v22029_v28  ;;  %6818 = vmatmul.bf16.gmra.mxu0 %v21994_v22  ;;  %6867 = vmatmul.bf16.gmra.mxu1 %v21995_v24  ;;  %v11947_v51 = vld [vmem:[%s21297_s4 + $0x438] sm:$0xf0]  ;;  %v13869_v28 = vld [vmem:[%s21297_s4 + $0x50c] sm:$0xf] }
 0xb55   : > { %6932 = vmatpush.bf16.msrb.mxu3 %v12094_v55  ;;  %v11950_v13 = vor.u32 %v13841_v8, %v11947_v51  ;;  %v11931_v2 = vld [vmem:[%s21297_s4 + $0x418] sm:$0xf0] }
 0xb56   : > { %v19013_v58 = vadd.f32 %v6104_v23, %v6056_v46  ;;  %v12078_v23 = vor.u32 %v13873_v4, %v12075_v21  ;;  %v11934_v51 = vor.u32 %v13837_v63, %v11931_v2  ;;  %v12059_v4 = vld [vmem:[%s21297_s4 + $0x518] sm:$0xf0] }
 0xb57   : > { %6884 = vmatpush.bf16.msrb.mxu2 %v11950_v13  ;;  %v12062_v21 = vor.u32 %v13869_v28, %v12059_v4 }
 0xb58   : > { %22030 = vst [vmem:[#allocation107_spill] sm:$0xff] %v19013_v58 }
 0xb59   : > { %v19027_v49 = vpop.f32.mrf.mxu0  ;;  %v19029_v55 = vpop.f32.mrf.mxu1  ;;  %6933 = vmatpush.bf16.msrb.mxu3 %v12078_v23 }
 0xb5b   : > { %v6057_v46 = vpop.f32.mrf.mxu2  ;;  %v6106_v8 = vpop.f32.mrf.mxu3  ;;  %6885 = vmatpush.bf16.msrb.mxu2 %v11934_v51 }
 0xb5c   : > { %v6058_v13 = vadd.f32 %v6057_v46, %v18501_v45 }
 0xb5d   : > { %6934 = vmatpush.bf16.msrb.mxu3 %v12062_v21 }
 0xb5e   : > { %v19044_v23 = vadd.f32 %v6106_v8, %v6058_v13 }
 0xb60   : > { %22031 = vst [vmem:[#allocation183_spill] sm:$0xff] %v19044_v23  ;;  %6720 = vmatmul.bf16.gmra.mxu2 %v21994_v22  ;;  %6769 = vmatmul.bf16.gmra.mxu3 %v21995_v24 }
 0xb61   : > { %v6628_v58 = vpop.f32.mrf.mxu0  ;;  %v6677_v48 = vpop.f32.mrf.mxu1 }
 0xb62   : > { %v6678_v3 = vadd.f32 %v6677_v48, %v6628_v58 }
 0xb63   : > { %v6060_v50 = vpop.f32.mrf.mxu2  ;;  %v6109_v63 = vpop.f32.mrf.mxu3 }
 0xb64   : > { %v19049_v2 = vadd.f32 %v6678_v3, %v18506_v57  ;;  %v6061_v12 = vadd.f32 %v6060_v50, %v18508_v61  ;;  %6823 = vmatmul.bf16.gmra.mxu0 %v21999_v53  ;;  %6872 = vmatmul.bf16.gmra.mxu1 %v22000_v16 }
 0xb66   : > { %v19054_v45 = vadd.f32 %v6109_v63, %v6061_v12 }
 0xb68   : > { %22032 = vst [vmem:[#allocation143_spill] sm:$0xff] %v19054_v45  ;;  %v22034_v45 = vld [vmem:[#allocation97_spill] sm:$0xff] }
 0xb69   : > { %v19056_v28 = vpop.f32.mrf.mxu0  ;;  %v19058_v46 = vpop.f32.mrf.mxu1 }
 0xb6b   : > { %v6062_v8 = vpop.f32.mrf.mxu2  ;;  %v6111_v51 = vpop.f32.mrf.mxu3 }
 0xb6c   : > { %v6063_v48 = vadd.f32 %v6062_v8, %v18515_v20 }
 0xb6e   : > { %v19061_v58 = vadd.f32 %v6111_v51, %v6063_v48 }
 0xb70   : > { %22033 = vst [vmem:[#allocation144_spill] sm:$0xff] %v19061_v58  ;;  %6725 = vmatmul.bf16.gmra.mxu2 %v21999_v53  ;;  %6774 = vmatmul.bf16.gmra.mxu3 %v22000_v16 }
 0xb71   : > { %v6789_v61 = vpop.f32.mrf.mxu0  ;;  %v6838_v57 = vpop.f32.mrf.mxu1 }
 0xb72   : > { %v6839_v50 = vadd.f32 %v6838_v57, %v6789_v61  ;;  %v22035_v61 = vld [vmem:[#allocation177_spill] sm:$0xff] }
 0xb73   : > { %v6065_v3 = vpop.f32.mrf.mxu2  ;;  %v6114_v12 = vpop.f32.mrf.mxu3 }
 0xb74   : > { %v19066_v4 = vadd.f32 %v6839_v50, %v18520_v1  ;;  %v6066_v13 = vadd.f32 %v6065_v3, %v18522_v59 }
 0xb76   : > { %v19071_v20 = vadd.f32 %v6114_v12, %v6066_v13 }
 0xb79   : > { %v6791_v63 = vpop.f32.mrf.mxu0  ;;  %v6840_v8 = vpop.f32.mrf.mxu1 }
 0xb7a   : > { %v6841_v51 = vadd.f32 %v6840_v8, %v6791_v63 }
 0xb7b   : > { %v6067_v48 = vpop.f32.mrf.mxu2  ;;  %v6116_v58 = vpop.f32.mrf.mxu3 }
 0xb7c   : > { %v19074_v23 = vadd.f32 %v6841_v51, %v22034_v45  ;;  %v6068_v57 = vadd.f32 %v6067_v48, %v22035_v61 }
 0xb7e   : > { %v19079_v50 = vadd.f32 %v6116_v58, %v6068_v57 }
 0xb80   : > { %6886 = vmatmul.bf16.vlgmr.msrb.gmra.mxu2 %v17641_v32  ;;  %6935 = vmatmul.bf16.vlgmr.msrb.gmra.mxu3 %v21957_v19 }
 0xb81   : > { %v6794_v59 = vpop.f32.mrf.mxu0  ;;  %v6843_v3 = vpop.f32.mrf.mxu1 }
 0xb82   : > { %v6844_v12 = vadd.f32 %v6843_v3, %v6794_v59  ;;  %v22036_v3 = vld [vmem:[#allocation21_spill] sm:$0xff] }
 0xb83   : > { %v6691_v13 = vpop.f32.mrf.mxu2  ;;  %v6740_v63 = vpop.f32.mrf.mxu3 }
 0xb84   : > { %v19084_v8 = vadd.f32 %v6844_v12, %v18534_v0  ;;  %v6741_v45 = vadd.f32 %v6740_v63, %v6691_v13 }
 0xb86   : > { %v19089_v48 = vadd.f32 %v6741_v45, %v18539_v7 }
 0xb89   : > { %v6796_v58 = vpop.f32.mrf.mxu0  ;;  %v6845_v61 = vpop.f32.mrf.mxu1 }
 0xb8a   : > { %v6846_v32 = vadd.f32 %v6845_v61, %v6796_v58 }
 0xb8b   : > { %v6693_v57 = vpop.f32.mrf.mxu2  ;;  %v6742_v19 = vpop.f32.mrf.mxu3 }
 0xb8c   : > { %v19092_v1 = vadd.f32 %v6846_v32, %v18542_v15  ;;  %v6743_v59 = vadd.f32 %v6742_v19, %v6693_v57  ;;  %v22037_v57 = vld [vmem:[#allocation10_spill] sm:$0xff]  ;;  %v22040_v32 = vld [vmem:[#allocation99_spill] sm:$0xff] }
 0xb8e   : > { %v19097_v12 = vadd.f32 %v6743_v59, %v22036_v3 }
 0xb90   : > { %6891 = vmatmul.bf16.gmra.mxu2 %v21960_v41  ;;  %6940 = vmatmul.bf16.gmra.mxu3 %v21961_v37 }
 0xb91   : > { %v6799_v7 = vpop.f32.mrf.mxu0  ;;  %v6848_v13 = vpop.f32.mrf.mxu1 }
 0xb92   : > { %v6849_v63 = vadd.f32 %v6848_v13, %v6799_v7  ;;  %v22038_v13 = vld [vmem:[#allocation98_spill] sm:$0xff] }
 0xb93   : > { %v6696_v45 = vpop.f32.mrf.mxu2  ;;  %v6745_v58 = vpop.f32.mrf.mxu3 }
 0xb94   : > { %v19102_v61 = vadd.f32 %v6849_v63, %v18550_v14  ;;  %v6746_v15 = vadd.f32 %v6745_v58, %v6696_v45 }
 0xb96   : > { %v19107_v19 = vadd.f32 %v6746_v15, %v22037_v57 }
 0xb99   : > { %v6801_v59 = vpop.f32.mrf.mxu0  ;;  %v6850_v3 = vpop.f32.mrf.mxu1 }
 0xb9a   : > { %v6851_v41 = vadd.f32 %v6850_v3, %v6801_v59 }
 0xb9b   : > { %v6698_v0 = vpop.f32.mrf.mxu2  ;;  %v6747_v37 = vpop.f32.mrf.mxu3 }
 0xb9c   : > { %v19110_v51 = vadd.f32 %v6851_v41, %v18558_v11  ;;  %v6748_v7 = vadd.f32 %v6747_v37, %v6698_v0  ;;  %v22039_v41 = vld [vmem:[#allocation90_spill] sm:$0xff] }
 0xb9e   : > { %v19115_v63 = vadd.f32 %v6748_v7, %v22038_v13 }
 0xba0   : > { %6896 = vmatmul.bf16.gmra.mxu2 %v21964_v42  ;;  %6945 = vmatmul.bf16.gmra.mxu3 %v21965_v39 }
 0xba1   : > { %v6804_v45 = vpop.f32.mrf.mxu0  ;;  %v6853_v58 = vpop.f32.mrf.mxu1 }
 0xba2   : > { %v6854_v15 = vadd.f32 %v6853_v58, %v6804_v45  ;;  %v22041_v58 = vld [vmem:[#allocation178_spill] sm:$0xff] }
 0xba3   : > { %v6701_v57 = vpop.f32.mrf.mxu2  ;;  %v6750_v59 = vpop.f32.mrf.mxu3 }
 0xba4   : > { %v19120_v3 = vadd.f32 %v6854_v15, %v18566_v9  ;;  %v6751_v11 = vadd.f32 %v6750_v59, %v6701_v57 }
 0xba6   : > { %v19125_v37 = vadd.f32 %v6751_v11, %v22039_v41 }
 0xba9   : > { %v6806_v7 = vpop.f32.mrf.mxu0  ;;  %v6855_v13 = vpop.f32.mrf.mxu1 }
 0xbaa   : > { %v6856_v42 = vadd.f32 %v6855_v13, %v6806_v7  ;;  %v22042_v13 = vld [vmem:[#allocation32_spill] sm:$0xff] }
 0xbab   : > { %v6703_v14 = vpop.f32.mrf.mxu2  ;;  %v6752_v39 = vpop.f32.mrf.mxu3 }
 0xbac   : > { %v19128_v21 = vadd.f32 %v6856_v42, %v22040_v32  ;;  %v6753_v45 = vadd.f32 %v6752_v39, %v6703_v14  ;;  %v22043_v42 = vld [vmem:[#allocation33_spill] sm:$0xff] }
 0xbae   : > { %v19133_v15 = vadd.f32 %v6753_v45, %v22041_v58  ;;  %v6665_v45 = vadd.f32 %v18911_v6, %v18909_v60  ;;  %v22047_v6 = vld [vmem:[#allocation141_spill] sm:$0xff] }
 0xbb0   : > { %6901 = vmatmul.bf16.gmra.mxu2 %v21969_v17  ;;  %6950 = vmatmul.bf16.gmra.mxu3 %v21970_v36  ;;  %v22044_v17 = vmax.f32 %v18838_v43, %v19066_v4 }
 0xbb1   : > { %v6809_v57 = vpop.f32.mrf.mxu0  ;;  %v6858_v59 = vpop.f32.mrf.mxu1 }
 0xbb2   : > { %v6859_v11 = vadd.f32 %v6858_v59, %v6809_v57  ;;  %v19150_v57 = vld [vmem:[%s21299_s6] sm:$0x3] }
 0xbb3   : > { %v6706_v41 = vpop.f32.mrf.mxu2  ;;  %v6755_v7 = vpop.f32.mrf.mxu3  ;;  %v19155_v60 = vperm.slane %v19150_v57, 0 }
 0xbb4   : > { %v7010_v0 = vadd.f32 %v6859_v11, %v22042_v13  ;;  %v6756_v32 = vadd.f32 %v6755_v7, %v6706_v41  ;;  %v22046_v7 = vld [vmem:[#allocation34_spill] sm:$0xff] }
 0xbb6   : > { %v7056_v14 = vmax.f32 %v18902_v26, %v7010_v0  ;;  %v19140_v39 = vadd.f32 %v6756_v32, %v22043_v42  ;;  %v22045_v0 = vld [vmem:[#allocation94_spill] sm:$0xff] }
 0xbb7   : > { %v7012_v41 = vadd.f32 %v6665_v45, %v22045_v0  ;;  %v22049_v0 = vld [vmem:[#allocation35_spill] sm:$0xff] }
 0xbb8   : > { %v7072_v36 = vmax.f32 %v22044_v17, %v7056_v14  ;;  %v22048_v14 = vmax.f32 %v18846_v56, %v19074_v23  ;;  %v22050_v23 = vld [vmem:[#allocation142_spill] sm:$0xff] }
 0xbb9   : > { %v6811_v58 = vpop.f32.mrf.mxu0  ;;  %v6860_v9 = vpop.f32.mrf.mxu1 }
 0xbba   : > { %v6861_v59 = vadd.f32 %v6860_v9, %v6811_v58  ;;  %v7094_v9 = vadd.f32 %v19155_v60, %v7072_v36  ;;  %v6670_v36 = vadd.f32 %v18964_v29, %v18962_v33 }
 0xbbb   : > { %v6708_v11 = vpop.f32.mrf.mxu2  ;;  %v6757_v26 = vpop.f32.mrf.mxu3 }
 0xbbc   : > { %v7014_v13 = vadd.f32 %v6861_v59, %v22046_v7  ;;  %v6758_v32 = vadd.f32 %v6757_v26, %v6708_v11 }
 0xbbe   : > { %v7058_v43 = vmax.f32 %v7012_v41, %v7014_v13  ;;  %v19158_v4 = vadd.f32 %v6758_v32, %v22047_v6  ;;  %v7110_v13 = vmax.f32 %v7094_v9, 0.0 }
 0xbc0   : > { %v7074_v42 = vmax.f32 %v22048_v14, %v7058_v43  ;;  %6906 = vmatmul.bf16.gmra.mxu2 %v21979_v38  ;;  %6955 = vmatmul.bf16.gmra.mxu3 %v21980_v40  ;;  %v22051_v43 = vmax.f32 %v18854_v52, %v19084_v8 }
 0xbc1   : > { %v6814_v45 = vpop.f32.mrf.mxu0  ;;  %v6863_v17 = vpop.f32.mrf.mxu1 }
 0xbc2   : > { %v6864_v58 = vadd.f32 %v6863_v17, %v6814_v45  ;;  %v7096_v59 = vadd.f32 %v19155_v60, %v7074_v42 }
 0xbc3   : > { %v6711_v11 = vpop.f32.mrf.mxu2  ;;  %v6760_v26 = vpop.f32.mrf.mxu3 }
 0xbc4   : > { %v7018_v41 = vadd.f32 %v6864_v58, %v22049_v0  ;;  %v6761_v7 = vadd.f32 %v6760_v26, %v6711_v11  ;;  %v7112_v32 = vmax.f32 %v7096_v59, 0.0  ;;  %v22053_v26 = vmax.f32 %v18862_v62, %v19092_v1  ;;  %v22054_v1 = vld [vmem:[#allocation179_spill] sm:$0xff] }
 0xbc6   : > { %v7060_v56 = vmax.f32 %v18943_v10, %v7018_v41  ;;  %v19170_v38 = vadd.f32 %v6761_v7, %v22050_v23  ;;  %v19172_v40 = vpack.c.bf16 %v7112_v32, %v7110_v13  ;;  %v22052_v10 = vld [vmem:[#allocation29_spill] sm:$0xff] }
 0xbc7   : > { %v7020_v58 = vadd.f32 %v6670_v36, %v22052_v10  ;;  %v6675_v36 = vadd.f32 %v19029_v55, %v19027_v49 }
 0xbc8   : > { %v7076_v6 = vmax.f32 %v22051_v43, %v7060_v56  ;;  %v22055_v43 = vmax.f32 %v18870_v34, %v19102_v61 }
 0xbc9   : > { %v6816_v14 = vpop.f32.mrf.mxu0  ;;  %v6865_v42 = vpop.f32.mrf.mxu1 }
 0xbca   : > { %v6866_v45 = vadd.f32 %v6865_v42, %v6816_v14  ;;  %v7098_v52 = vadd.f32 %v19155_v60, %v7076_v6 }
 0xbcb   : > { %v19179_v17 = vpop.f32.mrf.mxu2  ;;  %v19181_v9 = vpop.f32.mrf.mxu3 }
 0xbcc   : > { %v7022_v59 = vadd.f32 %v6866_v45, %v18732_v44  ;;  %v7114_v56 = vmax.f32 %v7098_v52, 0.0 }
 0xbce   : > { %v7062_v11 = vmax.f32 %v7020_v58, %v7022_v59  ;;  %v22056_v58 = vld [vmem:[#allocation96_spill] sm:$0xff] }
 0xbd0   : > { %v7078_v33 = vmax.f32 %v22053_v26, %v7062_v11  ;;  %6911 = vmatmul.bf16.gmra.mxu2 %v21988_v27  ;;  %6960 = vmatmul.bf16.gmra.mxu3 %v21989_v18  ;;  %v22057_v26 = vmax.f32 %v18878_v35, %v19110_v51  ;;  %v22058_v51 = vld [vmem:[#allocation180_spill] sm:$0xff] }
 0xbd1   : > { %v6819_v29 = vpop.f32.mrf.mxu0  ;;  %v6868_v8 = vpop.f32.mrf.mxu1 }
 0xbd2   : > { %v6869_v0 = vadd.f32 %v6868_v8, %v6819_v29  ;;  %v7100_v41 = vadd.f32 %v19155_v60, %v7078_v33 }
 0xbd3   : > { %v6716_v7 = vpop.f32.mrf.mxu2  ;;  %v6765_v13 = vpop.f32.mrf.mxu3 }
 0xbd4   : > { %v7026_v44 = vadd.f32 %v6869_v0, %v18782_v25  ;;  %v6766_v32 = vadd.f32 %v6765_v13, %v6716_v7  ;;  %v7116_v23 = vmax.f32 %v7100_v41, 0.0  ;;  %v6680_v13 = vadd.f32 %v19058_v46, %v19056_v28 }
 0xbd5   : > { %v22062_v28 = vmax.f32 %v18894_v47, %v19128_v21 }
 0xbd6   : > { %v7064_v62 = vmax.f32 %v19008_v5, %v7026_v44  ;;  %v19195_v27 = vadd.f32 %v6766_v32, %v22054_v1  ;;  %v7128_v18 = vpack.c.bf16 %v7116_v23, %v7114_v56  ;;  %v7028_v5 = vadd.f32 %v6675_v36, %v22056_v58  ;;  %v22060_v36 = vld [vmem:[#allocation176_spill] sm:$0xff] }
 0xbd7   : > { %v22059_v44 = vmax.f32 %v18886_v30, %v19120_v3 }
 0xbd8   : > { %v7080_v6 = vmax.f32 %v22055_v43, %v7064_v62  ;;  %v22061_v43 = vld [vmem:[#allocation139_spill] sm:$0xff] }
 0xbd9   : > { %v6821_v14 = vpop.f32.mrf.mxu0  ;;  %v6870_v42 = vpop.f32.mrf.mxu1 }
 0xbda   : > { %v6871_v45 = vadd.f32 %v6870_v42, %v6821_v14  ;;  %v7102_v34 = vadd.f32 %v19155_v60, %v7080_v6 }
 0xbdb   : > { %v19202_v25 = vpop.f32.mrf.mxu2  ;;  %v19204_v10 = vpop.f32.mrf.mxu3 }
 0xbdc   : > { %v7030_v59 = vadd.f32 %v6871_v45, %v18814_v31  ;;  %v7118_v41 = vmax.f32 %v7102_v34, 0.0 }
 0xbde   : > { %v7066_v11 = vmax.f32 %v7028_v5, %v7030_v59 }
 0xbe0   : > { %v7082_v49 = vmax.f32 %v22057_v26, %v7066_v11  ;;  %6916 = vmatmul.bf16.gmra.mxu2 %v21994_v22  ;;  %6965 = vmatmul.bf16.gmra.mxu3 %v21995_v24  ;;  %v22063_v11 = vld [vmem:[#allocation103_spill] sm:$0xff] }
 0xbe1   : > { %v6824_v55 = vpop.f32.mrf.mxu0  ;;  %v6873_v61 = vpop.f32.mrf.mxu1 }
 0xbe2   : > { %v6874_v33 = vadd.f32 %v6873_v61, %v6824_v55  ;;  %v7104_v52 = vadd.f32 %v19155_v60, %v7082_v49 }
 0xbe3   : > { %v6721_v29 = vpop.f32.mrf.mxu2  ;;  %v6770_v8 = vpop.f32.mrf.mxu3 }
 0xbe4   : > { %v7034_v31 = vadd.f32 %v6874_v33, %v18822_v54  ;;  %v6771_v0 = vadd.f32 %v6770_v8, %v6721_v29  ;;  %v7120_v7 = vmax.f32 %v7104_v52, 0.0  ;;  %v22065_v8 = vld [vmem:[#allocation181_spill] sm:$0xff] }
 0xbe6   : > { %v7068_v35 = vmax.f32 %v19049_v2, %v7034_v31  ;;  %v19218_v22 = vadd.f32 %v6771_v0, %v22058_v51  ;;  %v7130_v24 = vpack.c.bf16 %v7120_v7, %v7118_v41  ;;  %v7036_v2 = vadd.f32 %v6680_v13, %v22060_v36 }
 0xbe8   : > { %v7084_v32 = vmax.f32 %v22059_v44, %v7068_v35 }
 0xbe9   : > { %v6826_v56 = vpop.f32.mrf.mxu0  ;;  %v6875_v23 = vpop.f32.mrf.mxu1 }
 0xbea   : > { %v6876_v62 = vadd.f32 %v6875_v23, %v6826_v56  ;;  %v7106_v42 = vadd.f32 %v19155_v60, %v7084_v32  ;;  %v22067_v32 = vld [vmem:[#allocation37_spill] sm:$0xff] }
 0xbeb   : > { %v19225_v54 = vpop.f32.mrf.mxu2  ;;  %v19227_v1 = vpop.f32.mrf.mxu3 }
 0xbec   : > { %v7038_v6 = vadd.f32 %v6876_v62, %v22061_v43  ;;  %v7122_v58 = vmax.f32 %v7106_v42, 0.0 }
 0xbee   : > { %v7070_v14 = vmax.f32 %v7036_v2, %v7038_v6  ;;  %v22068_v2 = vld [vmem:[#allocation38_spill] sm:$0xff] }
 0xbf0   : > { %v7086_v46 = vmax.f32 %v22062_v28, %v7070_v14  ;;  %6921 = vmatmul.bf16.gmra.mxu2 %v21999_v53  ;;  %6970 = vmatmul.bf16.gmra.mxu3 %v22000_v16 }
 0xbf2   : > { %v7108_v30 = vadd.f32 %v19155_v60, %v7086_v46  ;;  %v22064_v60 = vld [vmem:[#allocation104_spill] sm:$0xff] }
 0xbf3   : > { %v6726_v3 = vpop.f32.mrf.mxu2  ;;  %v6775_v45 = vpop.f32.mrf.mxu3 }
 0xbf4   : > { %v6776_v5 = vadd.f32 %v6775_v45, %v6726_v3  ;;  %v7124_v59 = vmax.f32 %v7108_v30, 0.0  ;;  %v22070_v45 = vld [vmem:[#allocation39_spill] sm:$0xff] }
 0xbf6   : > { %v19239_v26 = vadd.f32 %v6776_v5, %v22063_v11  ;;  %v7132_v49 = vpack.c.bf16 %v7124_v59, %v7122_v58 }
 0xbf8   : > { %7259 = vmatpush.bf16.msra.mxu0 %v7132_v49  ;;  %v22071_v49 = vld [vmem:[#allocation146_spill] sm:$0xff] }
 0xbfb   : > { %v19241_v34 = vpop.f32.mrf.mxu2  ;;  %v19243_v47 = vpop.f32.mrf.mxu3 }
 0xbfc   : > { %7260 = vmatpush.bf16.msra.mxu0 %v7130_v24 }
 0xc00   : > { %7261 = vmatpush.bf16.msra.mxu0 %v7128_v18  ;;  %v22066_v18 = vld [vmem:[#allocation36_spill] sm:$0xff] }
 0xc03   : > { %v6887_v53 = vpop.f32.mrf.mxu2  ;;  %v6936_v16 = vpop.f32.mrf.mxu3 }
 0xc04   : > { %v6937_v21 = vadd.f32 %v6936_v16, %v6887_v53  ;;  %7262 = vmatpush.bf16.msra.mxu0 %v19172_v40 }
 0xc06   : > { %v6979_v55 = vadd.f32 %v6937_v21, %v22064_v60 }
 0xc08   : > { %v7041_v61 = vmax.f32 %v19089_v48, %v6979_v55 }
 0xc0b   : > { %v6889_v33 = vpop.f32.mrf.mxu2  ;;  %v6938_v52 = vpop.f32.mrf.mxu3 }
 0xc0c   : > { %v6939_v29 = vadd.f32 %v6938_v52, %v6889_v33  ;;  %v22072_v33 = vld [vmem:[#allocation106_spill] sm:$0xff] }
 0xc0e   : > { %v6983_v31 = vadd.f32 %v6939_v29, %v22065_v8  ;;  %v6763_v8 = vadd.f32 %v19181_v9, %v19179_v17  ;;  %v22075_v9 = vld [vmem:[#allocation107_spill] sm:$0xff] }
 0xc10   : > { %v7043_v0 = vmax.f32 %v19097_v12, %v6983_v31 }
 0xc13   : > { %v6892_v41 = vpop.f32.mrf.mxu2  ;;  %v6941_v7 = vpop.f32.mrf.mxu3 }
 0xc14   : > { %v6942_v35 = vadd.f32 %v6941_v7, %v6892_v41 }
 0xc16   : > { %v6987_v51 = vadd.f32 %v6942_v35, %v22066_v18  ;;  %v22073_v18 = vld [vmem:[#allocation101_spill] sm:$0xff] }
 0xc18   : > { %v7045_v24 = vmax.f32 %v19107_v19, %v6987_v51  ;;  %v22069_v19 = vld [vmem:[#allocation145_spill] sm:$0xff]  ;;  %v7013_v51 = vadd.f32 %v6763_v8, %v22073_v18  ;;  %v6773_v8 = vadd.f32 %v19227_v1, %v19225_v54 }
 0xc1b   : > { %v6894_v13 = vpop.f32.mrf.mxu2  ;;  %v6943_v40 = vpop.f32.mrf.mxu3 }
 0xc1c   : > { %v6944_v44 = vadd.f32 %v6943_v40, %v6894_v13  ;;  %v22074_v13 = vld [vmem:[#allocation182_spill] sm:$0xff] }
 0xc1e   : > { %v6991_v56 = vadd.f32 %v6944_v44, %v22067_v32  ;;  %v19281_v44 = vperm.slane %v19150_v57, 1  ;;  %v6768_v57 = vadd.f32 %v19204_v10, %v19202_v25 }
 0xc20   : > { %v7047_v48 = vmax.f32 %v19115_v63, %v6991_v56 }
 0xc23   : > { %v6897_v23 = vpop.f32.mrf.mxu2  ;;  %v6946_v62 = vpop.f32.mrf.mxu3 }
 0xc24   : > { %v6947_v36 = vadd.f32 %v6946_v62, %v6897_v23 }
 0xc26   : > { %v19255_v43 = vadd.f32 %v6947_v36, %v22068_v2 }
 0xc28   : > { %v7049_v12 = vmax.f32 %v19125_v37, %v19255_v43 }
 0xc2b   : > { %v6899_v6 = vpop.f32.mrf.mxu2  ;;  %v6948_v14 = vpop.f32.mrf.mxu3 }
 0xc2c   : > { %v6949_v42 = vadd.f32 %v6948_v14, %v6899_v6 }
 0xc2e   : > { %v19260_v28 = vadd.f32 %v6949_v42, %v22069_v19 }
 0xc30   : > { %v7051_v46 = vmax.f32 %v19133_v15, %v19260_v28 }
 0xc33   : > { %v6902_v30 = vpop.f32.mrf.mxu2  ;;  %v6951_v63 = vpop.f32.mrf.mxu3 }
 0xc34   : > { %v6952_v3 = vadd.f32 %v6951_v63, %v6902_v30  ;;  %v22076_v63 = vld [vmem:[#allocation102_spill] sm:$0xff] }
 0xc36   : > { %v19265_v58 = vadd.f32 %v6952_v3, %v22070_v45  ;;  %v7021_v3 = vadd.f32 %v6768_v57, %v22076_v63  ;;  %v22077_v45 = vld [vmem:[#allocation183_spill] sm:$0xff]  ;;  %v13908_v63 = vld [vmem:[%s21301_s8 + $0x40] sm:$0xff] }
 0xc38   : > { %v7053_v5 = vmax.f32 %v19140_v39, %v19265_v58 }
 0xc3b   : > { %v6904_v59 = vpop.f32.mrf.mxu2  ;;  %v6953_v37 = vpop.f32.mrf.mxu3 }
 0xc3c   : > { %v6954_v11 = vadd.f32 %v6953_v37, %v6904_v59 }
 0xc3e   : > { %v19270_v53 = vadd.f32 %v6954_v11, %v22071_v49 }
 0xc40   : > { %v7055_v16 = vmax.f32 %v19158_v4, %v19270_v53  ;;  %v13904_v4 = vld [vmem:[%s21301_s8 + $0x20] sm:$0xff]  ;;  %v13905_v53 = vld [vmem:[%s21301_s8 + $0x28] sm:$0xff] }
 0xc43   : > { %v6907_v21 = vpop.f32.mrf.mxu2  ;;  %v6956_v60 = vpop.f32.mrf.mxu3 }
 0xc44   : > { %v6957_v55 = vadd.f32 %v6956_v60, %v6907_v21 }
 0xc46   : > { %v7011_v52 = vadd.f32 %v6957_v55, %v22072_v33  ;;  %v22078_v33 = vld [vmem:[#allocation143_spill] sm:$0xff] }
 0xc48   : > { %v7057_v29 = vmax.f32 %v19170_v38, %v7011_v52 }
 0xc4a   : > { %v7073_v31 = vmax.f32 %v7041_v61, %v7057_v29 }
 0xc4b   : > { %v6909_v41 = vpop.f32.mrf.mxu2  ;;  %v6958_v7 = vpop.f32.mrf.mxu3 }
 0xc4c   : > { %v6959_v35 = vadd.f32 %v6958_v7, %v6909_v41  ;;  %v7095_v23 = vadd.f32 %v19281_v44, %v7073_v31 }
 0xc4e   : > { %v7015_v40 = vadd.f32 %v6959_v35, %v22074_v13  ;;  %v7111_v2 = vmax.f32 %v7095_v23, 0.0  ;;  %v22079_v35 = vld [vmem:[#allocation140_spill] sm:$0xff] }
 0xc4f   : > { %v7029_v18 = vadd.f32 %v6773_v8, %v22079_v35  ;;  %v12561_v8 = vld [vmem:[%s21300_s7 + $0x3e8] sm:$0xf] }
 0xc50   : > { %v7059_v32 = vmax.f32 %v7013_v51, %v7015_v40  ;;  %v22080_v51 = vld [vmem:[#allocation144_spill] sm:$0xff] }
 0xc51   : > { %v13900_v40 = vld [vmem:[%s21301_s8] sm:$0xff] }
 0xc52   : > { %v7075_v56 = vmax.f32 %v7043_v0, %v7059_v32  ;;  %12223 = vmatmul.msk.bf16.vlgmr.msra.gmra.mxu0 %vm7218_vm1, %v13900_v40 }
 0xc53   : > { %v6912_v62 = vpop.f32.mrf.mxu2  ;;  %v6961_v38 = vpop.f32.mrf.mxu3 }
 0xc54   : > { %v6962_v36 = vadd.f32 %v6961_v38, %v6912_v62  ;;  %v7097_v17 = vadd.f32 %v19281_v44, %v7075_v56 }
 0xc56   : > { %v7019_v61 = vadd.f32 %v6962_v36, %v22075_v9  ;;  %v7113_v43 = vmax.f32 %v7097_v17, 0.0 }
 0xc58   : > { %v7061_v6 = vmax.f32 %v19195_v27, %v7019_v61  ;;  %v7127_v14 = vpack.c.bf16 %v7113_v43, %v7111_v2  ;;  %v6778_v61 = vadd.f32 %v19243_v47, %v19241_v34  ;;  %v13901_v43 = vld [vmem:[%s21301_s8 + $0x8] sm:$0xff] }
 0xc5a   : > { %v7077_v42 = vmax.f32 %v7045_v24, %v7061_v6 }
 0xc5b   : > { %v6914_v19 = vpop.f32.mrf.mxu2  ;;  %v6963_v0 = vpop.f32.mrf.mxu3 }
 0xc5c   : > { %v6964_v30 = vadd.f32 %v6963_v0, %v6914_v19  ;;  %v7099_v49 = vadd.f32 %v19281_v44, %v7077_v42  ;;  %v13902_v19 = vld [vmem:[%s21301_s8 + $0x10] sm:$0xff] }
 0xc5e   : > { %v7023_v59 = vadd.f32 %v6964_v30, %v22077_v45  ;;  %v7115_v25 = vmax.f32 %v7099_v49, 0.0  ;;  %v13909_v45 = vld [vmem:[%s21301_s8 + $0x48] sm:$0xff] }
 0xc60   : > { %v7063_v37 = vmax.f32 %v7021_v3, %v7023_v59 }
 0xc62   : > { %v7079_v11 = vmax.f32 %v7047_v48, %v7063_v37  ;;  %12224 = vmatmul.msk.bf16.gmra.mxu0 %vm7218_vm1, %v13901_v43 }
 0xc63   : > { %v6917_v21 = vpop.f32.mrf.mxu2  ;;  %v6966_v60 = vpop.f32.mrf.mxu3 }
 0xc64   : > { %v6967_v55 = vadd.f32 %v6966_v60, %v6917_v21  ;;  %v7101_v27 = vadd.f32 %v19281_v44, %v7079_v11  ;;  %v19382_v60 = vld [vmem:[%s21301_s8 + $0x50] sm:$0xff] }
 0xc66   : > { %v7027_v52 = vadd.f32 %v6967_v55, %v22078_v33  ;;  %v7117_v10 = vmax.f32 %v7101_v27, 0.0  ;;  %v12425_v55 = vld [vmem:[%s21300_s7 + $0x2e0] sm:$0xf]  ;;  %v14006_v27 = vld [vmem:[%s21300_s7 + $0x2ec] sm:$0xf0] }
 0xc67   : > { %v12426_v33 = vor.u32 %v14006_v27, %v12425_v55  ;;  %v12489_v55 = vld [vmem:[%s21300_s7 + $0x360] sm:$0xf]  ;;  %v14022_v27 = vld [vmem:[%s21300_s7 + $0x36c] sm:$0xf0] }
 0xc68   : > { %v7065_v24 = vmax.f32 %v19218_v22, %v7027_v52  ;;  %v7129_v29 = vpack.c.bf16 %v7117_v10, %v7115_v25  ;;  %v12553_v52 = vld [vmem:[%s21300_s7 + $0x3e0] sm:$0xf]  ;;  %v14038_v25 = vld [vmem:[%s21300_s7 + $0x3ec] sm:$0xf0]  ;;  %v12433_v10 = vld [vmem:[%s21300_s7 + $0x2e8] sm:$0xf] }
 0xc69   : > { %7906 = vmatpush.bf16.msra.mxu2 %v12426_v33  ;;  %v12369_v33 = vld [vmem:[%s21300_s7 + $0x268] sm:$0xf] }
 0xc6a   : > { %v7081_v31 = vmax.f32 %v7049_v12, %v7065_v24  ;;  %v12554_v24 = vor.u32 %v14038_v25, %v12553_v52  ;;  %v12490_v52 = vor.u32 %v14022_v27, %v12489_v55  ;;  %v13991_v25 = vld [vmem:[%s21300_s7 + $0x274] sm:$0xf0] }
 0xc6b   : > { %v6919_v41 = vpop.f32.mrf.mxu2  ;;  %v6968_v48 = vpop.f32.mrf.mxu3 }
 0xc6c   : > { %v6969_v7 = vadd.f32 %v6968_v48, %v6919_v41  ;;  %v7103_v54 = vadd.f32 %v19281_v44, %v7081_v31  ;;  %v14039_v31 = vld [vmem:[%s21300_s7 + $0x3f4] sm:$0xf0]  ;;  %7935 = vmatpush.bf16.msra.mxu3 %v12554_v24 }
 0xc6d   : > { %v14023_v24 = vld [vmem:[%s21300_s7 + $0x374] sm:$0xf0] }
 0xc6e   : > { %v7031_v13 = vadd.f32 %v6969_v7, %v22080_v51  ;;  %v7119_v38 = vmax.f32 %v7103_v54, 0.0  ;;  %v12562_v7 = vor.u32 %v14039_v31, %v12561_v8  ;;  %v14002_v51 = vld [vmem:[%s21300_s7 + $0x2cc] sm:$0xf0]  ;;  %v12417_v54 = vld [vmem:[%s21300_s7 + $0x2c8] sm:$0xf]  ;;  %v12370_v8 = vor.u32 %v13991_v25, %v12369_v33 }
 0xc70   : > { %v7067_v32 = vmax.f32 %v7029_v18, %v7031_v13  ;;  %v12409_v18 = vld [vmem:[%s21300_s7 + $0x2c0] sm:$0xf] }
 0xc71   : > { %v12537_v13 = vld [vmem:[%s21300_s7 + $0x3c0] sm:$0xf] }
 0xc72   : > { %v7083_v22 = vmax.f32 %v7051_v46, %v7067_v32  ;;  %12225 = vmatmul.msk.bf16.gmra.mxu0 %vm7218_vm1, %v13902_v19  ;;  %v12410_v32 = vor.u32 %v14002_v51, %v12409_v18  ;;  %v12473_v18 = vld [vmem:[%s21300_s7 + $0x340] sm:$0xf] }
 0xc73   : > { %v6922_v1 = vpop.f32.mrf.mxu2  ;;  %v6971_v12 = vpop.f32.mrf.mxu3 }
 0xc74   : > { %v6972_v56 = vadd.f32 %v6971_v12, %v6922_v1  ;;  %v7105_v23 = vadd.f32 %v19281_v44, %v7083_v22  ;;  %v14034_v22 = vld [vmem:[%s21300_s7 + $0x3cc] sm:$0xf0]  ;;  %v14003_v1 = vld [vmem:[%s21300_s7 + $0x2d4] sm:$0xf0]  ;;  %7907 = vmatpush.bf16.msra.mxu2 %v12410_v32 }
 0xc75   : > { %v12538_v12 = vor.u32 %v14034_v22, %v12537_v13  ;;  %v12353_v13 = vld [vmem:[%s21300_s7 + $0x248] sm:$0xf]  ;;  %v13987_v32 = vld [vmem:[%s21300_s7 + $0x254] sm:$0xf0] }
 0xc76   : > { %v7035_v62 = vadd.f32 %v6972_v56, %v19071_v20  ;;  %v7121_v36 = vmax.f32 %v7105_v23, 0.0  ;;  %v22081_v20 = vld [vmem:[#allocation95_spill] sm:$0xff]  ;;  %v12418_v56 = vor.u32 %v14003_v1, %v12417_v54  ;;  %v12545_v23 = vld [vmem:[%s21300_s7 + $0x3c8] sm:$0xf]  ;;  %v12354_v54 = vor.u32 %v13987_v32, %v12353_v13  ;;  %v12681_v13 = vld [vmem:[%s21300_s7 + $0xe0] sm:$0xf] }
 0xc77   : > { %v7037_v6 = vadd.f32 %v6778_v61, %v22081_v20  ;;  %7936 = vmatpush.bf16.msra.mxu3 %v12538_v12  ;;  %v12529_v20 = vld [vmem:[%s21300_s7 + $0x3a8] sm:$0xf]  ;;  %v14019_v12 = vld [vmem:[%s21300_s7 + $0x354] sm:$0xf0]  ;;  %v13942_v32 = vld [vmem:[%s21300_s7 + $0xec] sm:$0xf0] }
 0xc78   : > { %v7069_v17 = vmax.f32 %v19239_v26, %v7035_v62  ;;  %v7131_v9 = vpack.c.bf16 %v7121_v36, %v7119_v38  ;;  %v14035_v62 = vld [vmem:[%s21300_s7 + $0x3d4] sm:$0xf0]  ;;  %v12393_v36 = vld [vmem:[%s21300_s7 + $0x2a0] sm:$0xf]  ;;  %v12481_v1 = vld [vmem:[%s21300_s7 + $0x348] sm:$0xf] }
 0xc79   : > { %v12546_v38 = vor.u32 %v14035_v62, %v12545_v23  ;;  %v12329_v23 = vld [vmem:[%s21300_s7 + $0x220] sm:$0xf] }
 0xc7a   : > { %v7085_v15 = vmax.f32 %v7053_v5, %v7069_v17  ;;  %v13998_v17 = vld [vmem:[%s21300_s7 + $0x2ac] sm:$0xf0]  ;;  %v12457_v62 = vld [vmem:[%s21300_s7 + $0x320] sm:$0xf] }
 0xc7b   : > { %v6924_v28 = vpop.f32.mrf.mxu2  ;;  %v6973_v46 = vpop.f32.mrf.mxu3  ;;  %v12394_v61 = vor.u32 %v13998_v17, %v12393_v36  ;;  %v14014_v17 = vld [vmem:[%s21300_s7 + $0x32c] sm:$0xf0] }
 0xc7c   : > { %v6974_v2 = vadd.f32 %v6973_v46, %v6924_v28  ;;  %v7107_v34 = vadd.f32 %v19281_v44, %v7085_v15  ;;  %v14030_v15 = vld [vmem:[%s21300_s7 + $0x3ac] sm:$0xf0]  ;;  %v12401_v28 = vld [vmem:[%s21300_s7 + $0x2a8] sm:$0xf]  ;;  %v13999_v46 = vld [vmem:[%s21300_s7 + $0x2b4] sm:$0xf0] }
 0xc7d   : > { %7908 = vmatpush.bf16.msra.mxu2 %v12394_v61  ;;  %v13983_v61 = vld [vmem:[%s21300_s7 + $0x234] sm:$0xf0] }
 0xc7e   : > { %v7039_v57 = vadd.f32 %v6974_v2, %v19079_v50  ;;  %v7123_v58 = vmax.f32 %v7107_v34, 0.0  ;;  %v13903_v50 = vld [vmem:[%s21301_s8 + $0x18] sm:$0xff]  ;;  %v12377_v34 = vld [vmem:[%s21300_s7 + $0x280] sm:$0xf] }
 0xc80   : > { %v7071_v26 = vmax.f32 %v7037_v6, %v7039_v57  ;;  %v14031_v6 = vld [vmem:[%s21300_s7 + $0x3b4] sm:$0xf0] }
 0xc82   : > { %v7087_v39 = vmax.f32 %v7055_v16, %v7071_v26  ;;  %12226 = vmatmul.msk.bf16.gmra.mxu0 %vm7218_vm1, %v13903_v50  ;;  %v13906_v16 = vld [vmem:[%s21301_s8 + $0x30] sm:$0xff]  ;;  %v12530_v26 = vor.u32 %v14031_v6, %v12529_v20  ;;  %v12313_v6 = vld [vmem:[%s21300_s7 + $0x200] sm:$0xf] }
 0xc84   : > { %v7109_v47 = vadd.f32 %v19281_v44, %v7087_v39  ;;  %v13907_v44 = vld [vmem:[%s21301_s8 + $0x38] sm:$0xff]  ;;  %v13994_v39 = vld [vmem:[%s21300_s7 + $0x28c] sm:$0xf0] }
 0xc86   : > { %v7125_v5 = vmax.f32 %v7109_v47, 0.0  ;;  %v12505_v47 = vld [vmem:[%s21300_s7 + $0x380] sm:$0xf] }
 0xc88   : > { %v7133_v42 = vpack.c.bf16 %v7125_v5, %v7123_v58  ;;  %v12378_v58 = vor.u32 %v13994_v39, %v12377_v34  ;;  %v14026_v5 = vld [vmem:[%s21300_s7 + $0x38c] sm:$0xf0]  ;;  %v12441_v34 = vld [vmem:[%s21300_s7 + $0x300] sm:$0xf] }
 0xc8a   : > { %7328 = vmatpush.bf16.msra.mxu1 %v7133_v42  ;;  %v12385_v42 = vld [vmem:[%s21300_s7 + $0x288] sm:$0xf]  ;;  %7909 = vmatpush.bf16.msra.mxu2 %v12378_v58 }
 0xc8b   : > { %v12321_v58 = vld [vmem:[%s21300_s7 + $0x208] sm:$0xf] }
 0xc8e   : > { %7329 = vmatpush.bf16.msra.mxu1 %v7131_v9  ;;  %v12521_v9 = vld [vmem:[%s21300_s7 + $0x3a0] sm:$0xf] }
 0xc8f   : > { %v12522_v2 = vor.u32 %v14030_v15, %v12521_v9  ;;  %v12337_v9 = vld [vmem:[%s21300_s7 + $0x228] sm:$0xf]  ;;  %v12458_v15 = vor.u32 %v14014_v17, %v12457_v62  ;;  %v12411_v62 = vld [vmem:[%s21300_s7 + $0x2d0] sm:$0xf0] }
 0xc90   : > { %v12539_v17 = vld [vmem:[%s21300_s7 + $0x3d0] sm:$0xf0] }
 0xc91   : > { %7937 = vmatpush.bf16.msra.mxu3 %v12522_v2  ;;  %v14015_v2 = vld [vmem:[%s21300_s7 + $0x334] sm:$0xf0] }
 0xc92   : > { %7330 = vmatpush.bf16.msra.mxu1 %v7129_v29  ;;  %12227 = vmatmul.msk.bf16.gmra.mxu0 %vm7218_vm1, %v13904_v4  ;;  %v14007_v29 = vld [vmem:[%s21300_s7 + $0x2f4] sm:$0xf0] }
 0xc93   : > { %v12434_v48 = vor.u32 %v14007_v29, %v12433_v10  ;;  %v12497_v10 = vld [vmem:[%s21300_s7 + $0x368] sm:$0xf] }
 0xc94   : > { %v12498_v31 = vor.u32 %v14023_v24, %v12497_v10 }
 0xc95   : > { %8022 = vmatpush.bf16.msrb.mxu0 %v12434_v48  ;;  %v12345_v48 = vld [vmem:[%s21300_s7 + $0x240] sm:$0xf] }
 0xc96   : > { %7331 = vmatpush.bf16.msra.mxu1 %v7127_v14 }
 0xc99   : > { %12235 = vmatmul.msk.bf16.vlgmr.msra.gmra.mxu1 %vm7218_vm1, %v13900_v40  ;;  %8023 = vmatpush.bf16.msrb.mxu0 %v12418_v56  ;;  %v12482_v56 = vor.u32 %v14019_v12, %v12481_v1  ;;  %v12682_v1 = vor.u32 %v13942_v32, %v12681_v13  ;;  %v12809_v12 = vld [vmem:[%s21300_s7 + $0x1e0] sm:$0xf]  ;;  %v13962_v32 = vld [vmem:[%s21300_s7 + $0x18c] sm:$0xf0] }
 0xc9a   : > { %8051 = vmatpush.bf16.msrb.mxu1 %v12562_v7  ;;  %v13986_v7 = vld [vmem:[%s21300_s7 + $0x24c] sm:$0xf0]  ;;  %v12761_v13 = vld [vmem:[%s21300_s7 + $0x180] sm:$0xf] }
 0xc9b   : > { %v12346_v51 = vor.u32 %v13986_v7, %v12345_v48  ;;  %v12427_v7 = vld [vmem:[%s21300_s7 + $0x2f0] sm:$0xf0] }
 0xc9e   : > { %8052 = vmatpush.bf16.msrb.mxu1 %v12546_v38 }
 0xca2   : > { %12228 = vmatmul.msk.bf16.gmra.mxu0 %vm7218_vm1, %v13905_v53  ;;  %8053 = vmatpush.bf16.msrb.mxu1 %v12530_v26  ;;  %v13978_v26 = vld [vmem:[%s21300_s7 + $0x20c] sm:$0xf0] }
 0xca3   : > { %v12314_v39 = vor.u32 %v13978_v26, %v12313_v6  ;;  %v13996_v26 = vld [vmem:[%s21300_s7 + $0x2a4] sm:$0xf] }
 0xca9   : > { %12236 = vmatmul.msk.bf16.gmra.mxu1 %vm7218_vm1, %v13901_v43  ;;  %v12402_v43 = vor.u32 %v13999_v46, %v12401_v28  ;;  %v12338_v28 = vor.u32 %v13983_v61, %v12337_v9  ;;  %v12465_v46 = vld [vmem:[%s21300_s7 + $0x328] sm:$0xf]  ;;  %v12665_v9 = vld [vmem:[%s21300_s7 + $0xc0] sm:$0xf]  ;;  %v13938_v61 = vld [vmem:[%s21300_s7 + $0xcc] sm:$0xf0] }
 0xcaa   : > { %v12466_v20 = vor.u32 %v14015_v2, %v12465_v46  ;;  %v12793_v46 = vld [vmem:[%s21300_s7 + $0x1c0] sm:$0xf]  ;;  %v13970_v2 = vld [vmem:[%s21300_s7 + $0x1cc] sm:$0xf0] }
 0xcab   : > { %8024 = vmatpush.bf16.msrb.mxu0 %v12402_v43 }
 0xcb2   : > { %12229 = vmatmul.msk.bf16.gmra.mxu0 %vm7218_vm1, %v13906_v16 }
 0xcb9   : > { %12237 = vmatmul.msk.bf16.gmra.mxu1 %vm7218_vm1, %v13902_v19  ;;  %v13995_v19 = vld [vmem:[%s21300_s7 + $0x294] sm:$0xf0] }
 0xcc2   : > { %12230 = vmatmul.msk.bf16.gmra.mxu0 %vm7218_vm1, %v13907_v44 }
 0xcc9   : > { %12238 = vmatmul.msk.bf16.gmra.mxu1 %vm7218_vm1, %v13903_v50  ;;  %v12506_v50 = vor.u32 %v14026_v5, %v12505_v47  ;;  %v14010_v47 = vld [vmem:[%s21300_s7 + $0x30c] sm:$0xf0]  ;;  %v13979_v5 = vld [vmem:[%s21300_s7 + $0x214] sm:$0xf0] }
 0xccb   : > { %7938 = vmatpush.bf16.msra.mxu3 %v12506_v50  ;;  %v12449_v50 = vld [vmem:[%s21300_s7 + $0x308] sm:$0xf] }
 0xccf   : > { %v7264_v14 = vpop.f32.mrf.mxu0  ;;  %7939 = vmatpush.bf16.msra.mxu3 %v12490_v52 }
 0xcd2   : > { %12231 = vmatmul.msk.bf16.gmra.mxu0 %vm7218_vm1, %v13908_v63 }
 0xcd7   : > { %v19356_v0 = vpop.f32.mrf.mxu0 }
 0xcd9   : > { %12239 = vmatmul.msk.bf16.gmra.mxu1 %vm7218_vm1, %v13904_v4  ;;  %v12386_v4 = vor.u32 %v13995_v19, %v12385_v42  ;;  %v12442_v42 = vor.u32 %v14010_v47, %v12441_v34  ;;  %v12322_v19 = vor.u32 %v13979_v5, %v12321_v58  ;;  %v12395_v34 = vld [vmem:[%s21300_s7 + $0x2b0] sm:$0xf0]  ;;  %v12649_v5 = vld [vmem:[%s21300_s7 + $0xa0] sm:$0xf] }
 0xcda   : > { %v12398_v47 = vor.u32 %v13996_v26, %v12395_v34  ;;  %v12523_v58 = vld [vmem:[%s21300_s7 + $0x3b0] sm:$0xf0] }
 0xcdb   : > { %8025 = vmatpush.bf16.msrb.mxu0 %v12386_v4  ;;  %v14011_v4 = vld [vmem:[%s21300_s7 + $0x314] sm:$0xf0]  ;;  %v12475_v26 = vld [vmem:[%s21300_s7 + $0x350] sm:$0xf0] }
 0xcdf   : > { %v7269_v30 = vpop.f32.mrf.mxu0  ;;  %8026 = vmatpush.bf16.msrb.mxu0 %v12370_v8 }
 0xce2   : > { %12232 = vmatmul.msk.bf16.gmra.mxu0 %vm7218_vm1, %v13909_v45 }
 0xce3   : > { %8027 = vmatpush.bf16.msrb.mxu0 %v12354_v54 }
 0xce7   : > { %v19364_v3 = vpop.f32.mrf.mxu0  ;;  %8028 = vmatpush.bf16.msrb.mxu0 %v12338_v28  ;;  %v12666_v28 = vor.u32 %v13938_v61, %v12665_v9 }
 0xce9   : > { %12240 = vmatmul.msk.bf16.gmra.mxu1 %vm7218_vm1, %v13905_v53  ;;  %v12513_v53 = vld [vmem:[%s21300_s7 + $0x388] sm:$0xf] }
 0xceb   : > { %8029 = vmatpush.bf16.msrb.mxu0 %v12322_v19 }
 0xcef   : > { %v19369_v59 = vpop.f32.mrf.mxu0  ;;  %8498 = vmatpush.bf16.msra.mxu0 %v12682_v1  ;;  %v12762_v1 = vor.u32 %v13962_v32, %v12761_v13  ;;  %v13914_v13 = vld [vmem:[%s21300_s7 + $0xc] sm:$0xf0] }
 0xcf2   : > { %12233 = vmatmul.msk.bf16.gmra.mxu0 %vm7218_vm1, %v19382_v60 }
 0xcf3   : > { %8499 = vmatpush.bf16.msra.mxu0 %v12666_v28  ;;  %v13958_v28 = vld [vmem:[%s21300_s7 + $0x16c] sm:$0xf0] }
 0xcf7   : > { %v19377_v21 = vpop.f32.mrf.mxu0 }
 0xcf9   : > { %12241 = vmatmul.msk.bf16.gmra.mxu1 %vm7218_vm1, %v13906_v16  ;;  %v14027_v16 = vld [vmem:[%s21300_s7 + $0x394] sm:$0xf0] }
 0xcff   : > { %v19421_v40 = vpop.f32.mrf.mxu0 }
 0xd09   : > { %12242 = vmatmul.msk.bf16.gmra.mxu1 %vm7218_vm1, %v13907_v44  ;;  %v19489_v44 = vpop.f32.mrf.mxu0 }
 0xd11   : > { %v7284_v38 = vpop.f32.mrf.mxu0 }
 0xd16   : > { %v7333_v37 = vpop.f32.mrf.mxu1 }
 0xd17   : > { %v19372_v11 = vpack.c.bf16 %v7333_v37, %v7264_v14  ;;  %v12514_v14 = vor.u32 %v14027_v16, %v12513_v53  ;;  %v12450_v53 = vor.u32 %v14011_v4, %v12449_v50 }
 0xd19   : > { %12243 = vmatmul.msk.bf16.gmra.mxu1 %vm7218_vm1, %v13908_v63  ;;  %v12361_v63 = vld [vmem:[%s21300_s7 + $0x260] sm:$0xf] }
 0xd1a   : > { %8054 = vmatpush.bf16.msrb.mxu1 %v12514_v14  ;;  %v7286_v14 = vpop.f32.mrf.mxu0 }
 0xd1e   : > { %v19375_v49 = vpop.f32.mrf.mxu1  ;;  %8055 = vmatpush.bf16.msrb.mxu1 %v12498_v31 }
 0xd22   : > { %8056 = vmatpush.bf16.msrb.mxu1 %v12482_v56  ;;  %v13974_v56 = vld [vmem:[%s21300_s7 + $0x1ec] sm:$0xf0] }
 0xd26   : > { %v7338_v41 = vpop.f32.mrf.mxu1  ;;  %8057 = vmatpush.bf16.msrb.mxu1 %v12466_v20  ;;  %v12794_v20 = vor.u32 %v13970_v2, %v12793_v46  ;;  %v13984_v46 = vld [vmem:[%s21300_s7 + $0x244] sm:$0xf] }
 0xd27   : > { %v19410_v35 = vpack.c.bf16 %v7338_v41, %v7269_v30  ;;  %v19494_v30 = vld [vmem:[%s21301_s8 + $0x58] sm:$0xff] }
 0xd28   : > { %12234 = vmatmul.msk.bf16.gmra.mxu0 %vm7218_vm1, %v19494_v30 }
 0xd29   : > { %12244 = vmatmul.msk.bf16.gmra.mxu1 %vm7218_vm1, %v13909_v45  ;;  %v13990_v45 = vld [vmem:[%s21300_s7 + $0x26c] sm:$0xf0] }
 0xd2a   : > { %v12362_v37 = vor.u32 %v13990_v45, %v12361_v63  ;;  %8058 = vmatpush.bf16.msrb.mxu1 %v12450_v53 }
 0xd2c   : > { %7910 = vmatpush.bf16.msra.mxu2 %v12362_v37  ;;  %v7289_v37 = vpop.f32.mrf.mxu0 }
 0xd2e   : > { %v19463_v57 = vpop.f32.mrf.mxu1 }
 0xd30   : > { %7911 = vmatpush.bf16.msra.mxu2 %v12346_v51 }
 0xd34   : > { %v7291_v27 = vpop.f32.mrf.mxu0 }
 0xd36   : > { %v7343_v29 = vpop.f32.mrf.mxu1 }
 0xd37   : > { %v19523_v41 = vpack.c.bf16 %v7343_v29, %v19369_v59  ;;  %v14018_v59 = vld [vmem:[%s21300_s7 + $0x34c] sm:$0xf0] }
 0xd38   : > { %v12474_v22 = vor.u32 %v14018_v59, %v12473_v18  ;;  %v14036_v18 = vld [vmem:[%s21300_s7 + $0x3e4] sm:$0xf]  ;;  %v12555_v59 = vld [vmem:[%s21300_s7 + $0x3f0] sm:$0xf0] }
 0xd39   : > { %12245 = vmatmul.msk.bf16.gmra.mxu1 %vm7218_vm1, %v19382_v60  ;;  %v13982_v60 = vld [vmem:[%s21300_s7 + $0x22c] sm:$0xf0]  ;;  %v12558_v54 = vor.u32 %v14036_v18, %v12555_v59 }
 0xd3a   : > { %7940 = vmatpush.bf16.msra.mxu3 %v12474_v22  ;;  %v12330_v36 = vor.u32 %v13982_v60, %v12329_v23  ;;  %v12810_v23 = vor.u32 %v13974_v56, %v12809_v12  ;;  %v14000_v60 = vld [vmem:[%s21300_s7 + $0x2c4] sm:$0xf]  ;;  %v13930_v18 = vld [vmem:[%s21300_s7 + $0x8c] sm:$0xf0]  ;;  %v12363_v56 = vld [vmem:[%s21300_s7 + $0x270] sm:$0xf0] }
 0xd3b   : > { %v13988_v12 = vld [vmem:[%s21300_s7 + $0x264] sm:$0xf] }
 0xd3c   : > { %7912 = vmatpush.bf16.msra.mxu2 %v12330_v36  ;;  %8527 = vmatpush.bf16.msra.mxu1 %v12810_v23  ;;  %v12414_v36 = vor.u32 %v14000_v60, %v12411_v62  ;;  %v14020_v23 = vld [vmem:[%s21300_s7 + $0x364] sm:$0xf]  ;;  %v12366_v60 = vor.u32 %v13988_v12, %v12363_v56  ;;  %v12491_v62 = vld [vmem:[%s21300_s7 + $0x370] sm:$0xf0] }
 0xd3d   : > { %v12494_v9 = vor.u32 %v14020_v23, %v12491_v62  ;;  %v13946_v62 = vld [vmem:[%s21300_s7 + $0x10c] sm:$0xf0] }
 0xd3e   : > { %v19575_v43 = vpop.f32.mrf.mxu1  ;;  %7941 = vmatpush.bf16.msra.mxu3 %v12458_v15 }
 0xd40   : > { %7913 = vmatpush.bf16.msra.mxu2 %v12314_v39  ;;  %v14028_v39 = vld [vmem:[%s21300_s7 + $0x3a4] sm:$0xf]  ;;  %8528 = vmatpush.bf16.msra.mxu1 %v12794_v20  ;;  %v12347_v20 = vld [vmem:[%s21300_s7 + $0x250] sm:$0xf0] }
 0xd41   : > { %v12526_v4 = vor.u32 %v14028_v39, %v12523_v58  ;;  %v12350_v39 = vor.u32 %v13984_v46, %v12347_v20  ;;  %v12601_v58 = vld [vmem:[%s21300_s7 + $0x40] sm:$0xf] }
 0xd42   : > { %7942 = vmatpush.bf16.msra.mxu3 %v12442_v42  ;;  %v13934_v42 = vld [vmem:[%s21300_s7 + $0xac] sm:$0xf0] }
 0xd43   : > { %v12650_v53 = vor.u32 %v13934_v42, %v12649_v5  ;;  %v13922_v5 = vld [vmem:[%s21300_s7 + $0x4c] sm:$0xf0]  ;;  %v12729_v42 = vld [vmem:[%s21300_s7 + $0x140] sm:$0xf] }
 0xd45   : > { %8500 = vmatpush.bf16.msra.mxu0 %v12650_v53  ;;  %v13980_v53 = vld [vmem:[%s21300_s7 + $0x224] sm:$0xf] }
 0xd46   : > { %v7348_v16 = vpop.f32.mrf.mxu1  ;;  %7993 = vmatpush.bf16.msrb.mxu3 %v12558_v54 }
 0xd47   : > { %v19602_v63 = vpack.c.bf16 %v7348_v16, %v19421_v40  ;;  %v19612_v40 = vpop.f32.mrf.mxu0  ;;  %v12777_v16 = vld [vmem:[%s21300_s7 + $0x1a0] sm:$0xf] }
 0xd49   : > { %12246 = vmatmul.msk.bf16.gmra.mxu1 %vm7218_vm1, %v19494_v30  ;;  %v14004_v30 = vld [vmem:[%s21300_s7 + $0x2e4] sm:$0xf] }
 0xd4a   : > { %v12430_v51 = vor.u32 %v14004_v30, %v12427_v7  ;;  %v12507_v30 = vld [vmem:[%s21300_s7 + $0x390] sm:$0xf0]  ;;  %v12633_v7 = vld [vmem:[%s21300_s7 + $0x80] sm:$0xf] }
 0xd4b   : > { %v12634_v59 = vor.u32 %v13930_v18, %v12633_v7  ;;  %v14008_v7 = vld [vmem:[%s21300_s7 + $0x304] sm:$0xf] }
 0xd4c   : > { %7964 = vmatpush.bf16.msrb.mxu2 %v12430_v51 }
 0xd4d   : > { %8501 = vmatpush.bf16.msra.mxu0 %v12634_v59  ;;  %v12569_v59 = vld [vmem:[%s21300_s7] sm:$0xf] }
 0xd4e   : > { %v19606_v45 = vpop.f32.mrf.mxu1  ;;  %v12570_v23 = vor.u32 %v13914_v13, %v12569_v59  ;;  %v12817_v59 = vld [vmem:[%s21300_s7 + $0x1e8] sm:$0xf]  ;;  %v13975_v13 = vld [vmem:[%s21300_s7 + $0x1f4] sm:$0xf0] }
 0xd4f   : > { %v19684_v50 = vpop.f32.mrf.mxu0 }
 0xd50   : > { %7965 = vmatpush.bf16.msrb.mxu2 %v12414_v36  ;;  %v13926_v36 = vld [vmem:[%s21300_s7 + $0x6c] sm:$0xf0] }
 0xd54   : > { %7966 = vmatpush.bf16.msrb.mxu2 %v12398_v47 }
 0xd56   : > { %v7353_v55 = vpop.f32.mrf.mxu1 }
 0xd57   : > { %v7401_v33 = vpack.c.bf16 %v7353_v55, %v7284_v38  ;;  %v14032_v38 = vld [vmem:[%s21300_s7 + $0x3c4] sm:$0xf]  ;;  %v19760_v34 = vpop.f32.mrf.mxu0 }
 0xd58   : > { %v12542_v15 = vor.u32 %v14032_v38, %v12539_v17  ;;  %v12617_v38 = vld [vmem:[%s21300_s7 + $0x60] sm:$0xf] }
 0xd59   : > { %v7554_v10 = vunpack.c.l.b16 %v7401_v33  ;;  %v7555_v24 = vunpack.c.h.b16 %v7401_v33  ;;  %v12618_v61 = vor.u32 %v13926_v36, %v12617_v38 }
 0xd5a   : > { %7994 = vmatpush.bf16.msrb.mxu3 %v12542_v15  ;;  %v12745_v15 = vld [vmem:[%s21300_s7 + $0x160] sm:$0xf] }
 0xd5b   : > { %v12746_v2 = vor.u32 %v13958_v28, %v12745_v15  ;;  %8502 = vmatpush.bf16.msra.mxu0 %v12618_v61 }
 0xd5e   : > { %v7355_v52 = vpop.f32.mrf.mxu1  ;;  %7995 = vmatpush.bf16.msrb.mxu3 %v12526_v4  ;;  %v13954_v4 = vld [vmem:[%s21300_s7 + $0x14c] sm:$0xf0] }
 0xd5f   : > { %v7402_v25 = vpack.c.bf16 %v7355_v52, %v7286_v14  ;;  %v13966_v14 = vld [vmem:[%s21300_s7 + $0x1ac] sm:$0xf0]  ;;  %v13992_v52 = vld [vmem:[%s21300_s7 + $0x284] sm:$0xf] }
 0xd60   : > { %v12778_v55 = vor.u32 %v13966_v14, %v12777_v16  ;;  %v12331_v16 = vld [vmem:[%s21300_s7 + $0x230] sm:$0xf0]  ;;  %v14012_v14 = vld [vmem:[%s21300_s7 + $0x324] sm:$0xf] }
 0xd61   : > { %v7556_v29 = vunpack.c.l.b16 %v7402_v25  ;;  %v7557_v8 = vunpack.c.h.b16 %v7402_v25  ;;  %v12379_v25 = vld [vmem:[%s21300_s7 + $0x290] sm:$0xf0] }
 0xd62   : > { %8529 = vmatpush.bf16.msra.mxu1 %v12778_v55  ;;  %v12585_v55 = vld [vmem:[%s21300_s7 + $0x20] sm:$0xf] }
 0xd63   : > { %v19608_v31 = vpack.c.b16 %v7556_v29, %v7554_v10  ;;  %v19610_v48 = vpack.c.b16 %v7557_v8, %v7555_v24  ;;  %v14024_v10 = vld [vmem:[%s21300_s7 + $0x384] sm:$0xf]  ;;  %v12382_v8 = vor.u32 %v13992_v52, %v12379_v25  ;;  %v12334_v52 = vor.u32 %v13980_v53, %v12331_v16  ;;  %v13918_v25 = vld [vmem:[%s21300_s7 + $0x2c] sm:$0xf0] }
 0xd64   : > { %v12510_v51 = vor.u32 %v14024_v10, %v12507_v30  ;;  %v12713_v10 = vld [vmem:[%s21300_s7 + $0x120] sm:$0xf]  ;;  %v12315_v30 = vld [vmem:[%s21300_s7 + $0x210] sm:$0xf0]  ;;  %v7394_v16 = vpack.c.bf16 %v19375_v49, %v19356_v0  ;;  %v12435_v0 = vld [vmem:[%s21300_s7 + $0x2f8] sm:$0xf0] }
 0xd65   : > { %7914 = vmatmul.bf16.vlgmr.msra.gmra.mxu2 %v19608_v31  ;;  %7943 = vmatmul.bf16.vlgmr.msra.gmra.mxu3 %v19610_v48  ;;  %v14037_v49 = vld [vmem:[%s21300_s7 + $0x3ec] sm:$0xf] }
 0xd66   : > { %8030 = vmatmul.bf16.vlgmr.msrb.gmra.mxu0 %v19608_v31  ;;  %8059 = vmatmul.bf16.vlgmr.msrb.gmra.mxu1 %v19610_v48  ;;  %v7358_v22 = vpop.f32.mrf.mxu1 }
 0xd67   : > { %v7403_v6 = vpack.c.bf16 %v7358_v22, %v7289_v37  ;;  %7967 = vmatpush.bf16.msrb.mxu2 %v12382_v8  ;;  %7996 = vmatpush.bf16.msrb.mxu3 %v12510_v51  ;;  %v13976_v8 = vld [vmem:[%s21300_s7 + $0x204] sm:$0xf]  ;;  %v12443_v51 = vld [vmem:[%s21300_s7 + $0x310] sm:$0xf0] }
 0xd68   : > { %8530 = vmatpush.bf16.msra.mxu1 %v12762_v1  ;;  %v12318_v56 = vor.u32 %v13976_v8, %v12315_v30  ;;  %v12689_v8 = vld [vmem:[%s21300_s7 + $0xe8] sm:$0xf]  ;;  %v13943_v30 = vld [vmem:[%s21300_s7 + $0xf4] sm:$0xf0] }
 0xd69   : > { %v7558_v33 = vunpack.c.l.b16 %v7403_v6  ;;  %v7559_v24 = vunpack.c.h.b16 %v7403_v6  ;;  %v14016_v6 = vld [vmem:[%s21300_s7 + $0x344] sm:$0xf] }
 0xd6a   : > { %v12478_v47 = vor.u32 %v14016_v6, %v12475_v26 }
 0xd6b   : > { %7968 = vmatpush.bf16.msrb.mxu2 %v12366_v60  ;;  %7997 = vmatpush.bf16.msrb.mxu3 %v12494_v9  ;;  %v12697_v60 = vld [vmem:[%s21300_s7 + $0x100] sm:$0xf]  ;;  %v7301_v9 = vpop.f32.mrf.mxu0 }
 0xd6c   : > { %8531 = vmatpush.bf16.msra.mxu1 %v12746_v2  ;;  %v12698_v28 = vor.u32 %v13946_v62, %v12697_v60 }
 0xd6e   : > { %v7360_v19 = vpop.f32.mrf.mxu1 }
 0xd6f   : > { %v7404_v37 = vpack.c.bf16 %v7360_v19, %v7291_v27  ;;  %v12602_v19 = vor.u32 %v13922_v5, %v12601_v58  ;;  %7969 = vmatpush.bf16.msrb.mxu2 %v12350_v39  ;;  %7998 = vmatpush.bf16.msrb.mxu3 %v12478_v47 }
 0xd71   : > { %v7560_v29 = vunpack.c.l.b16 %v7404_v37  ;;  %v7561_v27 = vunpack.c.h.b16 %v7404_v37  ;;  %v12459_v37 = vld [vmem:[%s21300_s7 + $0x330] sm:$0xf0]  ;;  %8503 = vmatpush.bf16.msra.mxu0 %v12602_v19 }
 0xd73   : > { %v19716_v22 = vpack.c.b16 %v7560_v29, %v7558_v33  ;;  %v19718_v54 = vpack.c.b16 %v7561_v27, %v7559_v24  ;;  %v12730_v33 = vor.u32 %v13954_v4, %v12729_v42  ;;  %v13950_v24 = vld [vmem:[%s21300_s7 + $0x12c] sm:$0xf0]  ;;  %v12462_v29 = vor.u32 %v14012_v14, %v12459_v37  ;;  %7970 = vmatpush.bf16.msrb.mxu2 %v12334_v52  ;;  %v7304_v2 = vpop.f32.mrf.mxu0 }
 0xd74   : > { %v12586_v27 = vor.u32 %v13918_v25, %v12585_v55  ;;  %v12714_v12 = vor.u32 %v13950_v24, %v12713_v10  ;;  %v8148_v55 = vunpack.c.l.b16 %v7394_v16  ;;  %v8146_v52 = vunpack.c.l.b16 %v19372_v11 }
 0xd75   : > { %7919 = vmatmul.bf16.gmra.mxu2 %v19716_v22  ;;  %7948 = vmatmul.bf16.gmra.mxu3 %v19718_v54  ;;  %v8147_v25 = vunpack.c.h.b16 %v19372_v11 }
 0xd76   : > { %8035 = vmatmul.bf16.gmra.mxu0 %v19716_v22  ;;  %8064 = vmatmul.bf16.gmra.mxu1 %v19718_v54  ;;  %v7363_v17 = vpop.f32.mrf.mxu1  ;;  %v19851_v10 = vpack.c.b16 %v8148_v55, %v8146_v52  ;;  %v12387_v52 = vld [vmem:[%s21300_s7 + $0x298] sm:$0xf0] }
 0xd77   : > { %v7405_v18 = vpack.c.bf16 %v7363_v17, %v19612_v40  ;;  %8532 = vmatpush.bf16.msra.mxu1 %v12730_v33  ;;  %7999 = vmatpush.bf16.msrb.mxu3 %v12462_v29  ;;  %v12446_v40 = vor.u32 %v14008_v7, %v12443_v51  ;;  %v8149_v33 = vunpack.c.h.b16 %v7394_v16  ;;  %v14005_v29 = vld [vmem:[%s21300_s7 + $0x2ec] sm:$0xf]  ;;  %v12690_v51 = vor.u32 %v13943_v30, %v12689_v8 }
 0xd78   : > { %8504 = vmatpush.bf16.msra.mxu0 %v12586_v27  ;;  %7971 = vmatpush.bf16.msrb.mxu2 %v12318_v56  ;;  %v12438_v11 = vor.u32 %v14005_v29, %v12435_v0  ;;  %v12563_v27 = vld [vmem:[%s21300_s7 + $0x3f8] sm:$0xf0]  ;;  %v7396_v16 = vpack.c.bf16 %v19463_v57, %v19364_v3  ;;  %v12641_v57 = vld [vmem:[%s21300_s7 + $0x88] sm:$0xf]  ;;  %v13931_v0 = vld [vmem:[%s21300_s7 + $0x94] sm:$0xf0] }
 0xd79   : > { %v7562_v38 = vunpack.c.l.b16 %v7405_v18  ;;  %v7563_v36 = vunpack.c.h.b16 %v7405_v18  ;;  %v19853_v24 = vpack.c.b16 %v8149_v33, %v8147_v25  ;;  %v12566_v18 = vor.u32 %v14037_v49, %v12563_v27  ;;  %v12419_v56 = vld [vmem:[%s21300_s7 + $0x2d8] sm:$0xf0]  ;;  %v13993_v33 = vld [vmem:[%s21300_s7 + $0x28c] sm:$0xf] }
 0xd7a   : > { %v14025_v25 = vld [vmem:[%s21300_s7 + $0x38c] sm:$0xf]  ;;  %v12515_v3 = vld [vmem:[%s21300_s7 + $0x398] sm:$0xf0]  ;;  %v8152_v27 = vunpack.c.l.b16 %v7396_v16  ;;  %v8153_v8 = vunpack.c.h.b16 %v7396_v16 }
 0xd7b   : > { %8533 = vmatpush.bf16.msra.mxu1 %v12714_v12  ;;  %8000 = vmatpush.bf16.msrb.mxu3 %v12446_v40  ;;  %v19837_v4 = vpop.f32.mrf.mxu0  ;;  %v12818_v12 = vor.u32 %v13975_v13, %v12817_v59  ;;  %v14033_v40 = vld [vmem:[%s21300_s7 + $0x3cc] sm:$0xf]  ;;  %v12518_v30 = vor.u32 %v14025_v25, %v12515_v3  ;;  %v8150_v59 = vunpack.c.l.b16 %v19410_v35  ;;  %v8151_v13 = vunpack.c.h.b16 %v19410_v35  ;;  %v13955_v25 = vld [vmem:[%s21300_s7 + $0x154] sm:$0xf0]  ;;  %v12339_v3 = vld [vmem:[%s21300_s7 + $0x238] sm:$0xf0] }
 0xd7c   : > { %8505 = vmatpush.bf16.msra.mxu0 %v12570_v23  ;;  %8080 = vmatpush.bf16.msra.mxu2 %v12438_v11  ;;  %v12547_v23 = vld [vmem:[%s21300_s7 + $0x3d8] sm:$0xf0]  ;;  %v12390_v11 = vor.u32 %v13993_v33, %v12387_v52  ;;  %v14021_v35 = vld [vmem:[%s21300_s7 + $0x36c] sm:$0xf]  ;;  %v12737_v33 = vld [vmem:[%s21300_s7 + $0x148] sm:$0xf] }
 0xd7e   : > { %v7365_v32 = vpop.f32.mrf.mxu1 }
 0xd7f   : > { %v7406_v1 = vpack.c.bf16 %v7365_v32, %v19684_v50  ;;  %8534 = vmatpush.bf16.msra.mxu1 %v12698_v28  ;;  %v14001_v32 = vld [vmem:[%s21300_s7 + $0x2cc] sm:$0xf]  ;;  %8109 = vmatpush.bf16.msra.mxu3 %v12566_v18  ;;  %v13971_v28 = vld [vmem:[%s21300_s7 + $0x1d4] sm:$0xf0]  ;;  %v12769_v18 = vld [vmem:[%s21300_s7 + $0x188] sm:$0xf] }
 0xd80   : > { %8614 = vmatpush.bf16.msrb.mxu0 %v12690_v51  ;;  %v12422_v62 = vor.u32 %v14001_v32, %v12419_v56  ;;  %v13963_v51 = vld [vmem:[%s21300_s7 + $0x194] sm:$0xf0]  ;;  %v19965_v56 = vpack.c.b16 %v8152_v27, %v8150_v59  ;;  %v12738_v27 = vor.u32 %v13955_v25, %v12737_v33  ;;  %v8159_v25 = vunpack.c.h.b16 %v19602_v63 }
 0xd81   : > { %v7564_v17 = vunpack.c.l.b16 %v7406_v1  ;;  %v7565_v50 = vunpack.c.h.b16 %v7406_v1 }
 0xd82   : > { %8081 = vmatpush.bf16.msra.mxu2 %v12422_v62  ;;  %v12371_v62 = vld [vmem:[%s21300_s7 + $0x278] sm:$0xf0] }
 0xd83   : > { %v19824_v61 = vpack.c.b16 %v7564_v17, %v7562_v38  ;;  %v19826_v15 = vpack.c.b16 %v7565_v50, %v7563_v36  ;;  %v7309_v37 = vpop.f32.mrf.mxu0  ;;  %v12550_v38 = vor.u32 %v14033_v40, %v12547_v23  ;;  %v12673_v36 = vld [vmem:[%s21300_s7 + $0xc8] sm:$0xf]  ;;  %v13939_v17 = vld [vmem:[%s21300_s7 + $0xd4] sm:$0xf0]  ;;  %8643 = vmatpush.bf16.msrb.mxu1 %v12818_v12  ;;  %v12770_v12 = vor.u32 %v13963_v51, %v12769_v18  ;;  %v13989_v23 = vld [vmem:[%s21300_s7 + $0x26c] sm:$0xf] }
 0xd84   : > { %v12801_v50 = vld [vmem:[%s21300_s7 + $0x1c8] sm:$0xf]  ;;  %v19967_v40 = vpack.c.b16 %v8153_v8, %v8151_v13 }
 0xd85   : > { %7924 = vmatmul.bf16.gmra.mxu2 %v19824_v61  ;;  %7953 = vmatmul.bf16.gmra.mxu3 %v19826_v15  ;;  %v12721_v13 = vld [vmem:[%s21300_s7 + $0x128] sm:$0xf] }
 0xd86   : > { %8040 = vmatmul.bf16.gmra.mxu0 %v19824_v61  ;;  %8069 = vmatmul.bf16.gmra.mxu1 %v19826_v15  ;;  %v7368_v46 = vpop.f32.mrf.mxu1 }
 0xd87   : > { %v7407_v20 = vpack.c.bf16 %v7368_v46, %v19760_v34  ;;  %v13997_v46 = vld [vmem:[%s21300_s7 + $0x2ac] sm:$0xf]  ;;  %8110 = vmatpush.bf16.msra.mxu3 %v12550_v38  ;;  %v12374_v38 = vor.u32 %v13989_v23, %v12371_v62 }
 0xd88   : > { %v13977_v62 = vld [vmem:[%s21300_s7 + $0x20c] sm:$0xf] }
 0xd89   : > { %v7566_v39 = vunpack.c.l.b16 %v7407_v20  ;;  %v7567_v47 = vunpack.c.h.b16 %v7407_v20  ;;  %v12802_v20 = vor.u32 %v13971_v28, %v12801_v50  ;;  %v13927_v50 = vld [vmem:[%s21300_s7 + $0x74] sm:$0xf0] }
 0xd8b   : > { %v19897_v60 = vpop.f32.mrf.mxu0  ;;  %8644 = vmatpush.bf16.msrb.mxu1 %v12802_v20  ;;  %v13959_v20 = vld [vmem:[%s21300_s7 + $0x174] sm:$0xf0] }
 0xd8e   : > { %v7370_v6 = vpop.f32.mrf.mxu1 }
 0xd8f   : > { %v7408_v26 = vpack.c.bf16 %v7370_v6, %v7301_v9  ;;  %v12674_v9 = vor.u32 %v13939_v17, %v12673_v36  ;;  %v14029_v6 = vld [vmem:[%s21300_s7 + $0x3ac] sm:$0xf]  ;;  %v12499_v36 = vld [vmem:[%s21300_s7 + $0x378] sm:$0xf0]  ;;  %v12625_v17 = vld [vmem:[%s21300_s7 + $0x68] sm:$0xf] }
 0xd90   : > { %v12502_v28 = vor.u32 %v14021_v35, %v12499_v36  ;;  %v12323_v35 = vld [vmem:[%s21300_s7 + $0x218] sm:$0xf0] }
 0xd91   : > { %v7568_v58 = vunpack.c.l.b16 %v7408_v26  ;;  %v7569_v5 = vunpack.c.h.b16 %v7408_v26  ;;  %v12531_v26 = vld [vmem:[%s21300_s7 + $0x3b8] sm:$0xf0]  ;;  %8615 = vmatpush.bf16.msrb.mxu0 %v12674_v9  ;;  %v12326_v36 = vor.u32 %v13977_v62, %v12323_v35  ;;  %v13936_v62 = vld [vmem:[%s21300_s7 + $0xc4] sm:$0xf]  ;;  %v12667_v35 = vld [vmem:[%s21300_s7 + $0xd0] sm:$0xf0] }
 0xd93   : > { %v19833_v42 = vpack.c.b16 %v7568_v58, %v7566_v39  ;;  %v19835_v19 = vpack.c.b16 %v7569_v5, %v7567_v47  ;;  %v12657_v39 = vld [vmem:[%s21300_s7 + $0xa8] sm:$0xf]  ;;  %v13935_v58 = vld [vmem:[%s21300_s7 + $0xb4] sm:$0xf0]  ;;  %v7314_v32 = vpop.f32.mrf.mxu0 }
 0xd94   : > { %v12785_v5 = vld [vmem:[%s21300_s7 + $0x1a8] sm:$0xf]  ;;  %v12658_v55 = vor.u32 %v13935_v58, %v12657_v39  ;;  %v14017_v58 = vld [vmem:[%s21300_s7 + $0x34c] sm:$0xf] }
 0xd95   : > { %7929 = vmatmul.bf16.gmra.mxu2 %v19833_v42  ;;  %7958 = vmatmul.bf16.gmra.mxu3 %v19835_v19 }
 0xd96   : > { %8045 = vmatmul.bf16.gmra.mxu0 %v19833_v42  ;;  %8074 = vmatmul.bf16.gmra.mxu1 %v19835_v19  ;;  %v7373_v34 = vpop.f32.mrf.mxu1 }
 0xd97   : > { %v19843_v53 = vpack.c.bf16 %v7373_v34, %v7304_v2  ;;  %v12403_v2 = vld [vmem:[%s21300_s7 + $0x2b8] sm:$0xf0]  ;;  %v13967_v34 = vld [vmem:[%s21300_s7 + $0x1b4] sm:$0xf0]  ;;  %8616 = vmatpush.bf16.msrb.mxu0 %v12658_v55 }
 0xd98   : > { %v12406_v47 = vor.u32 %v13997_v46, %v12403_v2  ;;  %v12786_v29 = vor.u32 %v13967_v34, %v12785_v5  ;;  %v12626_v46 = vor.u32 %v13927_v50, %v12625_v17  ;;  %v12753_v2 = vld [vmem:[%s21300_s7 + $0x168] sm:$0xf]  ;;  %v12483_v5 = vld [vmem:[%s21300_s7 + $0x358] sm:$0xf0]  ;;  %v13923_v55 = vld [vmem:[%s21300_s7 + $0x54] sm:$0xf0] }
 0xd99   : > { %v12754_v39 = vor.u32 %v13959_v20, %v12753_v2  ;;  %v12486_v16 = vor.u32 %v14017_v58, %v12483_v5  ;;  %v12451_v17 = vld [vmem:[%s21300_s7 + $0x318] sm:$0xf0]  ;;  %v12577_v50 = vld [vmem:[%s21300_s7 + $0x8] sm:$0xf] }
 0xd9a   : > { %8082 = vmatpush.bf16.msra.mxu2 %v12406_v47  ;;  %8645 = vmatpush.bf16.msrb.mxu1 %v12786_v29  ;;  %v12355_v47 = vld [vmem:[%s21300_s7 + $0x258] sm:$0xf0]  ;;  %v13981_v29 = vld [vmem:[%s21300_s7 + $0x22c] sm:$0xf] }
 0xd9b   : > { %v12342_v8 = vor.u32 %v13981_v29, %v12339_v3  ;;  %v20043_v18 = vpop.f32.mrf.mxu0 }
 0xd9e   : > { %v19847_v14 = vpop.f32.mrf.mxu1  ;;  %8083 = vmatpush.bf16.msra.mxu2 %v12390_v11  ;;  %8646 = vmatpush.bf16.msrb.mxu1 %v12770_v12  ;;  %v12593_v11 = vld [vmem:[%s21300_s7 + $0x28] sm:$0xf] }
 0xda2   : > { %8084 = vmatpush.bf16.msra.mxu2 %v12374_v38  ;;  %8647 = vmatpush.bf16.msrb.mxu1 %v12754_v39  ;;  %v14009_v38 = vld [vmem:[%s21300_s7 + $0x30c] sm:$0xf]  ;;  %v13947_v39 = vld [vmem:[%s21300_s7 + $0x114] sm:$0xf0] }
 0xda3   : > { %v12454_v2 = vor.u32 %v14009_v38, %v12451_v17  ;;  %v13968_v38 = vld [vmem:[%s21300_s7 + $0x1c4] sm:$0xf]  ;;  %v12670_v17 = vor.u32 %v13936_v62, %v12667_v35  ;;  %v14058_v62 = vld [vmem:[%s21300_s7 + $0x48c] sm:$0xf0] }
 0xda5   : > { %7972 = vmatmul.bf16.vlgmr.msrb.gmra.mxu2 %v19608_v31  ;;  %8001 = vmatmul.bf16.vlgmr.msrb.gmra.mxu3 %v19610_v48 }
 0xda6   : > { %8506 = vmatmul.bf16.vlgmr.msra.gmra.mxu0 %v19851_v10  ;;  %8535 = vmatmul.bf16.vlgmr.msra.gmra.mxu1 %v19853_v24  ;;  %v7378_v7 = vpop.f32.mrf.mxu1 }
 0xda7   : > { %v19886_v1 = vpack.c.bf16 %v7378_v7, %v7309_v37  ;;  %v12534_v37 = vor.u32 %v14029_v6, %v12531_v26  ;;  %v12642_v7 = vor.u32 %v13931_v0, %v12641_v57  ;;  %v13985_v6 = vld [vmem:[%s21300_s7 + $0x24c] sm:$0xf]  ;;  %v12467_v0 = vld [vmem:[%s21300_s7 + $0x338] sm:$0xf0]  ;;  %8648 = vmatpush.bf16.msrb.mxu1 %v12738_v27  ;;  %v12683_v27 = vld [vmem:[%s21300_s7 + $0xf0] sm:$0xf0] }
 0xda8   : > { %v12358_v34 = vor.u32 %v13985_v6, %v12355_v47  ;;  %v14013_v57 = vld [vmem:[%s21300_s7 + $0x32c] sm:$0xf]  ;;  %v12705_v6 = vld [vmem:[%s21300_s7 + $0x108] sm:$0xf] }
 0xda9   : > { %8111 = vmatpush.bf16.msra.mxu3 %v12534_v37  ;;  %8617 = vmatpush.bf16.msrb.mxu0 %v12642_v7  ;;  %v12609_v37 = vld [vmem:[%s21300_s7 + $0x48] sm:$0xf]  ;;  %v7398_v7 = vpack.c.bf16 %v19575_v43, %v19377_v21  ;;  %v12470_v51 = vor.u32 %v14013_v57, %v12467_v0  ;;  %v12706_v47 = vor.u32 %v13947_v39, %v12705_v6  ;;  %v14098_v6 = vld [vmem:[%s21300_s7 + $0x5cc] sm:$0xf0] }
 0xdaa   : > { %v12610_v52 = vor.u32 %v13923_v55, %v12609_v37  ;;  %8085 = vmatpush.bf16.msra.mxu2 %v12358_v34  ;;  %v7400_v37 = vpack.c.bf16 %v19606_v45, %v19489_v44 }
 0xdab   : > { %v8156_v21 = vunpack.c.l.b16 %v7398_v7  ;;  %v8157_v43 = vunpack.c.h.b16 %v7398_v7  ;;  %v12811_v7 = vld [vmem:[%s21300_s7 + $0x1f0] sm:$0xf0] }
 0xdac   : > { %v8160_v55 = vunpack.c.l.b16 %v7400_v37  ;;  %v8161_v33 = vunpack.c.h.b16 %v7400_v37  ;;  %v13932_v37 = vld [vmem:[%s21300_s7 + $0xa4] sm:$0xf] }
 0xdad   : > { %8112 = vmatpush.bf16.msra.mxu3 %v12518_v30  ;;  %8618 = vmatpush.bf16.msrb.mxu0 %v12626_v46  ;;  %v13919_v30 = vld [vmem:[%s21300_s7 + $0x34] sm:$0xf0]  ;;  %v8155_v46 = vunpack.c.h.b16 %v19523_v41 }
 0xdae   : > { %v19955_v49 = vpop.f32.mrf.mxu1  ;;  %v12594_v59 = vor.u32 %v13919_v30, %v12593_v11  ;;  %8086 = vmatpush.bf16.msra.mxu2 %v12342_v8  ;;  %v20095_v3 = vpack.c.b16 %v8161_v33, %v8159_v25  ;;  %v13972_v8 = vld [vmem:[%s21300_s7 + $0x1e4] sm:$0xf]  ;;  %v12779_v25 = vld [vmem:[%s21300_s7 + $0x1b0] sm:$0xf0] }
 0xdaf   : > { %v20081_v5 = vpack.c.b16 %v8157_v43, %v8155_v46  ;;  %v13964_v33 = vld [vmem:[%s21300_s7 + $0x1a4] sm:$0xf] }
 0xdb1   : > { %8113 = vmatpush.bf16.msra.mxu3 %v12502_v28  ;;  %8619 = vmatpush.bf16.msrb.mxu0 %v12610_v52  ;;  %v8154_v28 = vunpack.c.l.b16 %v19523_v41  ;;  %v7319_v41 = vpop.f32.mrf.mxu0  ;;  %v8158_v52 = vunpack.c.l.b16 %v19602_v63  ;;  %v13940_v63 = vld [vmem:[%s21300_s7 + $0xe4] sm:$0xf] }
 0xdb2   : > { %8087 = vmatpush.bf16.msra.mxu2 %v12326_v36  ;;  %v12686_v30 = vor.u32 %v13940_v63, %v12683_v27  ;;  %v12782_v63 = vor.u32 %v13964_v33, %v12779_v25 }
 0xdb3   : > { %v20079_v58 = vpack.c.b16 %v8156_v21, %v8154_v28  ;;  %v20093_v29 = vpack.c.b16 %v8160_v55, %v8158_v52  ;;  %v14066_v28 = vld [vmem:[%s21300_s7 + $0x4cc] sm:$0xf0]  ;;  %v12651_v55 = vld [vmem:[%s21300_s7 + $0xb0] sm:$0xf0] }
 0xdb4   : > { %v12654_v52 = vor.u32 %v13932_v37, %v12651_v55  ;;  %v12937_v37 = vld [vmem:[%s21300_s7 + $0x460] sm:$0xf]  ;;  %v14054_v55 = vld [vmem:[%s21300_s7 + $0x46c] sm:$0xf0] }
 0xdb5   : > { %7977 = vmatmul.bf16.gmra.mxu2 %v19716_v22  ;;  %8006 = vmatmul.bf16.gmra.mxu3 %v19718_v54  ;;  %v12938_v33 = vor.u32 %v14054_v55, %v12937_v37  ;;  %v14078_v37 = vld [vmem:[%s21300_s7 + $0x52c] sm:$0xf0] }
 0xdb6   : > { %8511 = vmatmul.bf16.gmra.mxu0 %v19965_v56  ;;  %8540 = vmatmul.bf16.gmra.mxu1 %v19967_v40  ;;  %v7383_v9 = vpop.f32.mrf.mxu1 }
 0xdb7   : > { %v20000_v26 = vpack.c.bf16 %v7383_v9, %v7314_v32  ;;  %8114 = vmatpush.bf16.msra.mxu3 %v12486_v16  ;;  %v13951_v32 = vld [vmem:[%s21300_s7 + $0x134] sm:$0xf0]  ;;  %8620 = vmatpush.bf16.msrb.mxu0 %v12594_v59  ;;  %v14070_v59 = vld [vmem:[%s21300_s7 + $0x4ec] sm:$0xf0] }
 0xdb8   : > { %v12722_v23 = vor.u32 %v13951_v32, %v12721_v13  ;;  %v13915_v9 = vld [vmem:[%s21300_s7 + $0x14] sm:$0xf0]  ;;  %v14102_v32 = vld [vmem:[%s21300_s7 + $0x5ec] sm:$0xf0]  ;;  %8556 = vmatpush.bf16.msrb.mxu2 %v12686_v30 }
 0xdb9   : > { %v12578_v20 = vor.u32 %v13915_v9, %v12577_v50  ;;  %v20101_v57 = vpop.f32.mrf.mxu0  ;;  %v12795_v50 = vld [vmem:[%s21300_s7 + $0x1d0] sm:$0xf0]  ;;  %v12985_v9 = vld [vmem:[%s21300_s7 + $0x4c0] sm:$0xf]  ;;  %v14094_v30 = vld [vmem:[%s21300_s7 + $0x5ac] sm:$0xf0] }
 0xdba   : > { %8649 = vmatpush.bf16.msrb.mxu1 %v12722_v23  ;;  %v12798_v46 = vor.u32 %v13968_v38, %v12795_v50  ;;  %v14090_v50 = vld [vmem:[%s21300_s7 + $0x58c] sm:$0xf0] }
 0xdbb   : > { %8115 = vmatpush.bf16.msra.mxu3 %v12470_v51  ;;  %8621 = vmatpush.bf16.msrb.mxu0 %v12578_v20  ;;  %v13001_v51 = vld [vmem:[%s21300_s7 + $0x4e0] sm:$0xf] }
 0xdbc   : > { %v13002_v13 = vor.u32 %v14070_v59, %v13001_v51  ;;  %v13113_v20 = vld [vmem:[%s21300_s7 + $0x5c0] sm:$0xf]  ;;  %8557 = vmatpush.bf16.msrb.mxu2 %v12670_v17 }
 0xdbd   : > { %v13081_v17 = vld [vmem:[%s21300_s7 + $0x580] sm:$0xf] }
 0xdbe   : > { %v20051_v12 = vpop.f32.mrf.mxu1  ;;  %8650 = vmatpush.bf16.msrb.mxu1 %v12706_v47 }
 0xdbf   : > { %8116 = vmatpush.bf16.msra.mxu3 %v12454_v2  ;;  %9155 = vmatpush.bf16.msra.mxu0 %v13002_v13  ;;  %v12986_v2 = vor.u32 %v14066_v28, %v12985_v9  ;;  %v12635_v13 = vld [vmem:[%s21300_s7 + $0x90] sm:$0xf0] }
 0xdc0   : > { %8558 = vmatpush.bf16.msrb.mxu2 %v12654_v52  ;;  %v14086_v52 = vld [vmem:[%s21300_s7 + $0x56c] sm:$0xf0] }
 0xdc3   : > { %9156 = vmatpush.bf16.msra.mxu0 %v12986_v2 }
 0xdc5   : > { %7982 = vmatmul.bf16.gmra.mxu2 %v19824_v61  ;;  %8011 = vmatmul.bf16.gmra.mxu3 %v19826_v15 }
 0xdc6   : > { %8516 = vmatmul.bf16.gmra.mxu0 %v20079_v58  ;;  %8545 = vmatmul.bf16.gmra.mxu1 %v20081_v5  ;;  %v7388_v34 = vpop.f32.mrf.mxu1 }
 0xdc7   : > { %v20087_v16 = vpack.c.bf16 %v7388_v34, %v7319_v41  ;;  %v13114_v41 = vor.u32 %v14098_v6, %v13113_v20  ;;  %v13924_v20 = vld [vmem:[%s21300_s7 + $0x64] sm:$0xf]  ;;  %v12619_v6 = vld [vmem:[%s21300_s7 + $0x70] sm:$0xf0] }
 0xdce   : > { %v20103_v44 = vpop.f32.mrf.mxu1 }
 0xdd5   : > { %7987 = vmatmul.bf16.gmra.mxu2 %v19833_v42  ;;  %8016 = vmatmul.bf16.gmra.mxu3 %v19835_v19 }
 0xdd6   : > { %8521 = vmatmul.bf16.gmra.mxu0 %v20093_v29  ;;  %8550 = vmatmul.bf16.gmra.mxu1 %v20095_v3 }
 0xde3   : > { %v8031_v45 = vpop.f32.mrf.mxu0  ;;  %v8060_v0 = vpop.f32.mrf.mxu1 }
 0xde4   : > { %v20105_v11 = vadd.f32 %v8060_v0, %v8031_v45  ;;  %v12969_v45 = vld [vmem:[%s21300_s7 + $0x4a0] sm:$0xf]  ;;  %v14062_v0 = vld [vmem:[%s21300_s7 + $0x4ac] sm:$0xf0] }
 0xde5   : > { %8088 = vmatmul.bf16.vlgmr.msra.gmra.mxu2 %v19608_v31  ;;  %8117 = vmatmul.bf16.vlgmr.msra.gmra.mxu3 %v19610_v48  ;;  %v12814_v31 = vor.u32 %v13972_v8, %v12811_v7  ;;  %v13129_v48 = vld [vmem:[%s21300_s7 + $0x5e0] sm:$0xf]  ;;  %v12970_v27 = vor.u32 %v14062_v0, %v12969_v45 }
 0xde6   : > { %8622 = vmatmul.bf16.vlgmr.msrb.gmra.mxu0 %v19851_v10  ;;  %8651 = vmatmul.bf16.vlgmr.msrb.gmra.mxu1 %v19853_v24  ;;  %v13130_v23 = vor.u32 %v14102_v32, %v13129_v48  ;;  %v13097_v8 = vld [vmem:[%s21300_s7 + $0x5a0] sm:$0xf]  ;;  %v13960_v48 = vld [vmem:[%s21300_s7 + $0x184] sm:$0xf] }
 0xde7   : > { %8585 = vmatpush.bf16.msrb.mxu3 %v12814_v31  ;;  %v13098_v7 = vor.u32 %v14094_v30, %v13097_v8  ;;  %9157 = vmatpush.bf16.msra.mxu0 %v12970_v27  ;;  %v13928_v31 = vld [vmem:[%s21300_s7 + $0x84] sm:$0xf]  ;;  %v12603_v27 = vld [vmem:[%s21300_s7 + $0x50] sm:$0xf0] }
 0xde8   : > { %v7915_v21 = vpop.f32.mrf.mxu2  ;;  %v7944_v43 = vpop.f32.mrf.mxu3  ;;  %9184 = vmatpush.bf16.msra.mxu1 %v13130_v23  ;;  %v12638_v23 = vor.u32 %v13928_v31, %v12635_v13  ;;  %v13952_v8 = vld [vmem:[%s21300_s7 + $0x144] sm:$0xf]  ;;  %v14050_v31 = vld [vmem:[%s21300_s7 + $0x44c] sm:$0xf0] }
 0xde9   : > { %v20144_v36 = vadd.f32 %v7944_v43, %v7915_v21  ;;  %v12763_v21 = vld [vmem:[%s21300_s7 + $0x190] sm:$0xf0]  ;;  %v12953_v43 = vld [vmem:[%s21300_s7 + $0x480] sm:$0xf] }
 0xdea   : > { %v12766_v35 = vor.u32 %v13960_v48, %v12763_v21  ;;  %v12954_v38 = vor.u32 %v14058_v62, %v12953_v43  ;;  %8559 = vmatpush.bf16.msrb.mxu2 %v12638_v23  ;;  %v13049_v23 = vld [vmem:[%s21300_s7 + $0x540] sm:$0xf]  ;;  %v14082_v21 = vld [vmem:[%s21300_s7 + $0x54c] sm:$0xf0] }
 0xdeb   : > { %v8033_v39 = vpop.f32.mrf.mxu0  ;;  %v8062_v47 = vpop.f32.mrf.mxu1  ;;  %8586 = vmatpush.bf16.msrb.mxu3 %v12798_v46  ;;  %v13082_v46 = vor.u32 %v14090_v50, %v13081_v17  ;;  %v13916_v17 = vld [vmem:[%s21300_s7 + $0x24] sm:$0xf]  ;;  %v12587_v50 = vld [vmem:[%s21300_s7 + $0x30] sm:$0xf0] }
 0xdec   : > { %v20161_v34 = vadd.f32 %v8062_v47, %v8033_v39  ;;  %9185 = vmatpush.bf16.msra.mxu1 %v13114_v41  ;;  %9158 = vmatpush.bf16.msra.mxu0 %v12954_v38  ;;  %v13956_v39 = vld [vmem:[%s21300_s7 + $0x164] sm:$0xf]  ;;  %v12622_v47 = vor.u32 %v13924_v20, %v12619_v6  ;;  %v12747_v41 = vld [vmem:[%s21300_s7 + $0x170] sm:$0xf0]  ;;  %v12905_v20 = vld [vmem:[%s21300_s7 + $0x420] sm:$0xf] }
 0xded   : > { %v14046_v6 = vld [vmem:[%s21300_s7 + $0x42c] sm:$0xf0] }
 0xdee   : > { %8560 = vmatpush.bf16.msrb.mxu2 %v12622_v47  ;;  %v12906_v47 = vor.u32 %v14046_v6, %v12905_v20 }
 0xdef   : > { %8587 = vmatpush.bf16.msrb.mxu3 %v12782_v63  ;;  %v13920_v63 = vld [vmem:[%s21300_s7 + $0x44] sm:$0xf] }
 0xdf0   : > { %v7917_v51 = vpop.f32.mrf.mxu2  ;;  %v7946_v59 = vpop.f32.mrf.mxu3  ;;  %9186 = vmatpush.bf16.msra.mxu1 %v13098_v7  ;;  %9159 = vmatpush.bf16.msra.mxu0 %v12938_v33  ;;  %v12606_v7 = vor.u32 %v13920_v63, %v12603_v27  ;;  %v12699_v63 = vld [vmem:[%s21300_s7 + $0x110] sm:$0xf0]  ;;  %v12889_v27 = vld [vmem:[%s21300_s7 + $0x400] sm:$0xf] }
 0xdf1   : > { %v20196_v32 = vadd.f32 %v7946_v59, %v7917_v51  ;;  %v12731_v51 = vld [vmem:[%s21300_s7 + $0x150] sm:$0xf0]  ;;  %v12921_v59 = vld [vmem:[%s21300_s7 + $0x440] sm:$0xf] }
 0xdf2   : > { %v12734_v13 = vor.u32 %v13952_v8, %v12731_v51  ;;  %v12922_v48 = vor.u32 %v14050_v31, %v12921_v59  ;;  %8561 = vmatpush.bf16.msrb.mxu2 %v12606_v7  ;;  %v14042_v8 = vld [vmem:[%s21300_s7 + $0x40c] sm:$0xf0]  ;;  %v13017_v59 = vld [vmem:[%s21300_s7 + $0x500] sm:$0xf] }
 0xdf3   : > { %v8036_v9 = vpop.f32.mrf.mxu0  ;;  %v8065_v28 = vpop.f32.mrf.mxu1  ;;  %8588 = vmatpush.bf16.msrb.mxu3 %v12766_v35  ;;  %v13050_v35 = vor.u32 %v14082_v21, %v13049_v23  ;;  %v12890_v51 = vor.u32 %v14042_v8, %v12889_v27  ;;  %v14074_v31 = vld [vmem:[%s21300_s7 + $0x50c] sm:$0xf0] }
 0xdf4   : > { %v20213_v2 = vadd.f32 %v8065_v28, %v8036_v9  ;;  %9187 = vmatpush.bf16.msra.mxu1 %v13082_v46  ;;  %9160 = vmatpush.bf16.msra.mxu0 %v12922_v48  ;;  %v13948_v9 = vld [vmem:[%s21300_s7 + $0x124] sm:$0xf]  ;;  %v12590_v28 = vor.u32 %v13916_v17, %v12587_v50  ;;  %v12715_v46 = vld [vmem:[%s21300_s7 + $0x130] sm:$0xf0]  ;;  %v13018_v23 = vor.u32 %v14074_v31, %v13017_v59  ;;  %v13973_v59 = vld [vmem:[%s21300_s7 + $0x1ec] sm:$0xf] }
 0xdf5   : > { %8093 = vmatmul.bf16.gmra.mxu2 %v19716_v22  ;;  %8122 = vmatmul.bf16.gmra.mxu3 %v19718_v54  ;;  %v12750_v22 = vor.u32 %v13956_v39, %v12747_v41  ;;  %v13065_v54 = vld [vmem:[%s21300_s7 + $0x560] sm:$0xf]  ;;  %v12718_v39 = vor.u32 %v13948_v9, %v12715_v46 }
 0xdf6   : > { %8627 = vmatmul.bf16.gmra.mxu0 %v19965_v56  ;;  %8656 = vmatmul.bf16.gmra.mxu1 %v19967_v40  ;;  %v13066_v25 = vor.u32 %v14086_v52, %v13065_v54  ;;  %v13033_v41 = vld [vmem:[%s21300_s7 + $0x520] sm:$0xf]  ;;  %v13912_v54 = vld [vmem:[%s21300_s7 + $0x4] sm:$0xf]  ;;  %v12571_v52 = vld [vmem:[%s21300_s7 + $0x10] sm:$0xf0] }
 0xdf7   : > { %8589 = vmatpush.bf16.msrb.mxu3 %v12750_v22  ;;  %8562 = vmatpush.bf16.msrb.mxu2 %v12590_v28  ;;  %v13034_v55 = vor.u32 %v14078_v37, %v13033_v41  ;;  %v7410_v37 = vpack.c.bf16 %v19847_v14, %v19837_v4 }
 0xdf8   : > { %v7920_v45 = vpop.f32.mrf.mxu2  ;;  %v7949_v0 = vpop.f32.mrf.mxu3  ;;  %9188 = vmatpush.bf16.msra.mxu1 %v13066_v25  ;;  %9161 = vmatpush.bf16.msra.mxu0 %v12906_v47  ;;  %v13944_v25 = vld [vmem:[%s21300_s7 + $0x104] sm:$0xf] }
 0xdf9   : > { %v20252_v30 = vadd.f32 %v7949_v0, %v7920_v45  ;;  %v12574_v0 = vor.u32 %v13912_v54, %v12571_v52  ;;  %v12702_v7 = vor.u32 %v13944_v25, %v12699_v63  ;;  %v8803_v54 = vunpack.c.l.b16 %v19843_v53 }
 0xdfa   : > { %v8806_v52 = vunpack.c.h.b16 %v7410_v37 }
 0xdfb   : > { %v8038_v43 = vpop.f32.mrf.mxu0  ;;  %v8067_v62 = vpop.f32.mrf.mxu1  ;;  %8590 = vmatpush.bf16.msrb.mxu3 %v12734_v13  ;;  %8563 = vmatpush.bf16.msrb.mxu2 %v12574_v0 }
 0xdfc   : > { %v20269_v38 = vadd.f32 %v8067_v62, %v8038_v43  ;;  %9189 = vmatpush.bf16.msra.mxu1 %v13050_v35  ;;  %9162 = vmatpush.bf16.msra.mxu0 %v12890_v51  ;;  %v13941_v51 = vld [vmem:[%s21300_s7 + $0xec] sm:$0xf] }
 0xdff   : > { %8591 = vmatpush.bf16.msrb.mxu3 %v12718_v39 }
 0xe00   : > { %v7922_v22 = vpop.f32.mrf.mxu2  ;;  %v7951_v33 = vpop.f32.mrf.mxu3  ;;  %9190 = vmatpush.bf16.msra.mxu1 %v13034_v55 }
 0xe01   : > { %v20304_v45 = vadd.f32 %v7951_v33, %v7922_v22 }
 0xe03   : > { %v8041_v13 = vpop.f32.mrf.mxu0  ;;  %v8070_v48 = vpop.f32.mrf.mxu1  ;;  %8592 = vmatpush.bf16.msrb.mxu3 %v12702_v7 }
 0xe04   : > { %v20321_v21 = vadd.f32 %v8070_v48, %v8041_v13  ;;  %9191 = vmatpush.bf16.msra.mxu1 %v13018_v23  ;;  %v13009_v13 = vld [vmem:[%s21300_s7 + $0x4e8] sm:$0xf]  ;;  %v14071_v48 = vld [vmem:[%s21300_s7 + $0x4f4] sm:$0xf0] }
 0xe05   : > { %8098 = vmatmul.bf16.gmra.mxu2 %v19824_v61  ;;  %8127 = vmatmul.bf16.gmra.mxu3 %v19826_v15 }
 0xe06   : > { %8632 = vmatmul.bf16.gmra.mxu0 %v20079_v58  ;;  %8661 = vmatmul.bf16.gmra.mxu1 %v20081_v5 }
 0xe08   : > { %v7925_v43 = vpop.f32.mrf.mxu2  ;;  %v7954_v62 = vpop.f32.mrf.mxu3 }
 0xe09   : > { %v20327_v35 = vadd.f32 %v7954_v62, %v7925_v43  ;;  %v13010_v62 = vor.u32 %v14071_v48, %v13009_v13  ;;  %v12787_v48 = vld [vmem:[%s21300_s7 + $0x1b8] sm:$0xf0] }
 0xe0b   : > { %v8043_v17 = vpop.f32.mrf.mxu0  ;;  %v8072_v50 = vpop.f32.mrf.mxu1  ;;  %9271 = vmatpush.bf16.msrb.mxu0 %v13010_v62  ;;  %v14063_v62 = vld [vmem:[%s21300_s7 + $0x4b4] sm:$0xf0] }
 0xe0c   : > { %v20329_v9 = vadd.f32 %v8072_v50, %v8043_v17  ;;  %v13137_v17 = vld [vmem:[%s21300_s7 + $0x5e8] sm:$0xf]  ;;  %v14103_v50 = vld [vmem:[%s21300_s7 + $0x5f4] sm:$0xf0] }
 0xe10   : > { %v7927_v28 = vpop.f32.mrf.mxu2  ;;  %v7956_v46 = vpop.f32.mrf.mxu3 }
 0xe11   : > { %v20331_v20 = vadd.f32 %v7956_v46, %v7927_v28  ;;  %v13138_v28 = vor.u32 %v14103_v50, %v13137_v17 }
 0xe13   : > { %v8046_v61 = vpop.f32.mrf.mxu0  ;;  %v8075_v6 = vpop.f32.mrf.mxu1  ;;  %9300 = vmatpush.bf16.msrb.mxu1 %v13138_v28 }
 0xe14   : > { %v20333_v15 = vadd.f32 %v8075_v6, %v8046_v61  ;;  %v13937_v6 = vld [vmem:[%s21300_s7 + $0xcc] sm:$0xf] }
 0xe15   : > { %8103 = vmatmul.bf16.gmra.mxu2 %v19833_v42  ;;  %8132 = vmatmul.bf16.gmra.mxu3 %v19835_v19  ;;  %v8804_v42 = vunpack.c.h.b16 %v19843_v53  ;;  %v8805_v19 = vunpack.c.l.b16 %v7410_v37  ;;  %v12691_v53 = vld [vmem:[%s21300_s7 + $0xf8] sm:$0xf0]  ;;  %v7412_v37 = vpack.c.bf16 %v19955_v49, %v19897_v60  ;;  %v13121_v60 = vld [vmem:[%s21300_s7 + $0x5c8] sm:$0xf]  ;;  %v14099_v49 = vld [vmem:[%s21300_s7 + $0x5d4] sm:$0xf0] }
 0xe16   : > { %8637 = vmatmul.bf16.gmra.mxu0 %v20093_v29  ;;  %8666 = vmatmul.bf16.gmra.mxu1 %v20095_v3  ;;  %v12694_v31 = vor.u32 %v13941_v51, %v12691_v53  ;;  %v13933_v51 = vld [vmem:[%s21300_s7 + $0xac] sm:$0xf]  ;;  %v12659_v53 = vld [vmem:[%s21300_s7 + $0xb8] sm:$0xf0] }
 0xe17   : > { %v20349_v27 = vpack.c.b16 %v8805_v19, %v8803_v54  ;;  %v20351_v8 = vpack.c.b16 %v8806_v52, %v8804_v42  ;;  %v12803_v54 = vld [vmem:[%s21300_s7 + $0x1d8] sm:$0xf0]  ;;  %v12993_v42 = vld [vmem:[%s21300_s7 + $0x4c8] sm:$0xf]  ;;  %v14067_v19 = vld [vmem:[%s21300_s7 + $0x4d4] sm:$0xf0]  ;;  %v8809_v13 = vunpack.c.l.b16 %v7412_v37  ;;  %v8810_v17 = vunpack.c.h.b16 %v7412_v37 }
 0xe18   : > { %v7930_v39 = vpop.f32.mrf.mxu2  ;;  %v7959_v47 = vpop.f32.mrf.mxu3  ;;  %8672 = vmatpush.bf16.msra.mxu2 %v12694_v31  ;;  %v8807_v31 = vunpack.c.l.b16 %v19886_v1  ;;  %v13929_v37 = vld [vmem:[%s21300_s7 + $0x8c] sm:$0xf] }
 0xe19   : > { %v20339_v41 = vadd.f32 %v7959_v47, %v7930_v39  ;;  %v12675_v39 = vld [vmem:[%s21300_s7 + $0xd8] sm:$0xf0]  ;;  %v13969_v47 = vld [vmem:[%s21300_s7 + $0x1cc] sm:$0xf] }
 0xe1a   : > { %v12806_v52 = vor.u32 %v13969_v47, %v12803_v54  ;;  %v13961_v54 = vld [vmem:[%s21300_s7 + $0x18c] sm:$0xf] }
 0xe1b   : > { %v8048_v55 = vpop.f32.mrf.mxu0  ;;  %v8077_v22 = vpop.f32.mrf.mxu1 }
 0xe1c   : > { %v20343_v33 = vadd.f32 %v8077_v22, %v8048_v55  ;;  %v12678_v22 = vor.u32 %v13937_v6, %v12675_v39 }
 0xe1e   : > { %8673 = vmatpush.bf16.msra.mxu2 %v12678_v22  ;;  %v12643_v22 = vld [vmem:[%s21300_s7 + $0x98] sm:$0xf0] }
 0xe20   : > { %v7932_v25 = vpop.f32.mrf.mxu2  ;;  %v7961_v0 = vpop.f32.mrf.mxu3 }
 0xe21   : > { %v20347_v63 = vadd.f32 %v7961_v0, %v7932_v25  ;;  %v12994_v25 = vor.u32 %v14067_v19, %v12993_v42  ;;  %v12646_v19 = vor.u32 %v13929_v37, %v12643_v22  ;;  %v13921_v22 = vld [vmem:[%s21300_s7 + $0x4c] sm:$0xf] }
 0xe23   : > { %v8507_v7 = vpop.f32.mrf.mxu0  ;;  %v8536_v4 = vpop.f32.mrf.mxu1  ;;  %9272 = vmatpush.bf16.msrb.mxu0 %v12994_v25  ;;  %v12961_v25 = vld [vmem:[%s21300_s7 + $0x488] sm:$0xf] }
 0xe24   : > { %v8508_v14 = vadd.f32 %v8507_v7, %v20144_v36  ;;  %v12819_v36 = vld [vmem:[%s21300_s7 + $0x1f8] sm:$0xf0] }
 0xe25   : > { %8564 = vmatmul.bf16.vlgmr.msrb.gmra.mxu2 %v19851_v10  ;;  %8593 = vmatmul.bf16.vlgmr.msrb.gmra.mxu3 %v19853_v24  ;;  %v12822_v43 = vor.u32 %v13973_v59, %v12819_v36  ;;  %v13965_v59 = vld [vmem:[%s21300_s7 + $0x1ac] sm:$0xf]  ;;  %v8808_v36 = vunpack.c.h.b16 %v19886_v1 }
 0xe26   : > { %v20374_v23 = vadd.f32 %v8536_v4, %v8508_v14  ;;  %9163 = vmatmul.bf16.vlgmr.msra.gmra.mxu0 %v20349_v27  ;;  %9192 = vmatmul.bf16.vlgmr.msra.gmra.mxu1 %v20351_v8  ;;  %v13122_v4 = vor.u32 %v14099_v49, %v13121_v60  ;;  %v12790_v28 = vor.u32 %v13965_v59, %v12787_v48  ;;  %v14059_v60 = vld [vmem:[%s21300_s7 + $0x494] sm:$0xf0] }
 0xe27   : > { %8701 = vmatpush.bf16.msra.mxu3 %v12822_v43  ;;  %v12977_v43 = vld [vmem:[%s21300_s7 + $0x4a8] sm:$0xf]  ;;  %v20461_v49 = vpack.c.b16 %v8809_v13, %v8807_v31  ;;  %v13925_v31 = vld [vmem:[%s21300_s7 + $0x6c] sm:$0xf] }
 0xe28   : > { %v7973_v46 = vpop.f32.mrf.mxu2  ;;  %v8002_v61 = vpop.f32.mrf.mxu3  ;;  %9301 = vmatpush.bf16.msrb.mxu1 %v13122_v4  ;;  %v12978_v1 = vor.u32 %v14063_v62, %v12977_v43  ;;  %v12962_v4 = vor.u32 %v14059_v60, %v12961_v25  ;;  %v13957_v13 = vld [vmem:[%s21300_s7 + $0x16c] sm:$0xf]  ;;  %v12945_v62 = vld [vmem:[%s21300_s7 + $0x468] sm:$0xf] }
 0xe29   : > { %v20395_v55 = vadd.f32 %v8002_v61, %v7973_v46  ;;  %v13105_v46 = vld [vmem:[%s21300_s7 + $0x5a8] sm:$0xf]  ;;  %v14095_v61 = vld [vmem:[%s21300_s7 + $0x5b4] sm:$0xf0] }
 0xe2a   : > { %v13106_v6 = vor.u32 %v14095_v61, %v13105_v46  ;;  %9273 = vmatpush.bf16.msrb.mxu0 %v12978_v1  ;;  %v13073_v61 = vld [vmem:[%s21300_s7 + $0x568] sm:$0xf] }
 0xe2b   : > { %v8509_v0 = vpop.f32.mrf.mxu0  ;;  %v8538_v7 = vpop.f32.mrf.mxu1  ;;  %8702 = vmatpush.bf16.msra.mxu3 %v12806_v52  ;;  %v12771_v52 = vld [vmem:[%s21300_s7 + $0x198] sm:$0xf0] }
 0xe2c   : > { %v8510_v14 = vadd.f32 %v8509_v0, %v20196_v32  ;;  %v12662_v32 = vor.u32 %v13933_v51, %v12659_v53  ;;  %9302 = vmatpush.bf16.msrb.mxu1 %v13106_v6  ;;  %v20463_v0 = vpack.c.b16 %v8810_v17, %v8808_v36  ;;  %v14091_v51 = vld [vmem:[%s21300_s7 + $0x594] sm:$0xf0]  ;;  %v12627_v36 = vld [vmem:[%s21300_s7 + $0x78] sm:$0xf0] }
 0xe2d   : > { %v12630_v43 = vor.u32 %v13925_v31, %v12627_v36  ;;  %v14055_v17 = vld [vmem:[%s21300_s7 + $0x474] sm:$0xf0]  ;;  %v13917_v36 = vld [vmem:[%s21300_s7 + $0x2c] sm:$0xf] }
 0xe2e   : > { %v20433_v50 = vadd.f32 %v8538_v7, %v8510_v14  ;;  %8674 = vmatpush.bf16.msra.mxu2 %v12662_v32  ;;  %v12774_v7 = vor.u32 %v13961_v54, %v12771_v52  ;;  %v13089_v14 = vld [vmem:[%s21300_s7 + $0x588] sm:$0xf]  ;;  %9274 = vmatpush.bf16.msrb.mxu0 %v12962_v4  ;;  %v12946_v46 = vor.u32 %v14055_v17, %v12945_v62  ;;  %v14087_v6 = vld [vmem:[%s21300_s7 + $0x574] sm:$0xf0]  ;;  %v12611_v54 = vld [vmem:[%s21300_s7 + $0x58] sm:$0xf0]  ;;  %v8812_v62 = vunpack.c.h.b16 %v20000_v26 }
 0xe2f   : > { %8703 = vmatpush.bf16.msra.mxu3 %v12790_v28  ;;  %v13090_v32 = vor.u32 %v14091_v51, %v13089_v14  ;;  %v7414_v52 = vpack.c.bf16 %v20051_v12, %v20043_v18  ;;  %v12614_v60 = vor.u32 %v13921_v22, %v12611_v54  ;;  %v12929_v4 = vld [vmem:[%s21300_s7 + $0x448] sm:$0xf]  ;;  %v14051_v14 = vld [vmem:[%s21300_s7 + $0x454] sm:$0xf0] }
 0xe30   : > { %v7975_v39 = vpop.f32.mrf.mxu2  ;;  %v8004_v47 = vpop.f32.mrf.mxu3  ;;  %v13057_v18 = vld [vmem:[%s21300_s7 + $0x548] sm:$0xf]  ;;  %v14083_v12 = vld [vmem:[%s21300_s7 + $0x554] sm:$0xf0] }
 0xe31   : > { %v20450_v42 = vadd.f32 %v8004_v47, %v7975_v39  ;;  %9303 = vmatpush.bf16.msrb.mxu1 %v13090_v32  ;;  %v13074_v39 = vor.u32 %v14087_v6, %v13073_v61  ;;  %v8813_v17 = vunpack.c.l.b16 %v7414_v52  ;;  %v14047_v61 = vld [vmem:[%s21300_s7 + $0x434] sm:$0xf0]  ;;  %v8814_v6 = vunpack.c.h.b16 %v7414_v52  ;;  %v13913_v52 = vld [vmem:[%s21300_s7 + $0xc] sm:$0xf] }
 0xe32   : > { %8675 = vmatpush.bf16.msra.mxu2 %v12646_v19  ;;  %9275 = vmatpush.bf16.msrb.mxu0 %v12946_v46  ;;  %v13953_v19 = vld [vmem:[%s21300_s7 + $0x14c] sm:$0xf]  ;;  %v12913_v46 = vld [vmem:[%s21300_s7 + $0x428] sm:$0xf]  ;;  %v14079_v22 = vld [vmem:[%s21300_s7 + $0x534] sm:$0xf0] }
 0xe33   : > { %v8512_v53 = vpop.f32.mrf.mxu0  ;;  %v8541_v59 = vpop.f32.mrf.mxu1  ;;  %8704 = vmatpush.bf16.msra.mxu3 %v12774_v7  ;;  %v12739_v7 = vld [vmem:[%s21300_s7 + $0x158] sm:$0xf0] }
 0xe34   : > { %v8513_v48 = vadd.f32 %v8512_v53, %v20252_v30  ;;  %v12755_v30 = vld [vmem:[%s21300_s7 + $0x178] sm:$0xf0]  ;;  %v12742_v51 = vor.u32 %v13953_v19, %v12739_v7  ;;  %v12930_v53 = vor.u32 %v14051_v14, %v12929_v4  ;;  %v13945_v4 = vld [vmem:[%s21300_s7 + $0x10c] sm:$0xf] }
 0xe35   : > { %8569 = vmatmul.bf16.gmra.mxu2 %v19965_v56  ;;  %8598 = vmatmul.bf16.gmra.mxu3 %v19967_v40  ;;  %v12758_v1 = vor.u32 %v13957_v13, %v12755_v30  ;;  %v12595_v13 = vld [vmem:[%s21300_s7 + $0x38] sm:$0xf0]  ;;  %v8811_v30 = vunpack.c.l.b16 %v20000_v26  ;;  %v13041_v26 = vld [vmem:[%s21300_s7 + $0x528] sm:$0xf] }
 0xe36   : > { %v20492_v28 = vadd.f32 %v8541_v59, %v8513_v48  ;;  %9168 = vmatmul.bf16.gmra.mxu0 %v20461_v49  ;;  %9197 = vmatmul.bf16.gmra.mxu1 %v20463_v0  ;;  %v13058_v48 = vor.u32 %v14083_v12, %v13057_v18  ;;  %v13042_v54 = vor.u32 %v14079_v22, %v13041_v26  ;;  %v12579_v7 = vld [vmem:[%s21300_s7 + $0x18] sm:$0xf0]  ;;  %v12897_v18 = vld [vmem:[%s21300_s7 + $0x408] sm:$0xf]  ;;  %v14043_v12 = vld [vmem:[%s21300_s7 + $0x414] sm:$0xf0]  ;;  %v8815_v26 = vunpack.c.l.b16 %v20087_v16 }
 0xe37   : > { %8676 = vmatpush.bf16.msra.mxu2 %v12630_v43  ;;  %8705 = vmatpush.bf16.msra.mxu3 %v12758_v1  ;;  %v13949_v43 = vld [vmem:[%s21300_s7 + $0x12c] sm:$0xf]  ;;  %v12723_v1 = vld [vmem:[%s21300_s7 + $0x138] sm:$0xf0]  ;;  %v8816_v22 = vunpack.c.h.b16 %v20087_v16 }
 0xe38   : > { %v7978_v47 = vpop.f32.mrf.mxu2  ;;  %v8007_v37 = vpop.f32.mrf.mxu3  ;;  %9304 = vmatpush.bf16.msrb.mxu1 %v13074_v39  ;;  %9276 = vmatpush.bf16.msrb.mxu0 %v12930_v53  ;;  %v12707_v53 = vld [vmem:[%s21300_s7 + $0x118] sm:$0xf0] }
 0xe39   : > { %v20513_v25 = vadd.f32 %v8007_v37, %v7978_v47  ;;  %v12726_v47 = vor.u32 %v13949_v43, %v12723_v1  ;;  %v12914_v37 = vor.u32 %v14047_v61, %v12913_v46 }
 0xe3b   : > { %v8514_v59 = vpop.f32.mrf.mxu0  ;;  %v8543_v32 = vpop.f32.mrf.mxu1  ;;  %8677 = vmatpush.bf16.msra.mxu2 %v12614_v60  ;;  %8706 = vmatpush.bf16.msra.mxu3 %v12742_v51  ;;  %v12582_v51 = vor.u32 %v13913_v52, %v12579_v7 }
 0xe3c   : > { %v8515_v31 = vadd.f32 %v8514_v59, %v20304_v45  ;;  %v12598_v45 = vor.u32 %v13917_v36, %v12595_v13  ;;  %9305 = vmatpush.bf16.msrb.mxu1 %v13058_v48  ;;  %9277 = vmatpush.bf16.msrb.mxu0 %v12914_v37  ;;  %v20579_v59 = vpack.c.b16 %v8813_v17, %v8811_v30  ;;  %v13025_v36 = vld [vmem:[%s21300_s7 + $0x508] sm:$0xf]  ;;  %v14075_v13 = vld [vmem:[%s21300_s7 + $0x514] sm:$0xf0] }
 0xe3d   : > { %v12710_v48 = vor.u32 %v13945_v4, %v12707_v53  ;;  %v13026_v1 = vor.u32 %v14075_v13, %v13025_v36 }
 0xe3e   : > { %v20551_v39 = vadd.f32 %v8543_v32, %v8515_v31  ;;  %v20581_v32 = vpack.c.b16 %v8814_v6, %v8812_v62  ;;  %v12898_v31 = vor.u32 %v14043_v12, %v12897_v18 }
 0xe3f   : > { %8678 = vmatpush.bf16.msra.mxu2 %v12598_v45  ;;  %8707 = vmatpush.bf16.msra.mxu3 %v12726_v47 }
 0xe40   : > { %v7980_v19 = vpop.f32.mrf.mxu2  ;;  %v8009_v60 = vpop.f32.mrf.mxu3  ;;  %9306 = vmatpush.bf16.msrb.mxu1 %v13042_v54  ;;  %9278 = vmatpush.bf16.msrb.mxu0 %v12898_v31 }
 0xe41   : > { %v20568_v14 = vadd.f32 %v8009_v60, %v7980_v19 }
 0xe43   : > { %v8517_v43 = vpop.f32.mrf.mxu0  ;;  %v8546_v45 = vpop.f32.mrf.mxu1  ;;  %8679 = vmatpush.bf16.msra.mxu2 %v12582_v51  ;;  %8708 = vmatpush.bf16.msra.mxu3 %v12710_v48 }
 0xe44   : > { %v8518_v30 = vadd.f32 %v8517_v43, %v20327_v35  ;;  %9307 = vmatpush.bf16.msrb.mxu1 %v13026_v1  ;;  %v7416_v35 = vpack.c.bf16 %v20103_v44, %v20101_v57 }
 0xe45   : > { %8574 = vmatmul.bf16.gmra.mxu2 %v20079_v58  ;;  %8603 = vmatmul.bf16.gmra.mxu3 %v20081_v5 }
 0xe46   : > { %v20592_v62 = vadd.f32 %v8546_v45, %v8518_v30  ;;  %9173 = vmatmul.bf16.gmra.mxu0 %v20579_v59  ;;  %9202 = vmatmul.bf16.gmra.mxu1 %v20581_v32  ;;  %v8817_v54 = vunpack.c.l.b16 %v7416_v35  ;;  %v8818_v19 = vunpack.c.h.b16 %v7416_v35  ;;  %v14068_v35 = vld [vmem:[%s21300_s7 + $0x4e4] sm:$0xf] }
 0xe48   : > { %v7983_v17 = vpop.f32.mrf.mxu2  ;;  %v8012_v46 = vpop.f32.mrf.mxu3  ;;  %v20607_v51 = vpack.c.b16 %v8817_v54, %v8815_v26  ;;  %v20609_v53 = vpack.c.b16 %v8818_v19, %v8816_v22  ;;  %v14096_v19 = vld [vmem:[%s21300_s7 + $0x5c4] sm:$0xf] }
 0xe49   : > { %v20596_v61 = vadd.f32 %v8012_v46, %v7983_v17 }
 0xe4b   : > { %v8519_v6 = vpop.f32.mrf.mxu0  ;;  %v8548_v47 = vpop.f32.mrf.mxu1 }
 0xe4c   : > { %v8520_v37 = vadd.f32 %v8519_v6, %v20331_v20  ;;  %v13003_v6 = vld [vmem:[%s21300_s7 + $0x4f0] sm:$0xf0] }
 0xe4e   : > { %v20603_v60 = vadd.f32 %v8548_v47, %v8520_v37  ;;  %v13006_v47 = vor.u32 %v14068_v35, %v13003_v6  ;;  %v12955_v35 = vld [vmem:[%s21300_s7 + $0x490] sm:$0xf0]  ;;  %v14088_v6 = vld [vmem:[%s21300_s7 + $0x584] sm:$0xf] }
 0xe50   : > { %v7985_v52 = vpop.f32.mrf.mxu2  ;;  %v8014_v7 = vpop.f32.mrf.mxu3  ;;  %9213 = vmatpush.bf16.msrb.mxu2 %v13006_v47 }
 0xe51   : > { %v20605_v4 = vadd.f32 %v8014_v7, %v7985_v52 }
 0xe53   : > { %v8522_v57 = vpop.f32.mrf.mxu0  ;;  %v8551_v44 = vpop.f32.mrf.mxu1 }
 0xe54   : > { %v8523_v20 = vadd.f32 %v8522_v57, %v20339_v41  ;;  %v13115_v57 = vld [vmem:[%s21300_s7 + $0x5d0] sm:$0xf0] }
 0xe55   : > { %8579 = vmatmul.bf16.gmra.mxu2 %v20093_v29  ;;  %8608 = vmatmul.bf16.gmra.mxu3 %v20095_v3 }
 0xe56   : > { %v20614_v16 = vadd.f32 %v8551_v44, %v8523_v20  ;;  %9178 = vmatmul.bf16.gmra.mxu0 %v20607_v51  ;;  %9207 = vmatmul.bf16.gmra.mxu1 %v20609_v53  ;;  %v13118_v44 = vor.u32 %v14096_v19, %v13115_v57  ;;  %v12939_v19 = vld [vmem:[%s21300_s7 + $0x470] sm:$0xf0] }
 0xe58   : > { %v7988_v18 = vpop.f32.mrf.mxu2  ;;  %v8017_v12 = vpop.f32.mrf.mxu3 }
 0xe59   : > { %v20618_v48 = vadd.f32 %v8017_v12, %v7988_v18  ;;  %v14060_v12 = vld [vmem:[%s21300_s7 + $0x4a4] sm:$0xf] }
 0xe5b   : > { %v8524_v31 = vpop.f32.mrf.mxu0  ;;  %v8553_v36 = vpop.f32.mrf.mxu1 }
 0xe5c   : > { %v8525_v13 = vadd.f32 %v8524_v31, %v20347_v63  ;;  %v14100_v63 = vld [vmem:[%s21300_s7 + $0x5e4] sm:$0xf]  ;;  %v12971_v31 = vld [vmem:[%s21300_s7 + $0x4b0] sm:$0xf0] }
 0xe5e   : > { %v20621_v43 = vadd.f32 %v8553_v36, %v8525_v13  ;;  %v14092_v36 = vld [vmem:[%s21300_s7 + $0x5a4] sm:$0xf]  ;;  %v12974_v13 = vor.u32 %v14060_v12, %v12971_v31 }
 0xe60   : > { %v7990_v41 = vpop.f32.mrf.mxu2  ;;  %v8019_v45 = vpop.f32.mrf.mxu3 }
 0xe61   : > { %v20623_v1 = vadd.f32 %v8019_v45, %v7990_v41  ;;  %v13099_v41 = vld [vmem:[%s21300_s7 + $0x5b0] sm:$0xf0] }
 0xe62   : > { %v13102_v45 = vor.u32 %v14092_v36, %v13099_v41 }
 0xe63   : > { %v8623_v30 = vpop.f32.mrf.mxu0  ;;  %v8652_v17 = vpop.f32.mrf.mxu1 }
 0xe64   : > { %v8624_v46 = vadd.f32 %v8623_v30, %v20105_v11  ;;  %v13131_v11 = vld [vmem:[%s21300_s7 + $0x5f0] sm:$0xf0] }
 0xe65   : > { %8680 = vmatmul.bf16.vlgmr.msra.gmra.mxu2 %v19851_v10  ;;  %8709 = vmatmul.bf16.vlgmr.msra.gmra.mxu3 %v19853_v24  ;;  %v13134_v26 = vor.u32 %v14100_v63, %v13131_v11  ;;  %v14064_v10 = vld [vmem:[%s21300_s7 + $0x4c4] sm:$0xf]  ;;  %v12987_v24 = vld [vmem:[%s21300_s7 + $0x4d0] sm:$0xf0] }
 0xe66   : > { %v20640_v37 = vadd.f32 %v8652_v17, %v8624_v46  ;;  %9279 = vmatmul.bf16.vlgmr.msrb.gmra.mxu0 %v20349_v27  ;;  %9308 = vmatmul.bf16.vlgmr.msrb.gmra.mxu1 %v20351_v8  ;;  %v12990_v7 = vor.u32 %v14064_v10, %v12987_v24  ;;  %v14056_v46 = vld [vmem:[%s21300_s7 + $0x484] sm:$0xf]  ;;  %v13083_v11 = vld [vmem:[%s21300_s7 + $0x590] sm:$0xf0] }
 0xe67   : > { %9242 = vmatpush.bf16.msrb.mxu3 %v13134_v26  ;;  %v12958_v47 = vor.u32 %v14056_v46, %v12955_v35  ;;  %v13086_v26 = vor.u32 %v14088_v6, %v13083_v11  ;;  %v14052_v24 = vld [vmem:[%s21300_s7 + $0x464] sm:$0xf] }
 0xe68   : > { %v8089_v22 = vpop.f32.mrf.mxu2  ;;  %v8118_v54 = vpop.f32.mrf.mxu3  ;;  %9214 = vmatpush.bf16.msrb.mxu2 %v12990_v7  ;;  %v14084_v7 = vld [vmem:[%s21300_s7 + $0x564] sm:$0xf]  ;;  %v12942_v57 = vor.u32 %v14052_v24, %v12939_v19 }
 0xe69   : > { %v20653_v52 = vadd.f32 %v8118_v54, %v8089_v22  ;;  %v14044_v6 = vld [vmem:[%s21300_s7 + $0x424] sm:$0xf] }
 0xe6a   : > { %v14076_v11 = vld [vmem:[%s21300_s7 + $0x524] sm:$0xf] }
 0xe6b   : > { %v20658_v20 = vpop.f32.mrf.mxu0  ;;  %v20660_v18 = vpop.f32.mrf.mxu1  ;;  %9243 = vmatpush.bf16.msrb.mxu3 %v13118_v44  ;;  %v14040_v19 = vld [vmem:[%s21300_s7 + $0x404] sm:$0xf] }
 0xe6c   : > { %9215 = vmatpush.bf16.msrb.mxu2 %v12974_v13  ;;  %v14080_v13 = vld [vmem:[%s21300_s7 + $0x544] sm:$0xf] }
 0xe6f   : > { %9244 = vmatpush.bf16.msrb.mxu3 %v13102_v45 }
 0xe70   : > { %v8091_v30 = vpop.f32.mrf.mxu2  ;;  %v8120_v17 = vpop.f32.mrf.mxu3  ;;  %9216 = vmatpush.bf16.msrb.mxu2 %v12958_v47  ;;  %v12907_v47 = vld [vmem:[%s21300_s7 + $0x430] sm:$0xf0] }
 0xe71   : > { %v20683_v63 = vadd.f32 %v8120_v17, %v8091_v30  ;;  %v13051_v30 = vld [vmem:[%s21300_s7 + $0x550] sm:$0xf0] }
 0xe72   : > { %v13054_v17 = vor.u32 %v14080_v13, %v13051_v30 }
 0xe73   : > { %v8628_v22 = vpop.f32.mrf.mxu0  ;;  %v8657_v54 = vpop.f32.mrf.mxu1  ;;  %9245 = vmatpush.bf16.msrb.mxu3 %v13086_v26  ;;  %v12910_v26 = vor.u32 %v14044_v6, %v12907_v47 }
 0xe74   : > { %v8629_v10 = vadd.f32 %v8628_v22, %v20213_v2  ;;  %v13067_v2 = vld [vmem:[%s21300_s7 + $0x570] sm:$0xf0]  ;;  %9217 = vmatpush.bf16.msrb.mxu2 %v12942_v57  ;;  %v14072_v57 = vld [vmem:[%s21300_s7 + $0x504] sm:$0xf] }
 0xe75   : > { %8685 = vmatmul.bf16.gmra.mxu2 %v19965_v56  ;;  %8714 = vmatmul.bf16.gmra.mxu3 %v19967_v40  ;;  %v13070_v12 = vor.u32 %v14084_v7, %v13067_v2  ;;  %v14048_v56 = vld [vmem:[%s21300_s7 + $0x444] sm:$0xf]  ;;  %v12923_v40 = vld [vmem:[%s21300_s7 + $0x450] sm:$0xf0] }
 0xe76   : > { %v20703_v44 = vadd.f32 %v8657_v54, %v8629_v10  ;;  %9284 = vmatmul.bf16.gmra.mxu0 %v20461_v49  ;;  %9313 = vmatmul.bf16.gmra.mxu1 %v20463_v0  ;;  %v12926_v45 = vor.u32 %v14048_v56, %v12923_v40  ;;  %v13035_v22 = vld [vmem:[%s21300_s7 + $0x530] sm:$0xf0] }
 0xe77   : > { %9246 = vmatpush.bf16.msrb.mxu3 %v13070_v12  ;;  %v13038_v54 = vor.u32 %v14076_v11, %v13035_v22  ;;  %v12891_v7 = vld [vmem:[%s21300_s7 + $0x410] sm:$0xf0] }
 0xe78   : > { %v8094_v31 = vpop.f32.mrf.mxu2  ;;  %v8123_v36 = vpop.f32.mrf.mxu3  ;;  %9218 = vmatpush.bf16.msrb.mxu2 %v12926_v45  ;;  %v12894_v12 = vor.u32 %v14040_v19, %v12891_v7 }
 0xe79   : > { %v20716_v41 = vadd.f32 %v8123_v36, %v8094_v31  ;;  %v13019_v31 = vld [vmem:[%s21300_s7 + $0x510] sm:$0xf0] }
 0xe7a   : > { %v13022_v36 = vor.u32 %v14072_v57, %v13019_v31 }
 0xe7b   : > { %v20721_v46 = vpop.f32.mrf.mxu0  ;;  %v20723_v35 = vpop.f32.mrf.mxu1  ;;  %9247 = vmatpush.bf16.msrb.mxu3 %v13054_v17 }
 0xe7c   : > { %9219 = vmatpush.bf16.msrb.mxu2 %v12910_v26 }
 0xe7f   : > { %9248 = vmatpush.bf16.msrb.mxu3 %v13038_v54 }
 0xe80   : > { %v8096_v10 = vpop.f32.mrf.mxu2  ;;  %v8125_v24 = vpop.f32.mrf.mxu3  ;;  %9220 = vmatpush.bf16.msrb.mxu2 %v12894_v12 }
 0xe81   : > { %v20746_v2 = vadd.f32 %v8125_v24, %v8096_v10 }
 0xe83   : > { %v8633_v56 = vpop.f32.mrf.mxu0  ;;  %v8662_v40 = vpop.f32.mrf.mxu1  ;;  %9249 = vmatpush.bf16.msrb.mxu3 %v13022_v36 }
 0xe84   : > { %v8634_v13 = vadd.f32 %v8633_v56, %v20321_v21 }
 0xe85   : > { %8690 = vmatmul.bf16.gmra.mxu2 %v20079_v58  ;;  %8719 = vmatmul.bf16.gmra.mxu3 %v20081_v5 }
 0xe86   : > { %v20754_v45 = vadd.f32 %v8662_v40, %v8634_v13  ;;  %9289 = vmatmul.bf16.gmra.mxu0 %v20579_v59  ;;  %9318 = vmatmul.bf16.gmra.mxu1 %v20581_v32 }
 0xe88   : > { %v8099_v30 = vpop.f32.mrf.mxu2  ;;  %v8128_v17 = vpop.f32.mrf.mxu3 }
 0xe89   : > { %v20758_v6 = vadd.f32 %v8128_v17, %v8099_v30  ;;  %v14069_v30 = vld [vmem:[%s21300_s7 + $0x4ec] sm:$0xf]  ;;  %v13011_v17 = vld [vmem:[%s21300_s7 + $0x4f8] sm:$0xf0] }
 0xe8b   : > { %v20760_v47 = vpop.f32.mrf.mxu0  ;;  %v20762_v11 = vpop.f32.mrf.mxu1 }
 0xe90   : > { %v8101_v21 = vpop.f32.mrf.mxu2  ;;  %v8130_v26 = vpop.f32.mrf.mxu3 }
 0xe91   : > { %v20764_v22 = vadd.f32 %v8130_v26, %v8101_v21  ;;  %v13014_v21 = vor.u32 %v14069_v30, %v13011_v17  ;;  %v13139_v26 = vld [vmem:[%s21300_s7 + $0x5f8] sm:$0xf0]  ;;  %v14061_v17 = vld [vmem:[%s21300_s7 + $0x4ac] sm:$0xf] }
 0xe93   : > { %v8638_v58 = vpop.f32.mrf.mxu0  ;;  %v8667_v5 = vpop.f32.mrf.mxu1  ;;  %9329 = vmatpush.bf16.msra.mxu2 %v13014_v21 }
 0xe94   : > { %v8639_v54 = vadd.f32 %v8638_v58, %v20333_v15 }
 0xe95   : > { %8695 = vmatmul.bf16.gmra.mxu2 %v20093_v29  ;;  %8724 = vmatmul.bf16.gmra.mxu3 %v20095_v3 }
 0xe96   : > { %v20769_v10 = vadd.f32 %v8667_v5, %v8639_v54  ;;  %9294 = vmatmul.bf16.gmra.mxu0 %v20607_v51  ;;  %9323 = vmatmul.bf16.gmra.mxu1 %v20609_v53 }
 0xe98   : > { %v8104_v24 = vpop.f32.mrf.mxu2  ;;  %v8133_v19 = vpop.f32.mrf.mxu3 }
 0xe99   : > { %v20773_v7 = vadd.f32 %v8133_v19, %v8104_v24  ;;  %v14065_v19 = vld [vmem:[%s21300_s7 + $0x4cc] sm:$0xf] }
 0xe9b   : > { %v8640_v57 = vpop.f32.mrf.mxu0  ;;  %v8669_v12 = vpop.f32.mrf.mxu1 }
 0xe9c   : > { %v8641_v31 = vadd.f32 %v8640_v57, %v20343_v33  ;;  %v14101_v33 = vld [vmem:[%s21300_s7 + $0x5ec] sm:$0xf]  ;;  %v12995_v57 = vld [vmem:[%s21300_s7 + $0x4d8] sm:$0xf0] }
 0xe9d   : > { %v13142_v5 = vor.u32 %v14101_v33, %v13139_v26  ;;  %v14093_v33 = vld [vmem:[%s21300_s7 + $0x5ac] sm:$0xf]  ;;  %v13107_v26 = vld [vmem:[%s21300_s7 + $0x5b8] sm:$0xf0] }
 0xe9e   : > { %v20776_v36 = vadd.f32 %v8669_v12, %v8641_v31  ;;  %v14097_v12 = vld [vmem:[%s21300_s7 + $0x5cc] sm:$0xf]  ;;  %v12998_v31 = vor.u32 %v14065_v19, %v12995_v57 }
 0xe9f   : > { %9358 = vmatpush.bf16.msra.mxu3 %v13142_v5  ;;  %v14057_v57 = vld [vmem:[%s21300_s7 + $0x48c] sm:$0xf] }
 0xea0   : > { %v8106_v15 = vpop.f32.mrf.mxu2  ;;  %v8135_v29 = vpop.f32.mrf.mxu3  ;;  %9330 = vmatpush.bf16.msra.mxu2 %v12998_v31 }
 0xea1   : > { %v20778_v56 = vadd.f32 %v8135_v29, %v8106_v15  ;;  %v13123_v15 = vld [vmem:[%s21300_s7 + $0x5d8] sm:$0xf0] }
 0xea2   : > { %v13126_v29 = vor.u32 %v14097_v12, %v13123_v15  ;;  %v12963_v12 = vld [vmem:[%s21300_s7 + $0x498] sm:$0xf0] }
 0xea3   : > { %v9164_v3 = vpop.f32.mrf.mxu0  ;;  %v9193_v40 = vpop.f32.mrf.mxu1  ;;  %v12966_v31 = vor.u32 %v14057_v57, %v12963_v12  ;;  %v13091_v15 = vld [vmem:[%s21300_s7 + $0x598] sm:$0xf0]  ;;  %v14049_v12 = vld [vmem:[%s21300_s7 + $0x44c] sm:$0xf] }
 0xea4   : > { %v9194_v13 = vadd.f32 %v9193_v40, %v9164_v3  ;;  %9359 = vmatpush.bf16.msra.mxu3 %v13126_v29 }
 0xea5   : > { %9221 = vmatmul.bf16.vlgmr.msrb.gmra.mxu2 %v20349_v27  ;;  %9250 = vmatmul.bf16.vlgmr.msrb.gmra.mxu3 %v20351_v8 }
 0xea6   : > { %v20795_v58 = vadd.f32 %v9194_v13, %v20374_v23 }
 0xea8   : > { %v8565_v54 = vpop.f32.mrf.mxu2  ;;  %v8594_v24 = vpop.f32.mrf.mxu3 }
 0xea9   : > { %v8566_v23 = vadd.f32 %v8565_v54, %v20395_v55  ;;  %v12979_v55 = vld [vmem:[%s21300_s7 + $0x4b8] sm:$0xf0]  ;;  %v13110_v54 = vor.u32 %v14093_v33, %v13107_v26  ;;  %v14085_v33 = vld [vmem:[%s21300_s7 + $0x56c] sm:$0xf] }
 0xeaa   : > { %v12982_v21 = vor.u32 %v14061_v17, %v12979_v55  ;;  %v14053_v55 = vld [vmem:[%s21300_s7 + $0x46c] sm:$0xf]  ;;  %v13075_v26 = vld [vmem:[%s21300_s7 + $0x578] sm:$0xf0] }
 0xeab   : > { %v20810_v3 = vadd.f32 %v8594_v24, %v8566_v23  ;;  %v9166_v40 = vpop.f32.mrf.mxu0  ;;  %v9195_v13 = vpop.f32.mrf.mxu1  ;;  %9360 = vmatpush.bf16.msra.mxu3 %v13110_v54  ;;  %v14089_v23 = vld [vmem:[%s21300_s7 + $0x58c] sm:$0xf] }
 0xeac   : > { %v9196_v30 = vadd.f32 %v9195_v13, %v9166_v40  ;;  %9331 = vmatpush.bf16.msra.mxu2 %v12982_v21  ;;  %v13094_v29 = vor.u32 %v14089_v23, %v13091_v15  ;;  %v12931_v23 = vld [vmem:[%s21300_s7 + $0x458] sm:$0xf0] }
 0xead   : > { %v13059_v15 = vld [vmem:[%s21300_s7 + $0x558] sm:$0xf0] }
 0xeae   : > { %v20825_v5 = vadd.f32 %v9196_v30, %v20433_v50 }
 0xeaf   : > { %9361 = vmatpush.bf16.msra.mxu3 %v13094_v29 }
 0xeb0   : > { %v8567_v24 = vpop.f32.mrf.mxu2  ;;  %v8596_v19 = vpop.f32.mrf.mxu3  ;;  %9332 = vmatpush.bf16.msra.mxu2 %v12966_v31  ;;  %v12934_v31 = vor.u32 %v14049_v12, %v12931_v23  ;;  %v14041_v23 = vld [vmem:[%s21300_s7 + $0x40c] sm:$0xf] }
 0xeb1   : > { %v8568_v50 = vadd.f32 %v8567_v24, %v20450_v42  ;;  %v12947_v42 = vld [vmem:[%s21300_s7 + $0x478] sm:$0xf0]  ;;  %v13078_v24 = vor.u32 %v14085_v33, %v13075_v26  ;;  %v14077_v33 = vld [vmem:[%s21300_s7 + $0x52c] sm:$0xf] }
 0xeb2   : > { %v12950_v21 = vor.u32 %v14053_v55, %v12947_v42  ;;  %v14045_v42 = vld [vmem:[%s21300_s7 + $0x42c] sm:$0xf]  ;;  %v13043_v26 = vld [vmem:[%s21300_s7 + $0x538] sm:$0xf0] }
 0xeb3   : > { %v20840_v40 = vadd.f32 %v8596_v19, %v8568_v50  ;;  %v9169_v13 = vpop.f32.mrf.mxu0  ;;  %v9198_v30 = vpop.f32.mrf.mxu1  ;;  %9362 = vmatpush.bf16.msra.mxu3 %v13078_v24  ;;  %v14081_v50 = vld [vmem:[%s21300_s7 + $0x54c] sm:$0xf] }
 0xeb4   : > { %v9199_v17 = vadd.f32 %v9198_v30, %v9169_v13  ;;  %9333 = vmatpush.bf16.msra.mxu2 %v12950_v21  ;;  %v13062_v29 = vor.u32 %v14081_v50, %v13059_v15  ;;  %v12899_v50 = vld [vmem:[%s21300_s7 + $0x418] sm:$0xf0] }
 0xeb5   : > { %9226 = vmatmul.bf16.gmra.mxu2 %v20461_v49  ;;  %9255 = vmatmul.bf16.gmra.mxu3 %v20463_v0  ;;  %v13027_v15 = vld [vmem:[%s21300_s7 + $0x518] sm:$0xf0] }
 0xeb6   : > { %v20857_v54 = vadd.f32 %v9199_v17, %v20492_v28 }
 0xeb7   : > { %9363 = vmatpush.bf16.msra.mxu3 %v13062_v29 }
 0xeb8   : > { %v8570_v19 = vpop.f32.mrf.mxu2  ;;  %v8599_v57 = vpop.f32.mrf.mxu3  ;;  %9334 = vmatpush.bf16.msra.mxu2 %v12934_v31  ;;  %v12902_v31 = vor.u32 %v14041_v23, %v12899_v50 }
 0xeb9   : > { %v8571_v28 = vadd.f32 %v8570_v19, %v20513_v25  ;;  %v12915_v25 = vld [vmem:[%s21300_s7 + $0x438] sm:$0xf0]  ;;  %v13046_v19 = vor.u32 %v14077_v33, %v13043_v26 }
 0xeba   : > { %v12918_v21 = vor.u32 %v14045_v42, %v12915_v25 }
 0xebb   : > { %v20872_v13 = vadd.f32 %v8599_v57, %v8571_v28  ;;  %v9171_v30 = vpop.f32.mrf.mxu0  ;;  %v9200_v17 = vpop.f32.mrf.mxu1  ;;  %9364 = vmatpush.bf16.msra.mxu3 %v13046_v19  ;;  %v14073_v28 = vld [vmem:[%s21300_s7 + $0x50c] sm:$0xf] }
 0xebc   : > { %v9201_v55 = vadd.f32 %v9200_v17, %v9171_v30  ;;  %9335 = vmatpush.bf16.msra.mxu2 %v12918_v21  ;;  %v13030_v29 = vor.u32 %v14073_v28, %v13027_v15 }
 0xebe   : > { %v20887_v24 = vadd.f32 %v9201_v55, %v20551_v39 }
 0xebf   : > { %9365 = vmatpush.bf16.msra.mxu3 %v13030_v29 }
 0xec0   : > { %v8572_v57 = vpop.f32.mrf.mxu2  ;;  %v8601_v12 = vpop.f32.mrf.mxu3  ;;  %9336 = vmatpush.bf16.msra.mxu2 %v12902_v31 }
 0xec1   : > { %v8573_v39 = vadd.f32 %v8572_v57, %v20568_v14 }
 0xec3   : > { %v20902_v30 = vadd.f32 %v8601_v12, %v8573_v39  ;;  %v9174_v17 = vpop.f32.mrf.mxu0  ;;  %v9203_v55 = vpop.f32.mrf.mxu1 }
 0xec4   : > { %v9204_v42 = vadd.f32 %v9203_v55, %v9174_v17 }
 0xec5   : > { %9231 = vmatmul.bf16.gmra.mxu2 %v20579_v59  ;;  %9260 = vmatmul.bf16.gmra.mxu3 %v20581_v32 }
 0xec6   : > { %v20907_v25 = vadd.f32 %v9204_v42, %v20592_v62 }
 0xec8   : > { %v8575_v14 = vpop.f32.mrf.mxu2  ;;  %v8604_v33 = vpop.f32.mrf.mxu3 }
 0xec9   : > { %v8576_v21 = vadd.f32 %v8575_v14, %v20596_v61 }
 0xecb   : > { %v20910_v26 = vadd.f32 %v8604_v33, %v8576_v21  ;;  %v9176_v19 = vpop.f32.mrf.mxu0  ;;  %v9205_v57 = vpop.f32.mrf.mxu1 }
 0xecc   : > { %v9206_v12 = vadd.f32 %v9205_v57, %v9176_v19 }
 0xece   : > { %v20913_v23 = vadd.f32 %v9206_v12, %v20603_v60 }
 0xed0   : > { %v8577_v50 = vpop.f32.mrf.mxu2  ;;  %v8606_v28 = vpop.f32.mrf.mxu3 }
 0xed1   : > { %v8578_v39 = vadd.f32 %v8577_v50, %v20605_v4 }
 0xed3   : > { %v20916_v31 = vadd.f32 %v8606_v28, %v8578_v39  ;;  %v9179_v62 = vpop.f32.mrf.mxu0  ;;  %v9208_v15 = vpop.f32.mrf.mxu1 }
 0xed4   : > { %v9209_v29 = vadd.f32 %v9208_v15, %v9179_v62  ;;  %v8626_v62 = vadd.f32 %v20658_v20, %v20161_v34 }
 0xed5   : > { %9236 = vmatmul.bf16.gmra.mxu2 %v20607_v51  ;;  %9265 = vmatmul.bf16.gmra.mxu3 %v20609_v53 }
 0xed6   : > { %v20921_v61 = vadd.f32 %v9209_v29, %v20614_v16 }
 0xed8   : > { %v8580_v17 = vpop.f32.mrf.mxu2  ;;  %v8609_v55 = vpop.f32.mrf.mxu3 }
 0xed9   : > { %v8581_v60 = vadd.f32 %v8580_v17, %v20618_v48 }
 0xedb   : > { %v20924_v42 = vadd.f32 %v8609_v55, %v8581_v60  ;;  %v9181_v14 = vpop.f32.mrf.mxu0  ;;  %v9210_v4 = vpop.f32.mrf.mxu1 }
 0xedc   : > { %v9211_v33 = vadd.f32 %v9210_v4, %v9181_v14  ;;  %v8655_v14 = vadd.f32 %v20660_v18, %v8626_v62  ;;  %v8631_v18 = vadd.f32 %v20721_v46, %v20269_v38 }
 0xede   : > { %v20927_v21 = vadd.f32 %v9211_v33, %v20621_v43 }
 0xee0   : > { %v8582_v19 = vpop.f32.mrf.mxu2  ;;  %v8611_v57 = vpop.f32.mrf.mxu3 }
 0xee1   : > { %v8583_v12 = vadd.f32 %v8582_v19, %v20623_v1 }
 0xee3   : > { %v20930_v50 = vadd.f32 %v8611_v57, %v8583_v12  ;;  %v9280_v16 = vpop.f32.mrf.mxu0  ;;  %v9309_v28 = vpop.f32.mrf.mxu1 }
 0xee4   : > { %v9310_v39 = vadd.f32 %v9309_v28, %v9280_v16 }
 0xee5   : > { %9337 = vmatmul.bf16.vlgmr.msra.gmra.mxu2 %v20349_v27  ;;  %9366 = vmatmul.bf16.vlgmr.msra.gmra.mxu3 %v20351_v8 }
 0xee6   : > { %v9389_v48 = vadd.f32 %v9310_v39, %v20640_v37 }
 0xee8   : > { %v9419_v43 = vmax.f32 %v20795_v58, %v9389_v48  ;;  %v8681_v15 = vpop.f32.mrf.mxu2  ;;  %v8710_v29 = vpop.f32.mrf.mxu3  ;;  %v8660_v48 = vadd.f32 %v20723_v35, %v8631_v18  ;;  %v8636_v35 = vadd.f32 %v20760_v47, %v20329_v9 }
 0xee9   : > { %v8682_v1 = vadd.f32 %v8681_v15, %v20653_v52 }
 0xeeb   : > { %v20939_v17 = vadd.f32 %v8710_v29, %v8682_v1  ;;  %v9282_v55 = vpop.f32.mrf.mxu0  ;;  %v9311_v60 = vpop.f32.mrf.mxu1 }
 0xeec   : > { %v9312_v27 = vadd.f32 %v9311_v60, %v9282_v55 }
 0xeee   : > { %v9393_v4 = vadd.f32 %v9312_v27, %v8655_v14 }
 0xef0   : > { %v9421_v8 = vmax.f32 %v20825_v5, %v9393_v4  ;;  %v20943_v37 = vpop.f32.mrf.mxu2  ;;  %v20945_v33 = vpop.f32.mrf.mxu3 }
 0xef3   : > { %v9285_v34 = vpop.f32.mrf.mxu0  ;;  %v9314_v20 = vpop.f32.mrf.mxu1 }
 0xef4   : > { %v9315_v58 = vadd.f32 %v9314_v20, %v9285_v34 }
 0xef5   : > { %9342 = vmatmul.bf16.gmra.mxu2 %v20461_v49  ;;  %9371 = vmatmul.bf16.gmra.mxu3 %v20463_v0 }
 0xef6   : > { %v9397_v52 = vadd.f32 %v9315_v58, %v20703_v44 }
 0xef8   : > { %v9423_v19 = vmax.f32 %v20857_v54, %v9397_v52  ;;  %v8686_v57 = vpop.f32.mrf.mxu2  ;;  %v8715_v5 = vpop.f32.mrf.mxu3 }
 0xef9   : > { %v8687_v12 = vadd.f32 %v8686_v57, %v20716_v41 }
 0xefb   : > { %v20954_v16 = vadd.f32 %v8715_v5, %v8687_v12  ;;  %v9287_v28 = vpop.f32.mrf.mxu0  ;;  %v9316_v39 = vpop.f32.mrf.mxu1 }
 0xefc   : > { %v9317_v49 = vadd.f32 %v9316_v39, %v9287_v28 }
 0xefe   : > { %v9401_v62 = vadd.f32 %v9317_v49, %v8660_v48 }
 0xf00   : > { %v9425_v0 = vmax.f32 %v20887_v24, %v9401_v62  ;;  %v8688_v44 = vpop.f32.mrf.mxu2  ;;  %v8717_v15 = vpop.f32.mrf.mxu3 }
 0xf01   : > { %v8689_v38 = vadd.f32 %v8688_v44, %v20746_v2 }
 0xf03   : > { %v20959_v46 = vadd.f32 %v8717_v15, %v8689_v38  ;;  %v9290_v54 = vpop.f32.mrf.mxu0  ;;  %v9319_v29 = vpop.f32.mrf.mxu1 }
 0xf04   : > { %v9320_v1 = vadd.f32 %v9319_v29, %v9290_v54 }
 0xf05   : > { %9347 = vmatmul.bf16.gmra.mxu2 %v20579_v59  ;;  %9376 = vmatmul.bf16.gmra.mxu3 %v20581_v32  ;;  %v8665_v59 = vadd.f32 %v20762_v11, %v8636_v35 }
 0xf06   : > { %v9405_v41 = vadd.f32 %v9320_v1, %v20754_v45 }
 0xf08   : > { %v9427_v24 = vmax.f32 %v20907_v25, %v9405_v41  ;;  %v8691_v55 = vpop.f32.mrf.mxu2  ;;  %v8720_v60 = vpop.f32.mrf.mxu3 }
 0xf09   : > { %v8692_v2 = vadd.f32 %v8691_v55, %v20758_v6 }
 0xf0a   : > { %v20968_v14 = vmax.f32 %v9419_v43, %v9427_v24 }
 0xf0b   : > { %v20970_v27 = vadd.f32 %v8720_v60, %v8692_v2  ;;  %v9292_v4 = vpop.f32.mrf.mxu0  ;;  %v9321_v34 = vpop.f32.mrf.mxu1 }
 0xf0c   : > { %v9322_v32 = vadd.f32 %v9321_v34, %v9292_v4  ;;  %v14135_v34 = vld [vmem:[%s21303_s10 + $0xf8] sm:$0xff] }
 0xf0d   : > { %9650 = vmatpush.bf16.msra.mxu1 %v14135_v34  ;;  %v14116_v34 = vld [vmem:[%s21303_s10 + $0x60] sm:$0xff] }
 0xf0e   : > { %v9409_v20 = vadd.f32 %v9322_v32, %v8665_v59  ;;  %v14134_v59 = vld [vmem:[%s21303_s10 + $0xf0] sm:$0xff] }
 0xf10   : > { %v9429_v45 = vmax.f32 %v20913_v23, %v9409_v20  ;;  %v8693_v58 = vpop.f32.mrf.mxu2  ;;  %v8722_v9 = vpop.f32.mrf.mxu3 }
 0xf11   : > { %v8694_v47 = vadd.f32 %v8693_v58, %v20764_v22  ;;  %9651 = vmatpush.bf16.msra.mxu1 %v14134_v59  ;;  %v14133_v58 = vld [vmem:[%s21303_s10 + $0xe8] sm:$0xff] }
 0xf12   : > { %v20975_v25 = vmax.f32 %v9421_v8, %v9429_v45  ;;  %v14141_v59 = vld [vmem:[%s21303_s10 + $0x128] sm:$0xff] }
 0xf13   : > { %v20977_v52 = vadd.f32 %v8722_v9, %v8694_v47  ;;  %v9295_v6 = vpop.f32.mrf.mxu0  ;;  %v9324_v43 = vpop.f32.mrf.mxu1  ;;  %v14124_v47 = vld [vmem:[%s21303_s10 + $0xa0] sm:$0xff] }
 0xf14   : > { %v9325_v18 = vadd.f32 %v9324_v43, %v9295_v6  ;;  %v14132_v6 = vld [vmem:[%s21303_s10 + $0xe0] sm:$0xff] }
 0xf15   : > { %9352 = vmatmul.bf16.gmra.mxu2 %v20607_v51  ;;  %9381 = vmatmul.bf16.gmra.mxu3 %v20609_v53 }
 0xf16   : > { %v9413_v11 = vadd.f32 %v9325_v18, %v20769_v10  ;;  %9652 = vmatpush.bf16.msra.mxu1 %v14133_v58  ;;  %v14148_v58 = vld [vmem:[%s21303_s10 + $0x160] sm:$0xff] }
 0xf18   : > { %v9431_v57 = vmax.f32 %v20921_v61, %v9413_v11  ;;  %v8696_v23 = vpop.f32.mrf.mxu2  ;;  %v8725_v5 = vpop.f32.mrf.mxu3 }
 0xf19   : > { %v8697_v12 = vadd.f32 %v8696_v23, %v20773_v7 }
 0xf1a   : > { %v20984_v22 = vmax.f32 %v9423_v19, %v9431_v57  ;;  %9653 = vmatpush.bf16.msra.mxu1 %v14132_v6  ;;  %v14131_v57 = vld [vmem:[%s21303_s10 + $0xd8] sm:$0xff] }
 0xf1b   : > { %v20986_v8 = vadd.f32 %v8725_v5, %v8697_v12  ;;  %v9297_v28 = vpop.f32.mrf.mxu0  ;;  %v9326_v39 = vpop.f32.mrf.mxu1  ;;  %v14122_v5 = vld [vmem:[%s21303_s10 + $0x90] sm:$0xff] }
 0xf1c   : > { %v9327_v48 = vadd.f32 %v9326_v39, %v9297_v28  ;;  %v14130_v12 = vld [vmem:[%s21303_s10 + $0xd0] sm:$0xff] }
 0xf1e   : > { %v9417_v49 = vadd.f32 %v9327_v48, %v20776_v36  ;;  %9654 = vmatpush.bf16.msra.mxu1 %v14131_v57  ;;  %v14139_v57 = vld [vmem:[%s21303_s10 + $0x118] sm:$0xff] }
 0xf20   : > { %v9433_v51 = vmax.f32 %v20927_v21, %v9417_v49  ;;  %v8698_v53 = vpop.f32.mrf.mxu2  ;;  %v8727_v62 = vpop.f32.mrf.mxu3  ;;  %v14129_v49 = vld [vmem:[%s21303_s10 + $0xc8] sm:$0xff] }
 0xf21   : > { %v8699_v10 = vadd.f32 %v8698_v53, %v20778_v56  ;;  %v14120_v53 = vld [vmem:[%s21303_s10 + $0x80] sm:$0xff] }
 0xf22   : > { %v20991_v61 = vmax.f32 %v9425_v0, %v9433_v51  ;;  %9655 = vmatpush.bf16.msra.mxu1 %v14130_v12 }
 0xf23   : > { %v20993_v44 = vadd.f32 %v8727_v62, %v8699_v10  ;;  %v14128_v62 = vld [vmem:[%s21303_s10 + $0xc0] sm:$0xff]  ;;  %v14111_v10 = vld [vmem:[%s21303_s10 + $0x38] sm:$0xff] }
 0xf26   : > { %9656 = vmatpush.bf16.msra.mxu1 %v14129_v49 }
 0xf28   : > { %v9222_v7 = vpop.f32.mrf.mxu2  ;;  %v9251_v19 = vpop.f32.mrf.mxu3 }
 0xf29   : > { %v9252_v15 = vadd.f32 %v9251_v19, %v9222_v7  ;;  %v14119_v7 = vld [vmem:[%s21303_s10 + $0x78] sm:$0xff] }
 0xf2a   : > { %9657 = vmatpush.bf16.msra.mxu1 %v14128_v62  ;;  %v14112_v62 = vld [vmem:[%s21303_s10 + $0x40] sm:$0xff] }
 0xf2b   : > { %v20996_v38 = vadd.f32 %v9252_v15, %v20810_v3 }
 0xf2e   : > { %9779 = vmatpush.bf16.msrb.mxu1 %v14119_v7  ;;  %v14137_v7 = vld [vmem:[%s21303_s10 + $0x108] sm:$0xff] }
 0xf30   : > { %v9224_v54 = vpop.f32.mrf.mxu2  ;;  %v9253_v29 = vpop.f32.mrf.mxu3 }
 0xf31   : > { %v9254_v1 = vadd.f32 %v9253_v29, %v9224_v54  ;;  %v14110_v54 = vld [vmem:[%s21303_s10 + $0x30] sm:$0xff] }
 0xf32   : > { %v14118_v29 = vld [vmem:[%s21303_s10 + $0x70] sm:$0xff] }
 0xf33   : > { %v20999_v36 = vadd.f32 %v9254_v1, %v20840_v40  ;;  %v14127_v40 = vld [vmem:[%s21303_s10 + $0xb8] sm:$0xff]  ;;  %9780 = vmatpush.bf16.msrb.mxu1 %v14118_v29 }
 0xf34   : > { %9637 = vmatpush.bf16.msra.mxu0 %v14127_v40  ;;  %v14108_v40 = vld [vmem:[%s21303_s10 + $0x20] sm:$0xff] }
 0xf38   : > { %v9227_v21 = vpop.f32.mrf.mxu2  ;;  %v9256_v41 = vpop.f32.mrf.mxu3 }
 0xf39   : > { %v9257_v35 = vadd.f32 %v9256_v41, %v9227_v21  ;;  %v14143_v21 = vld [vmem:[%s21303_s10 + $0x138] sm:$0xff] }
 0xf3a   : > { %v14151_v41 = vld [vmem:[%s21303_s10 + $0x178] sm:$0xff]  ;;  %9928 = vmatpush.bf16.msrb.mxu2 %v14143_v21 }
 0xf3b   : > { %v21002_v56 = vadd.f32 %v9257_v35, %v20872_v13  ;;  %v8684_v35 = vadd.f32 %v20943_v37, %v20683_v63  ;;  %9941 = vmatpush.bf16.msrb.mxu3 %v14151_v41  ;;  %v14150_v63 = vld [vmem:[%s21303_s10 + $0x170] sm:$0xff] }
 0xf3f   : > { %9942 = vmatpush.bf16.msrb.mxu3 %v14150_v63 }
 0xf40   : > { %v9229_v0 = vpop.f32.mrf.mxu2  ;;  %v9258_v24 = vpop.f32.mrf.mxu3 }
 0xf41   : > { %v9259_v55 = vadd.f32 %v9258_v24, %v9229_v0  ;;  %v14117_v24 = vld [vmem:[%s21303_s10 + $0x68] sm:$0xff] }
 0xf42   : > { %9781 = vmatpush.bf16.msrb.mxu1 %v14117_v24 }
 0xf43   : > { %v21005_v60 = vadd.f32 %v9259_v55, %v20902_v30  ;;  %v14126_v30 = vld [vmem:[%s21303_s10 + $0xb0] sm:$0xff] }
 0xf44   : > { %9638 = vmatpush.bf16.msra.mxu0 %v14126_v30  ;;  %v14142_v55 = vld [vmem:[%s21303_s10 + $0x130] sm:$0xff] }
 0xf45   : > { %9929 = vmatpush.bf16.msrb.mxu2 %v14142_v55 }
 0xf46   : > { %9782 = vmatpush.bf16.msrb.mxu1 %v14116_v34 }
 0xf48   : > { %v9232_v3 = vpop.f32.mrf.mxu2  ;;  %v9261_v2 = vpop.f32.mrf.mxu3 }
 0xf49   : > { %v9262_v4 = vadd.f32 %v9261_v2, %v9232_v3  ;;  %v8713_v2 = vadd.f32 %v20945_v33, %v8684_v35  ;;  %v14149_v33 = vld [vmem:[%s21303_s10 + $0x168] sm:$0xff]  ;;  %9930 = vmatpush.bf16.msrb.mxu2 %v14141_v59 }
 0xf4a   : > { %9943 = vmatpush.bf16.msrb.mxu3 %v14149_v33 }
 0xf4b   : > { %v21014_v13 = vadd.f32 %v9262_v4, %v20910_v26  ;;  %v14125_v26 = vld [vmem:[%s21303_s10 + $0xa8] sm:$0xff] }
 0xf4c   : > { %9639 = vmatpush.bf16.msra.mxu0 %v14125_v26  ;;  %v14140_v26 = vld [vmem:[%s21303_s10 + $0x120] sm:$0xff] }
 0xf4d   : > { %9931 = vmatpush.bf16.msrb.mxu2 %v14140_v26 }
 0xf4e   : > { %9944 = vmatpush.bf16.msrb.mxu3 %v14148_v58 }
 0xf50   : > { %v9234_v32 = vpop.f32.mrf.mxu2  ;;  %v9263_v20 = vpop.f32.mrf.mxu3  ;;  %9640 = vmatpush.bf16.msra.mxu0 %v14124_v47 }
 0xf51   : > { %v9264_v45 = vadd.f32 %v9263_v20, %v9234_v32  ;;  %v14107_v20 = vld [vmem:[%s21303_s10 + $0x18] sm:$0xff]  ;;  %9932 = vmatpush.bf16.msrb.mxu2 %v14139_v57 }
 0xf53   : > { %v21029_v9 = vadd.f32 %v9264_v45, %v20916_v31  ;;  %v14123_v31 = vld [vmem:[%s21303_s10 + $0x98] sm:$0xff] }
 0xf54   : > { %9641 = vmatpush.bf16.msra.mxu0 %v14123_v31  ;;  %v14115_v45 = vld [vmem:[%s21303_s10 + $0x58] sm:$0xff] }
 0xf55   : > { %9783 = vmatpush.bf16.msrb.mxu1 %v14115_v45 }
 0xf58   : > { %v9237_v43 = vpop.f32.mrf.mxu2  ;;  %v9266_v18 = vpop.f32.mrf.mxu3  ;;  %9642 = vmatpush.bf16.msra.mxu0 %v14122_v5  ;;  %v14147_v5 = vld [vmem:[%s21303_s10 + $0x158] sm:$0xff] }
 0xf59   : > { %v9267_v11 = vadd.f32 %v9266_v18, %v9237_v43  ;;  %v14106_v18 = vld [vmem:[%s21303_s10 + $0x10] sm:$0xff]  ;;  %9945 = vmatpush.bf16.msrb.mxu3 %v14147_v5 }
 0xf5b   : > { %v21044_v23 = vadd.f32 %v9267_v11, %v20924_v42  ;;  %v14121_v42 = vld [vmem:[%s21303_s10 + $0x88] sm:$0xff]  ;;  %v14114_v11 = vld [vmem:[%s21303_s10 + $0x50] sm:$0xff] }
 0xf5c   : > { %9643 = vmatpush.bf16.msra.mxu0 %v14121_v42  ;;  %9784 = vmatpush.bf16.msrb.mxu1 %v14114_v11 }
 0xf60   : > { %v9239_v28 = vpop.f32.mrf.mxu2  ;;  %v9268_v39 = vpop.f32.mrf.mxu3  ;;  %9644 = vmatpush.bf16.msra.mxu0 %v14120_v53  ;;  %v14104_v53 = vld [vmem:[%s21303_s10] sm:$0xff] }
 0xf61   : > { %v9269_v48 = vadd.f32 %v9268_v39, %v9239_v28  ;;  %v14113_v28 = vld [vmem:[%s21303_s10 + $0x48] sm:$0xff]  ;;  %v14138_v39 = vld [vmem:[%s21303_s10 + $0x110] sm:$0xff] }
 0xf62   : > { %9785 = vmatpush.bf16.msrb.mxu1 %v14113_v28  ;;  %9933 = vmatpush.bf16.msrb.mxu2 %v14138_v39 }
 0xf63   : > { %v21059_v51 = vadd.f32 %v9269_v48, %v20930_v50  ;;  %v14146_v48 = vld [vmem:[%s21303_s10 + $0x150] sm:$0xff] }
 0xf64   : > { %9766 = vmatpush.bf16.msrb.mxu0 %v14111_v10  ;;  %9946 = vmatpush.bf16.msrb.mxu3 %v14146_v48 }
 0xf66   : > { %9786 = vmatpush.bf16.msrb.mxu1 %v14112_v62  ;;  %9934 = vmatpush.bf16.msrb.mxu2 %v14137_v7 }
 0xf68   : > { %v9338_v50 = vpop.f32.mrf.mxu2  ;;  %v9367_v19 = vpop.f32.mrf.mxu3  ;;  %9767 = vmatpush.bf16.msrb.mxu0 %v14110_v54  ;;  %v9443_v54 = vld [vmem:[%s21302_s9] sm:$0x3] }
 0xf69   : > { %v9368_v15 = vadd.f32 %v9367_v19, %v9338_v50  ;;  %v14145_v50 = vld [vmem:[%s21303_s10 + $0x148] sm:$0xff]  ;;  %v9446_v24 = vperm.slane %v9443_v54, 1 }
 0xf6a   : > { %9947 = vmatpush.bf16.msrb.mxu3 %v14145_v50 }
 0xf6b   : > { %v21080_v1 = vadd.f32 %v9368_v15, %v20939_v17  ;;  %v14109_v17 = vld [vmem:[%s21303_s10 + $0x28] sm:$0xff]  ;;  %v14144_v15 = vld [vmem:[%s21303_s10 + $0x140] sm:$0xff] }
 0xf6c   : > { %9768 = vmatpush.bf16.msrb.mxu0 %v14109_v17 }
 0xf6d   : > { %v9420_v0 = vmax.f32 %v20996_v38, %v21080_v1 }
 0xf6e   : > { %9948 = vmatpush.bf16.msrb.mxu3 %v14144_v15 }
 0xf70   : > { %v9340_v37 = vpop.f32.mrf.mxu2  ;;  %v9369_v3 = vpop.f32.mrf.mxu3  ;;  %9769 = vmatpush.bf16.msrb.mxu0 %v14108_v40 }
 0xf71   : > { %v9370_v4 = vadd.f32 %v9369_v3, %v9340_v37 }
 0xf73   : > { %v21111_v30 = vadd.f32 %v9370_v4, %v8713_v2 }
 0xf74   : > { %9770 = vmatpush.bf16.msrb.mxu0 %v14107_v20 }
 0xf75   : > { %v9422_v32 = vmax.f32 %v20999_v36, %v21111_v30  ;;  %v14159_v36 = vld [vmem:[%s21303_s10 + $0x1b8] sm:$0xff] }
 0xf76   : > { %v14167_v30 = vld [vmem:[%s21303_s10 + $0x1f8] sm:$0xff] }
 0xf78   : > { %v9343_v47 = vpop.f32.mrf.mxu2  ;;  %v9372_v6 = vpop.f32.mrf.mxu3  ;;  %9771 = vmatpush.bf16.msrb.mxu0 %v14106_v18 }
 0xf79   : > { %v9373_v43 = vadd.f32 %v9372_v6, %v9343_v47 }
 0xf7b   : > { %v21140_v31 = vadd.f32 %v9373_v43, %v20954_v16  ;;  %v14105_v16 = vld [vmem:[%s21303_s10 + $0x8] sm:$0xff] }
 0xf7c   : > { %9772 = vmatpush.bf16.msrb.mxu0 %v14105_v16  ;;  %v14166_v16 = vld [vmem:[%s21303_s10 + $0x1f0] sm:$0xff] }
 0xf7d   : > { %v9424_v12 = vmax.f32 %v21002_v56, %v21140_v31 }
 0xf80   : > { %v9345_v42 = vpop.f32.mrf.mxu2  ;;  %v9374_v56 = vpop.f32.mrf.mxu3  ;;  %9773 = vmatpush.bf16.msrb.mxu0 %v14104_v53  ;;  %v14165_v53 = vld [vmem:[%s21303_s10 + $0x1e8] sm:$0xff] }
 0xf81   : > { %v9375_v49 = vadd.f32 %v9374_v56, %v9345_v42 }
 0xf83   : > { %v21169_v10 = vadd.f32 %v9375_v49, %v20959_v46  ;;  %v14136_v46 = vld [vmem:[%s21303_s10 + $0x100] sm:$0xff]  ;;  %v14157_v49 = vld [vmem:[%s21303_s10 + $0x1a8] sm:$0xff] }
 0xf84   : > { %9935 = vmatpush.bf16.msrb.mxu2 %v14136_v46 }
 0xf85   : > { %v9426_v19 = vmax.f32 %v21005_v60, %v21169_v10  ;;  %v9445_v60 = vperm.slane %v9443_v54, 0 }
 0xf87   : > { %v9449_v55 = vadd.f32 %v9445_v60, %v20968_v14  ;;  %v9453_v6 = vadd.f32 %v9445_v60, %v20984_v22  ;;  %v9455_v48 = vadd.f32 %v9445_v60, %v20991_v61  ;;  %v14156_v61 = vld [vmem:[%s21303_s10 + $0x1a0] sm:$0xff] }
 0xf88   : > { %v9348_v29 = vpop.f32.mrf.mxu2  ;;  %v9377_v21 = vpop.f32.mrf.mxu3 }
 0xf89   : > { %v9378_v41 = vadd.f32 %v9377_v21, %v9348_v29  ;;  %v9457_v40 = vmax.f32 %v9449_v55, 0.0  ;;  %v9463_v50 = vmax.f32 %v9455_v48, 0.0  ;;  %v14155_v29 = vld [vmem:[%s21303_s10 + $0x198] sm:$0xff]  ;;  %v14161_v55 = vld [vmem:[%s21303_s10 + $0x1c8] sm:$0xff] }
 0xf8a   : > { %v14163_v21 = vld [vmem:[%s21303_s10 + $0x1d8] sm:$0xff] }
 0xf8b   : > { %v9406_v35 = vadd.f32 %v9378_v41, %v20970_v27 }
 0xf8d   : > { %v9428_v17 = vmax.f32 %v21014_v13, %v9406_v35  ;;  %v9451_v13 = vadd.f32 %v9445_v60, %v20975_v25  ;;  %v14154_v35 = vld [vmem:[%s21303_s10 + $0x190] sm:$0xff] }
 0xf8f   : > { %v9436_v63 = vmax.f32 %v9420_v0, %v9428_v17  ;;  %v9459_v45 = vmax.f32 %v9451_v13, 0.0  ;;  %v14162_v17 = vld [vmem:[%s21303_s10 + $0x1d0] sm:$0xff] }
 0xf90   : > { %v9350_v37 = vpop.f32.mrf.mxu2  ;;  %v9379_v3 = vpop.f32.mrf.mxu3 }
 0xf91   : > { %v9450_v2 = vadd.f32 %v9446_v24, %v9436_v63  ;;  %v9380_v4 = vadd.f32 %v9379_v3, %v9350_v37  ;;  %v14152_v63 = vld [vmem:[%s21303_s10 + $0x180] sm:$0xff] }
 0xf92   : > { %v14160_v37 = vld [vmem:[%s21303_s10 + $0x1c0] sm:$0xff] }
 0xf93   : > { %v9458_v34 = vmax.f32 %v9450_v2, 0.0  ;;  %v9410_v59 = vadd.f32 %v9380_v4, %v20977_v52 }
 0xf95   : > { %v21195_v33 = vpack.c.bf16 %v9458_v34, %v9457_v40  ;;  %v9430_v27 = vmax.f32 %v21029_v9, %v9410_v59 }
 0xf97   : > { %v9438_v14 = vmax.f32 %v9422_v32, %v9430_v27  ;;  %v9664_v15 = vunpack.c.l.b16 %v21195_v33  ;;  %v9665_v54 = vunpack.c.h.b16 %v21195_v33 }
 0xf98   : > { %v9353_v38 = vpop.f32.mrf.mxu2  ;;  %v9382_v1 = vpop.f32.mrf.mxu3 }
 0xf99   : > { %v9452_v0 = vadd.f32 %v9446_v24, %v9438_v14  ;;  %v9383_v20 = vadd.f32 %v9382_v1, %v9353_v38  ;;  %v9666_v41 = vpack.c.b16 %v9664_v15, %v9664_v15  ;;  %v9667_v60 = vpack.c.b16 %v9665_v54, %v9665_v54 }
 0xf9b   : > { %v9460_v26 = vmax.f32 %v9452_v0, 0.0  ;;  %v9414_v58 = vadd.f32 %v9383_v20, %v20986_v8 }
 0xf9d   : > { %v9466_v47 = vpack.c.bf16 %v9460_v26, %v9459_v45  ;;  %v9432_v52 = vmax.f32 %v21044_v23, %v9414_v58  ;;  %v9461_v23 = vmax.f32 %v9453_v6, 0.0 }
 0xf9f   : > { %v9440_v9 = vmax.f32 %v9424_v12, %v9432_v52  ;;  %v9535_v43 = vunpack.c.l.b16 %v9466_v47  ;;  %v9536_v25 = vunpack.c.h.b16 %v9466_v47  ;;  %v14158_v12 = vld [vmem:[%s21303_s10 + $0x1b0] sm:$0xff] }
 0xfa0   : > { %v9355_v18 = vpop.f32.mrf.mxu2  ;;  %v9384_v11 = vpop.f32.mrf.mxu3 }
 0xfa1   : > { %v9454_v32 = vadd.f32 %v9446_v24, %v9440_v9  ;;  %v9385_v8 = vadd.f32 %v9384_v11, %v9355_v18  ;;  %v9537_v31 = vpack.c.b16 %v9535_v43, %v9535_v43  ;;  %v9538_v57 = vpack.c.b16 %v9536_v25, %v9536_v25  ;;  %v14207_v11 = vld [vmem:[%s21304_s11] ss:$0 sm:$0xff] }
 0xfa3   : > { %v9462_v5 = vmax.f32 %v9454_v32, 0.0  ;;  %v9418_v22 = vadd.f32 %v9385_v8, %v20993_v44  ;;  %9645 = vmatmul.bf16.vlgmr.msra.gmra.mxu0 %v9537_v31  ;;  %9658 = vmatmul.bf16.vlgmr.msra.gmra.mxu1 %v9538_v57 }
 0xfa4   : > { %10091 = vmatpush.bf16.msra.mxu0 %v14159_v36  ;;  %10104 = vmatpush.bf16.msra.mxu1 %v14167_v30 }
 0xfa5   : > { %v9467_v28 = vpack.c.bf16 %v9462_v5, %v9461_v23  ;;  %v9434_v39 = vmax.f32 %v21059_v51, %v9418_v22 }
 0xfa7   : > { %v9442_v42 = vmax.f32 %v9426_v19, %v9434_v39  ;;  %v9826_v56 = vunpack.c.l.b16 %v9467_v28  ;;  %v9827_v44 = vunpack.c.h.b16 %v9467_v28  ;;  %v14164_v19 = vld [vmem:[%s21303_s10 + $0x1e0] sm:$0xff] }
 0xfa8   : > { %10092 = vmatpush.bf16.msra.mxu0 %v14158_v12  ;;  %10105 = vmatpush.bf16.msra.mxu1 %v14166_v16 }
 0xfa9   : > { %v9456_v62 = vadd.f32 %v9446_v24, %v9442_v42  ;;  %v9828_v10 = vpack.c.b16 %v9826_v56, %v9826_v56  ;;  %v9829_v7 = vpack.c.b16 %v9827_v44, %v9827_v44  ;;  %v14153_v24 = vld [vmem:[%s21303_s10 + $0x188] sm:$0xff] }
 0xfab   : > { %v9464_v51 = vmax.f32 %v9456_v62, 0.0  ;;  %9936 = vmatmul.bf16.vlgmr.msrb.gmra.mxu2 %v9828_v10  ;;  %9949 = vmatmul.bf16.vlgmr.msrb.gmra.mxu3 %v9829_v7 }
 0xfac   : > { %10093 = vmatpush.bf16.msra.mxu0 %v14157_v49  ;;  %10106 = vmatpush.bf16.msra.mxu1 %v14165_v53 }
 0xfad   : > { %v9468_v46 = vpack.c.bf16 %v9464_v51, %v9463_v50 }
 0xfaf   : > { %v9989_v3 = vunpack.c.l.b16 %v9468_v46  ;;  %v9990_v2 = vunpack.c.h.b16 %v9468_v46 }
 0xfb0   : > { %10094 = vmatpush.bf16.msra.mxu0 %v14156_v61  ;;  %10107 = vmatpush.bf16.msra.mxu1 %v14164_v19 }
 0xfb1   : > { %v9991_v4 = vpack.c.b16 %v9989_v3, %v9989_v3  ;;  %v9992_v40 = vpack.c.b16 %v9990_v2, %v9990_v2 }
 0xfb3   : > { %9774 = vmatmul.bf16.vlgmr.msrb.gmra.mxu0 %v9666_v41  ;;  %9787 = vmatmul.bf16.vlgmr.msrb.gmra.mxu1 %v9667_v60 }
 0xfb4   : > { %10095 = vmatpush.bf16.msra.mxu0 %v14155_v29  ;;  %10108 = vmatpush.bf16.msra.mxu1 %v14163_v21 }
 0xfb8   : > { %10096 = vmatpush.bf16.msra.mxu0 %v14154_v35  ;;  %10109 = vmatpush.bf16.msra.mxu1 %v14162_v17 }
 0xfbc   : > { %10097 = vmatpush.bf16.msra.mxu0 %v14153_v24  ;;  %10110 = vmatpush.bf16.msra.mxu1 %v14161_v55 }
 0xfc0   : > { %10098 = vmatpush.bf16.msra.mxu0 %v14152_v63  ;;  %10111 = vmatpush.bf16.msra.mxu1 %v14160_v37 }
 0xfc3   : > { %10099 = vmatmul.bf16.vlgmr.msra.gmra.mxu0 %v9991_v4  ;;  %10112 = vmatmul.bf16.vlgmr.msra.gmra.mxu1 %v9992_v40 }
0x1020   : > { %v9646_v34 = vpop.f32.mrf.mxu0  ;;  %v9659_v59 = vpop.f32.mrf.mxu1 }
0x1021   : > { %v9660_v45 = vadd.f32 %v9659_v59, %v9646_v34 }
0x1028   : > { %v9648_v33 = vpop.f32.mrf.mxu0  ;;  %v9661_v27 = vpop.f32.mrf.mxu1 }
0x102e   : > { %v9937_v13 = vpop.f32.mrf.mxu2  ;;  %v9950_v14 = vpop.f32.mrf.mxu3 }
0x102f   : > { %v9951_v6 = vadd.f32 %v9950_v14, %v9937_v13 }
0x1030   : > { %v9775_v38 = vpop.f32.mrf.mxu0  ;;  %v9788_v1 = vpop.f32.mrf.mxu1 }
0x1031   : > { %v9776_v47 = vadd.f32 %v9775_v38, %v9660_v45 }
0x1033   : > { %v9789_v52 = vadd.f32 %v9788_v1, %v9776_v47 }
0x1035   : > { %v9954_v25 = vadd.f32 %v9951_v6, %v9789_v52 }
0x1036   : > { %v9939_v0 = vpop.f32.mrf.mxu2  ;;  %v9952_v20 = vpop.f32.mrf.mxu3 }
0x1038   : > { %v9777_v26 = vpop.f32.mrf.mxu0  ;;  %v9790_v58 = vpop.f32.mrf.mxu1 }
0x1040   : > { %v10100_v9 = vpop.f32.mrf.mxu0  ;;  %v10113_v43 = vpop.f32.mrf.mxu1 }
0x1041   : > { %v10114_v18 = vadd.f32 %v10113_v43, %v10100_v9 }
0x1043   : > { %v10117_v36 = vadd.f32 %v10114_v18, %v9954_v25 }
0x1045   : > { %v10122_v30 = vadd.f32 %v14207_v11, %v10117_v36 }
0x1047   : > { %v10123_v32 = vmax.f32 %v10122_v30, 0.0 }
0x1048   : > { %v10102_v8 = vpop.f32.mrf.mxu0  ;;  %v10115_v31 = vpop.f32.mrf.mxu1 }
0x1049   : > { %10124 = vst [vmem:[%s406_s18] sm:$0xff] %v10123_v32 }
0x104a   : > { %14235 = shalt.err (!%p14232_p3)
}
0x104b   : > { %14168 = dma.vmem_to_hbm [thread:$0]  (%p14375_p5), %s10139_s20, 128, %s10141_s26, %s10126_s25  }
0x104c PF: > { %p14174_p4 = scmp.ge.s32.totalorder %s14270_s24, 2  ;;  %s10152_s29 = sand.u32 1, %s14258_s21  }
0x104d   : > { %s10153_s0 = scalar_lea.sflag [#allocation3], %s10152_s29 }
0x104e   : > { %p14171_p7 = pnand %p14174_p4, %p14379_p6 }
0x1050   : > { %p14172_p8 = pneg %p14171_p7 }
0x1052   : > { %14253 = dma.done.wait (%p14172_p8), %s10153_s0, 128  }
0x1053   : > { %14255 = vsyncadd (%p14172_p8), %s10153_s0, 4294967168  ;;  %s22082_s18 = sld [smem:[#allocation5_spill]]  ;;  %p22_p9 = scmp.ge.s32.totalorder %s14362_s27, 4  }
0x1054   : > { %s22083_s21 = smov %s14262_s22  ;;  %s22084_s22 = smov %s14266_s23 }
0x1055   : > { %s22086_s24 = smov %s14362_s27  ;;  %24 = sbr.rel (!%p22_p9) target bundleno = 6 (0x6), region = 112 }
0x1059   : > { %s22085_s23 = smov %s22082_s18 }
0x105a   :  { %10159 = vsyncpa [#allocation3], 1 }
0x105b   :  { %10161 = vsyncpa [#allocation3 + $0x1], 1 }

</bundles_post_ra>
